<compile_context>
chip_gen: v5e
topology: v5e:2x2
jax: 0.10.0
libtpu: 0.0.40
codegen_flags: <defaults>
</compile_context>

<pallas_src>
import math

import jax
import jax.numpy as jnp
import numpy as np
from jax.experimental import pallas as pl
from jax.experimental.pallas import tpu as pltpu

# ---- model hyper-parameters (small, consistent with the module) ----
BATCH = 200            # non-multiple of the row tile -> exercises padding
INPUT_DIM = 128
HIDDEN_DIM = 64
LATENT_DIM = 32
LN_EPS = 0.1
MIXTURE_WEIGHTS = (3.0 / 20.0, 3.0 / 4.0, 1.0 / 10.0)
LOG_W0 = float(math.log(MIXTURE_WEIGHTS[0]))
LOG_W1 = float(math.log(MIXTURE_WEIGHTS[1]))
LOG_W2 = float(math.log(MIXTURE_WEIGHTS[2]))
LOG_2PI = float(math.log(2.0 * math.pi))

# Row indices inside the packed (21, H) "small parameter" slab.
_ROW_B = 0        # rows 0..4  : b1..b5
_ROW_LNW = 5      # rows 5..9  : ln_w for ln1..ln5
_ROW_LNB = 10     # rows 10..14: ln_b for ln1..ln5
_ROW_BHEAD = 15   # row 15     : bmu || blv
_ROW_MU_P = 16    # row 16     : mu_prior                        (first L lanes)
_ROW_C0A = 17     # row 17     : -0.5 / (exp(logvar_prior)+1e-8)
_ROW_C0B = 18     # row 18     : -0.5*log(2*pi*var_prior) + log w0
_ROW_C2A = 19     # row 19     : -0.5 / (exp(logvar_unif)+1e-8)
_ROW_C2B = 20     # row 20     : -0.5*log(2*pi*var_unif) + log w2
_N_ROWS = 21


def composite_prior_kernel(x_ref, z_ref, w1_ref, ws_ref, p_ref, out_ref):
    f32 = jnp.float32
    H, L = HIDDEN_DIM, LATENT_DIM
    inv_h = 1.0 / float(H)

    # ---------------- Encoder.forward(x, dropout_rate=0) ----------------
    x = x_ref[...].astype(f32)
    s = jnp.sum(x * x, axis=-1, keepdims=True)
    inv_norm = pl.reciprocal(jnp.sqrt(s) + 1e-6, approx=False)
    x = x * inv_norm                 # reciprocal-multiply instead of divide
    # dropout with p=0 is the identity -> skipped

    def layernorm(v, idx):
        w = p_ref[_ROW_LNW + idx:_ROW_LNW + idx + 1, :]
        b = p_ref[_ROW_LNB + idx:_ROW_LNB + idx + 1, :]
        # one-pass stats: the two reductions are independent (overlap on XLU)
        s1 = jnp.sum(v, axis=-1, keepdims=True)
        s2 = jnp.sum(v * v, axis=-1, keepdims=True)
        mean = s1 * inv_h
        var = s2 * inv_h - mean * mean
        return (v - mean) * jax.lax.rsqrt(var + LN_EPS) * w + b

    def swish(v):
        return v * jax.nn.sigmoid(v)

    def lin(v, k):
        # k-th row-block of the packed weight slab (k=0..3 hidden, k=4 head):
        # sublane-aligned, lane-0-aligned slice -> no relayout before matmul.
        w = ws_ref[k * H:(k + 1) * H, :]
        return jnp.dot(v, w, preferred_element_type=f32)

    h1 = layernorm(
        swish(jnp.dot(x, w1_ref[...], preferred_element_type=f32)
              + p_ref[_ROW_B:_ROW_B + 1, :]), 0)
    res = h1
    h2 = layernorm(swish(lin(h1, 0) + p_ref[_ROW_B + 1:_ROW_B + 2, :] + res), 1)
    res = res + h2
    h3 = layernorm(swish(lin(h2, 1) + p_ref[_ROW_B + 2:_ROW_B + 3, :] + res), 2)
    res = res + h3
    h4 = layernorm(swish(lin(h3, 2) + p_ref[_ROW_B + 3:_ROW_B + 4, :] + res), 3)
    res = res + h4
    h5 = layernorm(swish(lin(h4, 3) + p_ref[_ROW_B + 4:_ROW_B + 5, :] + res), 4)

    # Fused mu/logvar head: one [TB,H] x [H,2L] matmul, static lane split.
    head = lin(h5, 4) + p_ref[_ROW_BHEAD:_ROW_BHEAD + 1, :]
    post_mu = head[:, :L]
    post_logvar = jnp.clip(head[:, L:2 * L], -6.0, 6.0)
    # clamp(-10, 10) after clamp(-6, 6) is a no-op -> removed.

    # ---------------- CompositePrior mixture ----------------
    z = z_ref[...].astype(f32)
    mu_prior = p_ref[_ROW_MU_P:_ROW_MU_P + 1, :L]

    # g0 / g2: constant-parameter gaussians, coefficients precomputed on host.
    d0 = z - mu_prior
    d0sq = d0 * d0
    g0 = d0sq * p_ref[_ROW_C0A:_ROW_C0A + 1, :L] + p_ref[_ROW_C0B:_ROW_C0B + 1, :L]
    g2 = d0sq * p_ref[_ROW_C2A:_ROW_C2A + 1, :L] + p_ref[_ROW_C2B:_ROW_C2B + 1, :L]

    # g1: posterior gaussian, exact reference form (keeps the 1e-8 floor).
    var1 = jnp.exp(post_logvar) + 1e-8
    inv1 = pl.reciprocal(var1, approx=False)
    d1 = z - post_mu
    g1 = -0.5 * (d1 * d1 * inv1 + LOG_2PI + jnp.log(var1)) + LOG_W1

    # logsumexp over the 3 mixture components (numerically stable)
    m = jnp.maximum(jnp.maximum(g0, g1), g2)
    out_ref[...] = (m + jnp.log(jnp.exp(g0 - m) + jnp.exp(g1 - m)
                                + jnp.exp(g2 - m))).astype(out_ref.dtype)


def make_params(key, input_dim=INPUT_DIM, hidden_dim=HIDDEN_DIM,
                latent_dim=LATENT_DIM):
    """Deterministic synthetic parameters (shapes match Encoder/CompositePrior)."""
    ks = jax.random.split(key, 16)
    scale = 0.05

    def w(k, shape):
        return (scale * jax.random.normal(k, shape)).astype(jnp.float32)

    return dict(
        w1=w(ks[0], (input_dim, hidden_dim)),  b1=w(ks[1], (1, hidden_dim)),
        w2=w(ks[2], (hidden_dim, hidden_dim)), b2=w(ks[3], (1, hidden_dim)),
        w3=w(ks[4], (hidden_dim, hidden_dim)), b3=w(ks[5], (1, hidden_dim)),
        w4=w(ks[6], (hidden_dim, hidden_dim)), b4=w(ks[7], (1, hidden_dim)),
        w5=w(ks[8], (hidden_dim, hidden_dim)), b5=w(ks[9], (1, hidden_dim)),
        ln_w=jnp.ones((5, hidden_dim), jnp.float32)
             + 0.01 * jax.random.normal(ks[10], (5, hidden_dim)).astype(jnp.float32),
        ln_b=0.01 * jax.random.normal(ks[11], (5, hidden_dim)).astype(jnp.float32),
        wmu=w(ks[12], (hidden_dim, latent_dim)), bmu=w(ks[13], (1, latent_dim)),
        wlv=w(ks[14], (hidden_dim, latent_dim)), blv=w(ks[15], (1, latent_dim)),
        # fixed (non-trainable) prior parameters, exactly as in __init__
        mu_prior=jnp.zeros((1, latent_dim), jnp.float32),
        logvar_prior=jnp.zeros((1, latent_dim), jnp.float32),
        logvar_uniform_prior=jnp.full((1, latent_dim), 10.0, jnp.float32),
    )


def pack_params(p):
    """Pack parameters into 3 DMA-friendly slabs (host-side, once)."""
    H, L = HIDDEN_DIM, LATENT_DIM
    assert 2 * L <= H, "head packing requires 2*latent_dim <= hidden_dim"

    def pad_to_h(v):  # (1, C<=H) -> (1, H) zero-padded
        return jnp.pad(v, ((0, 0), (0, H - v.shape[1])))

    # Row-packed weight slab: w2..w5 plus the fused (wmu||wlv) head block.
    whead = jnp.concatenate([p["wmu"], p["wlv"]], axis=1)              # (H, 2L)
    whead = jnp.pad(whead, ((0, 0), (0, H - 2 * L)))                   # (H, H)
    ws = jnp.concatenate([p["w2"], p["w3"], p["w4"], p["w5"], whead],
                         axis=0).astype(jnp.float32)                   # (5H, H)

    bhead = jnp.concatenate([p["bmu"], p["blv"]], axis=1)              # (1, 2L)

    # Host-precomputed constants for the two fixed mixture components.
    var0 = jnp.exp(p["logvar_prior"]) + 1e-8
    var2 = jnp.exp(p["logvar_uniform_prior"]) + 1e-8
    coef0 = -0.5 / var0
    const0 = -0.5 * jnp.log(2.0 * np.pi * var0) + LOG_W0
    coef2 = -0.5 / var2
    const2 = -0.5 * jnp.log(2.0 * np.pi * var2) + LOG_W2

    small = jnp.concatenate(
        [p["b1"], p["b2"], p["b3"], p["b4"], p["b5"],                  # rows 0..4
         p["ln_w"],                                                    # rows 5..9
         p["ln_b"],                                                    # rows 10..14
         pad_to_h(bhead),                                              # row 15
         pad_to_h(p["mu_prior"]),                                      # row 16
         pad_to_h(coef0), pad_to_h(const0),                            # rows 17,18
         pad_to_h(coef2), pad_to_h(const2)],                           # rows 19,20
        axis=0).astype(jnp.float32)                                    # (21, H)
    assert small.shape == (_N_ROWS, H)
    return dict(w1=p["w1"].astype(jnp.float32), ws=ws, small=small)


def composite_prior_forward(x, z, packed, *, tb=128):
    """Gridded over the batch with row tile `tb` (128 fills the v5e MXU;
    use 256 on v6e/v7x)."""
    B = x.shape[0]
    n_blocks = pl.cdiv(B, tb)
    Bp = n_blocks * tb
    if Bp != B:
        x = jnp.pad(x, ((0, Bp - B), (0, 0)))
        z = jnp.pad(z, ((0, Bp - B), (0, 0)))

    flops = 2 * Bp * (INPUT_DIM * HIDDEN_DIM
                      + 4 * HIDDEN_DIM * HIDDEN_DIM
                      + HIDDEN_DIM * HIDDEN_DIM)
    transcendentals = Bp * (6 * HIDDEN_DIM + 8 * LATENT_DIM)
    bytes_accessed = (Bp * (INPUT_DIM + 2 * LATENT_DIM) * 4
                      + (INPUT_DIM * HIDDEN_DIM + 5 * HIDDEN_DIM * HIDDEN_DIM
                         + _N_ROWS * HIDDEN_DIM) * 4)

    out = pl.pallas_call(
        composite_prior_kernel,
        out_shape=jax.ShapeDtypeStruct((Bp, LATENT_DIM), jnp.float32),
        grid=(n_blocks,),
        in_specs=[
            pl.BlockSpec((tb, INPUT_DIM), lambda i: (i, 0)),            # x
            pl.BlockSpec((tb, LATENT_DIM), lambda i: (i, 0)),           # z
            pl.BlockSpec((INPUT_DIM, HIDDEN_DIM), lambda i: (0, 0)),    # w1
            pl.BlockSpec((5 * HIDDEN_DIM, HIDDEN_DIM), lambda i: (0, 0)),  # ws
            pl.BlockSpec((_N_ROWS, HIDDEN_DIM), lambda i: (0, 0)),      # small
        ],
        out_specs=pl.BlockSpec((tb, LATENT_DIM), lambda i: (i, 0)),
        compiler_params=pltpu.CompilerParams(
            dimension_semantics=("parallel",)),
        cost_estimate=pl.CostEstimate(
            flops=flops, transcendentals=transcendentals,
            bytes_accessed=bytes_accessed),
    )(x, z, packed["w1"], packed["ws"], packed["small"])
    return out[:B] if Bp != B else out


def composite_prior_reference(x, z, p):
    """Pure-JAX reference mirroring the torch module exactly."""
    def swish(v):
        return v * jax.nn.sigmoid(v)

    def ln(v, w, b):
        mean = jnp.mean(v, axis=-1, keepdims=True)
        var = jnp.mean((v - mean) ** 2, axis=-1, keepdims=True)
        return (v - mean) / jnp.sqrt(var + LN_EPS) * w + b

    def log_norm_pdf(xv, mu, logvar):
        var = jnp.exp(logvar) + 1e-8
        return -0.5 * (xv - mu) ** 2 / var - 0.5 * jnp.log(2 * np.pi * var)

    norm = jnp.sqrt(jnp.sum(x ** 2, axis=-1, keepdims=True)) + 1e-6
    xn = x / norm
    h1 = ln(swish(xn @ p["w1"] + p["b1"]), p["ln_w"][0], p["ln_b"][0])
    h2 = ln(swish(h1 @ p["w2"] + p["b2"] + h1), p["ln_w"][1], p["ln_b"][1])
    h3 = ln(swish(h2 @ p["w3"] + p["b3"] + h1 + h2), p["ln_w"][2], p["ln_b"][2])
    h4 = ln(swish(h3 @ p["w4"] + p["b4"] + h1 + h2 + h3),
            p["ln_w"][3], p["ln_b"][3])
    h5 = ln(swish(h4 @ p["w5"] + p["b5"] + h1 + h2 + h3 + h4),
            p["ln_w"][4], p["ln_b"][4])
    mu = h5 @ p["wmu"] + p["bmu"]
    logvar = jnp.clip(h5 @ p["wlv"] + p["blv"], -6.0, 6.0)
    logvar = jnp.clip(logvar, -10.0, 10.0)
    g0 = log_norm_pdf(z, p["mu_prior"], p["logvar_prior"]) + LOG_W0
    g1 = log_norm_pdf(z, mu, logvar) + LOG_W1
    g2 = log_norm_pdf(z, p["mu_prior"], p["logvar_uniform_prior"]) + LOG_W2
    return jax.scipy.special.logsumexp(jnp.stack([g0, g1, g2], axis=-1),
                                       axis=-1)


if __name__ == "__main__":
    key = jax.random.PRNGKey(0)
    k_param, k_x, k_z = jax.random.split(key, 3)

    params = make_params(k_param)
    packed = pack_params(params)
    # x is a (non-negative) interaction vector as in mult-VAE
    x = jax.random.uniform(k_x, (BATCH, INPUT_DIM), jnp.float32)
    z = jax.random.normal(k_z, (BATCH, LATENT_DIM), jnp.float32)

    out = composite_prior_forward(x, z, packed)
    out = jax.block_until_ready(out)
    assert out.shape == (BATCH, LATENT_DIM)
    assert bool(jnp.all(jnp.isfinite(out)))

    ref = composite_prior_reference(x, z, params)
    assert bool(jnp.allclose(out, ref, atol=1e-4, rtol=1e-4)), \
        f"max abs diff {float(jnp.max(jnp.abs(out - ref)))}"

    print("KERNEL_OK")
</pallas_src>

<mosaic_0001>
module attributes {stable_mosaic.version = 11 : i64} {
  func.func @composite_prior_kernel(%arg0: i32, %arg1: memref<128x128xf32, #tpu.memory_space<vmem>>, %arg2: memref<128x32xf32, #tpu.memory_space<vmem>>, %arg3: memref<128x64xf32, #tpu.memory_space<vmem>>, %arg4: memref<320x64xf32, #tpu.memory_space<vmem>>, %arg5: memref<21x64xf32, #tpu.memory_space<vmem>>, %arg6: memref<128x32xf32, #tpu.memory_space<vmem>>) attributes {dimension_semantics = [#tpu.dimension_semantics<parallel>], iteration_bounds = array<i64: 2>, scalar_prefetch = 0 : i64, scratch_operands = 0 : i64, tpu.core_type = #tpu.core_type<tc>, window_params = [{transform_indices = @transform_0, window_bounds = array<i64: 128, 128>}, {transform_indices = @transform_1, window_bounds = array<i64: 128, 32>}, {pipeline_mode = #tpu.pipeline_mode<synchronous>, transform_indices = @transform_2, window_bounds = array<i64: 128, 64>}, {pipeline_mode = #tpu.pipeline_mode<synchronous>, transform_indices = @transform_3, window_bounds = array<i64: 320, 64>}, {pipeline_mode = #tpu.pipeline_mode<synchronous>, transform_indices = @transform_4, window_bounds = array<i64: 21, 64>}, {transform_indices = @transform_5, window_bounds = array<i64: 128, 32>}]} {
    %c0 = arith.constant 0 : index
    %c0_0 = arith.constant 0 : index
    %0 = vector.load %arg1[%c0, %c0_0] : memref<128x128xf32, #tpu.memory_space<vmem>>, vector<128x128xf32>
    %1 = arith.mulf %0, %0 : vector<128x128xf32>
    %cst = arith.constant dense<0.000000e+00> : vector<128xf32>
    %2 = vector.multi_reduction <add>, %1, %cst [1] : vector<128x128xf32> to vector<128xf32>
    %3 = vector.shape_cast %2 : vector<128xf32> to vector<128x1xf32>
    %4 = math.sqrt %3 : vector<128x1xf32>
    %cst_1 = arith.constant 9.99999997E-7 : f32
    %5 = vector.broadcast %cst_1 : f32 to vector<128x1xf32>
    %6 = arith.addf %4, %5 : vector<128x1xf32>
    %7 = tpu.reciprocal %6 : vector<128x1xf32> -> vector<128x1xf32>
    %8 = vector.broadcast %7 : vector<128x1xf32> to vector<128x128xf32>
    %9 = arith.mulf %0, %8 : vector<128x128xf32>
    %c0_2 = arith.constant 0 : index
    %c0_3 = arith.constant 0 : index
    %10 = vector.load %arg3[%c0_2, %c0_3] : memref<128x64xf32, #tpu.memory_space<vmem>>, vector<128x64xf32>
    %cst_4 = arith.constant dense<0.000000e+00> : vector<128x64xf32>
    %11 = tpu.matmul %9, %10, %cst_4 {dimension_numbers = #tpu.dot_dimension_numbers<[1], [0], [0], [1], [0, 0, 1, 1], [], []>} : vector<128x128xf32>, vector<128x64xf32>, vector<128x64xf32> -> vector<128x64xf32>
    %c0_5 = arith.constant 0 : index
    %c0_6 = arith.constant 0 : index
    %12 = vector.load %arg5[%c0_5, %c0_6] : memref<21x64xf32, #tpu.memory_space<vmem>>, vector<1x64xf32>
    %13 = vector.broadcast %12 : vector<1x64xf32> to vector<128x64xf32>
    %14 = arith.addf %11, %13 : vector<128x64xf32>
    %15 = arith.negf %14 : vector<128x64xf32>
    %16 = math.exp %15 : vector<128x64xf32>
    %cst_7 = arith.constant 1.000000e+00 : f32
    %17 = vector.broadcast %cst_7 : f32 to vector<128x64xf32>
    %18 = arith.addf %17, %16 : vector<128x64xf32>
    %19 = arith.divf %17, %18 : vector<128x64xf32>
    %20 = arith.mulf %14, %19 : vector<128x64xf32>
    %c5 = arith.constant 5 : index
    %c0_8 = arith.constant 0 : index
    %21 = vector.load %arg5[%c5, %c0_8] : memref<21x64xf32, #tpu.memory_space<vmem>>, vector<1x64xf32>
    %c10 = arith.constant 10 : index
    %c0_9 = arith.constant 0 : index
    %22 = vector.load %arg5[%c10, %c0_9] : memref<21x64xf32, #tpu.memory_space<vmem>>, vector<1x64xf32>
    %cst_10 = arith.constant dense<0.000000e+00> : vector<128xf32>
    %23 = vector.multi_reduction <add>, %20, %cst_10 [1] : vector<128x64xf32> to vector<128xf32>
    %24 = vector.shape_cast %23 : vector<128xf32> to vector<128x1xf32>
    %25 = arith.mulf %20, %20 : vector<128x64xf32>
    %cst_11 = arith.constant dense<0.000000e+00> : vector<128xf32>
    %26 = vector.multi_reduction <add>, %25, %cst_11 [1] : vector<128x64xf32> to vector<128xf32>
    %27 = vector.shape_cast %26 : vector<128xf32> to vector<128x1xf32>
    %cst_12 = arith.constant 1.562500e-02 : f32
    %28 = vector.broadcast %cst_12 : f32 to vector<128x1xf32>
    %29 = arith.mulf %24, %28 : vector<128x1xf32>
    %cst_13 = arith.constant 1.562500e-02 : f32
    %30 = vector.broadcast %cst_13 : f32 to vector<128x1xf32>
    %31 = arith.mulf %27, %30 : vector<128x1xf32>
    %32 = arith.mulf %29, %29 : vector<128x1xf32>
    %33 = arith.subf %31, %32 : vector<128x1xf32>
    %34 = vector.broadcast %29 : vector<128x1xf32> to vector<128x64xf32>
    %35 = arith.subf %20, %34 : vector<128x64xf32>
    %cst_14 = arith.constant 1.000000e-01 : f32
    %36 = vector.broadcast %cst_14 : f32 to vector<128x1xf32>
    %37 = arith.addf %33, %36 : vector<128x1xf32>
    %38 = math.rsqrt %37 : vector<128x1xf32>
    %39 = vector.broadcast %38 : vector<128x1xf32> to vector<128x64xf32>
    %40 = arith.mulf %35, %39 : vector<128x64xf32>
    %41 = vector.broadcast %21 : vector<1x64xf32> to vector<128x64xf32>
    %42 = arith.mulf %40, %41 : vector<128x64xf32>
    %43 = vector.broadcast %22 : vector<1x64xf32> to vector<128x64xf32>
    %44 = arith.addf %42, %43 : vector<128x64xf32>
    %c0_15 = arith.constant 0 : index
    %c0_16 = arith.constant 0 : index
    %45 = vector.load %arg4[%c0_15, %c0_16] : memref<320x64xf32, #tpu.memory_space<vmem>>, vector<64x64xf32>
    %cst_17 = arith.constant dense<0.000000e+00> : vector<128x64xf32>
    %46 = tpu.matmul %44, %45, %cst_17 {dimension_numbers = #tpu.dot_dimension_numbers<[1], [0], [0], [1], [0, 0, 1, 1], [], []>} : vector<128x64xf32>, vector<64x64xf32>, vector<128x64xf32> -> vector<128x64xf32>
    %c1 = arith.constant 1 : index
    %c0_18 = arith.constant 0 : index
    %47 = vector.load %arg5[%c1, %c0_18] : memref<21x64xf32, #tpu.memory_space<vmem>>, vector<1x64xf32>
    %48 = vector.broadcast %47 : vector<1x64xf32> to vector<128x64xf32>
    %49 = arith.addf %46, %48 : vector<128x64xf32>
    %50 = arith.addf %49, %44 : vector<128x64xf32>
    %51 = arith.negf %50 : vector<128x64xf32>
    %52 = math.exp %51 : vector<128x64xf32>
    %cst_19 = arith.constant 1.000000e+00 : f32
    %53 = vector.broadcast %cst_19 : f32 to vector<128x64xf32>
    %54 = arith.addf %53, %52 : vector<128x64xf32>
    %55 = arith.divf %53, %54 : vector<128x64xf32>
    %56 = arith.mulf %50, %55 : vector<128x64xf32>
    %c6 = arith.constant 6 : index
    %c0_20 = arith.constant 0 : index
    %57 = vector.load %arg5[%c6, %c0_20] : memref<21x64xf32, #tpu.memory_space<vmem>>, vector<1x64xf32>
    %c11 = arith.constant 11 : index
    %c0_21 = arith.constant 0 : index
    %58 = vector.load %arg5[%c11, %c0_21] : memref<21x64xf32, #tpu.memory_space<vmem>>, vector<1x64xf32>
    %cst_22 = arith.constant dense<0.000000e+00> : vector<128xf32>
    %59 = vector.multi_reduction <add>, %56, %cst_22 [1] : vector<128x64xf32> to vector<128xf32>
    %60 = vector.shape_cast %59 : vector<128xf32> to vector<128x1xf32>
    %61 = arith.mulf %56, %56 : vector<128x64xf32>
    %cst_23 = arith.constant dense<0.000000e+00> : vector<128xf32>
    %62 = vector.multi_reduction <add>, %61, %cst_23 [1] : vector<128x64xf32> to vector<128xf32>
    %63 = vector.shape_cast %62 : vector<128xf32> to vector<128x1xf32>
    %cst_24 = arith.constant 1.562500e-02 : f32
    %64 = vector.broadcast %cst_24 : f32 to vector<128x1xf32>
    %65 = arith.mulf %60, %64 : vector<128x1xf32>
    %cst_25 = arith.constant 1.562500e-02 : f32
    %66 = vector.broadcast %cst_25 : f32 to vector<128x1xf32>
    %67 = arith.mulf %63, %66 : vector<128x1xf32>
    %68 = arith.mulf %65, %65 : vector<128x1xf32>
    %69 = arith.subf %67, %68 : vector<128x1xf32>
    %70 = vector.broadcast %65 : vector<128x1xf32> to vector<128x64xf32>
    %71 = arith.subf %56, %70 : vector<128x64xf32>
    %cst_26 = arith.constant 1.000000e-01 : f32
    %72 = vector.broadcast %cst_26 : f32 to vector<128x1xf32>
    %73 = arith.addf %69, %72 : vector<128x1xf32>
    %74 = math.rsqrt %73 : vector<128x1xf32>
    %75 = vector.broadcast %74 : vector<128x1xf32> to vector<128x64xf32>
    %76 = arith.mulf %71, %75 : vector<128x64xf32>
    %77 = vector.broadcast %57 : vector<1x64xf32> to vector<128x64xf32>
    %78 = arith.mulf %76, %77 : vector<128x64xf32>
    %79 = vector.broadcast %58 : vector<1x64xf32> to vector<128x64xf32>
    %80 = arith.addf %78, %79 : vector<128x64xf32>
    %81 = arith.addf %44, %80 : vector<128x64xf32>
    %c64 = arith.constant 64 : index
    %c0_27 = arith.constant 0 : index
    %82 = vector.load %arg4[%c64, %c0_27] : memref<320x64xf32, #tpu.memory_space<vmem>>, vector<64x64xf32>
    %cst_28 = arith.constant dense<0.000000e+00> : vector<128x64xf32>
    %83 = tpu.matmul %80, %82, %cst_28 {dimension_numbers = #tpu.dot_dimension_numbers<[1], [0], [0], [1], [0, 0, 1, 1], [], []>} : vector<128x64xf32>, vector<64x64xf32>, vector<128x64xf32> -> vector<128x64xf32>
    %c2 = arith.constant 2 : index
    %c0_29 = arith.constant 0 : index
    %84 = vector.load %arg5[%c2, %c0_29] : memref<21x64xf32, #tpu.memory_space<vmem>>, vector<1x64xf32>
    %85 = vector.broadcast %84 : vector<1x64xf32> to vector<128x64xf32>
    %86 = arith.addf %83, %85 : vector<128x64xf32>
    %87 = arith.addf %86, %81 : vector<128x64xf32>
    %88 = arith.negf %87 : vector<128x64xf32>
    %89 = math.exp %88 : vector<128x64xf32>
    %cst_30 = arith.constant 1.000000e+00 : f32
    %90 = vector.broadcast %cst_30 : f32 to vector<128x64xf32>
    %91 = arith.addf %90, %89 : vector<128x64xf32>
    %92 = arith.divf %90, %91 : vector<128x64xf32>
    %93 = arith.mulf %87, %92 : vector<128x64xf32>
    %c7 = arith.constant 7 : index
    %c0_31 = arith.constant 0 : index
    %94 = vector.load %arg5[%c7, %c0_31] : memref<21x64xf32, #tpu.memory_space<vmem>>, vector<1x64xf32>
    %c12 = arith.constant 12 : index
    %c0_32 = arith.constant 0 : index
    %95 = vector.load %arg5[%c12, %c0_32] : memref<21x64xf32, #tpu.memory_space<vmem>>, vector<1x64xf32>
    %cst_33 = arith.constant dense<0.000000e+00> : vector<128xf32>
    %96 = vector.multi_reduction <add>, %93, %cst_33 [1] : vector<128x64xf32> to vector<128xf32>
    %97 = vector.shape_cast %96 : vector<128xf32> to vector<128x1xf32>
    %98 = arith.mulf %93, %93 : vector<128x64xf32>
    %cst_34 = arith.constant dense<0.000000e+00> : vector<128xf32>
    %99 = vector.multi_reduction <add>, %98, %cst_34 [1] : vector<128x64xf32> to vector<128xf32>
    %100 = vector.shape_cast %99 : vector<128xf32> to vector<128x1xf32>
    %cst_35 = arith.constant 1.562500e-02 : f32
    %101 = vector.broadcast %cst_35 : f32 to vector<128x1xf32>
    %102 = arith.mulf %97, %101 : vector<128x1xf32>
    %cst_36 = arith.constant 1.562500e-02 : f32
    %103 = vector.broadcast %cst_36 : f32 to vector<128x1xf32>
    %104 = arith.mulf %100, %103 : vector<128x1xf32>
    %105 = arith.mulf %102, %102 : vector<128x1xf32>
    %106 = arith.subf %104, %105 : vector<128x1xf32>
    %107 = vector.broadcast %102 : vector<128x1xf32> to vector<128x64xf32>
    %108 = arith.subf %93, %107 : vector<128x64xf32>
    %cst_37 = arith.constant 1.000000e-01 : f32
    %109 = vector.broadcast %cst_37 : f32 to vector<128x1xf32>
    %110 = arith.addf %106, %109 : vector<128x1xf32>
    %111 = math.rsqrt %110 : vector<128x1xf32>
    %112 = vector.broadcast %111 : vector<128x1xf32> to vector<128x64xf32>
    %113 = arith.mulf %108, %112 : vector<128x64xf32>
    %114 = vector.broadcast %94 : vector<1x64xf32> to vector<128x64xf32>
    %115 = arith.mulf %113, %114 : vector<128x64xf32>
    %116 = vector.broadcast %95 : vector<1x64xf32> to vector<128x64xf32>
    %117 = arith.addf %115, %116 : vector<128x64xf32>
    %118 = arith.addf %81, %117 : vector<128x64xf32>
    %c128 = arith.constant 128 : index
    %c0_38 = arith.constant 0 : index
    %119 = vector.load %arg4[%c128, %c0_38] : memref<320x64xf32, #tpu.memory_space<vmem>>, vector<64x64xf32>
    %cst_39 = arith.constant dense<0.000000e+00> : vector<128x64xf32>
    %120 = tpu.matmul %117, %119, %cst_39 {dimension_numbers = #tpu.dot_dimension_numbers<[1], [0], [0], [1], [0, 0, 1, 1], [], []>} : vector<128x64xf32>, vector<64x64xf32>, vector<128x64xf32> -> vector<128x64xf32>
    %c3 = arith.constant 3 : index
    %c0_40 = arith.constant 0 : index
    %121 = vector.load %arg5[%c3, %c0_40] : memref<21x64xf32, #tpu.memory_space<vmem>>, vector<1x64xf32>
    %122 = vector.broadcast %121 : vector<1x64xf32> to vector<128x64xf32>
    %123 = arith.addf %120, %122 : vector<128x64xf32>
    %124 = arith.addf %123, %118 : vector<128x64xf32>
    %125 = arith.negf %124 : vector<128x64xf32>
    %126 = math.exp %125 : vector<128x64xf32>
    %cst_41 = arith.constant 1.000000e+00 : f32
    %127 = vector.broadcast %cst_41 : f32 to vector<128x64xf32>
    %128 = arith.addf %127, %126 : vector<128x64xf32>
    %129 = arith.divf %127, %128 : vector<128x64xf32>
    %130 = arith.mulf %124, %129 : vector<128x64xf32>
    %c8 = arith.constant 8 : index
    %c0_42 = arith.constant 0 : index
    %131 = vector.load %arg5[%c8, %c0_42] : memref<21x64xf32, #tpu.memory_space<vmem>>, vector<1x64xf32>
    %c13 = arith.constant 13 : index
    %c0_43 = arith.constant 0 : index
    %132 = vector.load %arg5[%c13, %c0_43] : memref<21x64xf32, #tpu.memory_space<vmem>>, vector<1x64xf32>
    %cst_44 = arith.constant dense<0.000000e+00> : vector<128xf32>
    %133 = vector.multi_reduction <add>, %130, %cst_44 [1] : vector<128x64xf32> to vector<128xf32>
    %134 = vector.shape_cast %133 : vector<128xf32> to vector<128x1xf32>
    %135 = arith.mulf %130, %130 : vector<128x64xf32>
    %cst_45 = arith.constant dense<0.000000e+00> : vector<128xf32>
    %136 = vector.multi_reduction <add>, %135, %cst_45 [1] : vector<128x64xf32> to vector<128xf32>
    %137 = vector.shape_cast %136 : vector<128xf32> to vector<128x1xf32>
    %cst_46 = arith.constant 1.562500e-02 : f32
    %138 = vector.broadcast %cst_46 : f32 to vector<128x1xf32>
    %139 = arith.mulf %134, %138 : vector<128x1xf32>
    %cst_47 = arith.constant 1.562500e-02 : f32
    %140 = vector.broadcast %cst_47 : f32 to vector<128x1xf32>
    %141 = arith.mulf %137, %140 : vector<128x1xf32>
    %142 = arith.mulf %139, %139 : vector<128x1xf32>
    %143 = arith.subf %141, %142 : vector<128x1xf32>
    %144 = vector.broadcast %139 : vector<128x1xf32> to vector<128x64xf32>
    %145 = arith.subf %130, %144 : vector<128x64xf32>
    %cst_48 = arith.constant 1.000000e-01 : f32
    %146 = vector.broadcast %cst_48 : f32 to vector<128x1xf32>
    %147 = arith.addf %143, %146 : vector<128x1xf32>
    %148 = math.rsqrt %147 : vector<128x1xf32>
    %149 = vector.broadcast %148 : vector<128x1xf32> to vector<128x64xf32>
    %150 = arith.mulf %145, %149 : vector<128x64xf32>
    %151 = vector.broadcast %131 : vector<1x64xf32> to vector<128x64xf32>
    %152 = arith.mulf %150, %151 : vector<128x64xf32>
    %153 = vector.broadcast %132 : vector<1x64xf32> to vector<128x64xf32>
    %154 = arith.addf %152, %153 : vector<128x64xf32>
    %155 = arith.addf %118, %154 : vector<128x64xf32>
    %c192 = arith.constant 192 : index
    %c0_49 = arith.constant 0 : index
    %156 = vector.load %arg4[%c192, %c0_49] : memref<320x64xf32, #tpu.memory_space<vmem>>, vector<64x64xf32>
    %cst_50 = arith.constant dense<0.000000e+00> : vector<128x64xf32>
    %157 = tpu.matmul %154, %156, %cst_50 {dimension_numbers = #tpu.dot_dimension_numbers<[1], [0], [0], [1], [0, 0, 1, 1], [], []>} : vector<128x64xf32>, vector<64x64xf32>, vector<128x64xf32> -> vector<128x64xf32>
    %c4 = arith.constant 4 : index
    %c0_51 = arith.constant 0 : index
    %158 = vector.load %arg5[%c4, %c0_51] : memref<21x64xf32, #tpu.memory_space<vmem>>, vector<1x64xf32>
    %159 = vector.broadcast %158 : vector<1x64xf32> to vector<128x64xf32>
    %160 = arith.addf %157, %159 : vector<128x64xf32>
    %161 = arith.addf %160, %155 : vector<128x64xf32>
    %162 = arith.negf %161 : vector<128x64xf32>
    %163 = math.exp %162 : vector<128x64xf32>
    %cst_52 = arith.constant 1.000000e+00 : f32
    %164 = vector.broadcast %cst_52 : f32 to vector<128x64xf32>
    %165 = arith.addf %164, %163 : vector<128x64xf32>
    %166 = arith.divf %164, %165 : vector<128x64xf32>
    %167 = arith.mulf %161, %166 : vector<128x64xf32>
    %c9 = arith.constant 9 : index
    %c0_53 = arith.constant 0 : index
    %168 = vector.load %arg5[%c9, %c0_53] : memref<21x64xf32, #tpu.memory_space<vmem>>, vector<1x64xf32>
    %c14 = arith.constant 14 : index
    %c0_54 = arith.constant 0 : index
    %169 = vector.load %arg5[%c14, %c0_54] : memref<21x64xf32, #tpu.memory_space<vmem>>, vector<1x64xf32>
    %cst_55 = arith.constant dense<0.000000e+00> : vector<128xf32>
    %170 = vector.multi_reduction <add>, %167, %cst_55 [1] : vector<128x64xf32> to vector<128xf32>
    %171 = vector.shape_cast %170 : vector<128xf32> to vector<128x1xf32>
    %172 = arith.mulf %167, %167 : vector<128x64xf32>
    %cst_56 = arith.constant dense<0.000000e+00> : vector<128xf32>
    %173 = vector.multi_reduction <add>, %172, %cst_56 [1] : vector<128x64xf32> to vector<128xf32>
    %174 = vector.shape_cast %173 : vector<128xf32> to vector<128x1xf32>
    %cst_57 = arith.constant 1.562500e-02 : f32
    %175 = vector.broadcast %cst_57 : f32 to vector<128x1xf32>
    %176 = arith.mulf %171, %175 : vector<128x1xf32>
    %cst_58 = arith.constant 1.562500e-02 : f32
    %177 = vector.broadcast %cst_58 : f32 to vector<128x1xf32>
    %178 = arith.mulf %174, %177 : vector<128x1xf32>
    %179 = arith.mulf %176, %176 : vector<128x1xf32>
    %180 = arith.subf %178, %179 : vector<128x1xf32>
    %181 = vector.broadcast %176 : vector<128x1xf32> to vector<128x64xf32>
    %182 = arith.subf %167, %181 : vector<128x64xf32>
    %cst_59 = arith.constant 1.000000e-01 : f32
    %183 = vector.broadcast %cst_59 : f32 to vector<128x1xf32>
    %184 = arith.addf %180, %183 : vector<128x1xf32>
    %185 = math.rsqrt %184 : vector<128x1xf32>
    %186 = vector.broadcast %185 : vector<128x1xf32> to vector<128x64xf32>
    %187 = arith.mulf %182, %186 : vector<128x64xf32>
    %188 = vector.broadcast %168 : vector<1x64xf32> to vector<128x64xf32>
    %189 = arith.mulf %187, %188 : vector<128x64xf32>
    %190 = vector.broadcast %169 : vector<1x64xf32> to vector<128x64xf32>
    %191 = arith.addf %189, %190 : vector<128x64xf32>
    %c256 = arith.constant 256 : index
    %c0_60 = arith.constant 0 : index
    %192 = vector.load %arg4[%c256, %c0_60] : memref<320x64xf32, #tpu.memory_space<vmem>>, vector<64x64xf32>
    %cst_61 = arith.constant dense<0.000000e+00> : vector<128x64xf32>
    %193 = tpu.matmul %191, %192, %cst_61 {dimension_numbers = #tpu.dot_dimension_numbers<[1], [0], [0], [1], [0, 0, 1, 1], [], []>} : vector<128x64xf32>, vector<64x64xf32>, vector<128x64xf32> -> vector<128x64xf32>
    %c15 = arith.constant 15 : index
    %c0_62 = arith.constant 0 : index
    %194 = vector.load %arg5[%c15, %c0_62] : memref<21x64xf32, #tpu.memory_space<vmem>>, vector<1x64xf32>
    %195 = vector.broadcast %194 : vector<1x64xf32> to vector<128x64xf32>
    %196 = arith.addf %193, %195 : vector<128x64xf32>
    %197 = vector.extract_strided_slice %196 {offsets = [0, 0], sizes = [128, 32], strides = [1, 1]} : vector<128x64xf32> to vector<128x32xf32>
    %198 = vector.extract_strided_slice %196 {offsets = [0, 32], sizes = [128, 32], strides = [1, 1]} : vector<128x64xf32> to vector<128x32xf32>
    %cst_63 = arith.constant -6.000000e+00 : f32
    %cst_64 = arith.constant 6.000000e+00 : f32
    %199 = vector.broadcast %cst_63 : f32 to vector<128x32xf32>
    %200 = arith.maximumf %199, %198 : vector<128x32xf32>
    %201 = vector.broadcast %cst_64 : f32 to vector<128x32xf32>
    %202 = arith.minimumf %201, %200 : vector<128x32xf32>
    %c0_65 = arith.constant 0 : index
    %c0_66 = arith.constant 0 : index
    %203 = vector.load %arg2[%c0_65, %c0_66] : memref<128x32xf32, #tpu.memory_space<vmem>>, vector<128x32xf32>
    %c16 = arith.constant 16 : index
    %c0_67 = arith.constant 0 : index
    %204 = vector.load %arg5[%c16, %c0_67] : memref<21x64xf32, #tpu.memory_space<vmem>>, vector<1x32xf32>
    %205 = vector.broadcast %204 : vector<1x32xf32> to vector<128x32xf32>
    %206 = arith.subf %203, %205 : vector<128x32xf32>
    %207 = arith.mulf %206, %206 : vector<128x32xf32>
    %c17 = arith.constant 17 : index
    %c0_68 = arith.constant 0 : index
    %208 = vector.load %arg5[%c17, %c0_68] : memref<21x64xf32, #tpu.memory_space<vmem>>, vector<1x32xf32>
    %209 = vector.broadcast %208 : vector<1x32xf32> to vector<128x32xf32>
    %210 = arith.mulf %207, %209 : vector<128x32xf32>
    %c18 = arith.constant 18 : index
    %c0_69 = arith.constant 0 : index
    %211 = vector.load %arg5[%c18, %c0_69] : memref<21x64xf32, #tpu.memory_space<vmem>>, vector<1x32xf32>
    %212 = vector.broadcast %211 : vector<1x32xf32> to vector<128x32xf32>
    %213 = arith.addf %210, %212 : vector<128x32xf32>
    %c19 = arith.constant 19 : index
    %c0_70 = arith.constant 0 : index
    %214 = vector.load %arg5[%c19, %c0_70] : memref<21x64xf32, #tpu.memory_space<vmem>>, vector<1x32xf32>
    %215 = vector.broadcast %214 : vector<1x32xf32> to vector<128x32xf32>
    %216 = arith.mulf %207, %215 : vector<128x32xf32>
    %c20 = arith.constant 20 : index
    %c0_71 = arith.constant 0 : index
    %217 = vector.load %arg5[%c20, %c0_71] : memref<21x64xf32, #tpu.memory_space<vmem>>, vector<1x32xf32>
    %218 = vector.broadcast %217 : vector<1x32xf32> to vector<128x32xf32>
    %219 = arith.addf %216, %218 : vector<128x32xf32>
    %220 = math.exp %202 : vector<128x32xf32>
    %cst_72 = arith.constant 9.99999993E-9 : f32
    %221 = vector.broadcast %cst_72 : f32 to vector<128x32xf32>
    %222 = arith.addf %220, %221 : vector<128x32xf32>
    %223 = tpu.reciprocal %222 : vector<128x32xf32> -> vector<128x32xf32>
    %224 = arith.subf %203, %197 : vector<128x32xf32>
    %225 = arith.mulf %224, %224 : vector<128x32xf32>
    %226 = arith.mulf %225, %223 : vector<128x32xf32>
    %cst_73 = arith.constant 1.83787704 : f32
    %227 = vector.broadcast %cst_73 : f32 to vector<128x32xf32>
    %228 = arith.addf %226, %227 : vector<128x32xf32>
    %229 = math.log %222 : vector<128x32xf32>
    %230 = arith.addf %228, %229 : vector<128x32xf32>
    %cst_74 = arith.constant -5.000000e-01 : f32
    %231 = vector.broadcast %cst_74 : f32 to vector<128x32xf32>
    %232 = arith.mulf %231, %230 : vector<128x32xf32>
    %cst_75 = arith.constant -0.287682086 : f32
    %233 = vector.broadcast %cst_75 : f32 to vector<128x32xf32>
    %234 = arith.addf %232, %233 : vector<128x32xf32>
    %235 = arith.maximumf %213, %234 : vector<128x32xf32>
    %236 = arith.maximumf %235, %219 : vector<128x32xf32>
    %237 = arith.subf %213, %236 : vector<128x32xf32>
    %238 = math.exp %237 : vector<128x32xf32>
    %239 = arith.subf %234, %236 : vector<128x32xf32>
    %240 = math.exp %239 : vector<128x32xf32>
    %241 = arith.addf %238, %240 : vector<128x32xf32>
    %242 = arith.subf %219, %236 : vector<128x32xf32>
    %243 = math.exp %242 : vector<128x32xf32>
    %244 = arith.addf %241, %243 : vector<128x32xf32>
    %245 = math.log %244 : vector<128x32xf32>
    %246 = arith.addf %236, %245 : vector<128x32xf32>
    %c0_76 = arith.constant 0 : index
    %c0_77 = arith.constant 0 : index
    %247 = vector.load %arg6[%c0_76, %c0_77] : memref<128x32xf32, #tpu.memory_space<vmem>>, vector<128x32xf32>
    tpu.vector_store %arg6[%c0_76, %c0_77], %246 {strides = array<i32>} : memref<128x32xf32, #tpu.memory_space<vmem>>, vector<128x32xf32>,
    return
  }
  func.func @transform_0(%arg0: i32) -> (i32, i32) {
    %c0_i32 = arith.constant 0 : i32
    %c0_i32_0 = arith.constant 0 : i32
    return %arg0, %c0_i32 : i32, i32
  }
  func.func @transform_1(%arg0: i32) -> (i32, i32) {
    %c0_i32 = arith.constant 0 : i32
    %c0_i32_0 = arith.constant 0 : i32
    return %arg0, %c0_i32 : i32, i32
  }
  func.func @transform_2(%arg0: i32) -> (i32, i32) {
    %c0_i32 = arith.constant 0 : i32
    %c0_i32_0 = arith.constant 0 : i32
    %c0_i32_1 = arith.constant 0 : i32
    return %c0_i32, %c0_i32_0 : i32, i32
  }
  func.func @transform_3(%arg0: i32) -> (i32, i32) {
    %c0_i32 = arith.constant 0 : i32
    %c0_i32_0 = arith.constant 0 : i32
    %c0_i32_1 = arith.constant 0 : i32
    return %c0_i32, %c0_i32_0 : i32, i32
  }
  func.func @transform_4(%arg0: i32) -> (i32, i32) {
    %c0_i32 = arith.constant 0 : i32
    %c0_i32_0 = arith.constant 0 : i32
    %c0_i32_1 = arith.constant 0 : i32
    return %c0_i32, %c0_i32_0 : i32, i32
  }
  func.func @transform_5(%arg0: i32) -> (i32, i32) {
    %c0_i32 = arith.constant 0 : i32
    %c0_i32_0 = arith.constant 0 : i32
    return %arg0, %c0_i32 : i32, i32
  }
}

</mosaic_0001>

<bundles_post_ra>
// kernel: tpu_custom_call.1
= control target key start
LH: loop header
LB: loop body
LE: loop exit
PB: predicated region body
PF: predicated region fallthrough
CT: control target
= control target key end

     0   :  { %s7363_s18 = smov 0   ;;  %s10666_s0 = inlined_call_operand.vmem [shape: f32[256,128], index: 0, kind: input, shape index: {}]   ;;  %s10667_s1 = inlined_call_operand.vmem [shape: f32[256,32], index: 1, kind: input, shape index: {}]   ;;  %s10668_s2 = inlined_call_operand.vmem [shape: f32[128,64], index: 2, kind: input, shape index: {}]   ;;  %s10669_s3 = inlined_call_operand.vmem [shape: f32[320,64], index: 3, kind: input, shape index: {}]   ;;  %s10670_s4 = inlined_call_operand.vmem [shape: f32[21,64], index: 4, kind: input, shape index: {}]   ;;  %s10671_s5 = inlined_call_operand.vmem [shape: f32[256,32], index: 5, kind: output, shape index: {}]  }
   0x1 LB: > { %s6312_s19 = sadd.s32 4294967295, %s7330_s18   ;;  %p6316_p0 = scmp.ge.s32.totalorder %s7330_s18, 1  ;;  %s7330_s18 = sphi %s7363_s18, %s15_s18  }
   0x2   : > { %p199_p1 = scmp.lt.s32.totalorder %s7330_s18, 3 }
   0x4   : > { %p200_p2 = pnand %p6316_p0, %p199_p1 }
   0x5   : > { %s6317_s20 = sshll.u32 (!%p200_p2), %s6312_s19, 4  ;;  %s7332_s7 = smov (!%p200_p2), 96  }
   0x6   : > { %203 = sbr.rel (%p200_p2) target bundleno = 2186 (0x88a), region = 40  ;;  %p233_p3 = scmp.lt.s32.totalorder (!%p200_p2), %s6317_s20, 31 }
   0xb   : > { %s10687_s20 = smov (!%p233_p3, %s6317_s20), 31  ;;  %v777_v32 = vld [vmem:[%s10668_s2 + $0x78] sm:$0xff]  ;;  %v776_v33 = vld [vmem:[%s10668_s2 + $0x70] sm:$0xff]  ;;  %v775_v34 = vld [vmem:[%s10668_s2 + $0x68] sm:$0xff] }
   0xc   : > { %s7371_s21 = sshll.u32 %s10687_s20, 3  ;;  %780 = vmatpush.msra.mxu0 %v777_v32  ;;  %v774_v35 = vld [vmem:[%s10668_s2 + $0x60] sm:$0xff]  ;;  %v773_v36 = vld [vmem:[%s10668_s2 + $0x58] sm:$0xff]  ;;  %v772_v37 = vld [vmem:[%s10668_s2 + $0x50] sm:$0xff] }
   0xd   : > { %s7377_s24 = scalar_lea.vmem %s10666_s0, %s7371_s21  ;;  %v771_v38 = vld [vmem:[%s10668_s2 + $0x48] sm:$0xff]  ;;  %v770_v39 = vld [vmem:[%s10668_s2 + $0x40] sm:$0xff]  ;;  %v769_v40 = vld [vmem:[%s10668_s2 + $0x38] sm:$0xff]  ;;  %s10277_s10 = scalar_lea.vmem %s10667_s1, %s7371_s21 }
   0xe   : > { %v7380_v0 = vld [vmem:[%s7377_s24 + $0x20] sm:$0xff]  ;;  %v7383_v1 = vld [vmem:[%s7377_s24 + $0x10] sm:$0xff]  ;;  %v7395_v6 = vld [vmem:[%s7377_s24 + $0x28] sm:$0xff]  ;;  %781 = vmatpush.msra.mxu0 %v776_v33  ;;  %s10444_s25 = scalar_lea.vmem %s10671_s5, %s7371_s21 }
   0xf   : > { %v7386_v2 = vld [vmem:[%s7377_s24] sm:$0xff]  ;;  %v270_v3 = vmul.f32 %v7380_v0, %v7380_v0  ;;  %v268_v4 = vmul.f32 %v7383_v1, %v7383_v1  ;;  %v7398_v7 = vld [vmem:[%s7377_s24 + $0x18] sm:$0xff]  ;;  %v7401_v8 = vld [vmem:[%s7377_s24 + $0x8] sm:$0xff]  ;;  %v271_v9 = vmul.f32 %v7395_v6, %v7395_v6 }
  0x10   : > { %v266_v5 = vmul.f32 %v7386_v2, %v7386_v2  ;;  %v269_v10 = vmul.f32 %v7398_v7, %v7398_v7  ;;  %v267_v11 = vmul.f32 %v7401_v8, %v7401_v8  ;;  %v7410_v12 = vld [vmem:[%s7377_s24 + $0x38] sm:$0xff]  ;;  %v7413_v13 = vld [vmem:[%s7377_s24 + $0x40] sm:$0xff]  ;;  %v7416_v14 = vld [vmem:[%s7377_s24 + $0x30] sm:$0xff]  ;;  %782 = vmatpush.msra.mxu0 %v775_v34 }
  0x11   : > { %290 = vadd.xlane.f32.xlu2 %v270_v3  ;;  %286 = vadd.xlane.f32.xlu1 %v268_v4  ;;  %v273_v15 = vmul.f32 %v7410_v12, %v7410_v12  ;;  %v274_v16 = vmul.f32 %v7413_v13, %v7413_v13  ;;  %v272_v17 = vmul.f32 %v7416_v14, %v7416_v14  ;;  %v7425_v18 = vld [vmem:[%s7377_s24 + $0x50] sm:$0xff]  ;;  %v7428_v19 = vld [vmem:[%s7377_s24 + $0x58] sm:$0xff]  ;;  %v7431_v20 = vld [vmem:[%s7377_s24 + $0x48] sm:$0xff] }
  0x12   : > { %282 = vadd.xlane.f32.xlu0 %v266_v5  ;;  %v276_v21 = vmul.f32 %v7425_v18, %v7425_v18  ;;  %v277_v22 = vmul.f32 %v7428_v19, %v7428_v19  ;;  %v275_v23 = vmul.f32 %v7431_v20, %v7431_v20  ;;  %v263_v24 = vld [vmem:[%s7377_s24 + $0x68] sm:$0xff]  ;;  %v264_v25 = vld [vmem:[%s7377_s24 + $0x70] sm:$0xff]  ;;  %v262_v26 = vld [vmem:[%s7377_s24 + $0x60] sm:$0xff]  ;;  %783 = vmatpush.msra.mxu0 %v774_v35 }
  0x13   : > { %v279_v27 = vmul.f32 %v263_v24, %v263_v24  ;;  %v280_v28 = vmul.f32 %v264_v25, %v264_v25  ;;  %v278_v29 = vmul.f32 %v262_v26, %v262_v26  ;;  %v265_v30 = vld [vmem:[%s7377_s24 + $0x78] sm:$0xff]  ;;  %v768_v43 = vld [vmem:[%s10668_s2 + $0x30] sm:$0xff]  ;;  %v767_v44 = vld [vmem:[%s10668_s2 + $0x28] sm:$0xff] }
  0x14   : > { %v281_v31 = vmul.f32 %v265_v30, %v265_v30  ;;  %784 = vmatpush.msra.mxu0 %v773_v36  ;;  %v766_v45 = vld [vmem:[%s10668_s2 + $0x20] sm:$0xff]  ;;  %v765_v46 = vld [vmem:[%s10668_s2 + $0x18] sm:$0xff]  ;;  %v764_v49 = vld [vmem:[%s10668_s2 + $0x10] sm:$0xff] }
  0x15   : > { %v763_v53 = vld [vmem:[%s10668_s2 + $0x8] sm:$0xff]  ;;  %v762_v56 = vld [vmem:[%s10668_s2] sm:$0xff] }
  0x16   : > { %785 = vmatpush.msra.mxu0 %v772_v37 }
  0x18   : > { %786 = vmatpush.msra.mxu0 %v771_v38 }
  0x19   : > { %292 = vadd.xlane.f32.xlu2 %v271_v9  ;;  %288 = vadd.xlane.f32.xlu1 %v269_v10 }
  0x1a   : > { %284 = vadd.xlane.f32.xlu0 %v267_v11  ;;  %787 = vmatpush.msra.mxu0 %v770_v39 }
  0x1c   : > { %788 = vmatpush.msra.mxu0 %v769_v40 }
  0x1e   : > { %789 = vmatpush.msra.mxu0 %v768_v43 }
  0x20   : > { %790 = vmatpush.msra.mxu0 %v767_v44 }
  0x21   : > { %296 = vadd.xlane.f32.xlu1 %v273_v15  ;;  %298 = vadd.xlane.f32.xlu2 %v274_v16 }
  0x22   : > { %294 = vadd.xlane.f32.xlu0 %v272_v17  ;;  %791 = vmatpush.msra.mxu0 %v766_v45 }
  0x24   : > { %792 = vmatpush.msra.mxu0 %v765_v46 }
  0x26   : > { %793 = vmatpush.msra.mxu0 %v764_v49 }
  0x28   : > { %794 = vmatpush.msra.mxu0 %v763_v53 }
  0x29   : > { %302 = vadd.xlane.f32.xlu1 %v276_v21  ;;  %304 = vadd.xlane.f32.xlu2 %v277_v22 }
  0x2a   : > { %300 = vadd.xlane.f32.xlu0 %v275_v23  ;;  %795 = vmatpush.msra.mxu0 %v762_v56 }
  0x31   : > { %308 = vadd.xlane.f32.xlu1 %v279_v27  ;;  %310 = vadd.xlane.f32.xlu2 %v280_v28 }
  0x32   : > { %306 = vadd.xlane.f32.xlu0 %v278_v29 }
  0x3a   : > { %312 = vadd.xlane.f32.xlu0 %v281_v31 }
  0x84   : > { %v7470_v41 = vpop.xlane.xlu1 %286  ;;  %v7488_v50 = vpop.xlane.xlu2 %290 }
  0x85   : > { %v283_v42 = vpop.xlane.xlu0 %282  ;;  %vm345_vm4 = vcmp.eq.f32.partialorder %v7470_v41, inf  ;;  %vm347_vm5 = vcmp.eq.f32.partialorder %v7470_v41, 0.0  ;;  %vm369_vm6 = vcmp.eq.f32.partialorder %v7488_v50, inf  ;;  %vm371_vm9 = vcmp.eq.f32.partialorder %v7488_v50, 0.0 }
  0x86   : > { %6547 = vrsqrt.f32 %v283_v42  ;;  %vm321_vm0 = vcmp.eq.f32.partialorder %v283_v42, inf  ;;  %v324_v16 = vand.u32 2147483648, %v283_v42  ;;  %vm323_vm1 = vcmp.eq.f32.partialorder %v283_v42, 0.0 }
  0x87   : > { %6549 = vrsqrt.f32 %v7470_v41 }
  0x8c   : > { %v6548_v47 = vpop.eup %6547  ;;  %v7490_v52 = vpop.xlane.xlu1 %288 }
  0x8d   : > { %v285_v48 = vpop.xlane.xlu0 %284  ;;  %v315_v51 = vmul.f32 %v6548_v47, %v283_v42  ;;  %v6550_v54 = vpop.eup %6549  ;;  %vm357_vm10 = vcmp.eq.f32.partialorder %v7490_v52, inf  ;;  %vm359_vm14 = vcmp.eq.f32.partialorder %v7490_v52, 0.0 }
  0x8e   : > { %6551 = vrsqrt.f32 %v285_v48  ;;  %v339_v58 = vmul.f32 %v6550_v54, %v7470_v41  ;;  %v7501_v5 = vpop.xlane.xlu2 %292  ;;  %vm333_vm2 = vcmp.eq.f32.partialorder %v285_v48, inf  ;;  %v336_v38 = vand.u32 2147483648, %v285_v48 }
  0x8f   : > { %v316_v55 = vmul.f32 %v6548_v47, %v315_v51  ;;  %6553 = vrsqrt.f32 %v7490_v52  ;;  %vm335_vm3 = vcmp.eq.f32.partialorder %v285_v48, 0.0  ;;  %vm381_vm13 = vcmp.eq.f32.partialorder %v7501_v5, inf }
  0x90   : > { %6555 = vrsqrt.f32 %v7488_v50  ;;  %v340_v63 = vmul.f32 %v6550_v54, %v339_v58 }
  0x91   : > { %v317_v57 = vmul.f32 0.5, %v316_v55  ;;  %6557 = vrsqrt.f32 %v7501_v5 }
  0x92   : > { %v341_v15 = vmul.f32 0.5, %v340_v63 }
  0x93   : > { %v318_v59 = vsub.f32 1.5, %v317_v57 }
  0x94   : > { %v6552_v60 = vpop.eup %6551  ;;  %v7507_v23 = vpop.xlane.xlu1 %296  ;;  %v342_v27 = vsub.f32 1.5, %v341_v15 }
  0x95   : > { %v319_v61 = vmul.f32 %v6548_v47, %v318_v59  ;;  %v6554_v62 = vpop.eup %6553  ;;  %v327_v3 = vmul.f32 %v6552_v60, %v285_v48  ;;  %v7509_v26 = vpop.xlane.xlu0 %294  ;;  %6559 = vrsqrt.f32 %v7507_v23 }
  0x96   : > { %v351_v11 = vmul.f32 %v6554_v62, %v7490_v52  ;;  %v7505_v21 = vpop.eup %6555  ;;  %6561 = vrsqrt.f32 %v7509_v26  ;;  %v343_v34 = vmul.f32 %v6550_v54, %v342_v27 }
  0x97   : > { %v320_v4 = vmul.f32 %v319_v61, %v283_v42  ;;  %v328_v9 = vmul.f32 %v6552_v60, %v327_v3  ;;  %v363_v29 = vmul.f32 %v7505_v21, %v7488_v50  ;;  %v7514_v31 = vpop.eup %6557 }
  0x98   : > { %v352_v25 = vmul.f32 %v6554_v62, %v351_v11  ;;  %v375_v37 = vmul.f32 %v7514_v31, %v7501_v5  ;;  %v344_v45 = vmul.f32 %v343_v34, %v7470_v41 }
  0x99   : > { %v322_v10 = vsel %vm321_vm0, %v283_v42, %v320_v4  ;;  %v329_v17 = vmul.f32 0.5, %v328_v9  ;;  %v364_v36 = vmul.f32 %v7505_v21, %v363_v29  ;;  %v7522_v42 = vpop.xlane.xlu2 %298  ;;  %v372_v9 = vand.u32 2147483648, %v7488_v50 }
  0x9a   : > { %v325_v24 = vsel %vm323_vm1, %v324_v16, %v322_v10  ;;  %v353_v33 = vmul.f32 0.5, %v352_v25  ;;  %v376_v51 = vmul.f32 %v7514_v31, %v375_v37  ;;  %v346_v55 = vsel %vm345_vm4, %v7470_v41, %v344_v45 }
  0x9b   : > { %v330_v22 = vsub.f32 1.5, %v329_v17  ;;  %v506_v30 = vadd.f32 1e-06, %v325_v24  ;;  %v7520_v39 = vpop.eup %6559  ;;  %v365_v49 = vmul.f32 0.5, %v364_v36  ;;  %vm383_vm0 = vcmp.eq.f32.partialorder %v7501_v5, 0.0 }
  0x9c   : > { %v354_v40 = vsub.f32 1.5, %v353_v33  ;;  %v7524_v44 = vpop.eup %6561  ;;  %v399_v53 = vmul.f32 %v7520_v39, %v7507_v23  ;;  %v377_v61 = vmul.f32 0.5, %v376_v51  ;;  %v7571_v45 = vpop.xlane.xlu1 %302  ;;  %vm405_vm4 = vcmp.eq.f32.partialorder %v7507_v23, inf }
  0x9d   : > { %v331_v28 = vmul.f32 %v6552_v60, %v330_v22  ;;  %6563 = vrcp.f32 %v506_v30  ;;  %v387_v56 = vmul.f32 %v7524_v44, %v7509_v26  ;;  %v7539_v57 = vpop.xlane.xlu0 %300  ;;  %v366_v59 = vsub.f32 1.5, %v365_v49 }
  0x9e   : > { %6565 = vrsqrt.f32 %v7522_v42  ;;  %v355_v54 = vmul.f32 %v6554_v62, %v354_v40  ;;  %v348_v60 = vand.u32 2147483648, %v7470_v41  ;;  %v533_v63 = vand.u32 2147483648, %v506_v30 }
  0x9f   : > { %v332_v32 = vmul.f32 %v331_v28, %v285_v48  ;;  %v400_v62 = vmul.f32 %v7520_v39, %v399_v53  ;;  %v531_v4 = vand.u32 2147483647, %v506_v30  ;;  %v388_v16 = vmul.f32 %v7524_v44, %v387_v56 }
  0xa0   : > { %v356_v10 = vmul.f32 %v355_v54, %v7490_v52  ;;  %v349_v11 = vsel %vm347_vm5, %v348_v60, %v346_v55  ;;  %vm527_vm8 = vweird.f32 %v506_v30  ;;  %v367_v25 = vmul.f32 %v7505_v21, %v366_v59 }
  0xa1   : > { %v334_v35 = vsel %vm333_vm2, %v285_v48, %v332_v32  ;;  %v7552_v22 = vadd.f32 1e-06, %v349_v11  ;;  %v378_v27 = vsub.f32 1.5, %v377_v61  ;;  %v534_v41 = vor.u32 1.1754944e-38, %v533_v63 }
  0xa2   : > { %v337_v43 = vsel %vm335_vm3, %v336_v38, %v334_v35  ;;  %v401_v28 = vmul.f32 0.5, %v400_v62  ;;  %vm532_vm12 = vcmp.eq.f32.partialorder %v531_v4, 8.507059e+37  ;;  %v360_v21 = vand.u32 2147483648, %v7490_v52 }
  0xa3   : > { %v7527_v46 = vadd.f32 1e-06, %v337_v43  ;;  %v6564_v47 = vpop.eup %6563  ;;  %v389_v35 = vmul.f32 0.5, %v388_v16  ;;  %v368_v40 = vmul.f32 %v367_v25, %v7488_v50  ;;  %v384_v43 = vand.u32 2147483648, %v7501_v5 }
  0xa4   : > { %v523_v48 = vmul.f32 %v6564_v47, %v506_v30  ;;  %vm528_vm7 = vweird.f32 %v6564_v47  ;;  %v7549_v15 = vpop.eup %6565  ;;  %v358_v30 = vsel %vm357_vm10, %v7490_v52, %v356_v10  ;;  %vm393_vm3 = vcmp.eq.f32.partialorder %v7509_v26, inf }
  0xa5   : > { %6567 = vrcp.f32 %v7527_v46  ;;  %vm529_vm11 = vmor %vm527_vm8, %vm528_vm7  ;;  %v411_v33 = vmul.f32 %v7549_v15, %v7522_v42  ;;  %v545_v51 = vand.u32 2147483647, %v7527_v46  ;;  %v361_v53 = vsel %vm359_vm14, %v360_v21, %v358_v30 }
  0xa6   : > { %v524_v58 = vsub.f32 1.0, %v523_v48  ;;  %6569 = vrsqrt.f32 %v7539_v57  ;;  %v402_v48 = vsub.f32 1.5, %v401_v28  ;;  %v7578_v55 = vadd.f32 1e-06, %v361_v53 }
  0xa7   : > { %6571 = vrcp.f32 %v7552_v22  ;;  %v412_v54 = vmul.f32 %v7549_v15, %v411_v33  ;;  %v390_v52 = vsub.f32 1.5, %v389_v35  ;;  %vm541_vm1 = vweird.f32 %v7527_v46 }
  0xa8   : > { %v525_v3 = vmul.f32 %v6564_v47, %v524_v58  ;;  %6573 = vrsqrt.f32 %v7571_v45  ;;  %v370_v59 = vsel %vm369_vm6, %v7488_v50, %v368_v40  ;;  %vm546_vm5 = vcmp.eq.f32.partialorder %v545_v51, 8.507059e+37 }
  0xa9   : > { %6575 = vrcp.f32 %v7578_v55  ;;  %v403_v62 = vmul.f32 %v7520_v39, %v402_v48  ;;  %v391_v10 = vmul.f32 %v7524_v44, %v390_v52  ;;  %v408_v44 = vand.u32 2147483648, %v7507_v23 }
  0xaa   : > { %v526_v17 = vadd.f32 %v6564_v47, %v525_v3  ;;  %v413_v3 = vmul.f32 0.5, %v412_v54  ;;  %v559_v50 = vand.u32 2147483647, %v7552_v22  ;;  %vm395_vm7 = vcmp.eq.f32.partialorder %v7509_v26, 0.0 }
  0xab   : > { %v6568_v24 = vpop.eup %6567  ;;  %v392_v33 = vmul.f32 %v391_v10, %v7509_v26  ;;  %vm407_vm8 = vcmp.eq.f32.partialorder %v7507_v23, 0.0  ;;  %vm417_vm10 = vcmp.eq.f32.partialorder %v7522_v42, inf  ;;  %v573_v53 = vand.u32 2147483647, %v7578_v55 }
  0xac   : > { %v530_v29 = vsel %vm529_vm11, %v6564_v47, %v526_v17  ;;  %v537_v32 = vmul.f32 %v6568_v24, %v7527_v46  ;;  %v7566_v38 = vpop.eup %6569  ;;  %v547_v47 = vand.u32 2147483648, %v7527_v46  ;;  %vm542_vm15 = vweird.f32 %v6568_v24 }
  0xad   : > { %v535_v34 = vsel %vm532_vm12, %v534_v41, %v530_v29  ;;  %v6572_v58 = vpop.eup %6571  ;;  %vm543_vm2 = vmor %vm541_vm1, %vm542_vm15  ;;  %v373_v17 = vsel %vm371_vm9, %v372_v9, %v370_v59  ;;  %v414_v30 = vsub.f32 1.5, %v413_v3  ;;  %vm555_vm9 = vweird.f32 %v7552_v22 }
  0xae   : > { %v746_v36 = vmul.f32 %v535_v34, %v7386_v2  ;;  %v538_v37 = vsub.f32 1.0, %v537_v32  ;;  %v379_v2 = vmul.f32 %v7514_v31, %v378_v27  ;;  %v423_v31 = vmul.f32 %v7566_v38, %v7539_v57  ;;  %v7605_v39 = vpop.eup %6573 }
  0xaf   : > { %v548_v60 = vor.u32 1.1754944e-38, %v547_v47  ;;  %v551_v46 = vmul.f32 %v6572_v58, %v7552_v22  ;;  %v561_v27 = vand.u32 2147483648, %v7552_v22  ;;  %v7603_v41 = vadd.f32 1e-06, %v373_v17  ;;  %v6576_v9 = vpop.eup %6575 }
  0xb0   : > { %796 = vmatmul.f32.vlgmr.msra.gmra.mxu0 %v746_v36  ;;  %v539_v49 = vmul.f32 %v6568_v24, %v538_v37  ;;  %v380_v63 = vmul.f32 %v379_v2, %v7501_v5  ;;  %v424_v25 = vmul.f32 %v7566_v38, %v423_v31  ;;  %vm556_vm6 = vweird.f32 %v6572_v58 }
  0xb1   : > { %v552_v16 = vsub.f32 1.0, %v551_v46  ;;  %v404_v32 = vmul.f32 %v403_v62, %v7507_v23  ;;  %6577 = vrcp.f32 %v7603_v41  ;;  %v565_v21 = vmul.f32 %v6576_v9, %v7578_v55  ;;  %vm557_vm11 = vmor %vm555_vm9, %vm556_vm6 }
  0xb2   : > { %v540_v56 = vadd.f32 %v6568_v24, %v539_v49  ;;  %v382_v29 = vsel %vm381_vm13, %v7501_v5, %v380_v63  ;;  %v425_v35 = vmul.f32 0.5, %v424_v25  ;;  %v435_v36 = vmul.f32 %v7605_v39, %v7571_v45 }
  0xb3   : > { %v553_v28 = vmul.f32 %v6572_v58, %v552_v16  ;;  %v562_v37 = vor.u32 1.1754944e-38, %v561_v27  ;;  %vm560_vm12 = vcmp.eq.f32.partialorder %v559_v50, 8.507059e+37  ;;  %v566_v47 = vsub.f32 1.0, %v565_v21 }
  0xb4   : > { %v544_v61 = vsel %vm543_vm2, %v6568_v24, %v540_v56  ;;  %v396_v24 = vand.u32 2147483648, %v7509_v26  ;;  %v385_v22 = vsel %vm383_vm0, %v384_v43, %v382_v29  ;;  %v415_v49 = vmul.f32 %v7549_v15, %v414_v30 }
  0xb5   : > { %v549_v4 = vsel %vm546_vm5, %v548_v60, %v544_v61  ;;  %v554_v34 = vadd.f32 %v6572_v58, %v553_v28  ;;  %v575_v2 = vand.u32 2147483648, %v7578_v55  ;;  %v567_v54 = vmul.f32 %v6576_v9, %v566_v47  ;;  %v7650_v61 = vpop.xlane.xlu0 %306 }
  0xb6   : > { %v747_v11 = vmul.f32 %v549_v4, %v7401_v8  ;;  %v7608_v8 = vpop.xlane.xlu2 %304  ;;  %vm570_vm13 = vweird.f32 %v6576_v9  ;;  %v7634_v52 = vadd.f32 1e-06, %v385_v22  ;;  %v406_v5 = vsel %vm405_vm4, %v7507_v23, %v404_v32 }
  0xb7   : > { %6579 = vrsqrt.f32 %v7608_v8  ;;  %v558_v40 = vsel %vm557_vm11, %v6572_v58, %v554_v34  ;;  %v6578_v56 = vpop.eup %6577  ;;  %v394_v58 = vsel %vm393_vm3, %v7509_v26, %v392_v33  ;;  %vm419_vm14 = vcmp.eq.f32.partialorder %v7522_v42, 0.0  ;;  %v7688_v34 = vpop.xlane.xlu1 %308 }
  0xb8   : > { %799 = vmatmul.f32.gmra.mxu0 %v747_v11  ;;  %v563_v51 = vsel %vm560_vm12, %v562_v37, %v558_v40  ;;  %v436_v15 = vmul.f32 %v7605_v39, %v435_v36  ;;  %v568_v43 = vadd.f32 %v6576_v9, %v567_v54  ;;  %vm569_vm15 = vweird.f32 %v7578_v55 }
  0xb9   : > { %v748_v48 = vmul.f32 %v563_v51, %v7383_v1  ;;  %v579_v1 = vmul.f32 %v6578_v56, %v7603_v41  ;;  %6581 = vrcp.f32 %v7634_v52  ;;  %v416_v31 = vmul.f32 %v415_v49, %v7522_v42  ;;  %vm571_vm0 = vmor %vm569_vm15, %vm570_vm13 }
  0xba   : > { %v426_v60 = vsub.f32 1.5, %v425_v35  ;;  %vm574_vm1 = vcmp.eq.f32.partialorder %v573_v53, 8.507059e+37  ;;  %v576_v46 = vor.u32 1.1754944e-38, %v575_v2  ;;  %v572_v63 = vsel %vm571_vm0, %v6576_v9, %v568_v43 }
  0xbb   : > { %v580_v62 = vsub.f32 1.0, %v579_v1  ;;  %vm583_vm2 = vweird.f32 %v7603_v41  ;;  %vm584_vm3 = vweird.f32 %v6578_v56  ;;  %v420_v55 = vand.u32 2147483648, %v7522_v42 }
  0xbc   : > { %v437_v3 = vmul.f32 0.5, %v436_v15  ;;  %v577_v4 = vsel %vm574_vm1, %v576_v46, %v572_v63  ;;  %v589_v10 = vand.u32 2147483648, %v7603_v41  ;;  %6583 = vrsqrt.f32 %v7650_v61  ;;  %vm7665_vm4 = vmor %vm583_vm2, %vm584_vm3 }
  0xbd   : > { %v7647_v59 = vpop.eup %6579  ;;  %v581_v11 = vmul.f32 %v6578_v56, %v580_v62  ;;  %v587_v16 = vand.u32 2147483647, %v7603_v41  ;;  %v397_v17 = vsel %vm395_vm7, %v396_v24, %v394_v58  ;;  %v427_v25 = vmul.f32 %v7566_v38, %v426_v60 }
  0xbe   : > { %v447_v27 = vmul.f32 %v7647_v59, %v7608_v8  ;;  %v7669_v50 = vadd.f32 1e-06, %v397_v17  ;;  %v409_v41 = vsel %vm407_vm8, %v408_v44, %v406_v5  ;;  %v418_v26 = vsel %vm417_vm10, %v7522_v42, %v416_v31  ;;  %v7727_v46 = vpop.xlane.xlu2 %310 }
  0xbf   : > { %v6582_v9 = vpop.eup %6581  ;;  %v749_v38 = vmul.f32 %v577_v4, %v7398_v7  ;;  %v582_v24 = vadd.f32 %v6578_v56, %v581_v11  ;;  %v7679_v29 = vadd.f32 1e-06, %v409_v41  ;;  %vm429_vm5 = vcmp.eq.f32.partialorder %v7539_v57, inf }
  0xc0   : > { %802 = vmatmul.f32.gmra.mxu0 %v748_v48  ;;  %v590_v32 = vor.u32 1.1754944e-38, %v589_v10  ;;  %v593_v30 = vmul.f32 %v6582_v9, %v7634_v52  ;;  %v438_v33 = vsub.f32 1.5, %v437_v3  ;;  %vm588_vm6 = vcmp.eq.f32.partialorder %v587_v16, 8.507059e+37 }
  0xc1   : > { %v586_v23 = vsel %vm7665_vm4, %v6578_v56, %v582_v24  ;;  %6585 = vrcp.f32 %v7669_v50  ;;  %v428_v44 = vmul.f32 %v427_v25, %v7539_v57  ;;  %v448_v7 = vmul.f32 %v7647_v59, %v447_v27 }
  0xc2   : > { %v594_v21 = vsub.f32 1.0, %v593_v30  ;;  %v421_v35 = vsel %vm419_vm14, %v420_v55, %v418_v26  ;;  %v7692_v36 = vpop.eup %6583  ;;  %vm431_vm7 = vcmp.eq.f32.partialorder %v7539_v57, 0.0  ;;  %vm597_vm8 = vweird.f32 %v7634_v52 }
  0xc3   : > { %vm598_vm9 = vweird.f32 %v6582_v9  ;;  %6587 = vrcp.f32 %v7679_v29  ;;  %v432_v37 = vand.u32 2147483648, %v7539_v57  ;;  %v591_v40 = vsel %vm588_vm6, %v590_v32, %v586_v23 }
  0xc4   : > { %v595_v47 = vmul.f32 %v6582_v9, %v594_v21  ;;  %v603_v22 = vand.u32 2147483648, %v7634_v52  ;;  %v439_v49 = vmul.f32 %v7605_v39, %v438_v33  ;;  %6589 = vrsqrt.f32 %v7688_v34  ;;  %vm7711_vm10 = vmor %vm597_vm8, %vm598_vm9  ;;  %v7771_v21 = vpop.xlane.xlu0 %312 }
  0xc5   : > { %v601_v42 = vand.u32 2147483647, %v7634_v52  ;;  %v7702_v51 = vadd.f32 1e-06, %v421_v35  ;;  %v430_v53 = vsel %vm429_vm5, %v7539_v57, %v428_v44  ;;  %v449_v2 = vmul.f32 0.5, %v448_v7 }
  0xc6   : > { %v459_v48 = vmul.f32 %v7692_v36, %v7650_v61  ;;  %v596_v54 = vadd.f32 %v6582_v9, %v595_v47  ;;  %v750_v58 = vmul.f32 %v591_v40, %v7380_v0  ;;  %vm441_vm11 = vcmp.eq.f32.partialorder %v7571_v45, inf }
  0xc7   : > { %v6586_v39 = vpop.eup %6585  ;;  %v604_v5 = vor.u32 1.1754944e-38, %v603_v22  ;;  %6591 = vrcp.f32 %v7702_v51  ;;  %v440_v1 = vmul.f32 %v439_v49, %v7571_v45  ;;  %vm602_vm12 = vcmp.eq.f32.partialorder %v601_v42, 8.507059e+37 }
  0xc8   : > { %805 = vmatmul.f32.gmra.mxu0 %v749_v38  ;;  %v607_v15 = vmul.f32 %v6586_v39, %v7669_v50  ;;  %v600_v52 = vsel %vm7711_vm10, %v6582_v9, %v596_v54  ;;  %v433_v31 = vsel %vm431_vm7, %v432_v37, %v430_v53  ;;  %v450_v0 = vsub.f32 1.5, %v449_v2 }
  0xc9   : > { %v7719_v43 = vpop.eup %6587  ;;  %v460_v60 = vmul.f32 %v7692_v36, %v459_v48  ;;  %vm443_vm13 = vcmp.eq.f32.partialorder %v7571_v45, 0.0  ;;  %vm611_vm14 = vweird.f32 %v7669_v50  ;;  %vm612_vm15 = vweird.f32 %v6586_v39 }
  0xca   : > { %v608_v63 = vsub.f32 1.0, %v607_v15  ;;  %v621_v62 = vmul.f32 %v7719_v43, %v7679_v29  ;;  %v7731_v55 = vpop.eup %6589  ;;  %v615_v3 = vand.u32 2147483647, %v7669_v50  ;;  %v605_v57 = vsel %vm602_vm12, %v604_v5, %v600_v52  ;;  %vm7752_vm0 = vmor %vm611_vm14, %vm612_vm15 }
  0xcb   : > { %v617_v10 = vand.u32 2147483648, %v7669_v50  ;;  %v7737_v11 = vadd.f32 1e-06, %v433_v31  ;;  %v442_v16 = vsel %vm441_vm11, %v7571_v45, %v440_v1  ;;  %v444_v17 = vand.u32 2147483648, %v7571_v45 }
  0xcc   : > { %v609_v4 = vmul.f32 %v6586_v39, %v608_v63  ;;  %6593 = vrsqrt.f32 %v7727_v46  ;;  %v622_v25 = vsub.f32 1.0, %v621_v62  ;;  %v451_v28 = vmul.f32 %v7647_v59, %v450_v0 }
  0xcd   : > { %v7744_v27 = vpop.eup %6591  ;;  %v461_v41 = vmul.f32 0.5, %v460_v60  ;;  %v471_v9 = vmul.f32 %v7731_v55, %v7688_v34  ;;  %v751_v24 = vmul.f32 %v605_v57, %v7395_v6  ;;  %vm7757_vm1 = vcmp.eq.f32.partialorder %v615_v3, 8.507059e+37 }
  0xce   : > { %v610_v26 = vadd.f32 %v6586_v39, %v609_v4  ;;  %v618_v30 = vor.u32 1.1754944e-38, %v617_v10  ;;  %6595 = vrcp.f32 %v7737_v11  ;;  %v623_v33 = vmul.f32 %v7719_v43, %v622_v25 }
  0xcf   : > { %v635_v50 = vmul.f32 %v7744_v27, %v7702_v51  ;;  %v445_v23 = vsel %vm443_vm13, %v444_v17, %v442_v16  ;;  %v452_v6 = vmul.f32 %v451_v28, %v7608_v8  ;;  %v462_v44 = vsub.f32 1.5, %v461_v41 }
  0xd0   : > { %808 = vmatmul.f32.gmra.mxu0 %v750_v58  ;;  %v614_v59 = vsel %vm7752_vm0, %v6586_v39, %v610_v26  ;;  %v472_v7 = vmul.f32 %v7731_v55, %v471_v9  ;;  %vm453_vm2 = vcmp.eq.f32.partialorder %v7608_v8, inf  ;;  %vm455_vm3 = vcmp.eq.f32.partialorder %v7608_v8, 0.0 }
  0xd1   : > { %vm625_vm4 = vweird.f32 %v7679_v29  ;;  %vm626_vm5 = vweird.f32 %v7719_v43  ;;  %v619_v45 = vsel %vm7757_vm1, %v618_v30, %v614_v59  ;;  %v629_v37 = vand.u32 2147483647, %v7679_v29 }
  0xd2   : > { %v7773_v35 = vpop.eup %6593  ;;  %v631_v40 = vand.u32 2147483648, %v7679_v29  ;;  %v7783_v47 = vadd.f32 1e-06, %v445_v23  ;;  %v456_v22 = vand.u32 2147483648, %v7608_v8  ;;  %6597 = vrsqrt.f32 %v7771_v21  ;;  %vm7796_vm6 = vmor %vm625_vm4, %vm626_vm5 }
  0xd3   : > { %v624_v49 = vadd.f32 %v7719_v43, %v623_v33  ;;  %v636_v42 = vsub.f32 1.0, %v635_v50  ;;  %v454_v2 = vsel %vm453_vm2, %v7608_v8, %v452_v6  ;;  %v463_v48 = vmul.f32 %v7692_v36, %v462_v44 }
  0xd4   : > { %v7788_v53 = vpop.eup %6595  ;;  %v473_v54 = vmul.f32 0.5, %v472_v7  ;;  %v483_v56 = vmul.f32 %v7773_v35, %v7727_v46  ;;  %v752_v58 = vmul.f32 %v619_v45, %v7416_v14  ;;  %vm630_vm7 = vcmp.eq.f32.partialorder %v629_v37, 8.507059e+37 }
  0xd5   : > { %v632_v5 = vor.u32 1.1754944e-38, %v631_v40  ;;  %6599 = vrcp.f32 %v7783_v47  ;;  %v628_v36 = vsel %vm7796_vm6, %v7719_v43, %v624_v49  ;;  %v637_v15 = vmul.f32 %v7744_v27, %v636_v42 }
  0xd6   : > { %v649_v29 = vmul.f32 %v7788_v53, %v7737_v11  ;;  %v457_v1 = vsel %vm455_vm3, %v456_v22, %v454_v2  ;;  %v464_v52 = vmul.f32 %v463_v48, %v7650_v61  ;;  %v474_v14 = vsub.f32 1.5, %v473_v54 }
  0xd7   : > { %v484_v31 = vmul.f32 %v7773_v35, %v483_v56  ;;  %vm465_vm8 = vcmp.eq.f32.partialorder %v7650_v61, inf  ;;  %vm639_vm9 = vweird.f32 %v7702_v51  ;;  %vm640_vm10 = vweird.f32 %v7744_v27 }
  0xd8   : > { %811 = vmatmul.f32.gmra.mxu0 %v751_v24  ;;  %v7812_v0 = vpop.eup %6597  ;;  %v633_v43 = vsel %vm630_vm7, %v632_v5, %v628_v36  ;;  %v643_v60 = vand.u32 2147483647, %v7702_v51  ;;  %v645_v63 = vand.u32 2147483648, %v7702_v51  ;;  %v7819_v8 = vadd.f32 1e-06, %v457_v1  ;;  %vm7832_vm12 = vmor %vm639_vm9, %vm640_vm10 }
  0xd9   : > { %vm467_vm11 = vcmp.eq.f32.partialorder %v7650_v61, 0.0  ;;  %v468_v62 = vand.u32 2147483648, %v7650_v61  ;;  %v638_v3 = vadd.f32 %v7744_v27, %v637_v15  ;;  %v650_v57 = vsub.f32 1.0, %v649_v29 }
  0xda   : > { %v466_v10 = vsel %vm465_vm8, %v7650_v61, %v464_v52  ;;  %v475_v16 = vmul.f32 %v7731_v55, %v474_v14  ;;  %v485_v17 = vmul.f32 0.5, %v484_v31  ;;  %v495_v25 = vmul.f32 %v7812_v0, %v7771_v21 }
  0xdb   : > { %v7824_v4 = vpop.eup %6599  ;;  %v753_v41 = vmul.f32 %v633_v43, %v7410_v12  ;;  %vm644_vm13 = vcmp.eq.f32.partialorder %v643_v60, 8.507059e+37  ;;  %v646_v9 = vor.u32 1.1754944e-38, %v645_v63  ;;  %6601 = vrcp.f32 %v7819_v8 }
  0xdc   : > { %v642_v55 = vsel %vm7832_vm12, %v7744_v27, %v638_v3  ;;  %v651_v26 = vmul.f32 %v7788_v53, %v650_v57  ;;  %v663_v51 = vmul.f32 %v7824_v4, %v7783_v47  ;;  %v469_v38 = vsel %vm467_vm11, %v468_v62, %v466_v10 }
  0xdd   : > { %v476_v24 = vmul.f32 %v475_v16, %v7688_v34  ;;  %v486_v12 = vsub.f32 1.5, %v485_v17  ;;  %v496_v32 = vmul.f32 %v7812_v0, %v495_v25  ;;  %vm477_vm14 = vcmp.eq.f32.partialorder %v7688_v34, inf }
  0xde   : > { %vm653_vm15 = vweird.f32 %v7737_v11  ;;  %vm654_vm0 = vweird.f32 %v7788_v53  ;;  %v647_v27 = vsel %vm644_vm13, %v646_v9, %v642_v55  ;;  %v657_v30 = vand.u32 2147483647, %v7737_v11 }
  0xdf   : > { %v659_v59 = vand.u32 2147483648, %v7737_v11  ;;  %v7853_v33 = vadd.f32 1e-06, %v469_v38  ;;  %v480_v61 = vand.u32 2147483648, %v7688_v34  ;;  %v652_v50 = vadd.f32 %v7788_v53, %v651_v26  ;;  %vm7862_vm2 = vmor %vm653_vm15, %vm654_vm0 }
  0xe0   : > { %814 = vmatmul.f32.gmra.mxu0 %v752_v58  ;;  %v664_v23 = vsub.f32 1.0, %v663_v51  ;;  %v478_v44 = vsel %vm477_vm14, %v7688_v34, %v476_v24  ;;  %vm479_vm1 = vcmp.eq.f32.partialorder %v7688_v34, 0.0  ;;  %v487_v7 = vmul.f32 %v7773_v35, %v486_v12 }
  0xe1   : > { %v7857_v6 = vpop.eup %6601  ;;  %v497_v45 = vmul.f32 0.5, %v496_v32  ;;  %v754_v11 = vmul.f32 %v647_v27, %v7413_v13  ;;  %vm658_vm3 = vcmp.eq.f32.partialorder %v657_v30, 8.507059e+37  ;;  %v660_v40 = vor.u32 1.1754944e-38, %v659_v59 }
  0xe2   : > { %6603 = vrcp.f32 %v7853_v33  ;;  %v656_v22 = vsel %vm7862_vm2, %v7788_v53, %v652_v50  ;;  %v665_v34 = vmul.f32 %v7824_v4, %v664_v23  ;;  %v677_v35 = vmul.f32 %v7857_v6, %v7819_v8  ;;  %v7315_v23 = vld [vmem:[%s7377_s24 + $0x60] sm:$0xff] }
  0xe3   : > { %v481_v49 = vsel %vm479_vm1, %v480_v61, %v478_v44  ;;  %v488_v42 = vmul.f32 %v487_v7, %v7727_v46  ;;  %v498_v2 = vsub.f32 1.5, %v497_v45  ;;  %vm489_vm4 = vcmp.eq.f32.partialorder %v7727_v46, inf }
  0xe4   : > { %vm667_vm5 = vweird.f32 %v7783_v47  ;;  %vm668_vm6 = vweird.f32 %v7824_v4  ;;  %v661_v13 = vsel %vm658_vm3, %v660_v40, %v656_v22  ;;  %v671_v48 = vand.u32 2147483647, %v7783_v47 }
  0xe5   : > { %v673_v53 = vand.u32 2147483648, %v7783_v47  ;;  %v7880_v54 = vadd.f32 1e-06, %v481_v49  ;;  %v492_v56 = vand.u32 2147483648, %v7727_v46  ;;  %v666_v39 = vadd.f32 %v7824_v4, %v665_v34  ;;  %vm669_vm8 = vmor %vm667_vm5, %vm668_vm6  ;;  %v7316_v49 = vld [vmem:[%s7377_s24 + $0x68] sm:$0xff] }
  0xe6   : > { %v678_v58 = vsub.f32 1.0, %v677_v35  ;;  %v490_v36 = vsel %vm489_vm4, %v7727_v46, %v488_v42  ;;  %vm491_vm7 = vcmp.eq.f32.partialorder %v7727_v46, 0.0  ;;  %v499_v15 = vmul.f32 %v7812_v0, %v498_v2 }
  0xe7   : > { %v755_v29 = vmul.f32 %v661_v13, %v7431_v20  ;;  %vm672_vm9 = vcmp.eq.f32.partialorder %v671_v48, 8.507059e+37  ;;  %v674_v1 = vor.u32 1.1754944e-38, %v673_v53  ;;  %6605 = vrcp.f32 %v7880_v54 }
  0xe8   : > { %817 = vmatmul.f32.gmra.mxu0 %v753_v41  ;;  %v6604_v5 = vpop.eup %6603  ;;  %v670_v47 = vsel %vm669_vm8, %v7824_v4, %v666_v39  ;;  %v679_v52 = vmul.f32 %v7857_v6, %v678_v58  ;;  %v493_v31 = vsel %vm491_vm7, %v492_v56, %v490_v36  ;;  %v500_v43 = vmul.f32 %v499_v15, %v7771_v21  ;;  %v7317_v58 = vld [vmem:[%s7377_s24 + $0x70] sm:$0xff] }
  0xe9   : > { %v691_v14 = vmul.f32 %v6604_v5, %v7853_v33  ;;  %vm501_vm10 = vcmp.eq.f32.partialorder %v7771_v21, inf  ;;  %vm681_vm11 = vweird.f32 %v7819_v8  ;;  %vm682_vm12 = vweird.f32 %v7857_v6 }
  0xea   : > { %v675_v20 = vsel %vm672_vm9, %v674_v1, %v670_v47  ;;  %v685_v46 = vand.u32 2147483647, %v7819_v8  ;;  %v687_v0 = vand.u32 2147483648, %v7819_v8  ;;  %v7898_v60 = vadd.f32 1e-06, %v493_v31  ;;  %vm683_vm14 = vmor %vm681_vm11, %vm682_vm12  ;;  %v7318_v1 = vld [vmem:[%s7377_s24 + $0x78] sm:$0xff] }
  0xeb   : > { %v504_v63 = vand.u32 2147483648, %v7771_v21  ;;  %v680_v62 = vadd.f32 %v7857_v6, %v679_v52  ;;  %v692_v3 = vsub.f32 1.0, %v691_v14  ;;  %v502_v4 = vsel %vm501_vm10, %v7771_v21, %v500_v43  ;;  %v7926_v52 = vld [vmem:[%s10670_s4] ss:$0 sm:$0xff] }
  0xec   : > { %vm503_vm13 = vcmp.eq.f32.partialorder %v7771_v21, 0.0  ;;  %v756_v10 = vmul.f32 %v675_v20, %v7425_v18  ;;  %vm686_vm15 = vcmp.eq.f32.partialorder %v685_v46, 8.507059e+37  ;;  %v688_v16 = vor.u32 1.1754944e-38, %v687_v0 }
  0xed   : > { %v6606_v57 = vpop.eup %6605  ;;  %6607 = vrcp.f32 %v7898_v60  ;;  %v684_v8 = vsel %vm683_vm14, %v7857_v6, %v680_v62  ;;  %v693_v17 = vmul.f32 %v6604_v5, %v692_v3  ;;  %v505_v28 = vsel %vm503_vm13, %v504_v63, %v502_v4 }
  0xee   : > { %v705_v25 = vmul.f32 %v6606_v57, %v7880_v54  ;;  %vm695_vm0 = vweird.f32 %v7853_v33  ;;  %vm696_vm1 = vweird.f32 %v6604_v5  ;;  %v689_v41 = vsel %vm686_vm15, %v688_v16, %v684_v8 }
  0xef   : > { %v701_v21 = vand.u32 2147483648, %v7853_v33  ;;  %v521_v9 = vadd.f32 1e-06, %v505_v28  ;;  %v694_v55 = vadd.f32 %v6604_v5, %v693_v17  ;;  %v699_v18 = vand.u32 2147483647, %v7853_v33  ;;  %vm697_vm2 = vmor %vm695_vm0, %vm696_vm1 }
  0xf0   : > { %820 = vmatmul.f32.gmra.mxu0 %v754_v11  ;;  %v706_v26 = vsub.f32 1.0, %v705_v25  ;;  %v757_v38 = vmul.f32 %v689_v41, %v7428_v19  ;;  %vm709_vm4 = vweird.f32 %v7880_v54  ;;  %vm710_vm5 = vweird.f32 %v6606_v57 }
  0xf1   : > { %v702_v24 = vor.u32 1.1754944e-38, %v701_v21  ;;  %6609 = vrcp.f32 %v521_v9  ;;  %v698_v12 = vsel %vm697_vm2, %v6604_v5, %v694_v55  ;;  %vm700_vm3 = vcmp.eq.f32.partialorder %v699_v18, 8.507059e+37  ;;  %vm711_vm6 = vmor %vm709_vm4, %vm710_vm5 }
  0xf2   : > { %v707_v32 = vmul.f32 %v6606_v57, %v706_v26  ;;  %v715_v59 = vand.u32 2147483648, %v7880_v54  ;;  %v713_v61 = vand.u32 2147483647, %v7880_v54  ;;  %vm723_vm8 = vweird.f32 %v7898_v60 }
  0xf3   : > { %v6608_v51 = vpop.eup %6607  ;;  %v703_v30 = vsel %vm700_vm3, %v702_v24, %v698_v12  ;;  %v729_v40 = vand.u32 2147483648, %v7898_v60  ;;  %v727_v34 = vand.u32 2147483647, %v7898_v60  ;;  %vm737_vm12 = vweird.f32 %v521_v9 }
  0xf4   : > { %v719_v27 = vmul.f32 %v6608_v51, %v7898_v60  ;;  %v708_v33 = vadd.f32 %v6606_v57, %v707_v32  ;;  %v758_v6 = vmul.f32 %v7315_v23, %v703_v30  ;;  %v716_v44 = vor.u32 1.1754944e-38, %v715_v59 }
  0xf5   : > { %vm714_vm7 = vcmp.eq.f32.partialorder %v713_v61, 8.507059e+37  ;;  %vm724_vm9 = vweird.f32 %v6608_v51  ;;  %v730_v2 = vor.u32 1.1754944e-38, %v729_v40  ;;  %vm728_vm11 = vcmp.eq.f32.partialorder %v727_v34, 8.507059e+37 }
  0xf6   : > { %v720_v50 = vsub.f32 1.0, %v719_v27  ;;  %v712_v7 = vsel %vm711_vm6, %v6606_v57, %v708_v33  ;;  %vm725_vm10 = vmor %vm723_vm8, %vm724_vm9  ;;  %v743_v54 = vand.u32 2147483648, %v521_v9  ;;  %v741_v39 = vand.u32 2147483647, %v521_v9 }
  0xf7   : > { %v6610_v19 = vpop.eup %6609  ;;  %v717_v11 = vsel %vm714_vm7, %v716_v44, %v712_v7  ;;  %vm1167_vm4 = vcmask 523264  }
  0xf8   : > { %823 = vmatmul.f32.gmra.mxu0 %v755_v29  ;;  %v721_v45 = vmul.f32 %v6608_v51, %v720_v50  ;;  %v733_v37 = vmul.f32 %v6610_v19, %v521_v9  ;;  %v759_v42 = vmul.f32 %v7316_v49, %v717_v11  ;;  %vm738_vm13 = vweird.f32 %v6610_v19 }
  0xf9   : > { %vm739_vm14 = vmor %vm737_vm12, %vm738_vm13  ;;  %v744_v36 = vor.u32 1.1754944e-38, %v743_v54  ;;  %vm742_vm15 = vcmp.eq.f32.partialorder %v741_v39, 8.507059e+37 }
  0xfa   : > { %v722_v22 = vadd.f32 %v6608_v51, %v721_v45  ;;  %v734_v35 = vsub.f32 1.0, %v733_v37 }
  0xfc   : > { %v726_v13 = vsel %vm725_vm10, %v6608_v51, %v722_v22  ;;  %v735_v48 = vmul.f32 %v6610_v19, %v734_v35 }
  0xfd   : > { %v731_v53 = vsel %vm728_vm11, %v730_v2, %v726_v13 }
  0xfe   : > { %v736_v56 = vadd.f32 %v6610_v19, %v735_v48  ;;  %v760_v5 = vmul.f32 %v7317_v58, %v731_v53 }
 0x100   : > { %826 = vmatmul.f32.gmra.mxu0 %v756_v10  ;;  %v740_v15 = vsel %vm739_vm14, %v6610_v19, %v736_v56 }
 0x101   : > { %v745_v29 = vsel %vm742_vm15, %v744_v36, %v740_v15 }
 0x102   : > { %v761_v47 = vmul.f32 %v7318_v1, %v745_v29 }
 0x108   : > { %829 = vmatmul.f32.gmra.mxu0 %v757_v38 }
 0x110   : > { %832 = vmatmul.f32.gmra.mxu0 %v758_v6 }
 0x118   : > { %835 = vmatmul.f32.gmra.mxu0 %v759_v42 }
 0x120   : > { %838 = vmatmul.f32.gmra.mxu0 %v760_v5 }
 0x128   : > { %841 = vmatmul.f32.gmra.mxu0 %v761_v47 }
 0x12d   : > { %v797_v14 = vpop.f32.mrf.mxu0 }
 0x12e   : > { %v798_v31 = vadd.f32 %v7926_v52, %v797_v14 }
 0x130   : > { %v6323_v43 = vmul.f32 -1.442695, %v798_v31 }
 0x132   : > { %6611 = vpow2.f32 %v6323_v43 }
 0x135   : > { %v800_v20 = vpop.f32.mrf.mxu0 }
 0x136   : > { %v7930_v46 = vadd.f32 %v7926_v52, %v800_v20 }
 0x138   : > { %v6612_v0 = vpop.eup %6611  ;;  %v6324_v60 = vmul.f32 -1.442695, %v7930_v46 }
 0x139   : > { %v893_v63 = vadd.f32 1.0, %v6612_v0 }
 0x13a   : > { %6613 = vpow2.f32 %v6324_v60 }
 0x13b   : > { %6615 = vrcp.f32 %v893_v63  ;;  %v920_v25 = vand.u32 2147483648, %v893_v63  ;;  %v918_v21 = vand.u32 2147483647, %v893_v63  ;;  %vm914_vm1 = vweird.f32 %v893_v63 }
 0x13d   : > { %v803_v62 = vpop.f32.mrf.mxu0  ;;  %v921_v38 = vor.u32 1.1754944e-38, %v920_v25  ;;  %vm919_vm3 = vcmp.eq.f32.partialorder %v918_v21, 8.507059e+37 }
 0x13e   : > { %v7934_v3 = vadd.f32 %v7926_v52, %v803_v62 }
 0x140   : > { %v6614_v57 = vpop.eup %6613  ;;  %v6325_v4 = vmul.f32 -1.442695, %v7934_v3 }
 0x141   : > { %v6616_v10 = vpop.eup %6615  ;;  %v894_v16 = vadd.f32 1.0, %v6614_v57 }
 0x142   : > { %v910_v8 = vmul.f32 %v6616_v10, %v893_v63  ;;  %6617 = vpow2.f32 %v6325_v4  ;;  %vm915_vm0 = vweird.f32 %v6616_v10 }
 0x143   : > { %6619 = vrcp.f32 %v894_v16  ;;  %vm916_vm2 = vmor %vm914_vm1, %vm915_vm0  ;;  %v933_v33 = vand.u32 2147483647, %v894_v16  ;;  %v935_v61 = vand.u32 2147483648, %v894_v16  ;;  %vm929_vm6 = vweird.f32 %v894_v16 }
 0x144   : > { %v911_v17 = vsub.f32 1.0, %v910_v8 }
 0x145   : > { %v806_v28 = vpop.f32.mrf.mxu0  ;;  %v936_v40 = vor.u32 1.1754944e-38, %v935_v61  ;;  %vm934_vm8 = vcmp.eq.f32.partialorder %v933_v33, 8.507059e+37 }
 0x146   : > { %v912_v41 = vmul.f32 %v6616_v10, %v911_v17  ;;  %v7938_v9 = vadd.f32 %v7926_v52, %v806_v28 }
 0x148   : > { %v6618_v55 = vpop.eup %6617  ;;  %v913_v18 = vadd.f32 %v6616_v10, %v912_v41  ;;  %v6326_v26 = vmul.f32 -1.442695, %v7938_v9 }
 0x149   : > { %v6620_v51 = vpop.eup %6619  ;;  %v895_v24 = vadd.f32 1.0, %v6618_v55 }
 0x14a   : > { %v917_v12 = vsel %vm916_vm2, %v6616_v10, %v913_v18  ;;  %v925_v32 = vmul.f32 %v6620_v51, %v894_v16  ;;  %6621 = vpow2.f32 %v6326_v26  ;;  %vm930_vm5 = vweird.f32 %v6620_v51 }
 0x14b   : > { %v922_v27 = vsel %vm919_vm3, %v921_v38, %v917_v12  ;;  %6623 = vrcp.f32 %v895_v24  ;;  %vm931_vm7 = vmor %vm929_vm6, %vm930_vm5  ;;  %v948_v48 = vand.u32 2147483647, %v895_v24  ;;  %v950_v53 = vand.u32 2147483648, %v895_v24 }
 0x14c   : > { %v7941_v30 = vmul.f32 %v922_v27, %v798_v31  ;;  %v926_v59 = vsub.f32 1.0, %v925_v32  ;;  %vm944_vm10 = vweird.f32 %v895_v24 }
 0x14d   : > { %v809_v50 = vpop.f32.mrf.mxu0  ;;  %v951_v47 = vor.u32 1.1754944e-38, %v950_v53  ;;  %vm949_vm12 = vcmp.eq.f32.partialorder %v948_v48, 8.507059e+37 }
 0x14e   : > { %v927_v19 = vmul.f32 %v6620_v51, %v926_v59  ;;  %v7944_v23 = vadd.f32 %v7926_v52, %v809_v50  ;;  %v1168_v6 = vsel %vm1167_vm4, %v7941_v30, 0.0  ;;  %v1216_v44 = vmul.f32 %v7941_v30, %v7941_v30 }
 0x14f   : > { %1169 = vadd.xlane.f32.xlu1 %v1168_v6 }
 0x150   : > { %v6622_v7 = vpop.eup %6621  ;;  %v928_v45 = vadd.f32 %v6620_v51, %v927_v19  ;;  %v6327_v37 = vmul.f32 -1.442695, %v7944_v23  ;;  %v1232_v34 = vsel %vm1167_vm4, %v1216_v44, 0.0 }
 0x151   : > { %v6624_v11 = vpop.eup %6623  ;;  %v896_v22 = vadd.f32 1.0, %v6622_v7  ;;  %1233 = vadd.xlane.f32.xlu2 %v1232_v34 }
 0x152   : > { %v932_v35 = vsel %vm931_vm7, %v6620_v51, %v928_v45  ;;  %v940_v49 = vmul.f32 %v6624_v11, %v895_v24  ;;  %6625 = vpow2.f32 %v6327_v37  ;;  %vm945_vm9 = vweird.f32 %v6624_v11 }
 0x153   : > { %v937_v42 = vsel %vm934_vm8, %v936_v40, %v932_v35  ;;  %6627 = vrcp.f32 %v896_v22  ;;  %vm946_vm11 = vmor %vm944_vm10, %vm945_vm9  ;;  %v963_v63 = vand.u32 2147483647, %v896_v22  ;;  %v965_v62 = vand.u32 2147483648, %v896_v22 }
 0x154   : > { %v7953_v2 = vmul.f32 %v937_v42, %v7930_v46  ;;  %v941_v13 = vsub.f32 1.0, %v940_v49  ;;  %vm959_vm14 = vweird.f32 %v896_v22 }
 0x155   : > { %v812_v54 = vpop.f32.mrf.mxu0  ;;  %v966_v41 = vor.u32 1.1754944e-38, %v965_v62  ;;  %vm964_vm0 = vcmp.eq.f32.partialorder %v963_v63, 8.507059e+37 }
 0x156   : > { %v942_v56 = vmul.f32 %v6624_v11, %v941_v13  ;;  %v7956_v39 = vadd.f32 %v7926_v52, %v812_v54  ;;  %v1171_v58 = vsel %vm1167_vm4, %v7953_v2, 0.0  ;;  %v1217_v5 = vmul.f32 %v7953_v2, %v7953_v2 }
 0x157   : > { %1172 = vadd.xlane.f32.xlu0 %v1171_v58 }
 0x158   : > { %v6626_v36 = vpop.eup %6625  ;;  %v943_v15 = vadd.f32 %v6624_v11, %v942_v56  ;;  %v6328_v29 = vmul.f32 -1.442695, %v7956_v39  ;;  %v1235_v31 = vsel %vm1167_vm4, %v1217_v5, 0.0 }
 0x159   : > { %v6628_v1 = vpop.eup %6627  ;;  %v897_v14 = vadd.f32 1.0, %v6626_v36  ;;  %1236 = vadd.xlane.f32.xlu1 %v1235_v31 }
 0x15a   : > { %v947_v43 = vsel %vm946_vm11, %v6624_v11, %v943_v15  ;;  %v955_v20 = vmul.f32 %v6628_v1, %v896_v22  ;;  %6629 = vpow2.f32 %v6328_v29  ;;  %vm960_vm13 = vweird.f32 %v6628_v1 }
 0x15b   : > { %v952_v46 = vsel %vm949_vm12, %v951_v47, %v947_v43  ;;  %6631 = vrcp.f32 %v897_v14  ;;  %vm961_vm15 = vmor %vm959_vm14, %vm960_vm13  ;;  %v978_v12 = vand.u32 2147483647, %v897_v14  ;;  %v980_v32 = vand.u32 2147483648, %v897_v14 }
 0x15c   : > { %v7965_v0 = vmul.f32 %v952_v46, %v7934_v3  ;;  %v956_v60 = vsub.f32 1.0, %v955_v20  ;;  %vm974_vm2 = vweird.f32 %v897_v14 }
 0x15d   : > { %v815_v57 = vpop.f32.mrf.mxu0  ;;  %v981_v7 = vor.u32 1.1754944e-38, %v980_v32  ;;  %vm979_vm5 = vcmp.eq.f32.partialorder %v978_v12, 8.507059e+37 }
 0x15e   : > { %v957_v4 = vmul.f32 %v6628_v1, %v956_v60  ;;  %v7968_v10 = vadd.f32 %v7926_v52, %v815_v57  ;;  %v1174_v16 = vsel %vm1167_vm4, %v7965_v0, 0.0  ;;  %v1218_v8 = vmul.f32 %v7965_v0, %v7965_v0 }
 0x15f   : > { %1175 = vadd.xlane.f32.xlu2 %v1174_v16 }
 0x160   : > { %v6630_v17 = vpop.eup %6629  ;;  %v958_v25 = vadd.f32 %v6628_v1, %v957_v4  ;;  %v6329_v3 = vmul.f32 -1.442695, %v7968_v10  ;;  %v1238_v55 = vsel %vm1167_vm4, %v1218_v8, 0.0 }
 0x161   : > { %v6632_v28 = vpop.eup %6631  ;;  %v898_v21 = vadd.f32 1.0, %v6630_v17  ;;  %1239 = vadd.xlane.f32.xlu0 %v1238_v55 }
 0x162   : > { %v962_v18 = vsel %vm961_vm15, %v6628_v1, %v958_v25  ;;  %v970_v26 = vmul.f32 %v6632_v28, %v897_v14  ;;  %6633 = vpow2.f32 %v6329_v3  ;;  %vm975_vm1 = vweird.f32 %v6632_v28 }
 0x163   : > { %v967_v51 = vsel %vm964_vm0, %v966_v41, %v962_v18  ;;  %6635 = vrcp.f32 %v898_v21  ;;  %vm976_vm3 = vmor %vm974_vm2, %vm975_vm1  ;;  %v993_v49 = vand.u32 2147483647, %v898_v21  ;;  %v995_v42 = vand.u32 2147483648, %v898_v21 }
 0x164   : > { %v7977_v38 = vmul.f32 %v967_v51, %v7938_v9  ;;  %v971_v24 = vsub.f32 1.0, %v970_v26  ;;  %vm989_vm7 = vweird.f32 %v898_v21 }
 0x165   : > { %v818_v27 = vpop.f32.mrf.mxu0  ;;  %v996_v15 = vor.u32 1.1754944e-38, %v995_v42  ;;  %vm994_vm9 = vcmp.eq.f32.partialorder %v993_v49, 8.507059e+37 }
 0x166   : > { %v972_v59 = vmul.f32 %v6632_v28, %v971_v24  ;;  %v7980_v33 = vadd.f32 %v7926_v52, %v818_v27  ;;  %v1177_v61 = vsel %vm1167_vm4, %v7977_v38, 0.0  ;;  %v1219_v50 = vmul.f32 %v7977_v38, %v7977_v38 }
 0x167   : > { %1178 = vadd.xlane.f32.xlu1 %v1177_v61 }
 0x168   : > { %v6634_v19 = vpop.eup %6633  ;;  %v973_v6 = vadd.f32 %v6632_v28, %v972_v59  ;;  %v6330_v9 = vmul.f32 -1.442695, %v7980_v33  ;;  %v1241_v37 = vsel %vm1167_vm4, %v1219_v50, 0.0 }
 0x169   : > { %v6636_v44 = vpop.eup %6635  ;;  %v899_v45 = vadd.f32 1.0, %v6634_v19  ;;  %1242 = vadd.xlane.f32.xlu2 %v1241_v37 }
 0x16a   : > { %v977_v11 = vsel %vm976_vm3, %v6632_v28, %v973_v6  ;;  %v985_v40 = vmul.f32 %v6636_v44, %v898_v21  ;;  %6637 = vpow2.f32 %v6330_v9  ;;  %vm990_vm6 = vweird.f32 %v6636_v44 }
 0x16b   : > { %v982_v22 = vsel %vm979_vm5, %v981_v7, %v977_v11  ;;  %6639 = vrcp.f32 %v899_v45  ;;  %vm991_vm8 = vmor %vm989_vm7, %vm990_vm6  ;;  %v1008_v46 = vand.u32 2147483647, %v899_v45  ;;  %v1010_v60 = vand.u32 2147483648, %v899_v45 }
 0x16c   : > { %v7989_v34 = vmul.f32 %v982_v22, %v7944_v23  ;;  %v986_v35 = vsub.f32 1.0, %v985_v40  ;;  %vm1004_vm11 = vweird.f32 %v899_v45 }
 0x16d   : > { %v821_v13 = vpop.f32.mrf.mxu0  ;;  %v1011_v3 = vor.u32 1.1754944e-38, %v1010_v60  ;;  %vm1009_vm13 = vcmp.eq.f32.partialorder %v1008_v46, 8.507059e+37 }
 0x16e   : > { %v987_v48 = vmul.f32 %v6636_v44, %v986_v35  ;;  %v7992_v53 = vadd.f32 %v7926_v52, %v821_v13  ;;  %v1180_v54 = vsel %vm1167_vm4, %v7989_v34, 0.0  ;;  %v1220_v56 = vmul.f32 %v7989_v34, %v7989_v34 }
 0x16f   : > { %1181 = vadd.xlane.f32.xlu0 %v1180_v54 }
 0x170   : > { %v6638_v58 = vpop.eup %6637  ;;  %v988_v5 = vadd.f32 %v6636_v44, %v987_v48  ;;  %v6331_v23 = vmul.f32 -1.442695, %v7992_v53  ;;  %v1244_v1 = vsel %vm1167_vm4, %v1220_v56, 0.0 }
 0x171   : > { %v6640_v36 = vpop.eup %6639  ;;  %v900_v29 = vadd.f32 1.0, %v6638_v58  ;;  %1245 = vadd.xlane.f32.xlu1 %v1244_v1 }
 0x172   : > { %v992_v47 = vsel %vm991_vm8, %v6636_v44, %v988_v5  ;;  %v1000_v14 = vmul.f32 %v6640_v36, %v899_v45  ;;  %6641 = vpow2.f32 %v6331_v23  ;;  %vm1005_vm10 = vweird.f32 %v6640_v36 }
 0x173   : > { %v997_v31 = vsel %vm994_vm9, %v996_v15, %v992_v47  ;;  %6643 = vrcp.f32 %v900_v29  ;;  %vm1006_vm12 = vmor %vm1004_vm11, %vm1005_vm10  ;;  %v1023_v24 = vand.u32 2147483647, %v900_v29  ;;  %v1025_v12 = vand.u32 2147483648, %v900_v29 }
 0x174   : > { %v8001_v43 = vmul.f32 %v997_v31, %v7956_v39  ;;  %v1001_v20 = vsub.f32 1.0, %v1000_v14  ;;  %vm1019_vm15 = vweird.f32 %v900_v29 }
 0x175   : > { %v824_v63 = vpop.f32.mrf.mxu0  ;;  %v1026_v44 = vor.u32 1.1754944e-38, %v1025_v12  ;;  %vm1024_vm1 = vcmp.eq.f32.partialorder %v1023_v24, 8.507059e+37 }
 0x176   : > { %v1002_v62 = vmul.f32 %v6640_v36, %v1001_v20  ;;  %v8004_v57 = vadd.f32 %v7926_v52, %v824_v63  ;;  %v1183_v4 = vsel %vm1167_vm4, %v8001_v43, 0.0  ;;  %v1221_v16 = vmul.f32 %v8001_v43, %v8001_v43 }
 0x177   : > { %1184 = vadd.xlane.f32.xlu2 %v1183_v4 }
 0x178   : > { %v6642_v8 = vpop.eup %6641  ;;  %v1003_v17 = vadd.f32 %v6640_v36, %v1002_v62  ;;  %v6332_v39 = vmul.f32 -1.442695, %v8004_v57  ;;  %v1247_v41 = vsel %vm1167_vm4, %v1221_v16, 0.0 }
 0x179   : > { %v6644_v25 = vpop.eup %6643  ;;  %v901_v28 = vadd.f32 1.0, %v6642_v8  ;;  %1248 = vadd.xlane.f32.xlu0 %v1247_v41 }
 0x17a   : > { %v1007_v21 = vsel %vm1006_vm12, %v6640_v36, %v1003_v17  ;;  %v1015_v55 = vmul.f32 %v6644_v25, %v900_v29  ;;  %6645 = vpow2.f32 %v6332_v39  ;;  %vm1020_vm14 = vweird.f32 %v6644_v25 }
 0x17b   : > { %v1012_v18 = vsel %vm1009_vm13, %v1011_v3, %v1007_v21  ;;  %6647 = vrcp.f32 %v901_v28  ;;  %vm1021_vm0 = vmor %vm1019_vm15, %vm1020_vm14  ;;  %v1038_v49 = vand.u32 2147483647, %v901_v28  ;;  %v1040_v42 = vand.u32 2147483648, %v901_v28 }
 0x17c   : > { %v8013_v26 = vmul.f32 %v1012_v18, %v7968_v10  ;;  %v1016_v51 = vsub.f32 1.0, %v1015_v55  ;;  %vm1034_vm3 = vweird.f32 %v901_v28 }
 0x17d   : > { %v827_v32 = vpop.f32.mrf.mxu0  ;;  %v1041_v15 = vor.u32 1.1754944e-38, %v1040_v42  ;;  %vm1039_vm6 = vcmp.eq.f32.partialorder %v1038_v49, 8.507059e+37 }
 0x17e   : > { %v1017_v27 = vmul.f32 %v6644_v25, %v1016_v51  ;;  %v8016_v59 = vadd.f32 %v7926_v52, %v827_v32  ;;  %v1186_v61 = vsel %vm1167_vm4, %v8013_v26, 0.0  ;;  %v1222_v50 = vmul.f32 %v8013_v26, %v8013_v26 }
 0x17f   : > { %1187 = vadd.xlane.f32.xlu1 %v1186_v61 }
 0x180   : > { %v6646_v19 = vpop.eup %6645  ;;  %v1018_v6 = vadd.f32 %v6644_v25, %v1017_v27  ;;  %v6333_v10 = vmul.f32 -1.442695, %v8016_v59  ;;  %v1250_v45 = vsel %vm1167_vm4, %v1222_v50, 0.0 }
 0x181   : > { %v6648_v9 = vpop.eup %6647  ;;  %v902_v7 = vadd.f32 1.0, %v6646_v19  ;;  %1251 = vadd.xlane.f32.xlu2 %v1250_v45 }
 0x182   : > { %v1022_v37 = vsel %vm1021_vm0, %v6644_v25, %v1018_v6  ;;  %v1030_v11 = vmul.f32 %v6648_v9, %v901_v28  ;;  %6649 = vpow2.f32 %v6333_v10  ;;  %vm1035_vm2 = vweird.f32 %v6648_v9 }
 0x183   : > { %v1027_v40 = vsel %vm1024_vm1, %v1026_v44, %v1022_v37  ;;  %6651 = vrcp.f32 %v902_v7  ;;  %vm1036_vm5 = vmor %vm1034_vm3, %vm1035_vm2  ;;  %v1053_v60 = vand.u32 2147483647, %v902_v7  ;;  %v1055_v63 = vand.u32 2147483648, %v902_v7 }
 0x184   : > { %v8025_v22 = vmul.f32 %v1027_v40, %v7980_v33  ;;  %v1031_v35 = vsub.f32 1.0, %v1030_v11  ;;  %vm1049_vm8 = vweird.f32 %v902_v7 }
 0x185   : > { %v830_v13 = vpop.f32.mrf.mxu0  ;;  %v1056_v28 = vor.u32 1.1754944e-38, %v1055_v63  ;;  %vm1054_vm10 = vcmp.eq.f32.partialorder %v1053_v60, 8.507059e+37 }
 0x186   : > { %v1032_v48 = vmul.f32 %v6648_v9, %v1031_v35  ;;  %v8028_v54 = vadd.f32 %v7926_v52, %v830_v13  ;;  %v1189_v56 = vsel %vm1167_vm4, %v8025_v22, 0.0  ;;  %v1223_v58 = vmul.f32 %v8025_v22, %v8025_v22 }
 0x187   : > { %1190 = vadd.xlane.f32.xlu0 %v1189_v56 }
 0x188   : > { %v6650_v5 = vpop.eup %6649  ;;  %v1033_v23 = vadd.f32 %v6648_v9, %v1032_v48  ;;  %v6334_v33 = vmul.f32 -1.442695, %v8028_v54  ;;  %v1253_v1 = vsel %vm1167_vm4, %v1223_v58, 0.0 }
 0x189   : > { %v6652_v36 = vpop.eup %6651  ;;  %v903_v29 = vadd.f32 1.0, %v6650_v5  ;;  %1254 = vadd.xlane.f32.xlu1 %v1253_v1 }
 0x18a   : > { %v1037_v47 = vsel %vm1036_vm5, %v6648_v9, %v1033_v23  ;;  %v1045_v14 = vmul.f32 %v6652_v36, %v902_v7  ;;  %6653 = vpow2.f32 %v6334_v33  ;;  %vm1050_vm7 = vweird.f32 %v6652_v36 }
 0x18b   : > { %v1042_v31 = vsel %vm1039_vm6, %v1041_v15, %v1037_v47  ;;  %6655 = vrcp.f32 %v903_v29  ;;  %vm1051_vm9 = vmor %vm1049_vm8, %vm1050_vm7  ;;  %v1068_v32 = vand.u32 2147483647, %v903_v29  ;;  %v1070_v27 = vand.u32 2147483648, %v903_v29 }
 0x18c   : > { %v8037_v20 = vmul.f32 %v1042_v31, %v7992_v53  ;;  %v1046_v46 = vsub.f32 1.0, %v1045_v14  ;;  %vm1064_vm12 = vweird.f32 %v903_v29 }
 0x18d   : > { %v833_v62 = vpop.f32.mrf.mxu0  ;;  %v1071_v45 = vor.u32 1.1754944e-38, %v1070_v27  ;;  %vm1069_vm14 = vcmp.eq.f32.partialorder %v1068_v32, 8.507059e+37 }
 0x18e   : > { %v1047_v4 = vmul.f32 %v6652_v36, %v1046_v46  ;;  %v8040_v16 = vadd.f32 %v7926_v52, %v833_v62  ;;  %v1192_v8 = vsel %vm1167_vm4, %v8037_v20, 0.0  ;;  %v1224_v17 = vmul.f32 %v8037_v20, %v8037_v20 }
 0x18f   : > { %1193 = vadd.xlane.f32.xlu2 %v1192_v8 }
 0x190   : > { %v6654_v39 = vpop.eup %6653  ;;  %v1048_v25 = vadd.f32 %v6652_v36, %v1047_v4  ;;  %v6335_v53 = vmul.f32 -1.442695, %v8040_v16  ;;  %v1256_v21 = vsel %vm1167_vm4, %v1224_v17, 0.0 }
 0x191   : > { %v6656_v3 = vpop.eup %6655  ;;  %v904_v41 = vadd.f32 1.0, %v6654_v39  ;;  %1257 = vadd.xlane.f32.xlu1 %v1256_v21 }
 0x192   : > { %v1052_v55 = vsel %vm1051_vm9, %v6652_v36, %v1048_v25  ;;  %v1060_v18 = vmul.f32 %v6656_v3, %v903_v29  ;;  %6657 = vpow2.f32 %v6335_v53  ;;  %vm1065_vm11 = vweird.f32 %v6656_v3 }
 0x193   : > { %v1057_v51 = vsel %vm1054_vm10, %v1056_v28, %v1052_v55  ;;  %6659 = vrcp.f32 %v904_v41  ;;  %vm1066_vm13 = vmor %vm1064_vm12, %vm1065_vm11  ;;  %v1083_v48 = vand.u32 2147483647, %v904_v41  ;;  %v1085_v56 = vand.u32 2147483648, %v904_v41 }
 0x194   : > { %v8049_v24 = vmul.f32 %v1057_v51, %v8004_v57  ;;  %v1061_v12 = vsub.f32 1.0, %v1060_v18  ;;  %vm1079_vm0 = vweird.f32 %v904_v41 }
 0x195   : > { %v836_v61 = vpop.f32.mrf.mxu0  ;;  %v1086_v47 = vor.u32 1.1754944e-38, %v1085_v56  ;;  %vm1084_vm2 = vcmp.eq.f32.partialorder %v1083_v48, 8.507059e+37 }
 0x196   : > { %v1062_v50 = vmul.f32 %v6656_v3, %v1061_v12  ;;  %v8052_v19 = vadd.f32 %v7926_v52, %v836_v61  ;;  %v1195_v6 = vsel %vm1167_vm4, %v8049_v24, 0.0  ;;  %v1225_v10 = vmul.f32 %v8049_v24, %v8049_v24 }
 0x197   : > { %1196 = vadd.xlane.f32.xlu0 %v1195_v6 }
 0x198   : > { %v6658_v9 = vpop.eup %6657  ;;  %v1063_v44 = vadd.f32 %v6656_v3, %v1062_v50  ;;  %v6336_v57 = vmul.f32 -1.442695, %v8052_v19  ;;  %v1259_v11 = vsel %vm1167_vm4, %v1225_v10, 0.0 }
 0x199   : > { %v6660_v7 = vpop.eup %6659  ;;  %v905_v37 = vadd.f32 1.0, %v6658_v9  ;;  %1260 = vadd.xlane.f32.xlu2 %v1259_v11 }
 0x19a   : > { %v1067_v40 = vsel %vm1066_vm13, %v6656_v3, %v1063_v44  ;;  %v1075_v35 = vmul.f32 %v6660_v7, %v904_v41  ;;  %6661 = vpow2.f32 %v6336_v57  ;;  %vm1080_vm15 = vweird.f32 %v6660_v7 }
 0x19b   : > { %v1072_v49 = vsel %vm1069_vm14, %v1071_v45, %v1067_v40  ;;  %6663 = vrcp.f32 %v905_v37  ;;  %vm1081_vm1 = vmor %vm1079_vm0, %vm1080_vm15  ;;  %v1098_v8 = vand.u32 2147483647, %v905_v37  ;;  %v1100_v17 = vand.u32 2147483648, %v905_v37 }
 0x19c   : > { %v8061_v42 = vmul.f32 %v1072_v49, %v8016_v59  ;;  %v1076_v13 = vsub.f32 1.0, %v1075_v35  ;;  %vm1094_vm5 = vweird.f32 %v905_v37 }
 0x19d   : > { %v839_v58 = vpop.f32.mrf.mxu0  ;;  %v1101_v18 = vor.u32 1.1754944e-38, %v1100_v17  ;;  %vm1099_vm7 = vcmp.eq.f32.partialorder %v1098_v8, 8.507059e+37 }
 0x19e   : > { %v1077_v5 = vmul.f32 %v6660_v7, %v1076_v13  ;;  %v8064_v23 = vadd.f32 %v7926_v52, %v839_v58  ;;  %v1198_v33 = vsel %vm1167_vm4, %v8061_v42, 0.0  ;;  %v1226_v36 = vmul.f32 %v8061_v42, %v8061_v42 }
 0x19f   : > { %1199 = vadd.xlane.f32.xlu0 %v1198_v33 }
 0x1a0   : > { %v6662_v15 = vpop.eup %6661  ;;  %v1078_v29 = vadd.f32 %v6660_v7, %v1077_v5  ;;  %v6337_v59 = vmul.f32 -1.442695, %v8064_v23  ;;  %v1262_v31 = vsel %vm1167_vm4, %v1226_v36, 0.0 }
 0x1a1   : > { %v6664_v1 = vpop.eup %6663  ;;  %v906_v14 = vadd.f32 1.0, %v6662_v15  ;;  %1263 = vadd.xlane.f32.xlu1 %v1262_v31 }
 0x1a2   : > { %v1082_v46 = vsel %vm1081_vm1, %v6660_v7, %v1078_v29  ;;  %v1090_v60 = vmul.f32 %v6664_v1, %v905_v37  ;;  %6665 = vpow2.f32 %v6337_v59  ;;  %vm1095_vm3 = vweird.f32 %v6664_v1 }
 0x1a3   : > { %v1087_v63 = vsel %vm1084_vm2, %v1086_v47, %v1082_v46  ;;  %6667 = vrcp.f32 %v906_v14  ;;  %vm1096_vm6 = vmor %vm1094_vm5, %vm1095_vm3  ;;  %v1113_v6 = vand.u32 2147483647, %v906_v14  ;;  %v1115_v10 = vand.u32 2147483648, %v906_v14 }
 0x1a4   : > { %v8073_v62 = vmul.f32 %v1087_v63, %v8028_v54  ;;  %v1091_v4 = vsub.f32 1.0, %v1090_v60  ;;  %vm1109_vm9 = vweird.f32 %v906_v14 }
 0x1a5   : > { %v842_v39 = vpop.f32.mrf.mxu0  ;;  %vm1114_vm11 = vcmp.eq.f32.partialorder %v1113_v6, 8.507059e+37 }
 0x1a6   : > { %v1092_v25 = vmul.f32 %v6664_v1, %v1091_v4  ;;  %v8076_v53 = vadd.f32 %v7926_v52, %v842_v39  ;;  %v1201_v3 = vsel %vm1167_vm4, %v8073_v62, 0.0  ;;  %v1227_v28 = vmul.f32 %v8073_v62, %v8073_v62 }
 0x1a7   : > { %1202 = vadd.xlane.f32.xlu2 %v1201_v3 }
 0x1a8   : > { %v6666_v41 = vpop.eup %6665  ;;  %v1093_v21 = vadd.f32 %v6664_v1, %v1092_v25  ;;  %v6338_v54 = vmul.f32 -1.442695, %v8076_v53  ;;  %v1265_v12 = vsel %vm1167_vm4, %v1227_v28, 0.0 }
 0x1a9   : > { %v6668_v55 = vpop.eup %6667  ;;  %v907_v51 = vadd.f32 1.0, %v6666_v41  ;;  %1266 = vadd.xlane.f32.xlu0 %v1265_v12 }
 0x1aa   : > { %v1097_v52 = vsel %vm1096_vm6, %v6664_v1, %v1093_v21  ;;  %v1105_v32 = vmul.f32 %v6668_v55, %v906_v14  ;;  %6669 = vpow2.f32 %v6338_v54  ;;  %vm1110_vm8 = vweird.f32 %v6668_v55 }
 0x1ab   : > { %v1102_v27 = vsel %vm1099_vm7, %v1101_v18, %v1097_v52  ;;  %6671 = vrcp.f32 %v907_v51  ;;  %vm1111_vm10 = vmor %vm1109_vm9, %vm1110_vm8  ;;  %v1128_v58 = vand.u32 2147483647, %v907_v51  ;;  %v1130_v5 = vand.u32 2147483648, %v907_v51 }
 0x1ac   : > { %v8085_v61 = vmul.f32 %v1102_v27, %v8040_v16  ;;  %v1106_v50 = vsub.f32 1.0, %v1105_v32  ;;  %v1116_v16 = vor.u32 1.1754944e-38, %v1115_v10  ;;  %vm1124_vm13 = vweird.f32 %v907_v51  ;;  %v1591_v10 = vld [vmem:[%s10669_s3 + $0x28] sm:$0xff] }
 0x1ad   : > { %vm1129_vm15 = vcmp.eq.f32.partialorder %v1128_v58, 8.507059e+37 }
 0x1ae   : > { %v1107_v9 = vmul.f32 %v6668_v55, %v1106_v50  ;;  %v1204_v44 = vsel %vm1167_vm4, %v8085_v61, 0.0  ;;  %v1228_v57 = vmul.f32 %v8085_v61, %v8085_v61 }
 0x1af   : > { %1205 = vadd.xlane.f32.xlu1 %v1204_v44 }
 0x1b0   : > { %v6670_v7 = vpop.eup %6669  ;;  %v1108_v45 = vadd.f32 %v6668_v55, %v1107_v9  ;;  %v1268_v37 = vsel %vm1167_vm4, %v1228_v57, 0.0 }
 0x1b1   : > { %v6672_v11 = vpop.eup %6671  ;;  %v908_v40 = vadd.f32 1.0, %v6670_v7  ;;  %1269 = vadd.xlane.f32.xlu2 %v1268_v37  ;;  %v1590_v7 = vld [vmem:[%s10669_s3 + $0x20] sm:$0xff] }
 0x1b2   : > { %v1112_v35 = vsel %vm1111_vm10, %v6668_v55, %v1108_v45  ;;  %v1120_v49 = vmul.f32 %v6672_v11, %v907_v51  ;;  %vm1125_vm12 = vweird.f32 %v6672_v11 }
 0x1b3   : > { %v1117_v13 = vsel %vm1114_vm11, %v1116_v16, %v1112_v35  ;;  %6673 = vrcp.f32 %v908_v40  ;;  %vm1126_vm14 = vmor %vm1124_vm13, %vm1125_vm12  ;;  %v1143_v63 = vand.u32 2147483647, %v908_v40  ;;  %v1145_v4 = vand.u32 2147483648, %v908_v40  ;;  %v1588_v35 = vld [vmem:[%s10669_s3 + $0x10] sm:$0xff] }
 0x1b4   : > { %v8093_v48 = vmul.f32 %v1117_v13, %v8052_v19  ;;  %v1121_v56 = vsub.f32 1.0, %v1120_v49  ;;  %v1131_v19 = vor.u32 1.1754944e-38, %v1130_v5  ;;  %vm1139_vm1 = vweird.f32 %v908_v40  ;;  %v1587_v49 = vld [vmem:[%s10669_s3 + $0x8] sm:$0xff] }
 0x1b5   : > { %v1146_v28 = vor.u32 1.1754944e-38, %v1145_v4  ;;  %vm1144_vm3 = vcmp.eq.f32.partialorder %v1143_v63, 8.507059e+37 }
 0x1b6   : > { %v1122_v33 = vmul.f32 %v6672_v11, %v1121_v56  ;;  %v1207_v36 = vsel %vm1167_vm4, %v8093_v48, 0.0  ;;  %v1229_v15 = vmul.f32 %v8093_v48, %v8093_v48 }
 0x1b7   : > { %1208 = vadd.xlane.f32.xlu0 %v1207_v36  ;;  %v1586_v36 = vld [vmem:[%s10669_s3] sm:$0xff] }
 0x1b8   : > { %v1123_v29 = vadd.f32 %v6672_v11, %v1122_v33  ;;  %v1271_v59 = vsel %vm1167_vm4, %v1229_v15, 0.0 }
 0x1b9   : > { %v6674_v1 = vpop.eup %6673  ;;  %1272 = vadd.xlane.f32.xlu1 %v1271_v59 }
 0x1ba   : > { %v1127_v47 = vsel %vm1126_vm14, %v6672_v11, %v1123_v29  ;;  %v1135_v14 = vmul.f32 %v6674_v1, %v908_v40  ;;  %vm1140_vm0 = vweird.f32 %v6674_v1  ;;  %v1589_v11 = vld [vmem:[%s10669_s3 + $0x18] sm:$0xff] }
 0x1bb   : > { %v1132_v31 = vsel %vm1129_vm15, %v1131_v19, %v1127_v47  ;;  %vm1141_vm2 = vmor %vm1139_vm1, %vm1140_vm0 }
 0x1bc   : > { %v8101_v46 = vmul.f32 %v1132_v31, %v8064_v23  ;;  %v1136_v60 = vsub.f32 1.0, %v1135_v14  ;;  %v1593_v23 = vld [vmem:[%s10669_s3 + $0x38] sm:$0xff] }
 0x1bd   : > { %1652 = vmatpush.msra.mxu1 %v1593_v23  ;;  %6501 = vmatpush.msra.mxu3 %v1593_v23 }
 0x1be   : > { %v1137_v8 = vmul.f32 %v6674_v1, %v1136_v60  ;;  %v1210_v17 = vsel %vm1167_vm4, %v8101_v46, 0.0  ;;  %v1230_v39 = vmul.f32 %v8101_v46, %v8101_v46 }
 0x1bf   : > { %1211 = vadd.xlane.f32.xlu2 %v1210_v17 }
 0x1c0   : > { %v1138_v25 = vadd.f32 %v6674_v1, %v1137_v8  ;;  %v1274_v3 = vsel %vm1167_vm4, %v1230_v39, 0.0 }
 0x1c1   : > { %1275 = vadd.xlane.f32.xlu0 %v1274_v3 }
 0x1c2   : > { %v1142_v41 = vsel %vm1141_vm2, %v6674_v1, %v1138_v25  ;;  %v1170_v21 = vpop.xlane.xlu1 %1169  ;;  %v8159_v25 = vld [vmem:[%s10670_s4 + $0x5] ss:$0 sm:$0xff] }
 0x1c3   : > { %v1147_v54 = vsel %vm1144_vm3, %v1146_v28, %v1142_v41  ;;  %v8111_v55 = vmul.f32 0.015625, %v1170_v21 }
 0x1c4   : > { %v8114_v18 = vmul.f32 %v1147_v54, %v8076_v53  ;;  %v1234_v12 = vpop.xlane.xlu2 %1233  ;;  %v1592_v53 = vld [vmem:[%s10669_s3 + $0x30] sm:$0xff] }
 0x1c5   : > { %v1312_v51 = vmul.f32 %v8111_v55, %v8111_v55  ;;  %v1296_v52 = vmul.f32 0.015625, %v1234_v12  ;;  %1653 = vmatpush.msra.mxu1 %v1592_v53  ;;  %6502 = vmatpush.msra.mxu3 %v1592_v53  ;;  %v1344_v39 = vsub.f32 %v7941_v30, %v8111_v55 }
 0x1c6   : > { %v1213_v32 = vsel %vm1167_vm4, %v8114_v18, 0.0  ;;  %v1231_v27 = vmul.f32 %v8114_v18, %v8114_v18 }
 0x1c7   : > { %1214 = vadd.xlane.f32.xlu1 %v1213_v32  ;;  %v1328_v50 = vsub.f32 %v1296_v52, %v1312_v51  ;;  %1654 = vmatpush.msra.mxu1 %v1591_v10  ;;  %v8166_v51 = vld [vmem:[%s10670_s4 + $0xa] ss:$0 sm:$0xff] }
 0x1c8   : > { %v1277_v6 = vsel %vm1167_vm4, %v1231_v27, 0.0  ;;  %6503 = vmatpush.msra.mxu3 %v1591_v10 }
 0x1c9   : > { %1278 = vadd.xlane.f32.xlu2 %v1277_v6  ;;  %v1360_v9 = vadd.f32 0.1, %v1328_v50  ;;  %1655 = vmatpush.msra.mxu1 %v1590_v7 }
 0x1ca   : > { %v1173_v44 = vpop.xlane.xlu0 %1172  ;;  %6504 = vmatpush.msra.mxu3 %v1590_v7 }
 0x1cb   : > { %v8129_v57 = vmul.f32 0.015625, %v1173_v44  ;;  %6675 = vrsqrt.f32 %v1360_v9  ;;  %1656 = vmatpush.msra.mxu1 %v1589_v11  ;;  %vm1382_vm6 = vweird.f32 %v1360_v9 }
 0x1cc   : > { %v1237_v37 = vpop.xlane.xlu1 %1236  ;;  %6505 = vmatpush.msra.mxu3 %v1589_v11 }
 0x1cd   : > { %v1313_v45 = vmul.f32 %v8129_v57, %v8129_v57  ;;  %v1297_v16 = vmul.f32 0.015625, %v1237_v37  ;;  %1657 = vmatpush.msra.mxu1 %v1588_v35  ;;  %v1345_v44 = vsub.f32 %v7953_v2, %v8129_v57 }
 0x1ce   : > { %6506 = vmatpush.msra.mxu3 %v1588_v35 }
 0x1cf   : > { %v1329_v40 = vsub.f32 %v1297_v16, %v1313_v45  ;;  %1658 = vmatpush.msra.mxu1 %v1587_v49 }
 0x1d0   : > { %6507 = vmatpush.msra.mxu3 %v1587_v49 }
 0x1d1   : > { %v6676_v13 = vpop.eup %6675  ;;  %v1361_v56 = vadd.f32 0.1, %v1329_v40  ;;  %1659 = vmatpush.msra.mxu1 %v1586_v36 }
 0x1d2   : > { %v1176_v58 = vpop.xlane.xlu2 %1175  ;;  %v1377_v5 = vmul.f32 %v6676_v13, %v1360_v9  ;;  %6508 = vmatpush.msra.mxu3 %v1586_v36  ;;  %vm1383_vm5 = vweird.f32 %v6676_v13 }
 0x1d3   : > { %v8145_v33 = vmul.f32 0.015625, %v1176_v58  ;;  %6677 = vrsqrt.f32 %v1361_v56  ;;  %vm1384_vm7 = vmor %vm1382_vm6, %vm1383_vm5  ;;  %vm1392_vm9 = vweird.f32 %v1361_v56 }
 0x1d4   : > { %v1378_v15 = vmul.f32 %v6676_v13, %v1377_v5  ;;  %v1240_v59 = vpop.xlane.xlu0 %1239 }
 0x1d5   : > { %v1314_v29 = vmul.f32 %v8145_v33, %v8145_v33  ;;  %v1298_v1 = vmul.f32 0.015625, %v1240_v59  ;;  %v1346_v59 = vsub.f32 %v7965_v0, %v8145_v33 }
 0x1d6   : > { %v1379_v19 = vmul.f32 0.5, %v1378_v15 }
 0x1d7   : > { %v1330_v47 = vsub.f32 %v1298_v1, %v1314_v29 }
 0x1d8   : > { %v1380_v14 = vsub.f32 1.5, %v1379_v19 }
 0x1d9   : > { %v6678_v31 = vpop.eup %6677  ;;  %v1362_v60 = vadd.f32 0.1, %v1330_v47 }
 0x1da   : > { %v1179_v63 = vpop.xlane.xlu1 %1178  ;;  %v1387_v4 = vmul.f32 %v6678_v31, %v1361_v56  ;;  %v1381_v17 = vmul.f32 %v6676_v13, %v1380_v14  ;;  %vm1393_vm8 = vweird.f32 %v6678_v31 }
 0x1db   : > { %v8152_v8 = vmul.f32 0.015625, %v1179_v63  ;;  %6679 = vrsqrt.f32 %v1362_v60  ;;  %vm1394_vm10 = vmor %vm1392_vm9, %vm1393_vm8  ;;  %vm1402_vm12 = vweird.f32 %v1362_v60 }
 0x1dc   : > { %v1388_v3 = vmul.f32 %v6678_v31, %v1387_v4  ;;  %v1243_v23 = vpop.xlane.xlu2 %1242  ;;  %v1385_v41 = vsel %vm1384_vm7, %v6676_v13, %v1381_v17 }
 0x1dd   : > { %v1315_v28 = vmul.f32 %v8152_v8, %v8152_v8  ;;  %v1299_v21 = vmul.f32 0.015625, %v1243_v23  ;;  %v1536_v54 = vmul.f32 %v1385_v41, %v1344_v39 }
 0x1de   : > { %v1389_v30 = vmul.f32 0.5, %v1388_v3 }
 0x1df   : > { %v1331_v55 = vsub.f32 %v1299_v21, %v1315_v28  ;;  %v1553_v12 = vmul.f32 %v8159_v25, %v1536_v54  ;;  %v1347_v54 = vsub.f32 %v7977_v38, %v8152_v8 }
 0x1e0   : > { %v1390_v52 = vsub.f32 1.5, %v1389_v30 }
 0x1e1   : > { %v6680_v32 = vpop.eup %6679  ;;  %v1363_v27 = vadd.f32 0.1, %v1331_v55  ;;  %v8170_v6 = vadd.f32 %v8166_v51, %v1553_v12 }
 0x1e2   : > { %v1182_v50 = vpop.xlane.xlu0 %1181  ;;  %v1397_v53 = vmul.f32 %v6680_v32, %v1362_v60  ;;  %v1391_v9 = vmul.f32 %v6678_v31, %v1390_v52  ;;  %vm1403_vm11 = vweird.f32 %v6680_v32 }
 0x1e3   : > { %v8172_v10 = vmul.f32 0.015625, %v1182_v50  ;;  %6681 = vrsqrt.f32 %v1363_v27  ;;  %6339 = vmatmul.msk.f32.vlgmr.msra.gmra.mxu1 %vm1167_vm4, %v8170_v6  ;;  %vm1404_vm13 = vmor %vm1402_vm12, %vm1403_vm11  ;;  %vm1412_vm15 = vweird.f32 %v1363_v27 }
 0x1e4   : > { %v1398_v7 = vmul.f32 %v6680_v32, %v1397_v53  ;;  %v1246_v37 = vpop.xlane.xlu1 %1245  ;;  %v1395_v11 = vsel %vm1394_vm10, %v6678_v31, %v1391_v9 }
 0x1e5   : > { %v1316_v45 = vmul.f32 %v8172_v10, %v8172_v10  ;;  %v1300_v16 = vmul.f32 0.015625, %v1246_v37  ;;  %v1537_v40 = vmul.f32 %v1395_v11, %v1345_v44 }
 0x1e6   : > { %v1399_v35 = vmul.f32 0.5, %v1398_v7 }
 0x1e7   : > { %v1332_v49 = vsub.f32 %v1300_v16, %v1316_v45  ;;  %v1554_v13 = vmul.f32 %v8159_v25, %v1537_v40  ;;  %v1348_v40 = vsub.f32 %v7989_v34, %v8172_v10 }
 0x1e8   : > { %v1400_v56 = vsub.f32 1.5, %v1399_v35 }
 0x1e9   : > { %v6682_v2 = vpop.eup %6681  ;;  %v1364_v57 = vadd.f32 0.1, %v1332_v49  ;;  %v8182_v5 = vadd.f32 %v8166_v51, %v1554_v13 }
 0x1ea   : > { %v1185_v58 = vpop.xlane.xlu2 %1184  ;;  %v1407_v36 = vmul.f32 %v6682_v2, %v1363_v27  ;;  %v1401_v29 = vmul.f32 %v6680_v32, %v1400_v56  ;;  %vm1413_vm14 = vweird.f32 %v6682_v2 }
 0x1eb   : > { %v8184_v15 = vmul.f32 0.015625, %v1185_v58  ;;  %6683 = vrsqrt.f32 %v1364_v57  ;;  %6340 = vmatmul.msk.f32.gmra.mxu1 %vm1167_vm4, %v8182_v5  ;;  %vm1414_vm0 = vmor %vm1412_vm15, %vm1413_vm14  ;;  %vm1422_vm2 = vweird.f32 %v1364_v57 }
 0x1ec   : > { %v1408_v1 = vmul.f32 %v6682_v2, %v1407_v36  ;;  %v1249_v47 = vpop.xlane.xlu0 %1248  ;;  %v1405_v14 = vsel %vm1404_vm13, %v6680_v32, %v1401_v29 }
 0x1ed   : > { %v1317_v19 = vmul.f32 %v8184_v15, %v8184_v15  ;;  %v1301_v31 = vmul.f32 0.015625, %v1249_v47  ;;  %v1538_v60 = vmul.f32 %v1405_v14, %v1346_v59 }
 0x1ee   : > { %v1409_v63 = vmul.f32 0.5, %v1408_v1 }
 0x1ef   : > { %v1333_v4 = vsub.f32 %v1301_v31, %v1317_v19  ;;  %v1555_v17 = vmul.f32 %v8159_v25, %v1538_v60  ;;  %v1349_v60 = vsub.f32 %v8001_v43, %v8184_v15 }
 0x1f0   : > { %v1410_v39 = vsub.f32 1.5, %v1409_v63 }
 0x1f1   : > { %v6684_v0 = vpop.eup %6683  ;;  %v1365_v33 = vadd.f32 0.1, %v1333_v4  ;;  %v8194_v28 = vadd.f32 %v8166_v51, %v1555_v17 }
 0x1f2   : > { %v1188_v3 = vpop.xlane.xlu1 %1187  ;;  %v1417_v23 = vmul.f32 %v6684_v0, %v1364_v57  ;;  %v1411_v21 = vmul.f32 %v6682_v2, %v1410_v39  ;;  %vm1423_vm1 = vweird.f32 %v6684_v0 }
 0x1f3   : > { %v8196_v41 = vmul.f32 0.015625, %v1188_v3  ;;  %6685 = vrsqrt.f32 %v1365_v33  ;;  %6341 = vmatmul.msk.f32.gmra.mxu1 %vm1167_vm4, %v8194_v28  ;;  %vm1424_vm3 = vmor %vm1422_vm2, %vm1423_vm1  ;;  %vm1432_vm6 = vweird.f32 %v1365_v33 }
 0x1f4   : > { %v1418_v30 = vmul.f32 %v6684_v0, %v1417_v23  ;;  %v1252_v12 = vpop.xlane.xlu2 %1251  ;;  %v1415_v52 = vsel %vm1414_vm0, %v6682_v2, %v1411_v21 }
 0x1f5   : > { %v1318_v55 = vmul.f32 %v8196_v41, %v8196_v41  ;;  %v1302_v32 = vmul.f32 0.015625, %v1252_v12  ;;  %v1539_v27 = vmul.f32 %v1415_v52, %v1347_v54 }
 0x1f6   : > { %v1419_v50 = vmul.f32 0.5, %v1418_v30 }
 0x1f7   : > { %v1334_v53 = vsub.f32 %v1302_v32, %v1318_v55  ;;  %v1556_v9 = vmul.f32 %v8159_v25, %v1539_v27  ;;  %v1350_v27 = vsub.f32 %v8013_v26, %v8196_v41 }
 0x1f8   : > { %v1420_v44 = vsub.f32 1.5, %v1419_v50 }
 0x1f9   : > { %v6686_v38 = vpop.eup %6685  ;;  %v1366_v8 = vadd.f32 0.1, %v1334_v53  ;;  %v8206_v45 = vadd.f32 %v8166_v51, %v1556_v9 }
 0x1fa   : > { %v1191_v7 = vpop.xlane.xlu0 %1190  ;;  %v1427_v37 = vmul.f32 %v6686_v38, %v1365_v33  ;;  %v1421_v16 = vmul.f32 %v6684_v0, %v1420_v44  ;;  %vm1433_vm5 = vweird.f32 %v6686_v38 }
 0x1fb   : > { %v8208_v11 = vmul.f32 0.015625, %v1191_v7  ;;  %6687 = vrsqrt.f32 %v1366_v8  ;;  %6342 = vmatmul.msk.f32.gmra.mxu1 %vm1167_vm4, %v8206_v45  ;;  %vm1434_vm7 = vmor %vm1432_vm6, %vm1433_vm5  ;;  %vm1442_vm9 = vweird.f32 %v1366_v8 }
 0x1fc   : > { %v1428_v35 = vmul.f32 %v6686_v38, %v1427_v37  ;;  %v1255_v13 = vpop.xlane.xlu1 %1254  ;;  %v1425_v56 = vsel %vm1424_vm3, %v6684_v0, %v1421_v16 }
 0x1fd   : > { %v1319_v49 = vmul.f32 %v8208_v11, %v8208_v11  ;;  %v1303_v2 = vmul.f32 0.015625, %v1255_v13  ;;  %v1540_v57 = vmul.f32 %v1425_v56, %v1348_v40 }
 0x1fe   : > { %v1429_v58 = vmul.f32 0.5, %v1428_v35 }
 0x1ff   : > { %v1335_v36 = vsub.f32 %v1303_v2, %v1319_v49  ;;  %v1557_v29 = vmul.f32 %v8159_v25, %v1540_v57  ;;  %v1351_v57 = vsub.f32 %v8025_v22, %v8208_v11 }
 0x200   : > { %v1430_v59 = vsub.f32 1.5, %v1429_v58 }
 0x201   : > { %v6688_v34 = vpop.eup %6687  ;;  %v1367_v10 = vadd.f32 0.1, %v1335_v36  ;;  %v8218_v19 = vadd.f32 %v8166_v51, %v1557_v29 }
 0x202   : > { %v1194_v1 = vpop.xlane.xlu2 %1193  ;;  %v1437_v47 = vmul.f32 %v6688_v34, %v1366_v8  ;;  %v1431_v31 = vmul.f32 %v6686_v38, %v1430_v59  ;;  %vm1443_vm8 = vweird.f32 %v6688_v34 }
 0x203   : > { %v8220_v14 = vmul.f32 0.015625, %v1194_v1  ;;  %6689 = vrsqrt.f32 %v1367_v10  ;;  %6343 = vmatmul.msk.f32.gmra.mxu1 %vm1167_vm4, %v8218_v19  ;;  %vm1444_vm10 = vmor %vm1442_vm9, %vm1443_vm8  ;;  %vm1452_vm12 = vweird.f32 %v1367_v10 }
 0x204   : > { %v1438_v63 = vmul.f32 %v6688_v34, %v1437_v47  ;;  %v1258_v17 = vpop.xlane.xlu1 %1257  ;;  %v1435_v39 = vsel %vm1434_vm7, %v6686_v38, %v1431_v31 }
 0x205   : > { %v1320_v4 = vmul.f32 %v8220_v14, %v8220_v14  ;;  %v1304_v0 = vmul.f32 0.015625, %v1258_v17  ;;  %v1541_v33 = vmul.f32 %v1435_v39, %v1349_v60 }
 0x206   : > { %v1439_v3 = vmul.f32 0.5, %v1438_v63 }
 0x207   : > { %v1336_v23 = vsub.f32 %v1304_v0, %v1320_v4  ;;  %v1558_v21 = vmul.f32 %v8159_v25, %v1541_v33  ;;  %v1352_v33 = vsub.f32 %v8037_v20, %v8220_v14 }
 0x208   : > { %v1440_v54 = vsub.f32 1.5, %v1439_v3 }
 0x209   : > { %v6690_v43 = vpop.eup %6689  ;;  %v1368_v15 = vadd.f32 0.1, %v1336_v23  ;;  %v8230_v55 = vadd.f32 %v8166_v51, %v1558_v21 }
 0x20a   : > { %v1197_v30 = vpop.xlane.xlu0 %1196  ;;  %v1447_v12 = vmul.f32 %v6690_v43, %v1367_v10  ;;  %v1441_v32 = vmul.f32 %v6688_v34, %v1440_v54  ;;  %vm1453_vm11 = vweird.f32 %v6690_v43 }
 0x20b   : > { %v8232_v52 = vmul.f32 0.015625, %v1197_v30  ;;  %6691 = vrsqrt.f32 %v1368_v15  ;;  %6344 = vmatmul.msk.f32.gmra.mxu1 %vm1167_vm4, %v8230_v55  ;;  %vm1454_vm13 = vmor %vm1452_vm12, %vm1453_vm11  ;;  %vm1462_vm15 = vweird.f32 %v1368_v15 }
 0x20c   : > { %v1448_v50 = vmul.f32 %v6690_v43, %v1447_v12  ;;  %v1261_v9 = vpop.xlane.xlu2 %1260  ;;  %v1445_v44 = vsel %vm1444_vm10, %v6688_v34, %v1441_v32 }
 0x20d   : > { %v1321_v53 = vmul.f32 %v8232_v52, %v8232_v52  ;;  %v1305_v38 = vmul.f32 0.015625, %v1261_v9  ;;  %v1542_v8 = vmul.f32 %v1445_v44, %v1350_v27 }
 0x20e   : > { %v1449_v7 = vmul.f32 0.5, %v1448_v50 }
 0x20f   : > { %v1337_v37 = vsub.f32 %v1305_v38, %v1321_v53  ;;  %v1559_v16 = vmul.f32 %v8159_v25, %v1542_v8 }
 0x210   : > { %v1450_v40 = vsub.f32 1.5, %v1449_v7  ;;  %v1353_v7 = vsub.f32 %v8049_v24, %v8232_v52 }
 0x211   : > { %v6692_v26 = vpop.eup %6691  ;;  %v1369_v41 = vadd.f32 0.1, %v1337_v37  ;;  %v8242_v49 = vadd.f32 %v8166_v51, %v1559_v16 }
 0x212   : > { %v1200_v35 = vpop.xlane.xlu0 %1199  ;;  %v1457_v13 = vmul.f32 %v6692_v26, %v1368_v15  ;;  %v1451_v2 = vmul.f32 %v6690_v43, %v1450_v40  ;;  %vm1463_vm14 = vweird.f32 %v6692_v26 }
 0x213   : > { %v8244_v56 = vmul.f32 0.015625, %v1200_v35  ;;  %6693 = vrsqrt.f32 %v1369_v41  ;;  %6345 = vmatmul.msk.f32.gmra.mxu1 %vm1167_vm4, %v8242_v49  ;;  %vm1464_vm0 = vmor %vm1462_vm15, %vm1463_vm14  ;;  %vm1472_vm2 = vweird.f32 %v1369_v41 }
 0x214   : > { %v1458_v58 = vmul.f32 %v6692_v26, %v1457_v13  ;;  %v1264_v29 = vpop.xlane.xlu1 %1263  ;;  %v1455_v59 = vsel %vm1454_vm13, %v6690_v43, %v1451_v2 }
 0x215   : > { %v1322_v36 = vmul.f32 %v8244_v56, %v8244_v56  ;;  %v1306_v34 = vmul.f32 0.015625, %v1264_v29  ;;  %v1543_v10 = vmul.f32 %v1455_v59, %v1351_v57 }
 0x216   : > { %v1459_v1 = vmul.f32 0.5, %v1458_v58 }
 0x217   : > { %v1338_v47 = vsub.f32 %v1306_v34, %v1322_v36  ;;  %v1560_v31 = vmul.f32 %v8159_v25, %v1543_v10 }
 0x218   : > { %v1460_v60 = vsub.f32 1.5, %v1459_v1  ;;  %v1354_v1 = vsub.f32 %v8061_v42, %v8244_v56 }
 0x219   : > { %v6694_v22 = vpop.eup %6693  ;;  %v1370_v11 = vadd.f32 0.1, %v1338_v47  ;;  %v8254_v4 = vadd.f32 %v8166_v51, %v1560_v31 }
 0x21a   : > { %v1203_v63 = vpop.xlane.xlu2 %1202  ;;  %v1467_v17 = vmul.f32 %v6694_v22, %v1369_v41  ;;  %v1461_v0 = vmul.f32 %v6692_v26, %v1460_v60  ;;  %vm1473_vm1 = vweird.f32 %v6694_v22 }
 0x21b   : > { %v8256_v39 = vmul.f32 0.015625, %v1203_v63  ;;  %6695 = vrsqrt.f32 %v1370_v11  ;;  %6346 = vmatmul.msk.f32.gmra.mxu1 %vm1167_vm4, %v8254_v4  ;;  %vm1474_vm3 = vmor %vm1472_vm2, %vm1473_vm1  ;;  %vm1482_vm6 = vweird.f32 %v1370_v11 }
 0x21c   : > { %v1468_v3 = vmul.f32 %v6694_v22, %v1467_v17  ;;  %v1267_v21 = vpop.xlane.xlu0 %1266  ;;  %v1465_v54 = vsel %vm1464_vm0, %v6692_v26, %v1461_v0 }
 0x21d   : > { %v1323_v23 = vmul.f32 %v8256_v39, %v8256_v39  ;;  %v1307_v43 = vmul.f32 0.015625, %v1267_v21  ;;  %v1544_v15 = vmul.f32 %v1465_v54, %v1352_v33 }
 0x21e   : > { %v1469_v30 = vmul.f32 0.5, %v1468_v3 }
 0x21f   : > { %v1339_v12 = vsub.f32 %v1307_v43, %v1323_v23  ;;  %v1561_v32 = vmul.f32 %v8159_v25, %v1544_v15  ;;  %v1355_v15 = vsub.f32 %v8073_v62, %v8256_v39 }
 0x220   : > { %v1470_v27 = vsub.f32 1.5, %v1469_v30 }
 0x221   : > { %v6696_v50 = vpop.eup %6695  ;;  %v1371_v20 = vadd.f32 0.1, %v1339_v12  ;;  %v8266_v53 = vadd.f32 %v8166_v51, %v1561_v32 }
 0x222   : > { %v1206_v14 = vpop.xlane.xlu1 %1205  ;;  %v1477_v9 = vmul.f32 %v6696_v50, %v1370_v11  ;;  %v1471_v38 = vmul.f32 %v6694_v22, %v1470_v27  ;;  %vm1483_vm5 = vweird.f32 %v6696_v50 }
 0x223   : > { %v8268_v44 = vmul.f32 0.015625, %v1206_v14  ;;  %6697 = vrsqrt.f32 %v1371_v20  ;;  %6347 = vmatmul.msk.f32.gmra.mxu1 %vm1167_vm4, %v8266_v53  ;;  %vm1484_vm7 = vmor %vm1482_vm6, %vm1483_vm5  ;;  %vm1492_vm9 = vweird.f32 %v1371_v20 }
 0x224   : > { %v1270_v8 = vpop.xlane.xlu2 %1269  ;;  %v1478_v37 = vmul.f32 %v6696_v50, %v1477_v9  ;;  %v1475_v26 = vsel %vm1474_vm3, %v6694_v22, %v1471_v38 }
 0x225   : > { %v1324_v16 = vmul.f32 %v8268_v44, %v8268_v44  ;;  %v1308_v40 = vmul.f32 0.015625, %v1270_v8  ;;  %v1545_v2 = vmul.f32 %v1475_v26, %v1353_v7 }
 0x226   : > { %v1479_v35 = vmul.f32 0.5, %v1478_v37 }
 0x227   : > { %v1340_v13 = vsub.f32 %v1308_v40, %v1324_v16  ;;  %v1562_v58 = vmul.f32 %v8159_v25, %v1545_v2  ;;  %v1356_v40 = vsub.f32 %v8085_v61, %v8268_v44 }
 0x228   : > { %v1480_v57 = vsub.f32 1.5, %v1479_v35 }
 0x229   : > { %v1372_v41 = vadd.f32 0.1, %v1340_v13  ;;  %v6698_v36 = vpop.eup %6697  ;;  %v8280_v52 = vadd.f32 %v8166_v51, %v1562_v58 }
 0x22a   : > { %v1209_v29 = vpop.xlane.xlu0 %1208  ;;  %v1487_v59 = vmul.f32 %v6698_v36, %v1371_v20  ;;  %v1481_v10 = vmul.f32 %v6696_v50, %v1480_v57  ;;  %vm1493_vm8 = vweird.f32 %v6698_v36 }
 0x22b   : > { %6699 = vrsqrt.f32 %v1372_v41  ;;  %v8277_v24 = vmul.f32 0.015625, %v1209_v29  ;;  %6348 = vmatmul.msk.f32.vlgmr.msra.gmra.mxu3 %vm1167_vm4, %v8280_v52  ;;  %vm1494_vm10 = vmor %vm1492_vm9, %vm1493_vm8  ;;  %vm1502_vm12 = vweird.f32 %v1372_v41 }
 0x22c   : > { %v1273_v34 = vpop.xlane.xlu1 %1272  ;;  %v1488_v47 = vmul.f32 %v6698_v36, %v1487_v59  ;;  %v1485_v22 = vsel %vm1484_vm7, %v6696_v50, %v1481_v10 }
 0x22d   : > { %v1309_v31 = vmul.f32 0.015625, %v1273_v34  ;;  %v1325_v60 = vmul.f32 %v8277_v24, %v8277_v24  ;;  %v1546_v63 = vmul.f32 %v1485_v22, %v1354_v1 }
 0x22e   : > { %v1489_v11 = vmul.f32 0.5, %v1488_v47 }
 0x22f   : > { %v1341_v17 = vsub.f32 %v1309_v31, %v1325_v60  ;;  %v1563_v3 = vmul.f32 %v8159_v25, %v1546_v63  ;;  %v1357_v60 = vsub.f32 %v8093_v48, %v8277_v24 }
 0x230   : > { %v1490_v33 = vsub.f32 1.5, %v1489_v11 }
 0x231   : > { %v6700_v0 = vpop.eup %6699  ;;  %v1373_v42 = vadd.f32 0.1, %v1341_v17  ;;  %v8292_v54 = vadd.f32 %v8166_v51, %v1563_v3 }
 0x232   : > { %v1497_v23 = vmul.f32 %v6700_v0, %v1372_v41  ;;  %v1212_v56 = vpop.xlane.xlu2 %1211  ;;  %v1491_v43 = vmul.f32 %v6698_v36, %v1490_v33  ;;  %vm1503_vm11 = vweird.f32 %v6700_v0 }
 0x233   : > { %v8289_v21 = vmul.f32 0.015625, %v1212_v56  ;;  %6701 = vrsqrt.f32 %v1373_v42  ;;  %6349 = vmatmul.msk.f32.gmra.mxu3 %vm1167_vm4, %v8292_v54  ;;  %vm1504_vm13 = vmor %vm1502_vm12, %vm1503_vm11  ;;  %vm1512_vm15 = vweird.f32 %v1373_v42 }
 0x234   : > { %v1498_v30 = vmul.f32 %v6700_v0, %v1497_v23  ;;  %v1276_v12 = vpop.xlane.xlu0 %1275  ;;  %v1495_v50 = vsel %vm1494_vm10, %v6698_v36, %v1491_v43 }
 0x235   : > { %v1326_v32 = vmul.f32 %v8289_v21, %v8289_v21  ;;  %v1310_v27 = vmul.f32 0.015625, %v1276_v12  ;;  %v1547_v20 = vmul.f32 %v1495_v50, %v1355_v15  ;;  %v1358_v48 = vsub.f32 %v8101_v46, %v8289_v21 }
 0x236   : > { %v1499_v14 = vmul.f32 0.5, %v1498_v30 }
 0x237   : > { %v1342_v9 = vsub.f32 %v1310_v27, %v1326_v32  ;;  %v1564_v8 = vmul.f32 %v8159_v25, %v1547_v20 }
 0x238   : > { %v1500_v38 = vsub.f32 1.5, %v1499_v14 }
 0x239   : > { %v1374_v62 = vadd.f32 0.1, %v1342_v9  ;;  %v6702_v39 = vpop.eup %6701  ;;  %v8302_v37 = vadd.f32 %v8166_v51, %v1564_v8 }
 0x23a   : > { %v1215_v7 = vpop.xlane.xlu1 %1214  ;;  %v1501_v16 = vmul.f32 %v6700_v0, %v1500_v38  ;;  %v1507_v26 = vmul.f32 %v6702_v39, %v1373_v42  ;;  %vm1513_vm14 = vweird.f32 %v6702_v39  ;;  %v8340_v38 = vld [vmem:[%s10670_s4 + $0x1] ss:$0 sm:$0xff] }
 0x23b   : > { %6703 = vrsqrt.f32 %v1374_v62  ;;  %v1295_v35 = vmul.f32 0.015625, %v1215_v7  ;;  %6350 = vmatmul.msk.f32.gmra.mxu3 %vm1167_vm4, %v8302_v37  ;;  %vm1514_vm0 = vmor %vm1512_vm15, %vm1513_vm14  ;;  %vm1522_vm2 = vweird.f32 %v1374_v62 }
 0x23c   : > { %v1279_v13 = vpop.xlane.xlu2 %1278  ;;  %v1505_v2 = vsel %vm1504_vm13, %v6700_v0, %v1501_v16  ;;  %v1508_v57 = vmul.f32 %v6702_v39, %v1507_v26 }
 0x23d   : > { %v1311_v58 = vmul.f32 0.015625, %v1279_v13  ;;  %v1548_v36 = vmul.f32 %v1505_v2, %v1356_v40  ;;  %v1327_v29 = vmul.f32 %v1295_v35, %v1295_v35  ;;  %v1359_v46 = vsub.f32 %v8114_v18, %v1295_v35 }
 0x23e   : > { %v1509_v41 = vmul.f32 0.5, %v1508_v57 }
 0x23f   : > { %v1565_v59 = vmul.f32 %v8159_v25, %v1548_v36  ;;  %v1343_v34 = vsub.f32 %v1311_v58, %v1327_v29 }
 0x240   : > { %v1510_v1 = vsub.f32 1.5, %v1509_v41 }
 0x241   : > { %v6704_v10 = vpop.eup %6703  ;;  %v1375_v44 = vadd.f32 0.1, %v1343_v34  ;;  %v8310_v47 = vadd.f32 %v8166_v51, %v1565_v59 }
 0x242   : > { %v1517_v61 = vmul.f32 %v6704_v10, %v1374_v62  ;;  %v1511_v31 = vmul.f32 %v6702_v39, %v1510_v1  ;;  %vm1523_vm1 = vweird.f32 %v6704_v10 }
 0x243   : > { %6705 = vrsqrt.f32 %v1375_v44  ;;  %6351 = vmatmul.msk.f32.gmra.mxu3 %vm1167_vm4, %v8310_v47  ;;  %vm1524_vm3 = vmor %vm1522_vm2, %vm1523_vm1  ;;  %vm1532_vm6 = vweird.f32 %v1375_v44 }
 0x244   : > { %v1518_v22 = vmul.f32 %v6704_v10, %v1517_v61  ;;  %v1515_v11 = vsel %vm1514_vm0, %v6702_v39, %v1511_v31 }
 0x245   : > { %v1549_v17 = vmul.f32 %v1515_v11, %v1357_v60 }
 0x246   : > { %v1519_v63 = vmul.f32 0.5, %v1518_v22 }
 0x247   : > { %v1566_v33 = vmul.f32 %v8159_v25, %v1549_v17 }
 0x248   : > { %v1520_v0 = vsub.f32 1.5, %v1519_v63 }
 0x249   : > { %v6706_v3 = vpop.eup %6705  ;;  %v8318_v23 = vadd.f32 %v8166_v51, %v1566_v33 }
 0x24a   : > { %v1521_v42 = vmul.f32 %v6704_v10, %v1520_v0  ;;  %v1527_v24 = vmul.f32 %v6706_v3, %v1375_v44  ;;  %vm1533_vm5 = vweird.f32 %v6706_v3 }
 0x24b   : > { %6352 = vmatmul.msk.f32.gmra.mxu3 %vm1167_vm4, %v8318_v23  ;;  %vm1534_vm7 = vmor %vm1532_vm6, %vm1533_vm5 }
 0x24c   : > { %v1525_v56 = vsel %vm1524_vm3, %v6704_v10, %v1521_v42  ;;  %v1528_v43 = vmul.f32 %v6706_v3, %v1527_v24 }
 0x24d   : > { %v1550_v15 = vmul.f32 %v1525_v56, %v1358_v48 }
 0x24e   : > { %v1529_v30 = vmul.f32 0.5, %v1528_v43 }
 0x24f   : > { %v1567_v12 = vmul.f32 %v8159_v25, %v1550_v15 }
 0x250   : > { %v1530_v32 = vsub.f32 1.5, %v1529_v30 }
 0x251   : > { %v8326_v27 = vadd.f32 %v8166_v51, %v1567_v12 }
 0x252   : > { %v1531_v50 = vmul.f32 %v6706_v3, %v1530_v32 }
 0x253   : > { %6353 = vmatmul.msk.f32.gmra.mxu3 %vm1167_vm4, %v8326_v27 }
 0x254   : > { %v1535_v21 = vsel %vm1534_vm7, %v6706_v3, %v1531_v50 }
 0x255   : > { %v1551_v14 = vmul.f32 %v1535_v21, %v1359_v46 }
 0x257   : > { %v1568_v20 = vmul.f32 %v8159_v25, %v1551_v14 }
 0x259   : > { %v8333_v9 = vadd.f32 %v8166_v51, %v1568_v20 }
 0x25b   : > { %6354 = vmatmul.msk.f32.gmra.mxu3 %vm1167_vm4, %v8333_v9 }
 0x260   : > { %v1661_v18 = vpop.f32.mrf.mxu1 }
 0x261   : > { %v1662_v8 = vadd.f32 %v8340_v38, %v1661_v18 }
 0x263   : > { %v1709_v62 = vadd.f32 %v1662_v8, %v8170_v6 }
 0x265   : > { %v6355_v39 = vmul.f32 -1.442695, %v1709_v62 }
 0x267   : > { %6707 = vpow2.f32 %v6355_v39 }
 0x268   : > { %v1664_v7 = vpop.f32.mrf.mxu1 }
 0x269   : > { %v1665_v25 = vadd.f32 %v8340_v38, %v1664_v7 }
 0x26b   : > { %v8346_v51 = vadd.f32 %v1665_v25, %v8182_v5 }
 0x26d   : > { %v6708_v16 = vpop.eup %6707  ;;  %v6356_v40 = vmul.f32 -1.442695, %v8346_v51 }
 0x26e   : > { %v1773_v26 = vadd.f32 1.0, %v6708_v16 }
 0x26f   : > { %6709 = vpow2.f32 %v6356_v40 }
 0x270   : > { %6711 = vrcp.f32 %v1773_v26  ;;  %v1667_v35 = vpop.f32.mrf.mxu1  ;;  %v1800_v44 = vand.u32 2147483648, %v1773_v26  ;;  %v1798_v31 = vand.u32 2147483647, %v1773_v26  ;;  %vm1794_vm9 = vweird.f32 %v1773_v26 }
 0x271   : > { %v1668_v13 = vadd.f32 %v8340_v38, %v1667_v35 }
 0x272   : > { %v1801_v3 = vor.u32 1.1754944e-38, %v1800_v44  ;;  %vm1799_vm11 = vcmp.eq.f32.partialorder %v1798_v31, 8.507059e+37 }
 0x273   : > { %v8351_v2 = vadd.f32 %v1668_v13, %v8194_v28 }
 0x275   : > { %v6710_v57 = vpop.eup %6709  ;;  %v6357_v58 = vmul.f32 -1.442695, %v8351_v2 }
 0x276   : > { %v6712_v36 = vpop.eup %6711  ;;  %v1774_v29 = vadd.f32 1.0, %v6710_v57 }
 0x277   : > { %6713 = vpow2.f32 %v6357_v58  ;;  %v1790_v41 = vmul.f32 %v6712_v36, %v1773_v26  ;;  %vm1795_vm8 = vweird.f32 %v6712_v36 }
 0x278   : > { %6715 = vrcp.f32 %v1774_v29  ;;  %v1670_v59 = vpop.f32.mrf.mxu1  ;;  %vm1796_vm10 = vmor %vm1794_vm9, %vm1795_vm8  ;;  %v1815_v43 = vand.u32 2147483648, %v1774_v29  ;;  %v1813_v12 = vand.u32 2147483647, %v1774_v29  ;;  %vm1809_vm13 = vweird.f32 %v1774_v29 }
 0x279   : > { %v1671_v34 = vadd.f32 %v8340_v38, %v1670_v59  ;;  %v1791_v10 = vsub.f32 1.0, %v1790_v41 }
 0x27a   : > { %v1816_v8 = vor.u32 1.1754944e-38, %v1815_v43  ;;  %vm1814_vm15 = vcmp.eq.f32.partialorder %v1813_v12, 8.507059e+37 }
 0x27b   : > { %v8356_v1 = vadd.f32 %v1671_v34, %v8206_v45  ;;  %v1792_v61 = vmul.f32 %v6712_v36, %v1791_v10 }
 0x27d   : > { %v6714_v60 = vpop.eup %6713  ;;  %v6358_v22 = vmul.f32 -1.442695, %v8356_v1  ;;  %v1793_v11 = vadd.f32 %v6712_v36, %v1792_v61 }
 0x27e   : > { %v6716_v63 = vpop.eup %6715  ;;  %v1775_v17 = vadd.f32 1.0, %v6714_v60 }
 0x27f   : > { %v1805_v0 = vmul.f32 %v6716_v63, %v1774_v29  ;;  %6717 = vpow2.f32 %v6358_v22  ;;  %v1797_v33 = vsel %vm1796_vm10, %v6712_v36, %v1793_v11  ;;  %vm1810_vm12 = vweird.f32 %v6716_v63 }
 0x280   : > { %6719 = vrcp.f32 %v1775_v17  ;;  %v1673_v42 = vpop.f32.mrf.mxu1  ;;  %v1802_v56 = vsel %vm1799_vm11, %v1801_v3, %v1797_v33  ;;  %vm1811_vm14 = vmor %vm1809_vm13, %vm1810_vm12  ;;  %v1828_v57 = vand.u32 2147483647, %v1775_v17  ;;  %v1830_v58 = vand.u32 2147483648, %v1775_v17 }
 0x281   : > { %v1806_v48 = vsub.f32 1.0, %v1805_v0  ;;  %v1674_v24 = vadd.f32 %v8340_v38, %v1673_v42  ;;  %v8360_v15 = vmul.f32 %v1802_v56, %v1709_v62  ;;  %vm1824_vm1 = vweird.f32 %v1775_v17 }
 0x282   : > { %v1831_v44 = vor.u32 1.1754944e-38, %v1830_v58  ;;  %vm1829_vm3 = vcmp.eq.f32.partialorder %v1828_v57, 8.507059e+37 }
 0x283   : > { %v1807_v30 = vmul.f32 %v6716_v63, %v1806_v48  ;;  %v8363_v32 = vadd.f32 %v1674_v24, %v8218_v19  ;;  %v2047_v50 = vsel %vm1167_vm4, %v8360_v15, 0.0  ;;  %v2095_v46 = vmul.f32 %v8360_v15, %v8360_v15 }
 0x284   : > { %2048 = vadd.xlane.f32.xlu0 %v2047_v50 }
 0x285   : > { %v6718_v21 = vpop.eup %6717  ;;  %v1808_v14 = vadd.f32 %v6716_v63, %v1807_v30  ;;  %v6359_v20 = vmul.f32 -1.442695, %v8363_v32  ;;  %v2111_v39 = vsel %vm1167_vm4, %v2095_v46, 0.0 }
 0x286   : > { %v6720_v18 = vpop.eup %6719  ;;  %v1776_v62 = vadd.f32 1.0, %v6718_v21  ;;  %2112 = vadd.xlane.f32.xlu1 %v2111_v39 }
 0x287   : > { %v1812_v7 = vsel %vm1811_vm14, %v6716_v63, %v1808_v14  ;;  %v1820_v25 = vmul.f32 %v6720_v18, %v1775_v17  ;;  %6721 = vpow2.f32 %v6359_v20  ;;  %vm1825_vm0 = vweird.f32 %v6720_v18 }
 0x288   : > { %v1817_v16 = vsel %vm1814_vm15, %v1816_v8, %v1812_v7  ;;  %6723 = vrcp.f32 %v1776_v62  ;;  %v1676_v40 = vpop.f32.mrf.mxu1  ;;  %vm1826_vm2 = vmor %vm1824_vm1, %vm1825_vm0  ;;  %v1843_v42 = vand.u32 2147483647, %v1776_v62  ;;  %v1845_v48 = vand.u32 2147483648, %v1776_v62 }
 0x289   : > { %v8372_v26 = vmul.f32 %v1817_v16, %v8346_v51  ;;  %v1821_v35 = vsub.f32 1.0, %v1820_v25  ;;  %v1677_v13 = vadd.f32 %v8340_v38, %v1676_v40  ;;  %vm1839_vm6 = vweird.f32 %v1776_v62 }
 0x28a   : > { %v1846_v21 = vor.u32 1.1754944e-38, %v1845_v48  ;;  %vm1844_vm8 = vcmp.eq.f32.partialorder %v1843_v42, 8.507059e+37 }
 0x28b   : > { %v1822_v36 = vmul.f32 %v6720_v18, %v1821_v35  ;;  %v8376_v29 = vadd.f32 %v1677_v13, %v8230_v55  ;;  %v2050_v41 = vsel %vm1167_vm4, %v8372_v26, 0.0  ;;  %v2096_v59 = vmul.f32 %v8372_v26, %v8372_v26 }
 0x28c   : > { %2051 = vadd.xlane.f32.xlu2 %v2050_v41 }
 0x28d   : > { %v6722_v34 = vpop.eup %6721  ;;  %v1823_v51 = vadd.f32 %v6720_v18, %v1822_v36  ;;  %v6360_v10 = vmul.f32 -1.442695, %v8376_v29  ;;  %v2114_v60 = vsel %vm1167_vm4, %v2096_v59, 0.0 }
 0x28e   : > { %v6724_v61 = vpop.eup %6723  ;;  %v1777_v31 = vadd.f32 1.0, %v6722_v34  ;;  %2115 = vadd.xlane.f32.xlu0 %v2114_v60 }
 0x28f   : > { %v1827_v22 = vsel %vm1826_vm2, %v6720_v18, %v1823_v51  ;;  %v1835_v11 = vmul.f32 %v6724_v61, %v1776_v62  ;;  %6725 = vpow2.f32 %v6360_v10  ;;  %vm1840_vm5 = vweird.f32 %v6724_v61 }
 0x290   : > { %v1832_v63 = vsel %vm1829_vm3, %v1831_v44, %v1827_v22  ;;  %6727 = vrcp.f32 %v1777_v31  ;;  %v1679_v0 = vpop.f32.mrf.mxu1  ;;  %vm1841_vm7 = vmor %vm1839_vm6, %vm1840_vm5  ;;  %v1858_v40 = vand.u32 2147483647, %v1777_v31  ;;  %v1860_v35 = vand.u32 2147483648, %v1777_v31 }
 0x291   : > { %v8385_v33 = vmul.f32 %v1832_v63, %v8351_v2  ;;  %v1836_v17 = vsub.f32 1.0, %v1835_v11  ;;  %v1680_v3 = vadd.f32 %v8340_v38, %v1679_v0  ;;  %vm1854_vm10 = vweird.f32 %v1777_v31 }
 0x292   : > { %v1861_v51 = vor.u32 1.1754944e-38, %v1860_v35  ;;  %vm1859_vm12 = vcmp.eq.f32.partialorder %v1858_v40, 8.507059e+37 }
 0x293   : > { %v1837_v24 = vmul.f32 %v6724_v61, %v1836_v17  ;;  %v8389_v56 = vadd.f32 %v1680_v3, %v8242_v49  ;;  %v2053_v43 = vsel %vm1167_vm4, %v8385_v33, 0.0  ;;  %v2097_v30 = vmul.f32 %v8385_v33, %v8385_v33  ;;  %v2488_v17 = vld [vmem:[%s10669_s3 + $0x78] sm:$0xff] }
 0x294   : > { %2054 = vadd.xlane.f32.xlu1 %v2053_v43  ;;  %2547 = vmatpush.msrb.mxu0 %v2488_v17 }
 0x295   : > { %v6726_v12 = vpop.eup %6725  ;;  %v1838_v2 = vadd.f32 %v6724_v61, %v1837_v24  ;;  %v6361_v50 = vmul.f32 -1.442695, %v8389_v56  ;;  %v2117_v20 = vsel %vm1167_vm4, %v2097_v30, 0.0  ;;  %6509 = vmatpush.msra.mxu2 %v2488_v17 }
 0x296   : > { %v6728_v46 = vpop.eup %6727  ;;  %v8396_v14 = vadd.f32 1.0, %v6726_v12  ;;  %2118 = vadd.xlane.f32.xlu2 %v2117_v20 }
 0x297   : > { %v1842_v18 = vsel %vm1841_vm7, %v6724_v61, %v1838_v2  ;;  %v1850_v8 = vmul.f32 %v6728_v46, %v1777_v31  ;;  %6729 = vpow2.f32 %v6361_v50  ;;  %vm1855_vm9 = vweird.f32 %v6728_v46 }
 0x298   : > { %v1847_v39 = vsel %vm1844_vm8, %v1846_v21, %v1842_v18  ;;  %6731 = vrcp.f32 %v8396_v14  ;;  %v1682_v7 = vpop.f32.mrf.mxu1  ;;  %vm1856_vm11 = vmor %vm1854_vm10, %vm1855_vm9  ;;  %v1873_v3 = vand.u32 2147483647, %v8396_v14  ;;  %v1875_v42 = vand.u32 2147483648, %v8396_v14 }
 0x299   : > { %v8401_v62 = vmul.f32 %v1847_v39, %v8356_v1  ;;  %v1851_v25 = vsub.f32 1.0, %v1850_v8  ;;  %v1683_v16 = vadd.f32 %v8340_v38, %v1682_v7  ;;  %vm1869_vm14 = vweird.f32 %v8396_v14 }
 0x29a   : > { %vm1874_vm0 = vcmp.eq.f32.partialorder %v1873_v3, 8.507059e+37 }
 0x29b   : > { %v1852_v13 = vmul.f32 %v6728_v46, %v1851_v25  ;;  %v8405_v57 = vadd.f32 %v1683_v16, %v8254_v4  ;;  %v2056_v58 = vsel %vm1167_vm4, %v8401_v62, 0.0  ;;  %v2098_v36 = vmul.f32 %v8401_v62, %v8401_v62 }
 0x29c   : > { %2057 = vadd.xlane.f32.xlu0 %v2056_v58 }
 0x29d   : > { %v6730_v41 = vpop.eup %6729  ;;  %v1853_v1 = vadd.f32 %v6728_v46, %v1852_v13  ;;  %v6362_v59 = vmul.f32 -1.442695, %v8405_v57  ;;  %v2120_v61 = vsel %vm1167_vm4, %v2098_v36, 0.0 }
 0x29e   : > { %v6732_v34 = vpop.eup %6731  ;;  %v1779_v10 = vadd.f32 1.0, %v6730_v41  ;;  %2121 = vadd.xlane.f32.xlu1 %v2120_v61 }
 0x29f   : > { %v1857_v44 = vsel %vm1856_vm11, %v6728_v46, %v1853_v1  ;;  %v1865_v60 = vmul.f32 %v6732_v34, %v8396_v14  ;;  %6733 = vpow2.f32 %v6362_v59  ;;  %vm1870_vm13 = vweird.f32 %v6732_v34 }
 0x2a0   : > { %v1862_v22 = vsel %vm1859_vm12, %v1861_v51, %v1857_v44  ;;  %6735 = vrcp.f32 %v1779_v10  ;;  %v1685_v11 = vpop.f32.mrf.mxu1  ;;  %vm1871_vm15 = vmor %vm1869_vm14, %vm1870_vm13  ;;  %v1876_v46 = vor.u32 1.1754944e-38, %v1875_v42  ;;  %v1888_v14 = vand.u32 2147483647, %v1779_v10 }
 0x2a1   : > { %v8415_v63 = vmul.f32 %v1862_v22, %v8363_v32  ;;  %v1866_v31 = vsub.f32 1.0, %v1865_v60  ;;  %v1686_v0 = vadd.f32 %v8340_v38, %v1685_v11  ;;  %v1890_v16 = vand.u32 2147483648, %v1779_v10 }
 0x2a2   : > { %vm1884_vm2 = vweird.f32 %v1779_v10  ;;  %vm1889_vm5 = vcmp.eq.f32.partialorder %v1888_v14, 8.507059e+37 }
 0x2a3   : > { %v1867_v48 = vmul.f32 %v6732_v34, %v1866_v31  ;;  %v8424_v24 = vadd.f32 %v1686_v0, %v8266_v53  ;;  %v2059_v32 = vsel %vm1167_vm4, %v8415_v63, 0.0  ;;  %v2099_v43 = vmul.f32 %v8415_v63, %v8415_v63 }
 0x2a4   : > { %2060 = vadd.xlane.f32.xlu2 %v2059_v32 }
 0x2a5   : > { %v6734_v30 = vpop.eup %6733  ;;  %v1868_v12 = vadd.f32 %v6732_v34, %v1867_v48  ;;  %v6363_v2 = vmul.f32 -1.442695, %v8424_v24  ;;  %v2123_v20 = vsel %vm1167_vm4, %v2099_v43, 0.0 }
 0x2a6   : > { %v6736_v50 = vpop.eup %6735  ;;  %v1780_v21 = vadd.f32 1.0, %v6734_v30  ;;  %2124 = vadd.xlane.f32.xlu0 %v2123_v20 }
 0x2a7   : > { %v1872_v18 = vsel %vm1871_vm15, %v6732_v34, %v1868_v12  ;;  %v1880_v8 = vmul.f32 %v6736_v50, %v1779_v10  ;;  %6737 = vpow2.f32 %v6363_v2  ;;  %vm1885_vm1 = vweird.f32 %v6736_v50  ;;  %v2487_v10 = vld [vmem:[%s10669_s3 + $0x70] sm:$0xff] }
 0x2a8   : > { %v1877_v39 = vsel %vm1874_vm0, %v1876_v46, %v1872_v18  ;;  %6739 = vrcp.f32 %v1780_v21  ;;  %vm1886_vm3 = vmor %vm1884_vm2, %vm1885_vm1  ;;  %v1903_v31 = vand.u32 2147483647, %v1780_v21  ;;  %v1905_v0 = vand.u32 2147483648, %v1780_v21  ;;  %2548 = vmatpush.msrb.mxu0 %v2487_v10  ;;  %6510 = vmatpush.msra.mxu2 %v2487_v10 }
 0x2a9   : > { %v8434_v7 = vmul.f32 %v1877_v39, %v8376_v29  ;;  %v1881_v25 = vsub.f32 1.0, %v1880_v8  ;;  %v1891_v29 = vor.u32 1.1754944e-38, %v1890_v16  ;;  %vm1899_vm7 = vweird.f32 %v1780_v21 }
 0x2aa   : > { %v1906_v30 = vor.u32 1.1754944e-38, %v1905_v0  ;;  %vm1904_vm9 = vcmp.eq.f32.partialorder %v1903_v31, 8.507059e+37 }
 0x2ab   : > { %v1882_v40 = vmul.f32 %v6736_v50, %v1881_v25  ;;  %v2062_v35 = vsel %vm1167_vm4, %v8434_v7, 0.0  ;;  %v2100_v13 = vmul.f32 %v8434_v7, %v8434_v7 }
 0x2ac   : > { %2063 = vadd.xlane.f32.xlu1 %v2062_v35 }
 0x2ad   : > { %v6738_v58 = vpop.eup %6737  ;;  %v1883_v36 = vadd.f32 %v6736_v50, %v1882_v40  ;;  %v2126_v41 = vsel %vm1167_vm4, %v2100_v13, 0.0 }
 0x2ae   : > { %v6740_v1 = vpop.eup %6739  ;;  %v1781_v59 = vadd.f32 1.0, %v6738_v58  ;;  %2127 = vadd.xlane.f32.xlu2 %v2126_v41  ;;  %v1688_v44 = vpop.f32.mrf.mxu3 }
 0x2af   : > { %v1887_v34 = vsel %vm1886_vm3, %v6736_v50, %v1883_v36  ;;  %v1895_v51 = vmul.f32 %v6740_v1, %v1780_v21  ;;  %v1689_v11 = vadd.f32 %v8340_v38, %v1688_v44  ;;  %vm1900_vm6 = vweird.f32 %v6740_v1 }
 0x2b0   : > { %v1892_v61 = vsel %vm1889_vm5, %v1891_v29, %v1887_v34  ;;  %6741 = vrcp.f32 %v1781_v59  ;;  %vm1901_vm8 = vmor %vm1899_vm7, %vm1900_vm6  ;;  %v1918_v39 = vand.u32 2147483647, %v1781_v59  ;;  %v1920_v25 = vand.u32 2147483648, %v1781_v59 }
 0x2b1   : > { %v8442_v60 = vmul.f32 %v1892_v61, %v8389_v56  ;;  %v1896_v22 = vsub.f32 1.0, %v1895_v51  ;;  %v8449_v3 = vadd.f32 %v1689_v11, %v8280_v52  ;;  %vm1914_vm11 = vweird.f32 %v1781_v59 }
 0x2b2   : > { %v1921_v41 = vor.u32 1.1754944e-38, %v1920_v25  ;;  %vm1919_vm13 = vcmp.eq.f32.partialorder %v1918_v39, 8.507059e+37 }
 0x2b3   : > { %v1897_v17 = vmul.f32 %v6740_v1, %v1896_v22  ;;  %v2065_v56 = vsel %vm1167_vm4, %v8442_v60, 0.0  ;;  %v2101_v42 = vmul.f32 %v8442_v60, %v8442_v60  ;;  %v6364_v32 = vmul.f32 -1.442695, %v8449_v3 }
 0x2b4   : > { %2066 = vadd.xlane.f32.xlu0 %v2065_v56 }
 0x2b5   : > { %v1898_v48 = vadd.f32 %v6740_v1, %v1897_v17  ;;  %v2129_v12 = vsel %vm1167_vm4, %v2101_v42, 0.0  ;;  %6743 = vpow2.f32 %v6364_v32 }
 0x2b6   : > { %v6742_v43 = vpop.eup %6741  ;;  %2130 = vadd.xlane.f32.xlu2 %v2129_v12  ;;  %v1691_v20 = vpop.f32.mrf.mxu3 }
 0x2b7   : > { %v1902_v2 = vsel %vm1901_vm8, %v6740_v1, %v1898_v48  ;;  %v1910_v50 = vmul.f32 %v6742_v43, %v1781_v59  ;;  %v1692_v21 = vadd.f32 %v8340_v38, %v1691_v20  ;;  %vm1915_vm10 = vweird.f32 %v6742_v43  ;;  %v2486_v59 = vld [vmem:[%s10669_s3 + $0x68] sm:$0xff] }
 0x2b8   : > { %v1907_v46 = vsel %vm1904_vm9, %v1906_v30, %v1902_v2  ;;  %vm1916_vm12 = vmor %vm1914_vm11, %vm1915_vm10  ;;  %2549 = vmatpush.msrb.mxu0 %v2486_v59  ;;  %6511 = vmatpush.msra.mxu2 %v2486_v59 }
 0x2b9   : > { %v8458_v18 = vmul.f32 %v1907_v46, %v8405_v57  ;;  %v1911_v8 = vsub.f32 1.0, %v1910_v50  ;;  %v8462_v16 = vadd.f32 %v1692_v21, %v8292_v54 }
 0x2bb   : > { %v1912_v14 = vmul.f32 %v6742_v43, %v1911_v8  ;;  %v2068_v40 = vsel %vm1167_vm4, %v8458_v18, 0.0  ;;  %v2102_v35 = vmul.f32 %v8458_v18, %v8458_v18  ;;  %v6744_v13 = vpop.eup %6743  ;;  %v6365_v58 = vmul.f32 -1.442695, %v8462_v16 }
 0x2bc   : > { %2069 = vadd.xlane.f32.xlu1 %v2068_v40  ;;  %v1782_v1 = vadd.f32 1.0, %v6744_v13 }
 0x2bd   : > { %v1913_v57 = vadd.f32 %v6742_v43, %v1912_v14  ;;  %v2132_v36 = vsel %vm1167_vm4, %v2102_v35, 0.0  ;;  %6745 = vpow2.f32 %v6365_v58 }
 0x2be   : > { %2133 = vadd.xlane.f32.xlu0 %v2132_v36  ;;  %6747 = vrcp.f32 %v1782_v1  ;;  %v1694_v51 = vpop.f32.mrf.mxu3  ;;  %v1935_v30 = vand.u32 2147483648, %v1782_v1  ;;  %v1933_v2 = vand.u32 2147483647, %v1782_v1  ;;  %vm1929_vm15 = vweird.f32 %v1782_v1 }
 0x2bf   : > { %v1917_v29 = vsel %vm1916_vm12, %v6742_v43, %v1913_v57  ;;  %v1695_v44 = vadd.f32 %v8340_v38, %v1694_v51 }
 0x2c0   : > { %v1922_v34 = vsel %vm1919_vm13, %v1921_v41, %v1917_v29  ;;  %v1936_v39 = vor.u32 1.1754944e-38, %v1935_v30  ;;  %vm1934_vm1 = vcmp.eq.f32.partialorder %v1933_v2, 8.507059e+37  ;;  %v2485_v41 = vld [vmem:[%s10669_s3 + $0x60] sm:$0xff] }
 0x2c1   : > { %v8471_v61 = vmul.f32 %v1922_v34, %v8424_v24  ;;  %v8478_v22 = vadd.f32 %v1695_v44, %v8302_v37  ;;  %2550 = vmatpush.msrb.mxu0 %v2485_v41  ;;  %6512 = vmatpush.msra.mxu2 %v2485_v41 }
 0x2c3   : > { %v2071_v11 = vsel %vm1167_vm4, %v8471_v61, 0.0  ;;  %v2103_v10 = vmul.f32 %v8471_v61, %v8471_v61  ;;  %v6746_v24 = vpop.eup %6745  ;;  %v6366_v31 = vmul.f32 -1.442695, %v8478_v22 }
 0x2c4   : > { %2072 = vadd.xlane.f32.xlu1 %v2071_v11  ;;  %v6748_v17 = vpop.eup %6747  ;;  %v1783_v56 = vadd.f32 1.0, %v6746_v24 }
 0x2c5   : > { %v2135_v0 = vsel %vm1167_vm4, %v2103_v10, 0.0  ;;  %v1925_v42 = vmul.f32 %v6748_v17, %v1782_v1  ;;  %6749 = vpow2.f32 %v6366_v31  ;;  %vm1930_vm14 = vweird.f32 %v6748_v17 }
 0x2c6   : > { %2136 = vadd.xlane.f32.xlu2 %v2135_v0  ;;  %6751 = vrcp.f32 %v1783_v56  ;;  %v1697_v48 = vpop.f32.mrf.mxu3  ;;  %vm1931_vm0 = vmor %vm1929_vm15, %vm1930_vm14  ;;  %v1948_v1 = vand.u32 2147483647, %v1783_v56  ;;  %v1950_v29 = vand.u32 2147483648, %v1783_v56  ;;  %vm1944_vm3 = vweird.f32 %v1783_v56 }
 0x2c7   : > { %v1926_v32 = vsub.f32 1.0, %v1925_v42  ;;  %v1698_v43 = vadd.f32 %v8340_v38, %v1697_v48 }
 0x2c8   : > { %v1951_v31 = vor.u32 1.1754944e-38, %v1950_v29  ;;  %vm1949_vm6 = vcmp.eq.f32.partialorder %v1948_v1, 8.507059e+37 }
 0x2c9   : > { %v1927_v12 = vmul.f32 %v6748_v17, %v1926_v32  ;;  %v8488_v50 = vadd.f32 %v1698_v43, %v8310_v47 }
 0x2cb   : > { %v6750_v46 = vpop.eup %6749  ;;  %v1928_v20 = vadd.f32 %v6748_v17, %v1927_v12  ;;  %v6367_v8 = vmul.f32 -1.442695, %v8488_v50 }
 0x2cc   : > { %v6752_v21 = vpop.eup %6751  ;;  %v1784_v25 = vadd.f32 1.0, %v6750_v46 }
 0x2cd   : > { %v1932_v14 = vsel %vm1931_vm0, %v6748_v17, %v1928_v20  ;;  %v1940_v40 = vmul.f32 %v6752_v21, %v1783_v56  ;;  %6753 = vpow2.f32 %v6367_v8  ;;  %vm1945_vm2 = vweird.f32 %v6752_v21 }
 0x2ce   : > { %v1937_v35 = vsel %vm1934_vm1, %v1936_v39, %v1932_v14  ;;  %6755 = vrcp.f32 %v1784_v25  ;;  %v1700_v13 = vpop.f32.mrf.mxu3  ;;  %vm1946_vm5 = vmor %vm1944_vm3, %vm1945_vm2  ;;  %v1963_v2 = vand.u32 2147483647, %v1784_v25  ;;  %v1965_v46 = vand.u32 2147483648, %v1784_v25 }
 0x2cf   : > { %v8492_v57 = vmul.f32 %v1937_v35, %v8449_v3  ;;  %v1941_v58 = vsub.f32 1.0, %v1940_v40  ;;  %v1701_v36 = vadd.f32 %v8340_v38, %v1700_v13  ;;  %vm1959_vm8 = vweird.f32 %v1784_v25 }
 0x2d0   : > { %v1966_v13 = vor.u32 1.1754944e-38, %v1965_v46  ;;  %vm1964_vm10 = vcmp.eq.f32.partialorder %v1963_v2, 8.507059e+37 }
 0x2d1   : > { %v1942_v34 = vmul.f32 %v6752_v21, %v1941_v58  ;;  %v8499_v51 = vadd.f32 %v1701_v36, %v8318_v23  ;;  %v2074_v3 = vsel %vm1167_vm4, %v8492_v57, 0.0  ;;  %v2104_v44 = vmul.f32 %v8492_v57, %v8492_v57 }
 0x2d2   : > { %2075 = vadd.xlane.f32.xlu0 %v2074_v3 }
 0x2d3   : > { %v6754_v59 = vpop.eup %6753  ;;  %v1943_v11 = vadd.f32 %v6752_v21, %v1942_v34  ;;  %v6368_v10 = vmul.f32 -1.442695, %v8499_v51  ;;  %v2138_v17 = vsel %vm1167_vm4, %v2104_v44, 0.0 }
 0x2d4   : > { %v6756_v24 = vpop.eup %6755  ;;  %v8506_v0 = vadd.f32 1.0, %v6754_v59  ;;  %2139 = vadd.xlane.f32.xlu1 %v2138_v17  ;;  %v2484_v59 = vld [vmem:[%s10669_s3 + $0x58] sm:$0xff] }
 0x2d5   : > { %v1947_v42 = vsel %vm1946_vm5, %v6752_v21, %v1943_v11  ;;  %v1955_v48 = vmul.f32 %v6756_v24, %v1784_v25  ;;  %6757 = vpow2.f32 %v6368_v10  ;;  %vm1960_vm7 = vweird.f32 %v6756_v24  ;;  %v2483_v11 = vld [vmem:[%s10669_s3 + $0x50] sm:$0xff]  ;;  %2551 = vmatpush.msrb.mxu0 %v2484_v59  ;;  %6513 = vmatpush.msra.mxu2 %v2484_v59 }
 0x2d6   : > { %v1952_v32 = vsel %vm1949_vm6, %v1951_v31, %v1947_v42  ;;  %6759 = vrcp.f32 %v8506_v0  ;;  %v1703_v43 = vpop.f32.mrf.mxu3  ;;  %vm1961_vm9 = vmor %vm1959_vm8, %vm1960_vm7  ;;  %v1978_v10 = vand.u32 2147483647, %v8506_v0  ;;  %vm1974_vm12 = vweird.f32 %v8506_v0 }
 0x2d7   : > { %v8511_v56 = vmul.f32 %v1952_v32, %v8462_v16  ;;  %v1956_v30 = vsub.f32 1.0, %v1955_v48  ;;  %v1704_v12 = vadd.f32 %v8340_v38, %v1703_v43  ;;  %2552 = vmatpush.msrb.mxu0 %v2483_v11  ;;  %6514 = vmatpush.msra.mxu2 %v2483_v11 }
 0x2d8   : > { %vm1979_vm14 = vcmp.eq.f32.partialorder %v1978_v10, 8.507059e+37 }
 0x2d9   : > { %v1957_v20 = vmul.f32 %v6756_v24, %v1956_v30  ;;  %v8515_v8 = vadd.f32 %v1704_v12, %v8326_v27  ;;  %v2077_v21 = vsel %vm1167_vm4, %v8511_v56, 0.0  ;;  %v2105_v39 = vmul.f32 %v8511_v56, %v8511_v56 }
 0x2da   : > { %2078 = vadd.xlane.f32.xlu2 %v2077_v21 }
 0x2db   : > { %v6758_v14 = vpop.eup %6757  ;;  %v1958_v16 = vadd.f32 %v6756_v24, %v1957_v20  ;;  %v6369_v40 = vmul.f32 -1.442695, %v8515_v8  ;;  %v2141_v36 = vsel %vm1167_vm4, %v2105_v39, 0.0 }
 0x2dc   : > { %v6760_v35 = vpop.eup %6759  ;;  %v8522_v58 = vadd.f32 1.0, %v6758_v14  ;;  %2142 = vadd.xlane.f32.xlu0 %v2141_v36 }
 0x2dd   : > { %v1962_v41 = vsel %vm1961_vm9, %v6756_v24, %v1958_v16  ;;  %v1970_v1 = vmul.f32 %v6760_v35, %v8506_v0  ;;  %6761 = vpow2.f32 %v6369_v40  ;;  %v1980_v24 = vand.u32 2147483648, %v8506_v0 }
 0x2de   : > { %v1967_v29 = vsel %vm1964_vm10, %v1966_v13, %v1962_v41  ;;  %6763 = vrcp.f32 %v8522_v58  ;;  %v1706_v34 = vpop.f32.mrf.mxu3  ;;  %vm1975_vm11 = vweird.f32 %v6760_v35  ;;  %v1993_v14 = vand.u32 2147483647, %v8522_v58 }
 0x2df   : > { %v8528_v25 = vmul.f32 %v1967_v29, %v8478_v22  ;;  %v1971_v3 = vsub.f32 1.0, %v1970_v1  ;;  %v1707_v44 = vadd.f32 %v8340_v38, %v1706_v34  ;;  %vm1976_vm13 = vmor %vm1974_vm12, %vm1975_vm11  ;;  %v1981_v30 = vor.u32 1.1754944e-38, %v1980_v24 }
 0x2e0   : > { %v1995_v16 = vand.u32 2147483648, %v8522_v58  ;;  %vm1989_vm0 = vweird.f32 %v8522_v58  ;;  %vm1994_vm2 = vcmp.eq.f32.partialorder %v1993_v14, 8.507059e+37 }
 0x2e1   : > { %v1972_v31 = vmul.f32 %v6760_v35, %v1971_v3  ;;  %v8540_v22 = vadd.f32 %v1707_v44, %v8333_v9  ;;  %v2080_v38 = vsel %vm1167_vm4, %v8528_v25, 0.0  ;;  %v2106_v17 = vmul.f32 %v8528_v25, %v8528_v25 }
 0x2e2   : > { %2081 = vadd.xlane.f32.xlu1 %v2080_v38  ;;  %v1996_v29 = vor.u32 1.1754944e-38, %v1995_v16 }
 0x2e3   : > { %v6762_v42 = vpop.eup %6761  ;;  %v1973_v48 = vadd.f32 %v6760_v35, %v1972_v31  ;;  %v6370_v32 = vmul.f32 -1.442695, %v8540_v22  ;;  %v2144_v2 = vsel %vm1167_vm4, %v2106_v17, 0.0 }
 0x2e4   : > { %v6764_v43 = vpop.eup %6763  ;;  %v1787_v12 = vadd.f32 1.0, %v6762_v42  ;;  %2145 = vadd.xlane.f32.xlu2 %v2144_v2 }
 0x2e5   : > { %v1977_v46 = vsel %vm1976_vm13, %v6760_v35, %v1973_v48  ;;  %v1985_v20 = vmul.f32 %v6764_v43, %v8522_v58  ;;  %6765 = vpow2.f32 %v6370_v32  ;;  %vm1990_vm15 = vweird.f32 %v6764_v43 }
 0x2e6   : > { %v1982_v21 = vsel %vm1979_vm14, %v1981_v30, %v1977_v46  ;;  %6767 = vrcp.f32 %v1787_v12  ;;  %vm1991_vm1 = vmor %vm1989_vm0, %vm1990_vm15  ;;  %v2008_v24 = vand.u32 2147483647, %v1787_v12  ;;  %v2010_v31 = vand.u32 2147483648, %v1787_v12 }
 0x2e7   : > { %v8551_v39 = vmul.f32 %v1982_v21, %v8488_v50  ;;  %v1986_v0 = vsub.f32 1.0, %v1985_v20  ;;  %vm2004_vm5 = vweird.f32 %v1787_v12 }
 0x2e8   : > { %vm2009_vm7 = vcmp.eq.f32.partialorder %v2008_v24, 8.507059e+37 }
 0x2e9   : > { %v1987_v40 = vmul.f32 %v6764_v43, %v1986_v0  ;;  %v2083_v35 = vsel %vm1167_vm4, %v8551_v39, 0.0  ;;  %v2107_v13 = vmul.f32 %v8551_v39, %v8551_v39 }
 0x2ea   : > { %2084 = vadd.xlane.f32.xlu0 %v2083_v35 }
 0x2eb   : > { %v6766_v36 = vpop.eup %6765  ;;  %v1988_v41 = vadd.f32 %v6764_v43, %v1987_v40  ;;  %v2147_v50 = vsel %vm1167_vm4, %v2107_v13, 0.0 }
 0x2ec   : > { %v6768_v1 = vpop.eup %6767  ;;  %v1788_v34 = vadd.f32 1.0, %v6766_v36  ;;  %2148 = vadd.xlane.f32.xlu1 %v2147_v50 }
 0x2ed   : > { %v1992_v3 = vsel %vm1991_vm1, %v6764_v43, %v1988_v41  ;;  %v2000_v44 = vmul.f32 %v6768_v1, %v1787_v12  ;;  %vm2005_vm3 = vweird.f32 %v6768_v1  ;;  %v2482_v43 = vld [vmem:[%s10669_s3 + $0x48] sm:$0xff] }
 0x2ee   : > { %v1997_v59 = vsel %vm1994_vm2, %v1996_v29, %v1992_v3  ;;  %6769 = vrcp.f32 %v1788_v34  ;;  %vm2006_vm6 = vmor %vm2004_vm5, %vm2005_vm3  ;;  %2553 = vmatpush.msrb.mxu0 %v2482_v43  ;;  %6515 = vmatpush.msra.mxu2 %v2482_v43  ;;  %v2023_v14 = vand.u32 2147483647, %v1788_v34  ;;  %v2025_v16 = vand.u32 2147483648, %v1788_v34 }
 0x2ef   : > { %v8562_v11 = vmul.f32 %v1997_v59, %v8499_v51  ;;  %v2001_v10 = vsub.f32 1.0, %v2000_v44  ;;  %v2011_v51 = vor.u32 1.1754944e-38, %v2010_v31  ;;  %vm2019_vm9 = vweird.f32 %v1788_v34 }
 0x2f0   : > { %v2026_v29 = vor.u32 1.1754944e-38, %v2025_v16  ;;  %vm2024_vm11 = vcmp.eq.f32.partialorder %v2023_v14, 8.507059e+37 }
 0x2f1   : > { %v2002_v38 = vmul.f32 %v6768_v1, %v2001_v10  ;;  %v2086_v58 = vsel %vm1167_vm4, %v8562_v11, 0.0  ;;  %v2108_v17 = vmul.f32 %v8562_v11, %v8562_v11 }
 0x2f2   : > { %2087 = vadd.xlane.f32.xlu2 %v2086_v58 }
 0x2f3   : > { %v2003_v42 = vadd.f32 %v6768_v1, %v2002_v38  ;;  %v2150_v48 = vsel %vm1167_vm4, %v2108_v17, 0.0 }
 0x2f4   : > { %v6770_v32 = vpop.eup %6769  ;;  %2151 = vadd.xlane.f32.xlu0 %v2150_v48 }
 0x2f5   : > { %v2007_v30 = vsel %vm2006_vm6, %v6768_v1, %v2003_v42  ;;  %v2015_v2 = vmul.f32 %v6770_v32, %v1788_v34  ;;  %vm2020_vm8 = vweird.f32 %v6770_v32 }
 0x2f6   : > { %v2012_v46 = vsel %vm2009_vm7, %v2011_v51, %v2007_v30  ;;  %vm2021_vm10 = vmor %vm2019_vm9, %vm2020_vm8 }
 0x2f7   : > { %v2049_v20 = vpop.xlane.xlu0 %2048  ;;  %v8573_v21 = vmul.f32 %v2012_v46, %v8515_v8  ;;  %v2016_v12 = vsub.f32 1.0, %v2015_v2 }
 0x2f8   : > { %v8575_v0 = vmul.f32 0.015625, %v2049_v20 }
 0x2f9   : > { %v2113_v40 = vpop.xlane.xlu1 %2112  ;;  %v2017_v35 = vmul.f32 %v6770_v32, %v2016_v12  ;;  %v2089_v41 = vsel %vm1167_vm4, %v8573_v21, 0.0  ;;  %v2109_v50 = vmul.f32 %v8573_v21, %v8573_v21 }
 0x2fa   : > { %v2191_v13 = vmul.f32 %v8575_v0, %v8575_v0  ;;  %v2175_v36 = vmul.f32 0.015625, %v2113_v40  ;;  %2090 = vadd.xlane.f32.xlu1 %v2089_v41 }
 0x2fb   : > { %v2018_v8 = vadd.f32 %v6770_v32, %v2017_v35  ;;  %v2153_v3 = vsel %vm1167_vm4, %v2109_v50, 0.0 }
 0x2fc   : > { %v2207_v1 = vsub.f32 %v2175_v36, %v2191_v13  ;;  %2154 = vadd.xlane.f32.xlu2 %v2153_v3 }
 0x2fd   : > { %v2022_v44 = vsel %vm2021_vm10, %v6770_v32, %v2018_v8 }
 0x2fe   : > { %v2239_v59 = vadd.f32 0.1, %v2207_v1  ;;  %v2027_v24 = vsel %vm2024_vm11, %v2026_v29, %v2022_v44  ;;  %v2223_v44 = vsub.f32 %v8360_v15, %v8575_v0 }
 0x2ff   : > { %v2052_v10 = vpop.xlane.xlu2 %2051  ;;  %v8587_v38 = vmul.f32 %v2027_v24, %v8540_v22  ;;  %v2481_v22 = vld [vmem:[%s10669_s3 + $0x40] sm:$0xff] }
 0x300   : > { %v8584_v31 = vmul.f32 0.015625, %v2052_v10  ;;  %6771 = vrsqrt.f32 %v2239_v59  ;;  %2554 = vmatpush.msrb.mxu0 %v2481_v22  ;;  %6516 = vmatpush.msra.mxu2 %v2481_v22  ;;  %vm2261_vm13 = vweird.f32 %v2239_v59  ;;  %v8610_v10 = vld [vmem:[%s10670_s4 + $0x6] ss:$0 sm:$0xff] }
 0x301   : > { %v2116_v58 = vpop.xlane.xlu0 %2115  ;;  %v2092_v42 = vsel %vm1167_vm4, %v8587_v38, 0.0  ;;  %v2110_v48 = vmul.f32 %v8587_v38, %v8587_v38 }
 0x302   : > { %v2192_v34 = vmul.f32 %v8584_v31, %v8584_v31  ;;  %v2176_v17 = vmul.f32 0.015625, %v2116_v58  ;;  %2093 = vadd.xlane.f32.xlu0 %v2092_v42 }
 0x303   : > { %v2156_v51 = vsel %vm1167_vm4, %v2110_v48, 0.0  ;;  %v8617_v48 = vld [vmem:[%s10670_s4 + $0xb] ss:$0 sm:$0xff] }
 0x304   : > { %v2208_v32 = vsub.f32 %v2176_v17, %v2192_v34  ;;  %2157 = vadd.xlane.f32.xlu1 %v2156_v51 }
 0x306   : > { %v6772_v43 = vpop.eup %6771  ;;  %v2240_v30 = vadd.f32 0.1, %v2208_v32 }
 0x307   : > { %v2055_v2 = vpop.xlane.xlu1 %2054  ;;  %v2256_v46 = vmul.f32 %v6772_v43, %v2239_v59  ;;  %vm2262_vm12 = vweird.f32 %v6772_v43 }
 0x308   : > { %v8599_v20 = vmul.f32 0.015625, %v2055_v2  ;;  %6773 = vrsqrt.f32 %v2240_v30  ;;  %vm2263_vm14 = vmor %vm2261_vm13, %vm2262_vm12  ;;  %vm2271_vm0 = vweird.f32 %v2240_v30 }
 0x309   : > { %v2257_v12 = vmul.f32 %v6772_v43, %v2256_v46  ;;  %v2119_v16 = vpop.xlane.xlu2 %2118 }
 0x30a   : > { %v2193_v14 = vmul.f32 %v8599_v20, %v8599_v20  ;;  %v2177_v40 = vmul.f32 0.015625, %v2119_v16 }
 0x30b   : > { %v2258_v35 = vmul.f32 0.5, %v2257_v12 }
 0x30c   : > { %v2209_v13 = vsub.f32 %v2177_v40, %v2193_v14  ;;  %v2224_v40 = vsub.f32 %v8372_v26, %v8584_v31 }
 0x30d   : > { %v2259_v36 = vsub.f32 1.5, %v2258_v35 }
 0x30e   : > { %v6774_v41 = vpop.eup %6773  ;;  %v2241_v50 = vadd.f32 0.1, %v2209_v13 }
 0x30f   : > { %v2058_v8 = vpop.xlane.xlu0 %2057  ;;  %v2260_v1 = vmul.f32 %v6772_v43, %v2259_v36  ;;  %v2266_v29 = vmul.f32 %v6774_v41, %v2240_v30  ;;  %vm2272_vm15 = vweird.f32 %v6774_v41 }
 0x310   : > { %v8603_v3 = vmul.f32 0.015625, %v2058_v8  ;;  %6775 = vrsqrt.f32 %v2241_v50  ;;  %vm2273_vm1 = vmor %vm2271_vm0, %vm2272_vm15  ;;  %vm2281_vm3 = vweird.f32 %v2241_v50 }
 0x311   : > { %v2264_v24 = vsel %vm2263_vm14, %v6772_v43, %v2260_v1  ;;  %v2267_v34 = vmul.f32 %v6774_v41, %v2266_v29  ;;  %v2122_v17 = vpop.xlane.xlu1 %2121 }
 0x312   : > { %v2194_v58 = vmul.f32 %v8603_v3, %v8603_v3  ;;  %v2178_v59 = vmul.f32 0.015625, %v2122_v17  ;;  %v2415_v42 = vmul.f32 %v2264_v24, %v2223_v44 }
 0x313   : > { %v2268_v15 = vmul.f32 0.5, %v2267_v34 }
 0x314   : > { %v2210_v0 = vsub.f32 %v2178_v59, %v2194_v58  ;;  %v2432_v32 = vmul.f32 %v8610_v10, %v2415_v42 }
 0x315   : > { %v2269_v51 = vsub.f32 1.5, %v2268_v15 }
 0x316   : > { %v6776_v22 = vpop.eup %6775  ;;  %v2242_v43 = vadd.f32 0.1, %v2210_v0  ;;  %v8621_v46 = vadd.f32 %v8617_v48, %v2432_v32  ;;  %v2225_v0 = vsub.f32 %v8385_v33, %v8599_v20 }
 0x317   : > { %v2061_v2 = vpop.xlane.xlu2 %2060  ;;  %v2276_v12 = vmul.f32 %v6776_v22, %v2241_v50  ;;  %v2270_v16 = vmul.f32 %v6774_v41, %v2269_v51  ;;  %vm2282_vm2 = vweird.f32 %v6776_v22 }
 0x318   : > { %v8623_v14 = vmul.f32 0.015625, %v2061_v2  ;;  %6777 = vrsqrt.f32 %v2242_v43  ;;  %6371 = vmatmul.msk.f32.vlgmr.msrb.gmra.mxu0 %vm1167_vm4, %v8621_v46  ;;  %vm2283_vm5 = vmor %vm2281_vm3, %vm2282_vm2  ;;  %vm2291_vm7 = vweird.f32 %v2242_v43 }
 0x319   : > { %v2277_v35 = vmul.f32 %v6776_v22, %v2276_v12  ;;  %v2125_v36 = vpop.xlane.xlu0 %2124  ;;  %v2274_v8 = vsel %vm2273_vm1, %v6774_v41, %v2270_v16 }
 0x31a   : > { %v2195_v13 = vmul.f32 %v8623_v14, %v8623_v14  ;;  %v2179_v1 = vmul.f32 0.015625, %v2125_v36  ;;  %v2416_v30 = vmul.f32 %v2274_v8, %v2224_v40 }
 0x31b   : > { %v2278_v29 = vmul.f32 0.5, %v2277_v35 }
 0x31c   : > { %v2211_v44 = vsub.f32 %v2179_v1, %v2195_v13  ;;  %v2433_v24 = vmul.f32 %v8610_v10, %v2416_v30 }
 0x31d   : > { %v2279_v34 = vsub.f32 1.5, %v2278_v29 }
 0x31e   : > { %v6778_v58 = vpop.eup %6777  ;;  %v2243_v26 = vadd.f32 0.1, %v2211_v44  ;;  %v8633_v17 = vadd.f32 %v8617_v48, %v2433_v24 }
 0x31f   : > { %v2064_v31 = vpop.xlane.xlu1 %2063  ;;  %v2286_v59 = vmul.f32 %v6778_v58, %v2242_v43  ;;  %v2280_v15 = vmul.f32 %v6776_v22, %v2279_v34  ;;  %vm2292_vm6 = vweird.f32 %v6778_v58 }
 0x320   : > { %v8635_v42 = vmul.f32 0.015625, %v2064_v31  ;;  %6779 = vrsqrt.f32 %v2243_v26  ;;  %6372 = vmatmul.msk.f32.gmra.mxu0 %vm1167_vm4, %v8633_v17  ;;  %vm2293_vm8 = vmor %vm2291_vm7, %vm2292_vm6  ;;  %vm2301_vm10 = vweird.f32 %v2243_v26 }
 0x321   : > { %v2128_v41 = vpop.xlane.xlu2 %2127  ;;  %v2287_v32 = vmul.f32 %v6778_v58, %v2286_v59  ;;  %v2284_v12 = vsel %vm2283_vm5, %v6776_v22, %v2280_v15  ;;  %v2226_v22 = vsub.f32 %v8401_v62, %v8603_v3 }
 0x322   : > { %v2196_v51 = vmul.f32 %v8635_v42, %v8635_v42  ;;  %v2180_v2 = vmul.f32 0.015625, %v2128_v41  ;;  %v2417_v35 = vmul.f32 %v2284_v12, %v2225_v0 }
 0x323   : > { %v2288_v16 = vmul.f32 0.5, %v2287_v32 }
 0x324   : > { %v2212_v40 = vsub.f32 %v2180_v2, %v2196_v51  ;;  %v2434_v36 = vmul.f32 %v8610_v10, %v2417_v35 }
 0x325   : > { %v2289_v13 = vsub.f32 1.5, %v2288_v16 }
 0x326   : > { %v2244_v50 = vadd.f32 0.1, %v2212_v40  ;;  %v6780_v8 = vpop.eup %6779  ;;  %v8647_v20 = vadd.f32 %v8617_v48, %v2434_v36 }
 0x327   : > { %v2067_v1 = vpop.xlane.xlu0 %2066  ;;  %v2296_v30 = vmul.f32 %v6780_v8, %v2243_v26  ;;  %v2290_v29 = vmul.f32 %v6778_v58, %v2289_v13  ;;  %vm2302_vm9 = vweird.f32 %v6780_v8 }
 0x328   : > { %6781 = vrsqrt.f32 %v2244_v50  ;;  %v8644_v33 = vmul.f32 0.015625, %v2067_v1  ;;  %6373 = vmatmul.msk.f32.gmra.mxu0 %vm1167_vm4, %v8647_v20  ;;  %vm2303_vm11 = vmor %vm2301_vm10, %vm2302_vm9  ;;  %vm2311_vm13 = vweird.f32 %v2244_v50 }
 0x329   : > { %v2297_v44 = vmul.f32 %v6780_v8, %v2296_v30  ;;  %v2131_v24 = vpop.xlane.xlu2 %2130  ;;  %v2294_v43 = vsel %vm2293_vm8, %v6778_v58, %v2290_v29  ;;  %v2227_v58 = vsub.f32 %v8415_v63, %v8623_v14 }
 0x32a   : > { %v2197_v34 = vmul.f32 %v8644_v33, %v8644_v33  ;;  %v2181_v31 = vmul.f32 0.015625, %v2131_v24  ;;  %v2418_v15 = vmul.f32 %v2294_v43, %v2226_v22 }
 0x32b   : > { %v2298_v59 = vmul.f32 0.5, %v2297_v44 }
 0x32c   : > { %v2213_v41 = vsub.f32 %v2181_v31, %v2197_v34  ;;  %v2435_v51 = vmul.f32 %v8610_v10, %v2418_v15 }
 0x32d   : > { %v2299_v32 = vsub.f32 1.5, %v2298_v59 }
 0x32e   : > { %v6782_v0 = vpop.eup %6781  ;;  %v2245_v3 = vadd.f32 0.1, %v2213_v41  ;;  %v8659_v16 = vadd.f32 %v8617_v48, %v2435_v51 }
 0x32f   : > { %v2306_v62 = vmul.f32 %v6782_v0, %v2244_v50  ;;  %v2070_v2 = vpop.xlane.xlu1 %2069  ;;  %v2300_v40 = vmul.f32 %v6780_v8, %v2299_v32  ;;  %vm2312_vm12 = vweird.f32 %v6782_v0 }
 0x330   : > { %v8656_v12 = vmul.f32 0.015625, %v2070_v2  ;;  %6783 = vrsqrt.f32 %v2245_v3  ;;  %6374 = vmatmul.msk.f32.gmra.mxu0 %vm1167_vm4, %v8659_v16  ;;  %vm2313_vm14 = vmor %vm2311_vm13, %vm2312_vm12  ;;  %vm2321_vm0 = vweird.f32 %v2245_v3 }
 0x331   : > { %v2307_v35 = vmul.f32 %v6782_v0, %v2306_v62  ;;  %v2134_v13 = vpop.xlane.xlu0 %2133  ;;  %v2304_v30 = vsel %vm2303_vm11, %v6780_v8, %v2300_v40  ;;  %v2228_v8 = vsub.f32 %v8434_v7, %v8635_v42 }
 0x332   : > { %v2198_v36 = vmul.f32 %v8656_v12, %v8656_v12  ;;  %v2182_v1 = vmul.f32 0.015625, %v2134_v13  ;;  %v2419_v26 = vmul.f32 %v2304_v30, %v2227_v58  ;;  %v2229_v30 = vsub.f32 %v8442_v60, %v8644_v33 }
 0x333   : > { %v2308_v29 = vmul.f32 0.5, %v2307_v35  ;;  %v2230_v60 = vsub.f32 %v8458_v18, %v8656_v12 }
 0x334   : > { %v2214_v22 = vsub.f32 %v2182_v1, %v2198_v36  ;;  %v2436_v24 = vmul.f32 %v8610_v10, %v2419_v26 }
 0x335   : > { %v2309_v44 = vsub.f32 1.5, %v2308_v29 }
 0x336   : > { %v2246_v63 = vadd.f32 0.1, %v2214_v22  ;;  %v6784_v14 = vpop.eup %6783  ;;  %v8669_v31 = vadd.f32 %v8617_v48, %v2436_v24 }
 0x337   : > { %v2073_v34 = vpop.xlane.xlu1 %2072  ;;  %v2310_v43 = vmul.f32 %v6782_v0, %v2309_v44  ;;  %v2316_v59 = vmul.f32 %v6784_v14, %v2245_v3  ;;  %vm2322_vm15 = vweird.f32 %v6784_v14 }
 0x338   : > { %6785 = vrsqrt.f32 %v2246_v63  ;;  %v8673_v15 = vmul.f32 0.015625, %v2073_v34  ;;  %6375 = vmatmul.msk.f32.gmra.mxu0 %vm1167_vm4, %v8669_v31  ;;  %vm2323_vm1 = vmor %vm2321_vm0, %vm2322_vm15  ;;  %vm2331_vm3 = vweird.f32 %v2246_v63 }
 0x339   : > { %v2137_v41 = vpop.xlane.xlu2 %2136  ;;  %v2314_v32 = vsel %vm2313_vm14, %v6782_v0, %v2310_v43  ;;  %v2317_v51 = vmul.f32 %v6784_v14, %v2316_v59 }
 0x33a   : > { %v2183_v62 = vmul.f32 0.015625, %v2137_v41  ;;  %v2420_v2 = vmul.f32 %v2314_v32, %v2228_v8  ;;  %v2199_v50 = vmul.f32 %v8673_v15, %v8673_v15 }
 0x33b   : > { %v2318_v40 = vmul.f32 0.5, %v2317_v51 }
 0x33c   : > { %v2437_v58 = vmul.f32 %v8610_v10, %v2420_v2  ;;  %v2215_v7 = vsub.f32 %v2183_v62, %v2199_v50 }
 0x33d   : > { %v2319_v35 = vsub.f32 1.5, %v2318_v40 }
 0x33e   : > { %v6786_v42 = vpop.eup %6785  ;;  %v2247_v36 = vadd.f32 0.1, %v2215_v7  ;;  %v8681_v0 = vadd.f32 %v8617_v48, %v2437_v58 }
 0x33f   : > { %v2326_v13 = vmul.f32 %v6786_v42, %v2246_v63  ;;  %v2320_v1 = vmul.f32 %v6784_v14, %v2319_v35  ;;  %vm2332_vm2 = vweird.f32 %v6786_v42 }
 0x340   : > { %6787 = vrsqrt.f32 %v2247_v36  ;;  %6376 = vmatmul.msk.f32.gmra.mxu0 %vm1167_vm4, %v8681_v0  ;;  %vm2333_vm5 = vmor %vm2331_vm3, %vm2332_vm2  ;;  %vm2341_vm7 = vweird.f32 %v2247_v36 }
 0x341   : > { %v2327_v29 = vmul.f32 %v6786_v42, %v2326_v13  ;;  %v2324_v26 = vsel %vm2323_vm1, %v6784_v14, %v2320_v1  ;;  %v2231_v1 = vsub.f32 %v8471_v61, %v8673_v15 }
 0x342   : > { %v2421_v44 = vmul.f32 %v2324_v26, %v2229_v30 }
 0x343   : > { %v2328_v22 = vmul.f32 0.5, %v2327_v29 }
 0x344   : > { %v2438_v34 = vmul.f32 %v8610_v10, %v2421_v44 }
 0x345   : > { %v2329_v24 = vsub.f32 1.5, %v2328_v22  ;;  %v2076_v3 = vpop.xlane.xlu0 %2075 }
 0x346   : > { %v6788_v43 = vpop.eup %6787  ;;  %v8689_v59 = vadd.f32 %v8617_v48, %v2438_v34  ;;  %v8693_v14 = vmul.f32 0.015625, %v2076_v3 }
 0x347   : > { %v2330_v8 = vmul.f32 %v6786_v42, %v2329_v24  ;;  %v2336_v33 = vmul.f32 %v6788_v43, %v2247_v36  ;;  %v2140_v62 = vpop.xlane.xlu1 %2139  ;;  %vm2342_vm6 = vweird.f32 %v6788_v43 }
 0x348   : > { %v2200_v51 = vmul.f32 %v8693_v14, %v8693_v14  ;;  %v2184_v50 = vmul.f32 0.015625, %v2140_v62  ;;  %6377 = vmatmul.msk.f32.gmra.mxu0 %vm1167_vm4, %v8689_v59  ;;  %vm2343_vm8 = vmor %vm2341_vm7, %vm2342_vm6 }
 0x349   : > { %v2334_v41 = vsel %vm2333_vm5, %v6786_v42, %v2330_v8  ;;  %v2337_v32 = vmul.f32 %v6788_v43, %v2336_v33 }
 0x34a   : > { %v2422_v2 = vmul.f32 %v2334_v41, %v2230_v60  ;;  %v2216_v58 = vsub.f32 %v2184_v50, %v2200_v51 }
 0x34b   : > { %v2338_v63 = vmul.f32 0.5, %v2337_v32 }
 0x34c   : > { %v2439_v40 = vmul.f32 %v8610_v10, %v2422_v2  ;;  %v2248_v7 = vadd.f32 0.1, %v2216_v58 }
 0x34d   : > { %v2339_v18 = vsub.f32 1.5, %v2338_v63  ;;  %v2079_v42 = vpop.xlane.xlu2 %2078 }
 0x34e   : > { %v8701_v12 = vadd.f32 %v8617_v48, %v2439_v40  ;;  %v8703_v13 = vmul.f32 0.015625, %v2079_v42  ;;  %6789 = vrsqrt.f32 %v2248_v7  ;;  %vm2351_vm10 = vweird.f32 %v2248_v7 }
 0x34f   : > { %v2340_v35 = vmul.f32 %v6788_v43, %v2339_v18  ;;  %v2143_v29 = vpop.xlane.xlu0 %2142 }
 0x350   : > { %6378 = vmatmul.msk.f32.vlgmr.msra.gmra.mxu2 %vm1167_vm4, %v8701_v12  ;;  %v2201_v30 = vmul.f32 %v8703_v13, %v8703_v13  ;;  %v2185_v22 = vmul.f32 0.015625, %v2143_v29 }
 0x351   : > { %v2344_v26 = vsel %vm2343_vm8, %v6788_v43, %v2340_v35 }
 0x352   : > { %v2423_v44 = vmul.f32 %v2344_v26, %v2231_v1  ;;  %v2217_v24 = vsub.f32 %v2185_v22, %v2201_v30  ;;  %v2232_v1 = vsub.f32 %v8492_v57, %v8693_v14  ;;  %v2233_v14 = vsub.f32 %v8511_v56, %v8703_v13 }
 0x354   : > { %v2440_v36 = vmul.f32 %v8610_v10, %v2423_v44  ;;  %v6790_v34 = vpop.eup %6789  ;;  %v2249_v8 = vadd.f32 0.1, %v2217_v24 }
 0x355   : > { %v2082_v3 = vpop.xlane.xlu1 %2081  ;;  %v2346_v33 = vmul.f32 %v6790_v34, %v2248_v7  ;;  %vm2352_vm9 = vweird.f32 %v6790_v34 }
 0x356   : > { %v8713_v60 = vadd.f32 %v8617_v48, %v2440_v36  ;;  %v8715_v61 = vmul.f32 0.015625, %v2082_v3  ;;  %6791 = vrsqrt.f32 %v2249_v8  ;;  %vm2353_vm11 = vmor %vm2351_vm10, %vm2352_vm9  ;;  %vm2361_vm13 = vweird.f32 %v2249_v8 }
 0x357   : > { %v2347_v15 = vmul.f32 %v6790_v34, %v2346_v33  ;;  %v2146_v41 = vpop.xlane.xlu2 %2145 }
 0x358   : > { %6379 = vmatmul.msk.f32.gmra.mxu2 %vm1167_vm4, %v8713_v60  ;;  %v2202_v43 = vmul.f32 %v8715_v61, %v8715_v61  ;;  %v2186_v32 = vmul.f32 0.015625, %v2146_v41 }
 0x359   : > { %v2348_v51 = vmul.f32 0.5, %v2347_v15 }
 0x35a   : > { %v2218_v62 = vsub.f32 %v2186_v32, %v2202_v43 }
 0x35b   : > { %v2349_v2 = vsub.f32 1.5, %v2348_v51 }
 0x35c   : > { %v6792_v50 = vpop.eup %6791  ;;  %v2250_v63 = vadd.f32 0.1, %v2218_v62 }
 0x35d   : > { %v2085_v40 = vpop.xlane.xlu0 %2084  ;;  %v2350_v58 = vmul.f32 %v6790_v34, %v2349_v2  ;;  %v2356_v18 = vmul.f32 %v6792_v50, %v2249_v8  ;;  %vm2362_vm12 = vweird.f32 %v6792_v50 }
 0x35e   : > { %v8721_v42 = vmul.f32 0.015625, %v2085_v40  ;;  %6793 = vrsqrt.f32 %v2250_v63  ;;  %vm2363_vm14 = vmor %vm2361_vm13, %vm2362_vm12  ;;  %vm2371_vm0 = vweird.f32 %v2250_v63 }
 0x35f   : > { %v2149_v35 = vpop.xlane.xlu1 %2148  ;;  %v2357_v30 = vmul.f32 %v6792_v50, %v2356_v18  ;;  %v2354_v22 = vsel %vm2353_vm11, %v6790_v34, %v2350_v58 }
 0x360   : > { %v2203_v29 = vmul.f32 %v8721_v42, %v8721_v42  ;;  %v2187_v26 = vmul.f32 0.015625, %v2149_v35  ;;  %v2424_v36 = vmul.f32 %v2354_v22, %v2232_v1 }
 0x361   : > { %v2358_v44 = vmul.f32 0.5, %v2357_v30 }
 0x362   : > { %v2219_v24 = vsub.f32 %v2187_v26, %v2203_v29  ;;  %v2441_v7 = vmul.f32 %v8610_v10, %v2424_v36  ;;  %v2234_v36 = vsub.f32 %v8528_v25, %v8715_v61 }
 0x363   : > { %v2359_v3 = vsub.f32 1.5, %v2358_v44 }
 0x364   : > { %v2251_v33 = vadd.f32 0.1, %v2219_v24  ;;  %v6794_v15 = vpop.eup %6793  ;;  %v8733_v34 = vadd.f32 %v8617_v48, %v2441_v7 }
 0x365   : > { %v2088_v43 = vpop.xlane.xlu2 %2087  ;;  %v2360_v41 = vmul.f32 %v6792_v50, %v2359_v3  ;;  %v2366_v57 = vmul.f32 %v6794_v15, %v2250_v63  ;;  %vm2372_vm15 = vweird.f32 %v6794_v15 }
 0x366   : > { %6795 = vrsqrt.f32 %v2251_v33  ;;  %v8730_v32 = vmul.f32 0.015625, %v2088_v43  ;;  %6380 = vmatmul.msk.f32.gmra.mxu2 %vm1167_vm4, %v8733_v34  ;;  %vm2373_vm1 = vmor %vm2371_vm0, %vm2372_vm15  ;;  %vm2381_vm3 = vweird.f32 %v2251_v33 }
 0x367   : > { %v2152_v51 = vpop.xlane.xlu0 %2151  ;;  %v2367_v62 = vmul.f32 %v6794_v15, %v2366_v57  ;;  %v2364_v40 = vsel %vm2363_vm14, %v6792_v50, %v2360_v41 }
 0x368   : > { %v2188_v2 = vmul.f32 0.015625, %v2152_v51  ;;  %v2204_v58 = vmul.f32 %v8730_v32, %v8730_v32  ;;  %v2425_v8 = vmul.f32 %v2364_v40, %v2233_v14 }
 0x369   : > { %v2368_v18 = vmul.f32 0.5, %v2367_v62 }
 0x36a   : > { %v2220_v35 = vsub.f32 %v2188_v2, %v2204_v58  ;;  %v2442_v56 = vmul.f32 %v8610_v10, %v2425_v8 }
 0x36b   : > { %v2369_v1 = vsub.f32 1.5, %v2368_v18  ;;  %v2235_v18 = vsub.f32 %v8551_v39, %v8721_v42 }
 0x36c   : > { %v6796_v13 = vpop.eup %6795  ;;  %v2252_v29 = vadd.f32 0.1, %v2220_v35  ;;  %v8741_v26 = vadd.f32 %v8617_v48, %v2442_v56 }
 0x36d   : > { %v2376_v30 = vmul.f32 %v6796_v13, %v2251_v33  ;;  %v2370_v50 = vmul.f32 %v6794_v15, %v2369_v1  ;;  %v2091_v22 = vpop.xlane.xlu1 %2090  ;;  %vm2382_vm2 = vweird.f32 %v6796_v13 }
 0x36e   : > { %6797 = vrsqrt.f32 %v2252_v29  ;;  %v8743_v24 = vmul.f32 0.015625, %v2091_v22  ;;  %6381 = vmatmul.msk.f32.gmra.mxu2 %vm1167_vm4, %v8741_v26  ;;  %vm2383_vm5 = vmor %vm2381_vm3, %vm2382_vm2  ;;  %vm2391_vm7 = vweird.f32 %v2252_v29 }
 0x36f   : > { %v2377_v44 = vmul.f32 %v6796_v13, %v2376_v30  ;;  %v2155_v3 = vpop.xlane.xlu2 %2154  ;;  %v2374_v7 = vsel %vm2373_vm1, %v6794_v15, %v2370_v50 }
 0x370   : > { %v2205_v41 = vmul.f32 %v8743_v24, %v8743_v24  ;;  %v2189_v57 = vmul.f32 0.015625, %v2155_v3  ;;  %v2426_v63 = vmul.f32 %v2374_v7, %v2234_v36 }
 0x371   : > { %v2378_v43 = vmul.f32 0.5, %v2377_v44 }
 0x372   : > { %v2221_v51 = vsub.f32 %v2189_v57, %v2205_v41  ;;  %v2443_v62 = vmul.f32 %v8610_v10, %v2426_v63  ;;  %v2236_v41 = vsub.f32 %v8562_v11, %v8730_v32  ;;  %v2237_v11 = vsub.f32 %v8573_v21, %v8743_v24 }
 0x373   : > { %v2379_v14 = vsub.f32 1.5, %v2378_v43 }
 0x374   : > { %v6798_v2 = vpop.eup %6797  ;;  %v2253_v25 = vadd.f32 0.1, %v2221_v51  ;;  %v8753_v8 = vadd.f32 %v8617_v48, %v2443_v62 }
 0x375   : > { %v2380_v40 = vmul.f32 %v6796_v13, %v2379_v14  ;;  %v2094_v61 = vpop.xlane.xlu0 %2093  ;;  %v2386_v15 = vmul.f32 %v6798_v2, %v2252_v29  ;;  %vm2392_vm6 = vweird.f32 %v6798_v2 }
 0x376   : > { %v2174_v58 = vmul.f32 0.015625, %v2094_v61  ;;  %6799 = vrsqrt.f32 %v2253_v25  ;;  %6382 = vmatmul.msk.f32.gmra.mxu2 %vm1167_vm4, %v8753_v8  ;;  %vm2393_vm8 = vmor %vm2391_vm7, %vm2392_vm6  ;;  %vm2401_vm10 = vweird.f32 %v2253_v25 }
 0x377   : > { %v2158_v35 = vpop.xlane.xlu1 %2157  ;;  %v2384_v56 = vsel %vm2383_vm5, %v6796_v13, %v2380_v40  ;;  %v2387_v1 = vmul.f32 %v6798_v2, %v2386_v15 }
 0x378   : > { %v2206_v30 = vmul.f32 %v2174_v58, %v2174_v58  ;;  %v2190_v50 = vmul.f32 0.015625, %v2158_v35  ;;  %v2427_v33 = vmul.f32 %v2384_v56, %v2235_v18 }
 0x379   : > { %v2388_v22 = vmul.f32 0.5, %v2387_v1 }
 0x37a   : > { %v2222_v44 = vsub.f32 %v2190_v50, %v2206_v30  ;;  %v2444_v36 = vmul.f32 %v8610_v10, %v2427_v33 }
 0x37b   : > { %v2389_v3 = vsub.f32 1.5, %v2388_v22  ;;  %v8785_v22 = vld [vmem:[%s10670_s4 + $0x2] ss:$0 sm:$0xff] }
 0x37c   : > { %v2254_v7 = vadd.f32 0.1, %v2222_v44  ;;  %v6800_v43 = vpop.eup %6799  ;;  %v8761_v39 = vadd.f32 %v8617_v48, %v2444_v36 }
 0x37d   : > { %v2390_v42 = vmul.f32 %v6798_v2, %v2389_v3  ;;  %v2396_v13 = vmul.f32 %v6800_v43, %v2253_v25  ;;  %vm2402_vm9 = vweird.f32 %v6800_v43  ;;  %v2238_v25 = vsub.f32 %v8587_v38, %v2174_v58 }
 0x37e   : > { %6801 = vrsqrt.f32 %v2254_v7  ;;  %6383 = vmatmul.msk.f32.gmra.mxu2 %vm1167_vm4, %v8761_v39  ;;  %vm2403_vm11 = vmor %vm2401_vm10, %vm2402_vm9  ;;  %vm2411_vm13 = vweird.f32 %v2254_v7  ;;  %v8790_v3 = vadd.f32 %v8621_v46, %v8170_v6 }
 0x37f   : > { %v2397_v57 = vmul.f32 %v6800_v43, %v2396_v13  ;;  %v2394_v63 = vsel %vm2393_vm8, %v6798_v2, %v2390_v42 }
 0x380   : > { %v2428_v14 = vmul.f32 %v2394_v63, %v2236_v41  ;;  %v8810_v63 = vadd.f32 %v8647_v20, %v8194_v28 }
 0x381   : > { %v2398_v51 = vmul.f32 0.5, %v2397_v57 }
 0x382   : > { %v2445_v62 = vmul.f32 %v8610_v10, %v2428_v14 }
 0x383   : > { %v2399_v61 = vsub.f32 1.5, %v2398_v51 }
 0x384   : > { %v6802_v40 = vpop.eup %6801  ;;  %v8769_v29 = vadd.f32 %v8617_v48, %v2445_v62 }
 0x385   : > { %v2406_v15 = vmul.f32 %v6802_v40, %v2254_v7  ;;  %v2400_v18 = vmul.f32 %v6800_v43, %v2399_v61  ;;  %vm2412_vm12 = vweird.f32 %v6802_v40 }
 0x386   : > { %6384 = vmatmul.msk.f32.gmra.mxu2 %vm1167_vm4, %v8769_v29  ;;  %vm2413_vm14 = vmor %vm2411_vm13, %vm2412_vm12 }
 0x387   : > { %v2407_v32 = vmul.f32 %v6802_v40, %v2406_v15  ;;  %v2404_v2 = vsel %vm2403_vm11, %v6800_v43, %v2400_v18 }
 0x388   : > { %v2429_v56 = vmul.f32 %v2404_v2, %v2237_v11  ;;  %v8819_v11 = vadd.f32 %v8659_v16, %v8206_v45 }
 0x389   : > { %v2408_v35 = vmul.f32 0.5, %v2407_v32 }
 0x38a   : > { %v2446_v30 = vmul.f32 %v8610_v10, %v2429_v56 }
 0x38b   : > { %v2409_v1 = vsub.f32 1.5, %v2408_v35 }
 0x38c   : > { %v8777_v33 = vadd.f32 %v8617_v48, %v2446_v30 }
 0x38d   : > { %v2410_v50 = vmul.f32 %v6802_v40, %v2409_v1 }
 0x38e   : > { %6385 = vmatmul.msk.f32.gmra.mxu2 %vm1167_vm4, %v8777_v33 }
 0x38f   : > { %v2414_v21 = vsel %vm2413_vm14, %v6802_v40, %v2410_v50 }
 0x390   : > { %v2430_v24 = vmul.f32 %v2414_v21, %v2238_v25 }
 0x392   : > { %v2447_v44 = vmul.f32 %v8610_v10, %v2430_v24  ;;  %v8801_v10 = vadd.f32 %v8633_v17, %v8182_v5 }
 0x394   : > { %v8794_v58 = vadd.f32 %v8617_v48, %v2447_v44 }
 0x395   : > { %v2556_v36 = vpop.f32.mrf.mxu0 }
 0x396   : > { %v2557_v38 = vadd.f32 %v8785_v22, %v2556_v36  ;;  %6386 = vmatmul.msk.f32.gmra.mxu2 %vm1167_vm4, %v8794_v58 }
 0x398   : > { %v2604_v7 = vadd.f32 %v2557_v38, %v8790_v3  ;;  %v8830_v38 = vadd.f32 %v8669_v31, %v8218_v19 }
 0x39a   : > { %v6387_v43 = vmul.f32 -1.442695, %v2604_v7 }
 0x39c   : > { %6803 = vpow2.f32 %v6387_v43 }
 0x39d   : > { %v2559_v42 = vpop.f32.mrf.mxu0 }
 0x39e   : > { %v2560_v6 = vadd.f32 %v8785_v22, %v2559_v42 }
 0x3a0   : > { %v8805_v46 = vadd.f32 %v2560_v6, %v8801_v10 }
 0x3a2   : > { %v6804_v13 = vpop.eup %6803  ;;  %v6388_v48 = vmul.f32 -1.442695, %v8805_v46 }
 0x3a3   : > { %v2668_v41 = vadd.f32 1.0, %v6804_v13 }
 0x3a4   : > { %6805 = vpow2.f32 %v6388_v48 }
 0x3a5   : > { %6807 = vrcp.f32 %v2668_v41  ;;  %v2562_v57 = vpop.f32.mrf.mxu0  ;;  %v2695_v18 = vand.u32 2147483648, %v2668_v41  ;;  %v2693_v32 = vand.u32 2147483647, %v2668_v41  ;;  %vm2689_vm0 = vweird.f32 %v2668_v41 }
 0x3a6   : > { %v2563_v14 = vadd.f32 %v8785_v22, %v2562_v57 }
 0x3a7   : > { %v2696_v30 = vor.u32 1.1754944e-38, %v2695_v18  ;;  %vm2694_vm2 = vcmp.eq.f32.partialorder %v2693_v32, 8.507059e+37 }
 0x3a8   : > { %v8814_v17 = vadd.f32 %v2563_v14, %v8810_v63 }
 0x3aa   : > { %v6806_v5 = vpop.eup %6805  ;;  %v6389_v61 = vmul.f32 -1.442695, %v8814_v17 }
 0x3ab   : > { %v6808_v51 = vpop.eup %6807  ;;  %v2669_v62 = vadd.f32 1.0, %v6806_v5 }
 0x3ac   : > { %v2685_v40 = vmul.f32 %v6808_v51, %v2668_v41  ;;  %vm2690_vm15 = vweird.f32 %v6808_v51 }
 0x3ad   : > { %6809 = vrcp.f32 %v2669_v62  ;;  %v2565_v28 = vpop.f32.mrf.mxu0  ;;  %vm2691_vm1 = vmor %vm2689_vm0, %vm2690_vm15  ;;  %v2708_v43 = vand.u32 2147483647, %v2669_v62  ;;  %v2710_v42 = vand.u32 2147483648, %v2669_v62  ;;  %vm2704_vm5 = vweird.f32 %v2669_v62 }
 0x3ae   : > { %v2686_v15 = vsub.f32 1.0, %v2685_v40  ;;  %6811 = vpow2.f32 %v6389_v61  ;;  %v2566_v2 = vadd.f32 %v8785_v22, %v2565_v28 }
 0x3af   : > { %v2711_v14 = vor.u32 1.1754944e-38, %v2710_v42  ;;  %vm2709_vm7 = vcmp.eq.f32.partialorder %v2708_v43, 8.507059e+37 }
 0x3b0   : > { %v2687_v20 = vmul.f32 %v6808_v51, %v2686_v15  ;;  %v8823_v56 = vadd.f32 %v2566_v2, %v8819_v11 }
 0x3b2   : > { %v2688_v35 = vadd.f32 %v6808_v51, %v2687_v20  ;;  %v6390_v45 = vmul.f32 -1.442695, %v8823_v56  ;;  %v8847_v20 = vadd.f32 %v8681_v0, %v8230_v55 }
 0x3b3   : > { %v6810_v1 = vpop.eup %6809 }
 0x3b4   : > { %v6812_v50 = vpop.eup %6811  ;;  %v2692_v25 = vsel %vm2691_vm1, %v6808_v51, %v2688_v35  ;;  %v2700_v21 = vmul.f32 %v6810_v1, %v2669_v62  ;;  %6813 = vpow2.f32 %v6390_v45  ;;  %vm2705_vm3 = vweird.f32 %v6810_v1 }
 0x3b5   : > { %v2697_v16 = vsel %vm2694_vm2, %v2696_v30, %v2692_v25  ;;  %v2670_v24 = vadd.f32 1.0, %v6812_v50  ;;  %v2568_v6 = vpop.f32.mrf.mxu0  ;;  %vm2706_vm6 = vmor %vm2704_vm5, %vm2705_vm3 }
 0x3b6   : > { %v8826_v44 = vmul.f32 %v2697_v16, %v2604_v7  ;;  %v2701_v36 = vsub.f32 1.0, %v2700_v21  ;;  %v2569_v48 = vadd.f32 %v8785_v22, %v2568_v6 }
 0x3b7   : > { %6815 = vrcp.f32 %v2670_v24  ;;  %v2723_v50 = vand.u32 2147483647, %v2670_v24  ;;  %vm2719_vm9 = vweird.f32 %v2670_v24 }
 0x3b8   : > { %v2702_v13 = vmul.f32 %v6810_v1, %v2701_v36  ;;  %v2942_v41 = vsel %vm1167_vm4, %v8826_v44, 0.0  ;;  %v2990_v7 = vmul.f32 %v8826_v44, %v8826_v44  ;;  %v8838_v19 = vadd.f32 %v2569_v48, %v8830_v38 }
 0x3b9   : > { %2943 = vadd.xlane.f32.xlu2 %v2942_v41  ;;  %vm2724_vm11 = vcmp.eq.f32.partialorder %v2723_v50, 8.507059e+37 }
 0x3ba   : > { %v2703_v57 = vadd.f32 %v6810_v1, %v2702_v13  ;;  %v3006_v31 = vsel %vm1167_vm4, %v2990_v7, 0.0  ;;  %v6814_v5 = vpop.eup %6813  ;;  %v6391_v40 = vmul.f32 -1.442695, %v8838_v19 }
 0x3bb   : > { %3007 = vadd.xlane.f32.xlu0 %v3006_v31  ;;  %v2671_v18 = vadd.f32 1.0, %v6814_v5 }
 0x3bc   : > { %v2707_v51 = vsel %vm2706_vm6, %v6810_v1, %v2703_v57  ;;  %6817 = vpow2.f32 %v6391_v40 }
 0x3bd   : > { %v6816_v61 = vpop.eup %6815  ;;  %v2712_v15 = vsel %vm2709_vm7, %v2711_v14, %v2707_v51  ;;  %6819 = vrcp.f32 %v2671_v18  ;;  %v2571_v32 = vpop.f32.mrf.mxu0  ;;  %v2738_v14 = vand.u32 2147483647, %v2671_v18  ;;  %v2740_v5 = vand.u32 2147483648, %v2671_v18 }
 0x3be   : > { %v8843_v28 = vmul.f32 %v2712_v15, %v8805_v46  ;;  %v2715_v62 = vmul.f32 %v6816_v61, %v2670_v24  ;;  %v2572_v35 = vadd.f32 %v8785_v22, %v2571_v32  ;;  %v2725_v46 = vand.u32 2147483648, %v2670_v24 }
 0x3bf   : > { %vm2720_vm8 = vweird.f32 %v6816_v61  ;;  %v8864_v24 = vadd.f32 %v8689_v59, %v8242_v49  ;;  %vm2734_vm13 = vweird.f32 %v2671_v18  ;;  %v2741_v32 = vor.u32 1.1754944e-38, %v2740_v5 }
 0x3c0   : > { %v2716_v2 = vsub.f32 1.0, %v2715_v62  ;;  %v2945_v1 = vsel %vm1167_vm4, %v8843_v28, 0.0  ;;  %v2991_v30 = vmul.f32 %v8843_v28, %v8843_v28  ;;  %v8855_v21 = vadd.f32 %v2572_v35, %v8847_v20  ;;  %vm2721_vm10 = vmor %vm2719_vm9, %vm2720_vm8 }
 0x3c1   : > { %2946 = vadd.xlane.f32.xlu1 %v2945_v1  ;;  %v2726_v43 = vor.u32 1.1754944e-38, %v2725_v46  ;;  %vm2739_vm15 = vcmp.eq.f32.partialorder %v2738_v14, 8.507059e+37 }
 0x3c2   : > { %v2717_v25 = vmul.f32 %v6816_v61, %v2716_v2  ;;  %v3009_v55 = vsel %vm1167_vm4, %v2991_v30, 0.0  ;;  %v6818_v0 = vpop.eup %6817  ;;  %v6392_v16 = vmul.f32 -1.442695, %v8855_v21 }
 0x3c3   : > { %3010 = vadd.xlane.f32.xlu2 %v3009_v55  ;;  %v6820_v36 = vpop.eup %6819  ;;  %v2672_v42 = vadd.f32 1.0, %v6818_v0 }
 0x3c4   : > { %v2718_v45 = vadd.f32 %v6816_v61, %v2717_v25  ;;  %v2730_v13 = vmul.f32 %v6820_v36, %v2671_v18  ;;  %6821 = vpow2.f32 %v6392_v16  ;;  %vm2735_vm12 = vweird.f32 %v6820_v36 }
 0x3c5   : > { %6823 = vrcp.f32 %v2672_v42  ;;  %v2574_v41 = vpop.f32.mrf.mxu0  ;;  %vm2736_vm14 = vmor %vm2734_vm13, %vm2735_vm12  ;;  %v2753_v18 = vand.u32 2147483647, %v2672_v42  ;;  %v2755_v55 = vand.u32 2147483648, %v2672_v42  ;;  %vm2749_vm1 = vweird.f32 %v2672_v42 }
 0x3c6   : > { %v2722_v6 = vsel %vm2721_vm10, %v6816_v61, %v2718_v45  ;;  %v2731_v57 = vsub.f32 1.0, %v2730_v13  ;;  %v2575_v31 = vadd.f32 %v8785_v22, %v2574_v41 }
 0x3c7   : > { %v2727_v48 = vsel %vm2724_vm11, %v2726_v43, %v2722_v6  ;;  %v8885_v43 = vadd.f32 %v8701_v12, %v8254_v4  ;;  %vm2754_vm3 = vcmp.eq.f32.partialorder %v2753_v18, 8.507059e+37 }
 0x3c8   : > { %v8860_v7 = vmul.f32 %v2727_v48, %v8814_v17  ;;  %v2732_v51 = vmul.f32 %v6820_v36, %v2731_v57  ;;  %v8868_v40 = vadd.f32 %v2575_v31, %v8864_v24  ;;  %v2756_v57 = vor.u32 1.1754944e-38, %v2755_v55 }
 0x3ca   : > { %v2948_v61 = vsel %vm1167_vm4, %v8860_v7, 0.0  ;;  %v2992_v17 = vmul.f32 %v8860_v7, %v8860_v7  ;;  %v6822_v15 = vpop.eup %6821  ;;  %v2733_v62 = vadd.f32 %v6820_v36, %v2732_v51  ;;  %v6393_v49 = vmul.f32 -1.442695, %v8868_v40 }
 0x3cb   : > { %2949 = vadd.xlane.f32.xlu0 %v2948_v61  ;;  %v6824_v59 = vpop.eup %6823  ;;  %v2673_v2 = vadd.f32 1.0, %v6822_v15 }
 0x3cc   : > { %v3012_v35 = vsel %vm1167_vm4, %v2992_v17, 0.0  ;;  %v2737_v1 = vsel %vm2736_vm14, %v6820_v36, %v2733_v62  ;;  %v2745_v30 = vmul.f32 %v6824_v59, %v2672_v42  ;;  %6825 = vpow2.f32 %v6393_v49 }
 0x3cd   : > { %3013 = vadd.xlane.f32.xlu1 %v3012_v35  ;;  %v2742_v50 = vsel %vm2739_vm15, %v2741_v32, %v2737_v1  ;;  %6827 = vrcp.f32 %v2673_v2  ;;  %vm2750_vm0 = vweird.f32 %v6824_v59  ;;  %v2768_v17 = vand.u32 2147483647, %v2673_v2 }
 0x3ce   : > { %v8877_v46 = vmul.f32 %v2742_v50, %v8823_v56  ;;  %v2746_v25 = vsub.f32 1.0, %v2745_v30  ;;  %vm2751_vm2 = vmor %vm2749_vm1, %vm2750_vm0  ;;  %v2770_v15 = vand.u32 2147483648, %v2673_v2  ;;  %vm2764_vm6 = vweird.f32 %v2673_v2 }
 0x3cf   : > { %vm2769_vm8 = vcmp.eq.f32.partialorder %v2768_v17, 8.507059e+37 }
 0x3d0   : > { %v2747_v0 = vmul.f32 %v6824_v59, %v2746_v25  ;;  %v2951_v45 = vsel %vm1167_vm4, %v8877_v46, 0.0  ;;  %v2993_v16 = vmul.f32 %v8877_v46, %v8877_v46  ;;  %v2771_v50 = vor.u32 1.1754944e-38, %v2770_v15 }
 0x3d1   : > { %2952 = vadd.xlane.f32.xlu2 %v2951_v45 }
 0x3d2   : > { %v6826_v6 = vpop.eup %6825  ;;  %v2748_v13 = vadd.f32 %v6824_v59, %v2747_v0  ;;  %v3015_v48 = vsel %vm1167_vm4, %v2993_v16, 0.0 }
 0x3d3   : > { %v2577_v36 = vpop.f32.mrf.mxu2  ;;  %v6828_v41 = vpop.eup %6827  ;;  %v2674_v31 = vadd.f32 1.0, %v6826_v6  ;;  %3016 = vadd.xlane.f32.xlu0 %v3015_v48 }
 0x3d4   : > { %v2578_v56 = vadd.f32 %v8785_v22, %v2577_v36  ;;  %v2752_v5 = vsel %vm2751_vm2, %v6824_v59, %v2748_v13  ;;  %v2760_v51 = vmul.f32 %v6828_v41, %v2673_v2  ;;  %vm2765_vm5 = vweird.f32 %v6828_v41 }
 0x3d5   : > { %v2757_v4 = vsel %vm2754_vm3, %v2756_v57, %v2752_v5  ;;  %6829 = vrcp.f32 %v2674_v31  ;;  %vm2766_vm7 = vmor %vm2764_vm6, %vm2765_vm5  ;;  %v2783_v36 = vand.u32 2147483647, %v2674_v31  ;;  %vm2779_vm10 = vweird.f32 %v2674_v31 }
 0x3d6   : > { %v8890_v14 = vadd.f32 %v2578_v56, %v8885_v43  ;;  %v8893_v12 = vmul.f32 %v2757_v4, %v8838_v19  ;;  %v2761_v61 = vsub.f32 1.0, %v2760_v51  ;;  %v8902_v19 = vadd.f32 %v8713_v60, %v8266_v53 }
 0x3d7   : > { %v2785_v56 = vand.u32 2147483648, %v2674_v31  ;;  %vm2784_vm12 = vcmp.eq.f32.partialorder %v2783_v36, 8.507059e+37 }
 0x3d8   : > { %v6394_v42 = vmul.f32 -1.442695, %v8890_v14  ;;  %v2762_v62 = vmul.f32 %v6828_v41, %v2761_v61  ;;  %v2954_v49 = vsel %vm1167_vm4, %v8893_v12, 0.0  ;;  %v2994_v59 = vmul.f32 %v8893_v12, %v8893_v12 }
 0x3d9   : > { %2955 = vadd.xlane.f32.xlu1 %v2954_v49  ;;  %v2786_v5 = vor.u32 1.1754944e-38, %v2785_v56 }
 0x3da   : > { %6831 = vpow2.f32 %v6394_v42  ;;  %v2763_v35 = vadd.f32 %v6828_v41, %v2762_v62  ;;  %v3018_v25 = vsel %vm1167_vm4, %v2994_v59, 0.0 }
 0x3db   : > { %v2580_v32 = vpop.f32.mrf.mxu2  ;;  %v6830_v30 = vpop.eup %6829  ;;  %3019 = vadd.xlane.f32.xlu2 %v3018_v25 }
 0x3dc   : > { %v2581_v1 = vadd.f32 %v8785_v22, %v2580_v32  ;;  %v2767_v18 = vsel %vm2766_vm7, %v6828_v41, %v2763_v35  ;;  %v2775_v55 = vmul.f32 %v6830_v30, %v2674_v31  ;;  %vm2780_vm9 = vweird.f32 %v6830_v30 }
 0x3dd   : > { %v2772_v45 = vsel %vm2769_vm8, %v2771_v50, %v2767_v18  ;;  %vm2781_vm11 = vmor %vm2779_vm10, %vm2780_vm9  ;;  %v8928_v35 = vadd.f32 %v8733_v34, %v8280_v52 }
 0x3de   : > { %v8907_v0 = vadd.f32 %v2581_v1, %v8902_v19  ;;  %v8910_v16 = vmul.f32 %v2772_v45, %v8855_v21  ;;  %v2776_v53 = vsub.f32 1.0, %v2775_v55 }
 0x3e0   : > { %v6832_v2 = vpop.eup %6831  ;;  %v6395_v60 = vmul.f32 -1.442695, %v8907_v0  ;;  %v2777_v13 = vmul.f32 %v6830_v30, %v2776_v53  ;;  %v2957_v48 = vsel %vm1167_vm4, %v8910_v16, 0.0  ;;  %v2995_v41 = vmul.f32 %v8910_v16, %v8910_v16 }
 0x3e1   : > { %v2675_v6 = vadd.f32 1.0, %v6832_v2  ;;  %2958 = vadd.xlane.f32.xlu0 %v2957_v48 }
 0x3e2   : > { %6833 = vpow2.f32 %v6395_v60  ;;  %v2778_v57 = vadd.f32 %v6830_v30, %v2777_v13  ;;  %v3021_v21 = vsel %vm1167_vm4, %v2995_v41, 0.0 }
 0x3e3   : > { %6835 = vrcp.f32 %v2675_v6  ;;  %3022 = vadd.xlane.f32.xlu1 %v3021_v21  ;;  %v2800_v1 = vand.u32 2147483648, %v2675_v6  ;;  %v2798_v25 = vand.u32 2147483647, %v2675_v6  ;;  %vm2794_vm14 = vweird.f32 %v2675_v6 }
 0x3e4   : > { %v2782_v51 = vsel %vm2781_vm11, %v6830_v30, %v2778_v57 }
 0x3e5   : > { %v2787_v4 = vsel %vm2784_vm12, %v2786_v5, %v2782_v51  ;;  %v2801_v2 = vor.u32 1.1754944e-38, %v2800_v1  ;;  %vm2799_vm0 = vcmp.eq.f32.partialorder %v2798_v25, 8.507059e+37 }
 0x3e6   : > { %v8919_v42 = vmul.f32 %v2787_v4, %v8868_v40 }
 0x3e8   : > { %v6834_v61 = vpop.eup %6833  ;;  %v2960_v62 = vsel %vm1167_vm4, %v8919_v42, 0.0  ;;  %v2996_v31 = vmul.f32 %v8919_v42, %v8919_v42 }
 0x3e9   : > { %v6836_v17 = vpop.eup %6835  ;;  %v2676_v15 = vadd.f32 1.0, %v6834_v61  ;;  %2961 = vadd.xlane.f32.xlu2 %v2960_v62  ;;  %v2583_v40 = vpop.f32.mrf.mxu2 }
 0x3ea   : > { %v2790_v49 = vmul.f32 %v6836_v17, %v2675_v6  ;;  %v3024_v59 = vsel %vm1167_vm4, %v2996_v31, 0.0  ;;  %v2584_v30 = vadd.f32 %v8785_v22, %v2583_v40  ;;  %vm2795_vm13 = vweird.f32 %v6836_v17 }
 0x3eb   : > { %6837 = vrcp.f32 %v2676_v15  ;;  %3025 = vadd.xlane.f32.xlu0 %v3024_v59  ;;  %vm2796_vm15 = vmor %vm2794_vm14, %vm2795_vm13  ;;  %v2813_v13 = vand.u32 2147483647, %v2676_v15  ;;  %v2815_v48 = vand.u32 2147483648, %v2676_v15  ;;  %v8940_v6 = vadd.f32 %v8741_v26, %v8292_v54 }
 0x3ec   : > { %v2791_v32 = vsub.f32 1.0, %v2790_v49  ;;  %v8932_v18 = vadd.f32 %v2584_v30, %v8928_v35  ;;  %vm2809_vm2 = vweird.f32 %v2676_v15 }
 0x3ed   : > { %v2816_v54 = vor.u32 1.1754944e-38, %v2815_v48  ;;  %vm2814_vm5 = vcmp.eq.f32.partialorder %v2813_v13, 8.507059e+37 }
 0x3ee   : > { %v2792_v50 = vmul.f32 %v6836_v17, %v2791_v32  ;;  %v6396_v52 = vmul.f32 -1.442695, %v8932_v18  ;;  %v8957_v32 = vadd.f32 %v8753_v8, %v8302_v37 }
 0x3f0   : > { %v2793_v55 = vadd.f32 %v6836_v17, %v2792_v50  ;;  %6839 = vpow2.f32 %v6396_v52  ;;  %v8971_v52 = vadd.f32 %v8761_v39, %v8310_v47 }
 0x3f1   : > { %v6838_v45 = vpop.eup %6837  ;;  %v2586_v41 = vpop.f32.mrf.mxu2 }
 0x3f2   : > { %v2805_v53 = vmul.f32 %v6838_v45, %v2676_v15  ;;  %v2797_v34 = vsel %vm2796_vm15, %v6836_v17, %v2793_v55  ;;  %vm2810_vm1 = vweird.f32 %v6838_v45  ;;  %v2587_v21 = vadd.f32 %v8785_v22, %v2586_v41 }
 0x3f3   : > { %v2802_v60 = vsel %vm2799_vm0, %v2801_v2, %v2797_v34  ;;  %vm2811_vm3 = vmor %vm2809_vm2, %vm2810_vm1 }
 0x3f4   : > { %v2806_v36 = vsub.f32 1.0, %v2805_v53  ;;  %v8936_v56 = vmul.f32 %v2802_v60, %v8890_v14  ;;  %v8948_v4 = vadd.f32 %v2587_v21, %v8940_v6 }
 0x3f6   : > { %v2807_v57 = vmul.f32 %v6838_v45, %v2806_v36  ;;  %v2963_v5 = vsel %vm1167_vm4, %v8936_v56, 0.0  ;;  %v2997_v51 = vmul.f32 %v8936_v56, %v8936_v56  ;;  %v6840_v26 = vpop.eup %6839  ;;  %v6397_v62 = vmul.f32 -1.442695, %v8948_v4 }
 0x3f7   : > { %2964 = vadd.xlane.f32.xlu1 %v2963_v5  ;;  %v2677_v49 = vadd.f32 1.0, %v6840_v26 }
 0x3f8   : > { %v2808_v14 = vadd.f32 %v6838_v45, %v2807_v57  ;;  %v3027_v61 = vsel %vm1167_vm4, %v2997_v51, 0.0  ;;  %6841 = vpow2.f32 %v6397_v62  ;;  %v8983_v62 = vadd.f32 %v8769_v29, %v8318_v23 }
 0x3f9   : > { %3028 = vadd.xlane.f32.xlu2 %v3027_v61  ;;  %6843 = vrcp.f32 %v2677_v49  ;;  %v2589_v15 = vpop.f32.mrf.mxu2  ;;  %v2830_v60 = vand.u32 2147483648, %v2677_v49  ;;  %v2828_v13 = vand.u32 2147483647, %v2677_v49  ;;  %vm2824_vm7 = vweird.f32 %v2677_v49 }
 0x3fa   : > { %v2812_v17 = vsel %vm2811_vm3, %v6838_v45, %v2808_v14  ;;  %v2590_v40 = vadd.f32 %v8785_v22, %v2589_v15 }
 0x3fb   : > { %v2817_v31 = vsel %vm2814_vm5, %v2816_v54, %v2812_v17  ;;  %v2831_v51 = vor.u32 1.1754944e-38, %v2830_v60  ;;  %vm2829_vm9 = vcmp.eq.f32.partialorder %v2828_v13, 8.507059e+37  ;;  %v9003_v13 = vadd.f32 %v8777_v33, %v8326_v27 }
 0x3fc   : > { %v8953_v59 = vmul.f32 %v2817_v31, %v8907_v0  ;;  %v8965_v50 = vadd.f32 %v2590_v40, %v8957_v32 }
 0x3fe   : > { %v2966_v1 = vsel %vm1167_vm4, %v8953_v59, 0.0  ;;  %v2998_v30 = vmul.f32 %v8953_v59, %v8953_v59  ;;  %v6842_v25 = vpop.eup %6841  ;;  %v6398_v55 = vmul.f32 -1.442695, %v8965_v50 }
 0x3ff   : > { %2967 = vadd.xlane.f32.xlu0 %v2966_v1  ;;  %v6844_v37 = vpop.eup %6843  ;;  %v2678_v8 = vadd.f32 1.0, %v6842_v25 }
 0x400   : > { %v3030_v0 = vsel %vm1167_vm4, %v2998_v30, 0.0  ;;  %v2820_v45 = vmul.f32 %v6844_v37, %v2677_v49  ;;  %6845 = vpow2.f32 %v6398_v55  ;;  %vm2825_vm6 = vweird.f32 %v6844_v37 }
 0x401   : > { %3031 = vadd.xlane.f32.xlu1 %v3030_v0  ;;  %6847 = vrcp.f32 %v2678_v8  ;;  %v2592_v2 = vpop.f32.mrf.mxu2  ;;  %vm2826_vm8 = vmor %vm2824_vm7, %vm2825_vm6  ;;  %v2843_v49 = vand.u32 2147483647, %v2678_v8  ;;  %v2845_v15 = vand.u32 2147483648, %v2678_v8  ;;  %vm2839_vm11 = vweird.f32 %v2678_v8 }
 0x402   : > { %v2821_v53 = vsub.f32 1.0, %v2820_v45  ;;  %v2593_v34 = vadd.f32 %v8785_v22, %v2592_v2 }
 0x403   : > { %v2846_v55 = vor.u32 1.1754944e-38, %v2845_v15  ;;  %vm2844_vm13 = vcmp.eq.f32.partialorder %v2843_v49, 8.507059e+37 }
 0x404   : > { %v2822_v36 = vmul.f32 %v6844_v37, %v2821_v53  ;;  %v8975_v48 = vadd.f32 %v2593_v34, %v8971_v52 }
 0x406   : > { %v6846_v41 = vpop.eup %6845  ;;  %v2823_v57 = vadd.f32 %v6844_v37, %v2822_v36  ;;  %v6399_v21 = vmul.f32 -1.442695, %v8975_v48 }
 0x407   : > { %v6848_v5 = vpop.eup %6847  ;;  %v2679_v14 = vadd.f32 1.0, %v6846_v41 }
 0x408   : > { %v2827_v47 = vsel %vm2826_vm8, %v6844_v37, %v2823_v57  ;;  %v2835_v39 = vmul.f32 %v6848_v5, %v2678_v8  ;;  %6849 = vpow2.f32 %v6399_v21  ;;  %vm2840_vm10 = vweird.f32 %v6848_v5 }
 0x409   : > { %v2832_v61 = vsel %vm2829_vm9, %v2831_v51, %v2827_v47  ;;  %6851 = vrcp.f32 %v2679_v14  ;;  %v2595_v54 = vpop.f32.mrf.mxu2  ;;  %vm2841_vm12 = vmor %vm2839_vm11, %vm2840_vm10  ;;  %v2858_v57 = vand.u32 2147483647, %v2679_v14  ;;  %v2860_v21 = vand.u32 2147483648, %v2679_v14 }
 0x40a   : > { %v8979_v26 = vmul.f32 %v2832_v61, %v8932_v18  ;;  %v2836_v17 = vsub.f32 1.0, %v2835_v39  ;;  %v2596_v31 = vadd.f32 %v8785_v22, %v2595_v54  ;;  %vm2854_vm15 = vweird.f32 %v2679_v14 }
 0x40b   : > { %v2861_v54 = vor.u32 1.1754944e-38, %v2860_v21  ;;  %vm2859_vm1 = vcmp.eq.f32.partialorder %v2858_v57, 8.507059e+37 }
 0x40c   : > { %v2837_v40 = vmul.f32 %v6848_v5, %v2836_v17  ;;  %v8987_v1 = vadd.f32 %v2596_v31, %v8983_v62  ;;  %v2969_v30 = vsel %vm1167_vm4, %v8979_v26, 0.0  ;;  %v2999_v18 = vmul.f32 %v8979_v26, %v8979_v26 }
 0x40d   : > { %2970 = vadd.xlane.f32.xlu2 %v2969_v30 }
 0x40e   : > { %v6850_v0 = vpop.eup %6849  ;;  %v2838_v25 = vadd.f32 %v6848_v5, %v2837_v40  ;;  %v6400_v23 = vmul.f32 -1.442695, %v8987_v1  ;;  %v3033_v45 = vsel %vm1167_vm4, %v2999_v18, 0.0 }
 0x40f   : > { %v6852_v29 = vpop.eup %6851  ;;  %v8994_v37 = vadd.f32 1.0, %v6850_v0  ;;  %3034 = vadd.xlane.f32.xlu0 %v3033_v45  ;;  %v9024_v0 = vadd.f32 %v8794_v58, %v8333_v9 }
 0x410   : > { %v2842_v2 = vsel %vm2841_vm12, %v6848_v5, %v2838_v25  ;;  %v2850_v53 = vmul.f32 %v6852_v29, %v2679_v14  ;;  %6853 = vpow2.f32 %v6400_v23  ;;  %vm2855_vm14 = vweird.f32 %v6852_v29  ;;  %v3383_v23 = vld [vmem:[%s10669_s3 + $0xb8] sm:$0xff] }
 0x411   : > { %v2847_v34 = vsel %vm2844_vm13, %v2846_v55, %v2842_v2  ;;  %6855 = vrcp.f32 %v8994_v37  ;;  %v2598_v60 = vpop.f32.mrf.mxu2  ;;  %vm2856_vm0 = vmor %vm2854_vm15, %vm2855_vm14  ;;  %v2873_v55 = vand.u32 2147483647, %v8994_v37  ;;  %3442 = vmatpush.msrb.mxu3 %v3383_v23  ;;  %vm2869_vm3 = vweird.f32 %v8994_v37 }
 0x412   : > { %v8999_v8 = vmul.f32 %v2847_v34, %v8948_v4  ;;  %v2851_v36 = vsub.f32 1.0, %v2850_v53  ;;  %v2599_v41 = vadd.f32 %v8785_v22, %v2598_v60 }
 0x413   : > { %vm2874_vm6 = vcmp.eq.f32.partialorder %v2873_v55, 8.507059e+37 }
 0x414   : > { %v2852_v5 = vmul.f32 %v6852_v29, %v2851_v36  ;;  %v9007_v51 = vadd.f32 %v2599_v41, %v9003_v13  ;;  %v2972_v47 = vsel %vm1167_vm4, %v8999_v8, 0.0  ;;  %v3000_v4 = vmul.f32 %v8999_v8, %v8999_v8 }
 0x415   : > { %2973 = vadd.xlane.f32.xlu1 %v2972_v47 }
 0x416   : > { %v6854_v39 = vpop.eup %6853  ;;  %v2853_v61 = vadd.f32 %v6852_v29, %v2852_v5  ;;  %v6401_v27 = vmul.f32 -1.442695, %v9007_v51  ;;  %v3036_v31 = vsel %vm1167_vm4, %v3000_v4, 0.0 }
 0x417   : > { %v6856_v33 = vpop.eup %6855  ;;  %v9014_v17 = vadd.f32 1.0, %v6854_v39  ;;  %3037 = vadd.xlane.f32.xlu2 %v3036_v31 }
 0x418   : > { %v2857_v49 = vsel %vm2856_vm0, %v6852_v29, %v2853_v61  ;;  %v2865_v15 = vmul.f32 %v6856_v33, %v8994_v37  ;;  %6857 = vpow2.f32 %v6401_v27  ;;  %v3382_v29 = vld [vmem:[%s10669_s3 + $0xb0] sm:$0xff]  ;;  %vm2870_vm2 = vweird.f32 %v6856_v33  ;;  %v3381_v27 = vld [vmem:[%s10669_s3 + $0xa8] sm:$0xff] }
 0x419   : > { %v2862_v40 = vsel %vm2859_vm1, %v2861_v54, %v2857_v49  ;;  %6859 = vrcp.f32 %v9014_v17  ;;  %v2601_v30 = vpop.f32.mrf.mxu2  ;;  %3443 = vmatpush.msrb.mxu3 %v3382_v29  ;;  %vm2871_vm5 = vmor %vm2869_vm3, %vm2870_vm2  ;;  %v2888_v39 = vand.u32 2147483647, %v9014_v17  ;;  %v2890_v61 = vand.u32 2147483648, %v9014_v17 }
 0x41a   : > { %v9020_v14 = vmul.f32 %v2862_v40, %v8965_v50  ;;  %v2866_v18 = vsub.f32 1.0, %v2865_v15  ;;  %v2602_v25 = vadd.f32 %v8785_v22, %v2601_v30  ;;  %v2875_v50 = vand.u32 2147483648, %v8994_v37 }
 0x41b   : > { %3444 = vmatpush.msrb.mxu3 %v3381_v27  ;;  %vm2884_vm8 = vweird.f32 %v9014_v17  ;;  %vm2889_vm10 = vcmp.eq.f32.partialorder %v2888_v39, 8.507059e+37 }
 0x41c   : > { %v2867_v45 = vmul.f32 %v6856_v33, %v2866_v18  ;;  %v9036_v9 = vadd.f32 %v2602_v25, %v9024_v0  ;;  %v2975_v22 = vsel %vm1167_vm4, %v9020_v14, 0.0  ;;  %v3001_v58 = vmul.f32 %v9020_v14, %v9020_v14 }
 0x41d   : > { %2976 = vadd.xlane.f32.xlu0 %v2975_v22  ;;  %v2876_v36 = vor.u32 1.1754944e-38, %v2875_v50  ;;  %v2891_v18 = vor.u32 1.1754944e-38, %v2890_v61  ;;  %v3379_v50 = vld [vmem:[%s10669_s3 + $0x98] sm:$0xff] }
 0x41e   : > { %v6858_v2 = vpop.eup %6857  ;;  %v2868_v53 = vadd.f32 %v6856_v33, %v2867_v45  ;;  %v6402_v34 = vmul.f32 -1.442695, %v9036_v9  ;;  %v3039_v57 = vsel %vm1167_vm4, %v3001_v58, 0.0 }
 0x41f   : > { %v6860_v60 = vpop.eup %6859  ;;  %v2682_v41 = vadd.f32 1.0, %v6858_v2  ;;  %3040 = vadd.xlane.f32.xlu1 %v3039_v57 }
 0x420   : > { %v2872_v21 = vsel %vm2871_vm5, %v6856_v33, %v2868_v53  ;;  %v2880_v5 = vmul.f32 %v6860_v60, %v9014_v17  ;;  %6861 = vpow2.f32 %v6402_v34  ;;  %v3380_v33 = vld [vmem:[%s10669_s3 + $0xa0] sm:$0xff]  ;;  %vm2885_vm7 = vweird.f32 %v6860_v60 }
 0x421   : > { %v2877_v47 = vsel %vm2874_vm6, %v2876_v36, %v2872_v21  ;;  %6863 = vrcp.f32 %v2682_v41  ;;  %3445 = vmatpush.msrb.mxu3 %v3380_v33  ;;  %vm2886_vm9 = vmor %vm2884_vm8, %vm2885_vm7  ;;  %v2905_v53 = vand.u32 2147483648, %v2682_v41  ;;  %v2903_v36 = vand.u32 2147483647, %v2682_v41 }
 0x422   : > { %v9047_v4 = vmul.f32 %v2877_v47, %v8975_v48  ;;  %v2881_v37 = vsub.f32 1.0, %v2880_v5  ;;  %vm2899_vm12 = vweird.f32 %v2682_v41 }
 0x423   : > { %3446 = vmatpush.msrb.mxu3 %v3379_v50  ;;  %v2906_v39 = vor.u32 1.1754944e-38, %v2905_v53  ;;  %vm2904_vm14 = vcmp.eq.f32.partialorder %v2903_v36, 8.507059e+37 }
 0x424   : > { %v2882_v54 = vmul.f32 %v6860_v60, %v2881_v37  ;;  %v2978_v31 = vsel %vm1167_vm4, %v9047_v4, 0.0  ;;  %v3002_v48 = vmul.f32 %v9047_v4, %v9047_v4 }
 0x425   : > { %2979 = vadd.xlane.f32.xlu2 %v2978_v31 }
 0x426   : > { %v6862_v49 = vpop.eup %6861  ;;  %v2883_v15 = vadd.f32 %v6860_v60, %v2882_v54  ;;  %v3042_v40 = vsel %vm1167_vm4, %v3002_v48, 0.0 }
 0x427   : > { %v6864_v30 = vpop.eup %6863  ;;  %v9063_v25 = vadd.f32 1.0, %v6862_v49  ;;  %3043 = vadd.xlane.f32.xlu0 %v3042_v40 }
 0x428   : > { %v2887_v23 = vsel %vm2886_vm9, %v6860_v60, %v2883_v15  ;;  %v2895_v29 = vmul.f32 %v6864_v30, %v2682_v41  ;;  %vm2900_vm11 = vweird.f32 %v6864_v30 }
 0x429   : > { %v2892_v45 = vsel %vm2889_vm10, %v2891_v18, %v2887_v23  ;;  %6865 = vrcp.f32 %v9063_v25  ;;  %vm2901_vm13 = vmor %vm2899_vm12, %vm2900_vm11  ;;  %v2918_v18 = vand.u32 2147483647, %v9063_v25  ;;  %v2920_v23 = vand.u32 2147483648, %v9063_v25 }
 0x42a   : > { %v9070_v17 = vmul.f32 %v2892_v45, %v8987_v1  ;;  %v2896_v22 = vsub.f32 1.0, %v2895_v29  ;;  %vm2914_vm0 = vweird.f32 %v9063_v25 }
 0x42b   : > { %vm2919_vm2 = vcmp.eq.f32.partialorder %v2918_v18, 8.507059e+37 }
 0x42c   : > { %v2944_v55 = vpop.xlane.xlu2 %2943  ;;  %v2897_v60 = vmul.f32 %v6864_v30, %v2896_v22  ;;  %v2981_v21 = vsel %vm1167_vm4, %v9070_v17, 0.0  ;;  %v3003_v5 = vmul.f32 %v9070_v17, %v9070_v17 }
 0x42d   : > { %v9072_v58 = vmul.f32 0.015625, %v2944_v55  ;;  %2982 = vadd.xlane.f32.xlu1 %v2981_v21  ;;  %v3378_v55 = vld [vmem:[%s10669_s3 + $0x90] sm:$0xff] }
 0x42e   : > { %v3008_v2 = vpop.xlane.xlu0 %3007  ;;  %v2898_v1 = vadd.f32 %v6864_v30, %v2897_v60  ;;  %v3045_v61 = vsel %vm1167_vm4, %v3003_v5, 0.0  ;;  %3447 = vmatpush.msrb.mxu3 %v3378_v55 }
 0x42f   : > { %v3070_v34 = vmul.f32 0.015625, %v3008_v2  ;;  %v3086_v57 = vmul.f32 %v9072_v58, %v9072_v58  ;;  %v6866_v37 = vpop.eup %6865  ;;  %3046 = vadd.xlane.f32.xlu2 %v3045_v61 }
 0x430   : > { %v2902_v27 = vsel %vm2901_vm13, %v6864_v30, %v2898_v1  ;;  %v2910_v33 = vmul.f32 %v6866_v37, %v9063_v25  ;;  %vm2915_vm15 = vweird.f32 %v6866_v37  ;;  %v3377_v25 = vld [vmem:[%s10669_s3 + $0x88] sm:$0xff] }
 0x431   : > { %v3102_v47 = vsub.f32 %v3070_v34, %v3086_v57  ;;  %v2907_v48 = vsel %vm2904_vm14, %v2906_v39, %v2902_v27  ;;  %vm2916_vm1 = vmor %vm2914_vm0, %vm2915_vm15  ;;  %v2921_v34 = vor.u32 1.1754944e-38, %v2920_v23  ;;  %v3376_v39 = vld [vmem:[%s10669_s3 + $0x80] sm:$0xff]  ;;  %3448 = vmatpush.msrb.mxu3 %v3377_v25 }
 0x432   : > { %v9085_v15 = vmul.f32 %v2907_v48, %v9007_v51  ;;  %v2911_v41 = vsub.f32 1.0, %v2910_v33 }
 0x433   : > { %v3134_v54 = vadd.f32 0.1, %v3102_v47  ;;  %3449 = vmatpush.msrb.mxu3 %v3376_v39 }
 0x434   : > { %v2947_v31 = vpop.xlane.xlu1 %2946  ;;  %v2912_v50 = vmul.f32 %v6866_v37, %v2911_v41  ;;  %v2984_v51 = vsel %vm1167_vm4, %v9085_v15, 0.0  ;;  %v3004_v45 = vmul.f32 %v9085_v15, %v9085_v15 }
 0x435   : > { %v9082_v49 = vmul.f32 0.015625, %v2947_v31  ;;  %6867 = vrsqrt.f32 %v3134_v54  ;;  %2985 = vadd.xlane.f32.xlu0 %v2984_v51  ;;  %vm3156_vm5 = vweird.f32 %v3134_v54 }
 0x436   : > { %v3011_v40 = vpop.xlane.xlu2 %3010  ;;  %v2913_v2 = vadd.f32 %v6866_v37, %v2912_v50  ;;  %v3048_v53 = vsel %vm1167_vm4, %v3004_v45, 0.0  ;;  %v3118_v50 = vsub.f32 %v8826_v44, %v9072_v58  ;;  %v9130_v44 = vld [vmem:[%s10670_s4 + $0xc] ss:$0 sm:$0xff] }
 0x437   : > { %v3087_v30 = vmul.f32 %v9082_v49, %v9082_v49  ;;  %v3071_v29 = vmul.f32 0.015625, %v3011_v40  ;;  %3049 = vadd.xlane.f32.xlu1 %v3048_v53 }
 0x438   : > { %v2917_v57 = vsel %vm2916_vm1, %v6866_v37, %v2913_v2  ;;  %v9123_v2 = vld [vmem:[%s10670_s4 + $0x7] ss:$0 sm:$0xff] }
 0x439   : > { %v3103_v22 = vsub.f32 %v3071_v29, %v3087_v30  ;;  %v2922_v21 = vsel %vm2919_vm2, %v2921_v34, %v2917_v57 }
 0x43a   : > { %v9101_v1 = vmul.f32 %v2922_v21, %v9036_v9 }
 0x43b   : > { %v3135_v60 = vadd.f32 0.1, %v3103_v22  ;;  %v6868_v36 = vpop.eup %6867 }
 0x43c   : > { %v3151_v5 = vmul.f32 %v6868_v36, %v3134_v54  ;;  %v2987_v37 = vsel %vm1167_vm4, %v9101_v1, 0.0  ;;  %v3005_v9 = vmul.f32 %v9101_v1, %v9101_v1  ;;  %vm3157_vm3 = vweird.f32 %v6868_v36 }
 0x43d   : > { %6869 = vrsqrt.f32 %v3135_v60  ;;  %2988 = vadd.xlane.f32.xlu2 %v2987_v37  ;;  %vm3158_vm6 = vmor %vm3156_vm5, %vm3157_vm3  ;;  %vm3166_vm8 = vweird.f32 %v3135_v60 }
 0x43e   : > { %v2950_v47 = vpop.xlane.xlu0 %2949  ;;  %v3152_v61 = vmul.f32 %v6868_v36, %v3151_v5  ;;  %v3051_v40 = vsel %vm1167_vm4, %v3005_v9, 0.0 }
 0x43f   : > { %v9109_v27 = vmul.f32 0.015625, %v2950_v47  ;;  %3052 = vadd.xlane.f32.xlu0 %v3051_v40 }
 0x440   : > { %v3153_v33 = vmul.f32 0.5, %v3152_v61  ;;  %v3014_v48 = vpop.xlane.xlu1 %3013 }
 0x441   : > { %v3088_v31 = vmul.f32 %v9109_v27, %v9109_v27  ;;  %v3072_v41 = vmul.f32 0.015625, %v3014_v48 }
 0x442   : > { %v3154_v23 = vsub.f32 1.5, %v3153_v33  ;;  %v3119_v33 = vsub.f32 %v8843_v28, %v9082_v49 }
 0x443   : > { %v6870_v18 = vpop.eup %6869  ;;  %v3104_v29 = vsub.f32 %v3072_v41, %v3088_v31 }
 0x444   : > { %v3161_v30 = vmul.f32 %v6870_v18, %v3135_v60  ;;  %v3155_v55 = vmul.f32 %v6868_v36, %v3154_v23  ;;  %v2953_v22 = vpop.xlane.xlu2 %2952  ;;  %vm3167_vm7 = vweird.f32 %v6870_v18 }
 0x445   : > { %v3136_v45 = vadd.f32 0.1, %v3104_v29  ;;  %v9125_v34 = vmul.f32 0.015625, %v2953_v22  ;;  %vm3168_vm9 = vmor %vm3166_vm8, %vm3167_vm7 }
 0x446   : > { %v3162_v51 = vmul.f32 %v6870_v18, %v3161_v30  ;;  %v3159_v53 = vsel %vm3158_vm6, %v6868_v36, %v3155_v55  ;;  %v3017_v21 = vpop.xlane.xlu0 %3016 }
 0x447   : > { %6871 = vrsqrt.f32 %v3136_v45  ;;  %v3310_v5 = vmul.f32 %v3159_v53, %v3118_v50  ;;  %v3089_v58 = vmul.f32 %v9125_v34, %v9125_v34  ;;  %v3073_v54 = vmul.f32 0.015625, %v3017_v21 }
 0x448   : > { %v3163_v57 = vmul.f32 0.5, %v3162_v51  ;;  %vm3176_vm11 = vweird.f32 %v3136_v45 }
 0x449   : > { %v3327_v25 = vmul.f32 %v9123_v2, %v3310_v5  ;;  %v3105_v36 = vsub.f32 %v3073_v54, %v3089_v58  ;;  %v3120_v54 = vsub.f32 %v8860_v7, %v9109_v27 }
 0x44a   : > { %v3164_v47 = vsub.f32 1.5, %v3163_v57 }
 0x44b   : > { %v9136_v61 = vadd.f32 %v9130_v44, %v3327_v25  ;;  %v3137_v37 = vadd.f32 0.1, %v3105_v36 }
 0x44c   : > { %v3165_v39 = vmul.f32 %v6870_v18, %v3164_v47  ;;  %v2956_v31 = vpop.xlane.xlu1 %2955 }
 0x44d   : > { %v6872_v9 = vpop.eup %6871  ;;  %6403 = vmatmul.msk.f32.vlgmr.msrb.gmra.mxu3 %vm1167_vm4, %v9136_v61  ;;  %6873 = vrsqrt.f32 %v3137_v37  ;;  %v9142_v40 = vmul.f32 0.015625, %v2956_v31  ;;  %vm3186_vm14 = vweird.f32 %v3137_v37 }
 0x44e   : > { %v3169_v48 = vsel %vm3168_vm9, %v6870_v18, %v3165_v39  ;;  %v3171_v41 = vmul.f32 %v6872_v9, %v3136_v45  ;;  %v3020_v30 = vpop.xlane.xlu2 %3019  ;;  %vm3177_vm10 = vweird.f32 %v6872_v9 }
 0x44f   : > { %v3311_v23 = vmul.f32 %v3169_v48, %v3119_v33  ;;  %v3090_v29 = vmul.f32 %v9142_v40, %v9142_v40  ;;  %v3074_v55 = vmul.f32 0.015625, %v3020_v30  ;;  %vm3178_vm12 = vmor %vm3176_vm11, %vm3177_vm10 }
 0x450   : > { %v3172_v60 = vmul.f32 %v6872_v9, %v3171_v41 }
 0x451   : > { %v3328_v50 = vmul.f32 %v9123_v2, %v3311_v23  ;;  %v3106_v28 = vsub.f32 %v3074_v55, %v3090_v29  ;;  %v3121_v55 = vsub.f32 %v8877_v46, %v9125_v34 }
 0x452   : > { %v3173_v51 = vmul.f32 0.5, %v3172_v60 }
 0x453   : > { %v9148_v49 = vadd.f32 %v9130_v44, %v3328_v50  ;;  %v6874_v22 = vpop.eup %6873  ;;  %v3138_v57 = vadd.f32 0.1, %v3106_v28 }
 0x454   : > { %v3174_v18 = vsub.f32 1.5, %v3173_v51  ;;  %v3181_v53 = vmul.f32 %v6874_v22, %v3137_v37  ;;  %v2959_v21 = vpop.xlane.xlu0 %2958  ;;  %vm3187_vm13 = vweird.f32 %v6874_v22 }
 0x455   : > { %6404 = vmatmul.msk.f32.gmra.mxu3 %vm1167_vm4, %v9148_v49  ;;  %v9152_v58 = vmul.f32 0.015625, %v2959_v21  ;;  %6875 = vrsqrt.f32 %v3138_v57  ;;  %vm3188_vm15 = vmor %vm3186_vm14, %vm3187_vm13  ;;  %vm3196_vm1 = vweird.f32 %v3138_v57 }
 0x456   : > { %v3175_v5 = vmul.f32 %v6872_v9, %v3174_v18  ;;  %v3182_v47 = vmul.f32 %v6874_v22, %v3181_v53  ;;  %v3023_v25 = vpop.xlane.xlu1 %3022 }
 0x457   : > { %v3091_v36 = vmul.f32 %v9152_v58, %v9152_v58  ;;  %v3075_v39 = vmul.f32 0.015625, %v3023_v25 }
 0x458   : > { %v3179_v33 = vsel %vm3178_vm12, %v6872_v9, %v3175_v5  ;;  %v3183_v31 = vmul.f32 0.5, %v3182_v47 }
 0x459   : > { %v3312_v48 = vmul.f32 %v3179_v33, %v3120_v54  ;;  %v3107_v41 = vsub.f32 %v3075_v39, %v3091_v36 }
 0x45a   : > { %v3184_v23 = vsub.f32 1.5, %v3183_v31 }
 0x45b   : > { %v3329_v45 = vmul.f32 %v9123_v2, %v3312_v48  ;;  %v3139_v60 = vadd.f32 0.1, %v3107_v41  ;;  %v6876_v30 = vpop.eup %6875 }
 0x45c   : > { %v3185_v29 = vmul.f32 %v6874_v22, %v3184_v23  ;;  %v2962_v7 = vpop.xlane.xlu2 %2961  ;;  %v3191_v9 = vmul.f32 %v6876_v30, %v3138_v57  ;;  %vm3197_vm0 = vweird.f32 %v6876_v30 }
 0x45d   : > { %v9160_v27 = vadd.f32 %v9130_v44, %v3329_v45  ;;  %6877 = vrsqrt.f32 %v3139_v60  ;;  %v9164_v50 = vmul.f32 0.015625, %v2962_v7  ;;  %vm3198_vm2 = vmor %vm3196_vm1, %vm3197_vm0  ;;  %vm3206_vm5 = vweird.f32 %v3139_v60 }
 0x45e   : > { %v3026_v51 = vpop.xlane.xlu0 %3025  ;;  %v3189_v28 = vsel %vm3188_vm15, %v6874_v22, %v3185_v29  ;;  %v3192_v18 = vmul.f32 %v6876_v30, %v3191_v9  ;;  %v3122_v22 = vsub.f32 %v8893_v12, %v9142_v40 }
 0x45f   : > { %6405 = vmatmul.msk.f32.gmra.mxu3 %vm1167_vm4, %v9160_v27  ;;  %v3076_v53 = vmul.f32 0.015625, %v3026_v51  ;;  %v3313_v37 = vmul.f32 %v3189_v28, %v3121_v55  ;;  %v3092_v21 = vmul.f32 %v9164_v50, %v9164_v50 }
 0x460   : > { %v3193_v5 = vmul.f32 0.5, %v3192_v18 }
 0x461   : > { %v3330_v54 = vmul.f32 %v9123_v2, %v3313_v37  ;;  %v3108_v46 = vsub.f32 %v3076_v53, %v3092_v21 }
 0x462   : > { %v3194_v47 = vsub.f32 1.5, %v3193_v5 }
 0x463   : > { %v6878_v34 = vpop.eup %6877  ;;  %v9172_v25 = vadd.f32 %v9130_v44, %v3330_v54  ;;  %v3140_v39 = vadd.f32 0.1, %v3108_v46 }
 0x464   : > { %v3201_v36 = vmul.f32 %v6878_v34, %v3139_v60  ;;  %v3195_v33 = vmul.f32 %v6876_v30, %v3194_v47  ;;  %vm3207_vm3 = vweird.f32 %v6878_v34 }
 0x465   : > { %6879 = vrsqrt.f32 %v3140_v39  ;;  %vm3208_vm6 = vmor %vm3206_vm5, %vm3207_vm3  ;;  %vm3216_vm8 = vweird.f32 %v3140_v39 }
 0x466   : > { %v3202_v31 = vmul.f32 %v6878_v34, %v3201_v36  ;;  %v3199_v48 = vsel %vm3198_vm2, %v6876_v30, %v3195_v33  ;;  %v3123_v30 = vsub.f32 %v8910_v16, %v9152_v58 }
 0x467   : > { %6406 = vmatmul.msk.f32.gmra.mxu3 %vm1167_vm4, %v9172_v25  ;;  %v3314_v45 = vmul.f32 %v3199_v48, %v3122_v22 }
 0x468   : > { %v3203_v41 = vmul.f32 0.5, %v3202_v31 }
 0x469   : > { %v3331_v9 = vmul.f32 %v9123_v2, %v3314_v45 }
 0x46a   : > { %v2965_v23 = vpop.xlane.xlu1 %2964  ;;  %v3204_v7 = vsub.f32 1.5, %v3203_v41  ;;  %v3124_v41 = vsub.f32 %v8919_v42, %v9164_v50 }
 0x46b   : > { %v3061_v29 = vmul.f32 0.015625, %v2965_v23  ;;  %v6880_v28 = vpop.eup %6879  ;;  %v9180_v40 = vadd.f32 %v9130_v44, %v3331_v9 }
 0x46c   : > { %v3029_v55 = vpop.xlane.xlu2 %3028  ;;  %v3205_v12 = vmul.f32 %v6878_v34, %v3204_v7  ;;  %v3211_v18 = vmul.f32 %v6880_v28, %v3140_v39  ;;  %vm3217_vm7 = vweird.f32 %v6880_v28 }
 0x46d   : > { %v3093_v57 = vmul.f32 %v3061_v29, %v3061_v29  ;;  %v3077_v51 = vmul.f32 0.015625, %v3029_v55  ;;  %vm3218_vm9 = vmor %vm3216_vm8, %vm3217_vm7 }
 0x46e   : > { %v3209_v37 = vsel %vm3208_vm6, %v6878_v34, %v3205_v12  ;;  %v3212_v21 = vmul.f32 %v6880_v28, %v3211_v18 }
 0x46f   : > { %v3109_v53 = vsub.f32 %v3077_v51, %v3093_v57  ;;  %6407 = vmatmul.msk.f32.gmra.mxu3 %vm1167_vm4, %v9180_v40  ;;  %v3315_v54 = vmul.f32 %v3209_v37, %v3123_v30 }
 0x470   : > { %v3213_v47 = vmul.f32 0.5, %v3212_v21 }
 0x471   : > { %v3141_v5 = vadd.f32 0.1, %v3109_v53  ;;  %v3332_v33 = vmul.f32 %v9123_v2, %v3315_v54 }
 0x472   : > { %v2968_v46 = vpop.xlane.xlu0 %2967  ;;  %v3214_v22 = vsub.f32 1.5, %v3213_v47 }
 0x473   : > { %6881 = vrsqrt.f32 %v3141_v5  ;;  %v3062_v60 = vmul.f32 0.015625, %v2968_v46  ;;  %v9188_v31 = vadd.f32 %v9130_v44, %v3332_v33  ;;  %vm3226_vm11 = vweird.f32 %v3141_v5 }
 0x474   : > { %v3032_v36 = vpop.xlane.xlu1 %3031  ;;  %v3215_v48 = vmul.f32 %v6880_v28, %v3214_v22 }
 0x475   : > { %v3094_v16 = vmul.f32 %v3062_v60, %v3062_v60  ;;  %v3078_v58 = vmul.f32 0.015625, %v3032_v36 }
 0x476   : > { %v3219_v7 = vsel %vm3218_vm9, %v6880_v28, %v3215_v48  ;;  %v3125_v28 = vsub.f32 %v8936_v56, %v3061_v29  ;;  %v3126_v29 = vsub.f32 %v8953_v59, %v3062_v60 }
 0x477   : > { %v3110_v34 = vsub.f32 %v3078_v58, %v3094_v16  ;;  %6408 = vmatmul.msk.f32.gmra.mxu3 %vm1167_vm4, %v9188_v31  ;;  %v3316_v9 = vmul.f32 %v3219_v7, %v3124_v41 }
 0x479   : > { %v6882_v23 = vpop.eup %6881  ;;  %v3142_v45 = vadd.f32 0.1, %v3110_v34  ;;  %v3333_v51 = vmul.f32 %v9123_v2, %v3316_v9 }
 0x47a   : > { %v3221_v55 = vmul.f32 %v6882_v23, %v3141_v5  ;;  %vm3227_vm10 = vweird.f32 %v6882_v23 }
 0x47b   : > { %6883 = vrsqrt.f32 %v3142_v45  ;;  %v9196_v39 = vadd.f32 %v9130_v44, %v3333_v51  ;;  %vm3228_vm12 = vmor %vm3226_vm11, %vm3227_vm10  ;;  %vm3236_vm14 = vweird.f32 %v3142_v45 }
 0x47c   : > { %v3222_v57 = vmul.f32 %v6882_v23, %v3221_v55 }
 0x47e   : > { %v3223_v12 = vmul.f32 0.5, %v3222_v57 }
 0x47f   : > { %6409 = vmatmul.msk.f32.gmra.mxu3 %vm1167_vm4, %v9196_v39 }
 0x480   : > { %v3224_v30 = vsub.f32 1.5, %v3223_v12  ;;  %v2971_v37 = vpop.xlane.xlu2 %2970 }
 0x481   : > { %v6884_v42 = vpop.eup %6883  ;;  %v3063_v54 = vmul.f32 0.015625, %v2971_v37 }
 0x482   : > { %v3225_v50 = vmul.f32 %v6882_v23, %v3224_v30  ;;  %v3231_v18 = vmul.f32 %v6884_v42, %v3142_v45  ;;  %v3035_v33 = vpop.xlane.xlu0 %3034  ;;  %vm3237_vm13 = vweird.f32 %v6884_v42 }
 0x483   : > { %v3095_v36 = vmul.f32 %v3063_v54, %v3063_v54  ;;  %v3079_v58 = vmul.f32 0.015625, %v3035_v33  ;;  %vm3238_vm15 = vmor %vm3236_vm14, %vm3237_vm13 }
 0x484   : > { %v3232_v53 = vmul.f32 %v6884_v42, %v3231_v18  ;;  %v3229_v21 = vsel %vm3228_vm12, %v6882_v23, %v3225_v50 }
 0x485   : > { %v3317_v46 = vmul.f32 %v3229_v21, %v3125_v28  ;;  %v3111_v56 = vsub.f32 %v3079_v58, %v3095_v36 }
 0x486   : > { %v3233_v47 = vmul.f32 0.5, %v3232_v53 }
 0x487   : > { %v3334_v22 = vmul.f32 %v9123_v2, %v3317_v46  ;;  %v3143_v34 = vadd.f32 0.1, %v3111_v56 }
 0x488   : > { %v3234_v16 = vsub.f32 1.5, %v3233_v47  ;;  %v2974_v41 = vpop.xlane.xlu1 %2973 }
 0x489   : > { %v9203_v48 = vadd.f32 %v9130_v44, %v3334_v22  ;;  %v9208_v7 = vmul.f32 0.015625, %v2974_v41  ;;  %6885 = vrsqrt.f32 %v3143_v34  ;;  %vm3246_vm1 = vweird.f32 %v3143_v34 }
 0x48a   : > { %v3235_v5 = vmul.f32 %v6884_v42, %v3234_v16  ;;  %v3038_v57 = vpop.xlane.xlu2 %3037  ;;  %v3127_v41 = vsub.f32 %v8979_v26, %v3063_v54 }
 0x48b   : > { %6410 = vmatmul.msk.f32.gmra.mxu3 %vm1167_vm4, %v9203_v48  ;;  %v3096_v9 = vmul.f32 %v9208_v7, %v9208_v7  ;;  %v3080_v51 = vmul.f32 0.015625, %v3038_v57  ;;  %v3128_v54 = vsub.f32 %v8999_v8, %v9208_v7 }
 0x48c   : > { %v3239_v23 = vsel %vm3238_vm15, %v6884_v42, %v3235_v5 }
 0x48d   : > { %v3318_v55 = vmul.f32 %v3239_v23, %v3126_v29  ;;  %v3112_v60 = vsub.f32 %v3080_v51, %v3096_v9 }
 0x48f   : > { %v3335_v45 = vmul.f32 %v9123_v2, %v3318_v55  ;;  %v6886_v12 = vpop.eup %6885  ;;  %v3144_v30 = vadd.f32 0.1, %v3112_v60 }
 0x490   : > { %v2977_v42 = vpop.xlane.xlu0 %2976  ;;  %v3241_v50 = vmul.f32 %v6886_v12, %v3143_v34  ;;  %vm3247_vm0 = vweird.f32 %v6886_v12 }
 0x491   : > { %v9214_v59 = vadd.f32 %v9130_v44, %v3335_v45  ;;  %v9218_v18 = vmul.f32 0.015625, %v2977_v42  ;;  %6887 = vrsqrt.f32 %v3144_v30  ;;  %vm3248_vm2 = vmor %vm3246_vm1, %vm3247_vm0  ;;  %vm3256_vm5 = vweird.f32 %v3144_v30 }
 0x492   : > { %v3242_v28 = vmul.f32 %v6886_v12, %v3241_v50  ;;  %v3041_v37 = vpop.xlane.xlu1 %3040 }
 0x493   : > { %6411 = vmatmul.msk.f32.gmra.mxu3 %vm1167_vm4, %v9214_v59  ;;  %v3097_v53 = vmul.f32 %v9218_v18, %v9218_v18  ;;  %v3081_v21 = vmul.f32 0.015625, %v3041_v37 }
 0x494   : > { %v3243_v46 = vmul.f32 0.5, %v3242_v28 }
 0x495   : > { %v3113_v47 = vsub.f32 %v3081_v21, %v3097_v53 }
 0x496   : > { %v3244_v36 = vsub.f32 1.5, %v3243_v46 }
 0x497   : > { %v6888_v33 = vpop.eup %6887  ;;  %v3145_v22 = vadd.f32 0.1, %v3113_v47 }
 0x498   : > { %v2980_v16 = vpop.xlane.xlu2 %2979  ;;  %v3245_v58 = vmul.f32 %v6886_v12, %v3244_v36  ;;  %v3251_v5 = vmul.f32 %v6888_v33, %v3144_v30  ;;  %vm3257_vm3 = vweird.f32 %v6888_v33 }
 0x499   : > { %v9222_v56 = vmul.f32 0.015625, %v2980_v16  ;;  %6889 = vrsqrt.f32 %v3145_v22  ;;  %vm3258_vm6 = vmor %vm3256_vm5, %vm3257_vm3  ;;  %vm3266_vm8 = vweird.f32 %v3145_v22 }
 0x49a   : > { %v3044_v29 = vpop.xlane.xlu0 %3043  ;;  %v3252_v23 = vmul.f32 %v6888_v33, %v3251_v5  ;;  %v3249_v57 = vsel %vm3248_vm2, %v6886_v12, %v3245_v58 }
 0x49b   : > { %v3098_v55 = vmul.f32 %v9222_v56, %v9222_v56  ;;  %v3082_v9 = vmul.f32 0.015625, %v3044_v29  ;;  %v3319_v60 = vmul.f32 %v3249_v57, %v3127_v41 }
 0x49c   : > { %v3253_v45 = vmul.f32 0.5, %v3252_v23 }
 0x49d   : > { %v3114_v51 = vsub.f32 %v3082_v9, %v3098_v55  ;;  %v3336_v28 = vmul.f32 %v9123_v2, %v3319_v60 }
 0x49e   : > { %v3254_v42 = vsub.f32 1.5, %v3253_v45 }
 0x49f   : > { %v3146_v50 = vadd.f32 0.1, %v3114_v51  ;;  %v6890_v34 = vpop.eup %6889  ;;  %v9233_v12 = vadd.f32 %v9130_v44, %v3336_v28  ;;  %v3129_v51 = vsub.f32 %v9020_v14, %v9218_v18 }
 0x4a0   : > { %v3255_v53 = vmul.f32 %v6888_v33, %v3254_v42  ;;  %v3261_v37 = vmul.f32 %v6890_v34, %v3145_v22  ;;  %v2983_v26 = vpop.xlane.xlu1 %2982  ;;  %vm3267_vm7 = vweird.f32 %v6890_v34 }
 0x4a1   : > { %6891 = vrsqrt.f32 %v3146_v50  ;;  %v9230_v21 = vmul.f32 0.015625, %v2983_v26  ;;  %6412 = vmatmul.msk.f32.gmra.mxu3 %vm1167_vm4, %v9233_v12  ;;  %vm3268_vm9 = vmor %vm3266_vm8, %vm3267_vm7  ;;  %vm3276_vm11 = vweird.f32 %v3146_v50 }
 0x4a2   : > { %v3262_v46 = vmul.f32 %v6890_v34, %v3261_v37  ;;  %v3047_v47 = vpop.xlane.xlu2 %3046  ;;  %v3259_v36 = vsel %vm3258_vm6, %v6888_v33, %v3255_v53 }
 0x4a3   : > { %v3099_v16 = vmul.f32 %v9230_v21, %v9230_v21  ;;  %v3083_v30 = vmul.f32 0.015625, %v3047_v47  ;;  %v3320_v58 = vmul.f32 %v3259_v36, %v3128_v54 }
 0x4a4   : > { %v3263_v5 = vmul.f32 0.5, %v3262_v46 }
 0x4a5   : > { %v3115_v29 = vsub.f32 %v3083_v30, %v3099_v16  ;;  %v3337_v8 = vmul.f32 %v9123_v2, %v3320_v58 }
 0x4a6   : > { %v3264_v41 = vsub.f32 1.5, %v3263_v5 }
 0x4a7   : > { %v6892_v7 = vpop.eup %6891  ;;  %v3147_v55 = vadd.f32 0.1, %v3115_v29  ;;  %v9241_v33 = vadd.f32 %v9130_v44, %v3337_v8 }
 0x4a8   : > { %v3271_v23 = vmul.f32 %v6892_v7, %v3146_v50  ;;  %v2986_v9 = vpop.xlane.xlu0 %2985  ;;  %v3265_v57 = vmul.f32 %v6890_v34, %v3264_v41  ;;  %vm3277_vm10 = vweird.f32 %v6892_v7 }
 0x4a9   : > { %v9243_v45 = vmul.f32 0.015625, %v2986_v9  ;;  %6893 = vrsqrt.f32 %v3147_v55  ;;  %6413 = vmatmul.msk.f32.gmra.mxu3 %vm1167_vm4, %v9241_v33  ;;  %vm3278_vm12 = vmor %vm3276_vm11, %vm3277_vm10  ;;  %vm3286_vm14 = vweird.f32 %v3147_v55 }
 0x4aa   : > { %v3272_v60 = vmul.f32 %v6892_v7, %v3271_v23  ;;  %v3050_v42 = vpop.xlane.xlu1 %3049  ;;  %v3269_v37 = vsel %vm3268_vm9, %v6890_v34, %v3265_v57  ;;  %v3130_v34 = vsub.f32 %v9047_v4, %v9222_v56 }
 0x4ab   : > { %v3100_v28 = vmul.f32 %v9243_v45, %v9243_v45  ;;  %v3084_v53 = vmul.f32 0.015625, %v3050_v42  ;;  %v3321_v54 = vmul.f32 %v3269_v37, %v3129_v51  ;;  %v3131_v37 = vsub.f32 %v9070_v17, %v9230_v21 }
 0x4ac   : > { %v3273_v26 = vmul.f32 0.5, %v3272_v60  ;;  %v3132_v17 = vsub.f32 %v9085_v15, %v9243_v45  ;;  %v9283_v45 = vld [vmem:[%s10670_s4 + $0x3] ss:$0 sm:$0xff] }
 0x4ad   : > { %v3116_v22 = vsub.f32 %v3084_v53, %v3100_v28  ;;  %v3338_v47 = vmul.f32 %v9123_v2, %v3321_v54 }
 0x4ae   : > { %v3274_v46 = vsub.f32 1.5, %v3273_v26 }
 0x4af   : > { %v3148_v14 = vadd.f32 0.1, %v3116_v22  ;;  %v6894_v18 = vpop.eup %6893  ;;  %v9253_v30 = vadd.f32 %v9130_v44, %v3338_v47 }
 0x4b0   : > { %v3275_v36 = vmul.f32 %v6892_v7, %v3274_v46  ;;  %v2989_v16 = vpop.xlane.xlu2 %2988  ;;  %v3281_v58 = vmul.f32 %v6894_v18, %v3147_v55  ;;  %vm3287_vm13 = vweird.f32 %v6894_v18 }
 0x4b1   : > { %6895 = vrsqrt.f32 %v3148_v14  ;;  %v3069_v5 = vmul.f32 0.015625, %v2989_v16  ;;  %6414 = vmatmul.msk.f32.gmra.mxu3 %vm1167_vm4, %v9253_v30  ;;  %vm3288_vm15 = vmor %vm3286_vm14, %vm3287_vm13  ;;  %vm3296_vm1 = vweird.f32 %v3148_v14 }
 0x4b2   : > { %v3053_v29 = vpop.xlane.xlu0 %3052  ;;  %v3279_v8 = vsel %vm3278_vm12, %v6892_v7, %v3275_v36  ;;  %v3282_v41 = vmul.f32 %v6894_v18, %v3281_v58 }
 0x4b3   : > { %v3085_v23 = vmul.f32 0.015625, %v3053_v29  ;;  %v3322_v9 = vmul.f32 %v3279_v8, %v3130_v34  ;;  %v3101_v57 = vmul.f32 %v3069_v5, %v3069_v5  ;;  %v3133_v15 = vsub.f32 %v9101_v1, %v3069_v5 }
 0x4b4   : > { %v3283_v50 = vmul.f32 0.5, %v3282_v41 }
 0x4b5   : > { %v3339_v51 = vmul.f32 %v9123_v2, %v3322_v9  ;;  %v3117_v60 = vsub.f32 %v3085_v23, %v3101_v57 }
 0x4b6   : > { %v3284_v28 = vsub.f32 1.5, %v3283_v50 }
 0x4b7   : > { %v6896_v42 = vpop.eup %6895  ;;  %v3149_v56 = vadd.f32 0.1, %v3117_v60  ;;  %v9261_v53 = vadd.f32 %v9130_v44, %v3339_v51  ;;  %v9289_v60 = vadd.f32 %v9136_v61, %v8790_v3 }
 0x4b8   : > { %v3291_v4 = vmul.f32 %v6896_v42, %v3148_v14  ;;  %v3285_v7 = vmul.f32 %v6894_v18, %v3284_v28  ;;  %vm3297_vm0 = vweird.f32 %v6896_v42 }
 0x4b9   : > { %6897 = vrsqrt.f32 %v3149_v56  ;;  %6415 = vmatmul.msk.f32.gmra.mxu3 %vm1167_vm4, %v9261_v53  ;;  %vm3298_vm2 = vmor %vm3296_vm1, %vm3297_vm0  ;;  %vm3306_vm5 = vweird.f32 %v3149_v56 }
 0x4ba   : > { %v3292_v26 = vmul.f32 %v6896_v42, %v3291_v4  ;;  %v3289_v54 = vsel %vm3288_vm15, %v6894_v18, %v3285_v7  ;;  %v9301_v7 = vadd.f32 %v9148_v49, %v8801_v10 }
 0x4bb   : > { %v3323_v46 = vmul.f32 %v3289_v54, %v3131_v37  ;;  %v9310_v54 = vadd.f32 %v9160_v27, %v8810_v63 }
 0x4bc   : > { %v3293_v22 = vmul.f32 0.5, %v3292_v26 }
 0x4bd   : > { %v3340_v36 = vmul.f32 %v9123_v2, %v3323_v46 }
 0x4be   : > { %v3294_v47 = vsub.f32 1.5, %v3293_v22 }
 0x4bf   : > { %v6898_v16 = vpop.eup %6897  ;;  %v9269_v55 = vadd.f32 %v9130_v44, %v3340_v36 }
 0x4c0   : > { %v3295_v34 = vmul.f32 %v6896_v42, %v3294_v47  ;;  %v3301_v21 = vmul.f32 %v6898_v16, %v3149_v56  ;;  %vm3307_vm3 = vweird.f32 %v6898_v16 }
 0x4c1   : > { %6416 = vmatmul.msk.f32.gmra.mxu3 %vm1167_vm4, %v9269_v55  ;;  %vm3308_vm6 = vmor %vm3306_vm5, %vm3307_vm3 }
 0x4c2   : > { %v3299_v18 = vsel %vm3298_vm2, %v6896_v42, %v3295_v34  ;;  %v3302_v58 = vmul.f32 %v6898_v16, %v3301_v21  ;;  %v9319_v21 = vadd.f32 %v9172_v25, %v8819_v11 }
 0x4c3   : > { %v3324_v29 = vmul.f32 %v3299_v18, %v3132_v17 }
 0x4c4   : > { %v3303_v8 = vmul.f32 0.5, %v3302_v58 }
 0x4c5   : > { %v3341_v41 = vmul.f32 %v9123_v2, %v3324_v29 }
 0x4c6   : > { %v3304_v23 = vsub.f32 1.5, %v3303_v8 }
 0x4c7   : > { %v9277_v14 = vadd.f32 %v9130_v44, %v3341_v41 }
 0x4c8   : > { %v3305_v9 = vmul.f32 %v6898_v16, %v3304_v23 }
 0x4c9   : > { %6417 = vmatmul.msk.f32.gmra.mxu3 %vm1167_vm4, %v9277_v14 }
 0x4ca   : > { %v3309_v57 = vsel %vm3308_vm6, %v6898_v16, %v3305_v9 }
 0x4cb   : > { %v3325_v50 = vmul.f32 %v3309_v57, %v3133_v15 }
 0x4cd   : > { %v3342_v1 = vmul.f32 %v9123_v2, %v3325_v50 }
 0x4cf   : > { %v9295_v28 = vadd.f32 %v9130_v44, %v3342_v1  ;;  %v9330_v1 = vadd.f32 %v9180_v40, %v8830_v38 }
 0x4d0   : > { %v3451_v51 = vpop.f32.mrf.mxu3 }
 0x4d1   : > { %v3452_v42 = vadd.f32 %v9283_v45, %v3451_v51  ;;  %6418 = vmatmul.msk.f32.gmra.mxu3 %vm1167_vm4, %v9295_v28 }
 0x4d3   : > { %v3499_v5 = vadd.f32 %v3452_v42, %v9289_v60 }
 0x4d5   : > { %v6419_v4 = vmul.f32 -1.442695, %v3499_v5 }
 0x4d7   : > { %6899 = vpow2.f32 %v6419_v4 }
 0x4d8   : > { %v3454_v56 = vpop.f32.mrf.mxu3 }
 0x4d9   : > { %v3455_v3 = vadd.f32 %v9283_v45, %v3454_v56 }
 0x4db   : > { %v9305_v61 = vadd.f32 %v3455_v3, %v9301_v7 }
 0x4dd   : > { %v6900_v2 = vpop.eup %6899  ;;  %v6420_v37 = vmul.f32 -1.442695, %v9305_v61 }
 0x4de   : > { %v3563_v44 = vadd.f32 1.0, %v6900_v2 }
 0x4df   : > { %6901 = vpow2.f32 %v6420_v37 }
 0x4e0   : > { %6903 = vrcp.f32 %v3563_v44  ;;  %v3590_v17 = vand.u32 2147483648, %v3563_v44  ;;  %v3588_v18 = vand.u32 2147483647, %v3563_v44  ;;  %vm3584_vm8 = vweird.f32 %v3563_v44 }
 0x4e2   : > { %v3457_v26 = vpop.f32.mrf.mxu3  ;;  %v3591_v23 = vor.u32 1.1754944e-38, %v3590_v17  ;;  %vm3589_vm10 = vcmp.eq.f32.partialorder %v3588_v18, 8.507059e+37 }
 0x4e3   : > { %v3458_v22 = vadd.f32 %v9283_v45, %v3457_v26 }
 0x4e5   : > { %v6902_v10 = vpop.eup %6901  ;;  %v9314_v49 = vadd.f32 %v3458_v22, %v9310_v54 }
 0x4e6   : > { %v6904_v46 = vpop.eup %6903  ;;  %v3564_v47 = vadd.f32 1.0, %v6902_v10 }
 0x4e7   : > { %v3580_v36 = vmul.f32 %v6904_v46, %v3563_v44  ;;  %v6421_v16 = vmul.f32 -1.442695, %v9314_v49  ;;  %vm3585_vm7 = vweird.f32 %v6904_v46 }
 0x4e8   : > { %6905 = vrcp.f32 %v3564_v47  ;;  %vm3586_vm9 = vmor %vm3584_vm8, %vm3585_vm7  ;;  %v3603_v4 = vand.u32 2147483647, %v3564_v47  ;;  %v3605_v56 = vand.u32 2147483648, %v3564_v47  ;;  %vm3599_vm12 = vweird.f32 %v3564_v47 }
 0x4e9   : > { %v3581_v34 = vsub.f32 1.0, %v3580_v36  ;;  %6907 = vpow2.f32 %v6421_v16 }
 0x4ea   : > { %v3460_v63 = vpop.f32.mrf.mxu3  ;;  %v3606_v22 = vor.u32 1.1754944e-38, %v3605_v56  ;;  %vm3604_vm14 = vcmp.eq.f32.partialorder %v3603_v4, 8.507059e+37 }
 0x4eb   : > { %v3582_v27 = vmul.f32 %v6904_v46, %v3581_v34  ;;  %v3461_v58 = vadd.f32 %v9283_v45, %v3460_v63 }
 0x4ed   : > { %v3583_v29 = vadd.f32 %v6904_v46, %v3582_v27  ;;  %v9323_v8 = vadd.f32 %v3461_v58, %v9319_v21  ;;  %v9347_v27 = vadd.f32 %v9188_v31, %v8847_v20 }
 0x4ee   : > { %v6906_v41 = vpop.eup %6905 }
 0x4ef   : > { %v6908_v9 = vpop.eup %6907  ;;  %v3587_v15 = vsel %vm3586_vm9, %v6904_v46, %v3583_v29  ;;  %v3595_v57 = vmul.f32 %v6906_v41, %v3564_v47  ;;  %v6422_v11 = vmul.f32 -1.442695, %v9323_v8  ;;  %vm3600_vm11 = vweird.f32 %v6906_v41 }
 0x4f0   : > { %v3592_v25 = vsel %vm3589_vm10, %v3591_v23, %v3587_v15  ;;  %v3565_v50 = vadd.f32 1.0, %v6908_v9  ;;  %vm3601_vm13 = vmor %vm3599_vm12, %vm3600_vm11 }
 0x4f1   : > { %v9326_v51 = vmul.f32 %v3592_v25, %v3499_v5  ;;  %v3596_v42 = vsub.f32 1.0, %v3595_v57  ;;  %6909 = vpow2.f32 %v6422_v11 }
 0x4f2   : > { %6911 = vrcp.f32 %v3565_v50  ;;  %v3463_v3 = vpop.f32.mrf.mxu3  ;;  %v3618_v9 = vand.u32 2147483647, %v3565_v50  ;;  %vm3614_vm0 = vweird.f32 %v3565_v50 }
 0x4f3   : > { %v3597_v2 = vmul.f32 %v6906_v41, %v3596_v42  ;;  %v3464_v37 = vadd.f32 %v9283_v45, %v3463_v3  ;;  %v3837_v44 = vsel %vm1167_vm4, %v9326_v51, 0.0  ;;  %v3885_v5 = vmul.f32 %v9326_v51, %v9326_v51 }
 0x4f4   : > { %3838 = vadd.xlane.f32.xlu1 %v3837_v44  ;;  %vm3619_vm2 = vcmp.eq.f32.partialorder %v3618_v9, 8.507059e+37 }
 0x4f5   : > { %v3598_v26 = vadd.f32 %v6906_v41, %v3597_v2  ;;  %v9338_v38 = vadd.f32 %v3464_v37, %v9330_v1  ;;  %v3901_v40 = vsel %vm1167_vm4, %v3885_v5, 0.0 }
 0x4f6   : > { %3902 = vadd.xlane.f32.xlu2 %v3901_v40 }
 0x4f7   : > { %v6910_v10 = vpop.eup %6909  ;;  %v3602_v46 = vsel %vm3601_vm13, %v6906_v41, %v3598_v26  ;;  %v6423_v36 = vmul.f32 -1.442695, %v9338_v38 }
 0x4f8   : > { %v6912_v16 = vpop.eup %6911  ;;  %v3607_v34 = vsel %vm3604_vm14, %v3606_v22, %v3602_v46  ;;  %v3566_v17 = vadd.f32 1.0, %v6910_v10 }
 0x4f9   : > { %v9343_v63 = vmul.f32 %v3607_v34, %v9305_v61  ;;  %v3610_v47 = vmul.f32 %v6912_v16, %v3565_v50  ;;  %6913 = vpow2.f32 %v6423_v36  ;;  %v3620_v61 = vand.u32 2147483648, %v3565_v50 }
 0x4fa   : > { %6915 = vrcp.f32 %v3566_v17  ;;  %v3466_v18 = vpop.f32.mrf.mxu3  ;;  %vm3615_vm15 = vweird.f32 %v6912_v16  ;;  %v9364_v50 = vadd.f32 %v9196_v39, %v8864_v24  ;;  %v3633_v22 = vand.u32 2147483647, %v3566_v17 }
 0x4fb   : > { %v3611_v58 = vsub.f32 1.0, %v3610_v47  ;;  %v3467_v29 = vadd.f32 %v9283_v45, %v3466_v18  ;;  %v3840_v41 = vsel %vm1167_vm4, %v9343_v63, 0.0  ;;  %v3886_v23 = vmul.f32 %v9343_v63, %v9343_v63  ;;  %vm3616_vm1 = vmor %vm3614_vm0, %vm3615_vm15 }
 0x4fc   : > { %3841 = vadd.xlane.f32.xlu0 %v3840_v41  ;;  %v3621_v4 = vor.u32 1.1754944e-38, %v3620_v61  ;;  %v3635_v10 = vand.u32 2147483648, %v3566_v17  ;;  %vm3629_vm5 = vweird.f32 %v3566_v17  ;;  %vm3634_vm7 = vcmp.eq.f32.partialorder %v3633_v22, 8.507059e+37 }
 0x4fd   : > { %v3612_v15 = vmul.f32 %v6912_v16, %v3611_v58  ;;  %v9355_v57 = vadd.f32 %v3467_v29, %v9347_v27  ;;  %v3904_v20 = vsel %vm1167_vm4, %v3886_v23, 0.0 }
 0x4fe   : > { %3905 = vadd.xlane.f32.xlu1 %v3904_v20  ;;  %v3636_v18 = vor.u32 1.1754944e-38, %v3635_v10 }
 0x4ff   : > { %v6914_v31 = vpop.eup %6913  ;;  %v3613_v11 = vadd.f32 %v6912_v16, %v3612_v15  ;;  %v6424_v25 = vmul.f32 -1.442695, %v9355_v57 }
 0x500   : > { %v6916_v42 = vpop.eup %6915  ;;  %v3567_v56 = vadd.f32 1.0, %v6914_v31 }
 0x501   : > { %v3617_v3 = vsel %vm3616_vm1, %v6912_v16, %v3613_v11  ;;  %v3625_v2 = vmul.f32 %v6916_v42, %v3566_v17  ;;  %6917 = vpow2.f32 %v6424_v25  ;;  %vm3630_vm3 = vweird.f32 %v6916_v42 }
 0x502   : > { %v3622_v37 = vsel %vm3619_vm2, %v3621_v4, %v3617_v3  ;;  %6919 = vrcp.f32 %v3567_v56  ;;  %v3469_v44 = vpop.f32.mrf.mxu3  ;;  %vm3631_vm6 = vmor %vm3629_vm5, %vm3630_vm3  ;;  %v3648_v17 = vand.u32 2147483647, %v3567_v56  ;;  %v3650_v20 = vand.u32 2147483648, %v3567_v56 }
 0x503   : > { %v9360_v5 = vmul.f32 %v3622_v37, %v9314_v49  ;;  %v3626_v26 = vsub.f32 1.0, %v3625_v2  ;;  %v3470_v40 = vadd.f32 %v9283_v45, %v3469_v44  ;;  %v9385_v4 = vadd.f32 %v9203_v48, %v8885_v43 }
 0x504   : > { %vm3644_vm9 = vweird.f32 %v3567_v56  ;;  %vm3649_vm11 = vcmp.eq.f32.partialorder %v3648_v17, 8.507059e+37 }
 0x505   : > { %v3627_v46 = vmul.f32 %v6916_v42, %v3626_v26  ;;  %v9368_v36 = vadd.f32 %v3470_v40, %v9364_v50  ;;  %v3843_v16 = vsel %vm1167_vm4, %v9360_v5, 0.0  ;;  %v3887_v49 = vmul.f32 %v9360_v5, %v9360_v5 }
 0x506   : > { %3844 = vadd.xlane.f32.xlu2 %v3843_v16  ;;  %v3651_v26 = vor.u32 1.1754944e-38, %v3650_v20 }
 0x507   : > { %v6918_v34 = vpop.eup %6917  ;;  %v3628_v47 = vadd.f32 %v6916_v42, %v3627_v46  ;;  %v6425_v24 = vmul.f32 -1.442695, %v9368_v36  ;;  %v3907_v29 = vsel %vm1167_vm4, %v3887_v49, 0.0 }
 0x508   : > { %v6920_v39 = vpop.eup %6919  ;;  %v3568_v58 = vadd.f32 1.0, %v6918_v34  ;;  %3908 = vadd.xlane.f32.xlu0 %v3907_v29 }
 0x509   : > { %v3632_v41 = vsel %vm3631_vm6, %v6916_v42, %v3628_v47  ;;  %v3640_v23 = vmul.f32 %v6920_v39, %v3567_v56  ;;  %6921 = vpow2.f32 %v6425_v24  ;;  %vm3645_vm8 = vweird.f32 %v6920_v39 }
 0x50a   : > { %v3637_v9 = vsel %vm3634_vm7, %v3636_v18, %v3632_v41  ;;  %6923 = vrcp.f32 %v3568_v58  ;;  %vm3646_vm10 = vmor %vm3644_vm9, %vm3645_vm8  ;;  %v3663_v49 = vand.u32 2147483647, %v3568_v58  ;;  %v3665_v34 = vand.u32 2147483648, %v3568_v58 }
 0x50b   : > { %v9377_v61 = vmul.f32 %v3637_v9, %v9323_v8  ;;  %v3641_v15 = vsub.f32 1.0, %v3640_v23  ;;  %vm3659_vm13 = vweird.f32 %v3568_v58 }
 0x50c   : > { %v3666_v9 = vor.u32 1.1754944e-38, %v3665_v34  ;;  %vm3664_vm15 = vcmp.eq.f32.partialorder %v3663_v49, 8.507059e+37 }
 0x50d   : > { %v3642_v31 = vmul.f32 %v6920_v39, %v3641_v15  ;;  %v3846_v11 = vsel %vm1167_vm4, %v9377_v61, 0.0  ;;  %v3888_v25 = vmul.f32 %v9377_v61, %v9377_v61 }
 0x50e   : > { %v3472_v42 = vpop.f32.mrf.mxu3  ;;  %3847 = vadd.xlane.f32.xlu1 %v3846_v11 }
 0x50f   : > { %v3473_v8 = vadd.f32 %v9283_v45, %v3472_v42  ;;  %v6922_v3 = vpop.eup %6921  ;;  %v3643_v2 = vadd.f32 %v6920_v39, %v3642_v31  ;;  %v3910_v37 = vsel %vm1167_vm4, %v3888_v25, 0.0 }
 0x510   : > { %v6924_v44 = vpop.eup %6923  ;;  %v3569_v40 = vadd.f32 1.0, %v6922_v3  ;;  %3911 = vadd.xlane.f32.xlu2 %v3910_v37 }
 0x511   : > { %v9390_v22 = vadd.f32 %v3473_v8, %v9385_v4  ;;  %v3647_v10 = vsel %vm3646_vm10, %v6920_v39, %v3643_v2  ;;  %v3655_v46 = vmul.f32 %v6924_v44, %v3568_v58  ;;  %vm3660_vm12 = vweird.f32 %v6924_v44 }
 0x512   : > { %v3652_v43 = vsel %vm3649_vm11, %v3651_v26, %v3647_v10  ;;  %6925 = vrcp.f32 %v3569_v40  ;;  %vm3661_vm14 = vmor %vm3659_vm13, %vm3660_vm12  ;;  %v3678_v42 = vand.u32 2147483647, %v3569_v40  ;;  %v3680_v8 = vand.u32 2147483648, %v3569_v40 }
 0x513   : > { %v9393_v48 = vmul.f32 %v3652_v43, %v9338_v38  ;;  %v3656_v16 = vsub.f32 1.0, %v3655_v46  ;;  %v6426_v56 = vmul.f32 -1.442695, %v9390_v22  ;;  %v9402_v38 = vadd.f32 %v9214_v59, %v8902_v19 }
 0x514   : > { %vm3674_vm1 = vweird.f32 %v3569_v40  ;;  %v3681_v10 = vor.u32 1.1754944e-38, %v3680_v8  ;;  %vm3679_vm3 = vcmp.eq.f32.partialorder %v3678_v42, 8.507059e+37 }
 0x515   : > { %v3657_v47 = vmul.f32 %v6924_v44, %v3656_v16  ;;  %6927 = vpow2.f32 %v6426_v56  ;;  %v3849_v24 = vsel %vm1167_vm4, %v9393_v48, 0.0  ;;  %v3889_v39 = vmul.f32 %v9393_v48, %v9393_v48 }
 0x516   : > { %v3475_v18 = vpop.f32.mrf.mxu3  ;;  %3850 = vadd.xlane.f32.xlu0 %v3849_v24 }
 0x517   : > { %v3476_v29 = vadd.f32 %v9283_v45, %v3475_v18  ;;  %v3658_v41 = vadd.f32 %v6924_v44, %v3657_v47  ;;  %v3913_v15 = vsel %vm1167_vm4, %v3889_v39, 0.0 }
 0x518   : > { %v6926_v23 = vpop.eup %6925  ;;  %3914 = vadd.xlane.f32.xlu1 %v3913_v15 }
 0x519   : > { %v9407_v17 = vadd.f32 %v3476_v29, %v9402_v38  ;;  %v3662_v20 = vsel %vm3661_vm14, %v6924_v44, %v3658_v41  ;;  %v3670_v31 = vmul.f32 %v6926_v23, %v3569_v40  ;;  %vm3675_vm0 = vweird.f32 %v6926_v23 }
 0x51a   : > { %v3667_v11 = vsel %vm3664_vm15, %v3666_v9, %v3662_v20  ;;  %vm3676_vm2 = vmor %vm3674_vm1, %vm3675_vm0  ;;  %v9428_v20 = vadd.f32 %v9233_v12, %v8928_v35 }
 0x51b   : > { %v6427_v19 = vmul.f32 -1.442695, %v9407_v17  ;;  %v6928_v59 = vpop.eup %6927  ;;  %v9411_v25 = vmul.f32 %v3667_v11, %v9355_v57  ;;  %v3671_v58 = vsub.f32 1.0, %v3670_v31 }
 0x51c   : > { %v3570_v3 = vadd.f32 1.0, %v6928_v59 }
 0x51d   : > { %6929 = vpow2.f32 %v6427_v19  ;;  %v3672_v2 = vmul.f32 %v6926_v23, %v3671_v58  ;;  %v3852_v37 = vsel %vm1167_vm4, %v9411_v25, 0.0  ;;  %v3890_v44 = vmul.f32 %v9411_v25, %v9411_v25 }
 0x51e   : > { %6931 = vrcp.f32 %v3570_v3  ;;  %3853 = vadd.xlane.f32.xlu2 %v3852_v37  ;;  %v3695_v39 = vand.u32 2147483648, %v3570_v3  ;;  %vm3689_vm6 = vweird.f32 %v3570_v3 }
 0x51f   : > { %v3673_v26 = vadd.f32 %v6926_v23, %v3672_v2  ;;  %v3916_v57 = vsel %vm1167_vm4, %v3890_v44, 0.0 }
 0x520   : > { %3917 = vadd.xlane.f32.xlu0 %v3916_v57  ;;  %v3696_v11 = vor.u32 1.1754944e-38, %v3695_v39 }
 0x521   : > { %v3677_v46 = vsel %vm3676_vm2, %v6926_v23, %v3673_v26  ;;  %v3693_v23 = vand.u32 2147483647, %v3570_v3 }
 0x522   : > { %v3682_v16 = vsel %vm3679_vm3, %v3681_v10, %v3677_v46  ;;  %v9444_v46 = vadd.f32 %v9241_v33, %v8940_v6 }
 0x523   : > { %v6930_v43 = vpop.eup %6929  ;;  %v9419_v56 = vmul.f32 %v3682_v16, %v9368_v36  ;;  %vm3694_vm8 = vcmp.eq.f32.partialorder %v3693_v23, 8.507059e+37 }
 0x524   : > { %v3571_v49 = vadd.f32 1.0, %v6930_v43  ;;  %v6932_v34 = vpop.eup %6931  ;;  %v3478_v36 = vpop.f32.mrf.mxu3 }
 0x525   : > { %v3685_v47 = vmul.f32 %v6932_v34, %v3570_v3  ;;  %v3855_v24 = vsel %vm1167_vm4, %v9419_v56, 0.0  ;;  %v3891_v40 = vmul.f32 %v9419_v56, %v9419_v56  ;;  %vm3690_vm5 = vweird.f32 %v6932_v34 }
 0x526   : > { %6933 = vrcp.f32 %v3571_v49  ;;  %3856 = vadd.xlane.f32.xlu1 %v3855_v24  ;;  %v3479_v31 = vadd.f32 %v9283_v45, %v3478_v36  ;;  %vm3691_vm7 = vmor %vm3689_vm6, %vm3690_vm5  ;;  %v3710_v3 = vand.u32 2147483648, %v3571_v49  ;;  %v3708_v12 = vand.u32 2147483647, %v3571_v49 }
 0x527   : > { %v3686_v18 = vsub.f32 1.0, %v3685_v47  ;;  %v3919_v29 = vsel %vm1167_vm4, %v3891_v40, 0.0  ;;  %vm3704_vm10 = vweird.f32 %v3571_v49 }
 0x528   : > { %3920 = vadd.xlane.f32.xlu2 %v3919_v29  ;;  %v9432_v58 = vadd.f32 %v3479_v31, %v9428_v20  ;;  %vm3709_vm12 = vcmp.eq.f32.partialorder %v3708_v12, 8.507059e+37 }
 0x529   : > { %v3687_v41 = vmul.f32 %v6932_v34, %v3686_v18 }
 0x52a   : > { %v6428_v37 = vmul.f32 -1.442695, %v9432_v58 }
 0x52b   : > { %v3688_v15 = vadd.f32 %v6932_v34, %v3687_v41  ;;  %v9461_v41 = vadd.f32 %v9253_v30, %v8957_v32  ;;  %v9471_v32 = vadd.f32 %v9261_v53, %v8971_v52 }
 0x52c   : > { %v6934_v9 = vpop.eup %6933  ;;  %6935 = vpow2.f32 %v6428_v37  ;;  %v3481_v10 = vpop.f32.mrf.mxu3 }
 0x52d   : > { %v3700_v19 = vmul.f32 %v6934_v9, %v3571_v49  ;;  %v3692_v59 = vsel %vm3691_vm7, %v6932_v34, %v3688_v15  ;;  %vm3705_vm9 = vweird.f32 %v6934_v9  ;;  %v3482_v43 = vadd.f32 %v9283_v45, %v3481_v10 }
 0x52e   : > { %v3697_v42 = vsel %vm3694_vm8, %v3696_v11, %v3692_v59  ;;  %vm3706_vm11 = vmor %vm3704_vm10, %vm3705_vm9 }
 0x52f   : > { %v3701_v8 = vsub.f32 1.0, %v3700_v19  ;;  %v9435_v2 = vmul.f32 %v3697_v42, %v9390_v22  ;;  %v3711_v22 = vor.u32 1.1754944e-38, %v3710_v3  ;;  %v9449_v24 = vadd.f32 %v3482_v43, %v9444_v46 }
 0x531   : > { %v3702_v35 = vmul.f32 %v6934_v9, %v3701_v8  ;;  %v3858_v44 = vsel %vm1167_vm4, %v9435_v2, 0.0  ;;  %v3892_v26 = vmul.f32 %v9435_v2, %v9435_v2  ;;  %v6429_v18 = vmul.f32 -1.442695, %v9449_v24 }
 0x532   : > { %3859 = vadd.xlane.f32.xlu0 %v3858_v44  ;;  %v6936_v40 = vpop.eup %6935 }
 0x533   : > { %v3703_v57 = vadd.f32 %v6934_v9, %v3702_v35  ;;  %v3922_v16 = vsel %vm1167_vm4, %v3892_v26, 0.0  ;;  %v3572_v39 = vadd.f32 1.0, %v6936_v40  ;;  %6937 = vpow2.f32 %v6429_v18 }
 0x534   : > { %3923 = vadd.xlane.f32.xlu1 %v3922_v16  ;;  %v3484_v29 = vpop.f32.mrf.mxu3  ;;  %v9483_v40 = vadd.f32 %v9269_v55, %v8983_v62 }
 0x535   : > { %v3707_v34 = vsel %vm3706_vm11, %v6934_v9, %v3703_v57  ;;  %6939 = vrcp.f32 %v3572_v39  ;;  %v3725_v8 = vand.u32 2147483648, %v3572_v39  ;;  %v3723_v37 = vand.u32 2147483647, %v3572_v39 }
 0x536   : > { %v3712_v47 = vsel %vm3709_vm12, %v3711_v22, %v3707_v34  ;;  %vm3719_vm14 = vweird.f32 %v3572_v39 }
 0x537   : > { %v9452_v49 = vmul.f32 %v3712_v47, %v9407_v17  ;;  %v3485_v17 = vadd.f32 %v9283_v45, %v3484_v29  ;;  %v3726_v10 = vor.u32 1.1754944e-38, %v3725_v8  ;;  %vm3724_vm0 = vcmp.eq.f32.partialorder %v3723_v37, 8.507059e+37 }
 0x538   : > { %v9503_v37 = vadd.f32 %v9277_v14, %v9003_v13 }
 0x539   : > { %v3861_v6 = vsel %vm1167_vm4, %v9452_v49, 0.0  ;;  %v3893_v33 = vmul.f32 %v9452_v49, %v9452_v49  ;;  %v9466_v36 = vadd.f32 %v3485_v17, %v9461_v41  ;;  %v6938_v9 = vpop.eup %6937 }
 0x53a   : > { %3862 = vadd.xlane.f32.xlu2 %v3861_v6  ;;  %v3573_v11 = vadd.f32 1.0, %v6938_v9 }
 0x53b   : > { %v3925_v23 = vsel %vm1167_vm4, %v3893_v33, 0.0  ;;  %v6430_v15 = vmul.f32 -1.442695, %v9466_v36  ;;  %v6940_v31 = vpop.eup %6939 }
 0x53c   : > { %3926 = vadd.xlane.f32.xlu0 %v3925_v23  ;;  %v3715_v19 = vmul.f32 %v6940_v31, %v3572_v39  ;;  %v3487_v59 = vpop.f32.mrf.mxu3  ;;  %vm3720_vm13 = vweird.f32 %v6940_v31  ;;  %v3738_v39 = vand.u32 2147483647, %v3573_v11  ;;  %v3740_v6 = vand.u32 2147483648, %v3573_v11 }
 0x53d   : > { %6941 = vpow2.f32 %v6430_v15  ;;  %v3488_v30 = vadd.f32 %v9283_v45, %v3487_v59  ;;  %vm3721_vm15 = vmor %vm3719_vm14, %vm3720_vm13  ;;  %vm3734_vm2 = vweird.f32 %v3573_v11 }
 0x53e   : > { %6943 = vrcp.f32 %v3573_v11  ;;  %v3716_v42 = vsub.f32 1.0, %v3715_v19  ;;  %v3741_v15 = vor.u32 1.1754944e-38, %v3740_v6  ;;  %vm3739_vm5 = vcmp.eq.f32.partialorder %v3738_v39, 8.507059e+37 }
 0x53f   : > { %v9475_v35 = vadd.f32 %v3488_v30, %v9471_v32 }
 0x540   : > { %v3717_v3 = vmul.f32 %v6940_v31, %v3716_v42 }
 0x541   : > { %v6431_v26 = vmul.f32 -1.442695, %v9475_v35 }
 0x542   : > { %v3718_v44 = vadd.f32 %v6940_v31, %v3717_v3 }
 0x543   : > { %v6942_v12 = vpop.eup %6941  ;;  %6945 = vpow2.f32 %v6431_v26 }
 0x544   : > { %v6944_v57 = vpop.eup %6943  ;;  %v3574_v22 = vadd.f32 1.0, %v6942_v12  ;;  %v3722_v52 = vsel %vm3721_vm15, %v6940_v31, %v3718_v44  ;;  %v3490_v16 = vpop.f32.mrf.mxu3  ;;  %v4278_v44 = vld [vmem:[%s10669_s3 + $0xf8] sm:$0xff] }
 0x545   : > { %v3730_v53 = vmul.f32 %v6944_v57, %v3573_v11  ;;  %v3727_v43 = vsel %vm3724_vm0, %v3726_v10, %v3722_v52  ;;  %v3491_v18 = vadd.f32 %v9283_v45, %v3490_v16  ;;  %vm3735_vm1 = vweird.f32 %v6944_v57  ;;  %4337 = vmatpush.msrb.mxu1 %v4278_v44 }
 0x546   : > { %6947 = vrcp.f32 %v3574_v22  ;;  %v9479_v34 = vmul.f32 %v3727_v43, %v9432_v58  ;;  %vm3736_vm3 = vmor %vm3734_vm2, %vm3735_vm1  ;;  %v3753_v26 = vand.u32 2147483647, %v3574_v22  ;;  %vm3749_vm7 = vweird.f32 %v3574_v22 }
 0x547   : > { %v3731_v47 = vsub.f32 1.0, %v3730_v53  ;;  %v9487_v29 = vadd.f32 %v3491_v18, %v9483_v40 }
 0x548   : > { %v3864_v17 = vsel %vm1167_vm4, %v9479_v34, 0.0  ;;  %v3894_v58 = vmul.f32 %v9479_v34, %v9479_v34  ;;  %vm3754_vm9 = vcmp.eq.f32.partialorder %v3753_v26, 8.507059e+37 }
 0x549   : > { %v3732_v33 = vmul.f32 %v6944_v57, %v3731_v47  ;;  %3865 = vadd.xlane.f32.xlu1 %v3864_v17  ;;  %v6946_v23 = vpop.eup %6945  ;;  %v6432_v62 = vmul.f32 -1.442695, %v9487_v29 }
 0x54a   : > { %v9494_v31 = vadd.f32 1.0, %v6946_v23  ;;  %v3928_v19 = vsel %vm1167_vm4, %v3894_v58, 0.0 }
 0x54b   : > { %v3733_v9 = vadd.f32 %v6944_v57, %v3732_v33  ;;  %6949 = vpow2.f32 %v6432_v62  ;;  %3929 = vadd.xlane.f32.xlu2 %v3928_v19 }
 0x54c   : > { %v6948_v55 = vpop.eup %6947  ;;  %6951 = vrcp.f32 %v9494_v31  ;;  %v3493_v8 = vpop.f32.mrf.mxu3  ;;  %v3768_v19 = vand.u32 2147483647, %v9494_v31  ;;  %vm3764_vm11 = vweird.f32 %v9494_v31 }
 0x54d   : > { %v3737_v59 = vsel %vm3736_vm3, %v6944_v57, %v3733_v9  ;;  %v3745_v42 = vmul.f32 %v6948_v55, %v3574_v22  ;;  %v3494_v12 = vadd.f32 %v9283_v45, %v3493_v8  ;;  %v3755_v57 = vand.u32 2147483648, %v3574_v22 }
 0x54e   : > { %v3742_v30 = vsel %vm3739_vm5, %v3741_v15, %v3737_v59  ;;  %vm3750_vm6 = vweird.f32 %v6948_v55  ;;  %v9527_v9 = vadd.f32 %v9295_v28, %v9024_v0  ;;  %v4276_v15 = vld [vmem:[%s10669_s3 + $0xe8] sm:$0xff]  ;;  %v4275_v28 = vld [vmem:[%s10669_s3 + $0xe0] sm:$0xff]  ;;  %vm3769_vm13 = vcmp.eq.f32.partialorder %v3768_v19, 8.507059e+37  ;;  %v4273_v19 = vld [vmem:[%s10669_s3 + $0xd0] sm:$0xff] }
 0x54f   : > { %v9499_v11 = vmul.f32 %v3742_v30, %v9449_v24  ;;  %v3746_v3 = vsub.f32 1.0, %v3745_v42  ;;  %v9510_v52 = vadd.f32 %v3494_v12, %v9503_v37  ;;  %vm3751_vm8 = vmor %vm3749_vm7, %vm3750_vm6  ;;  %v3756_v47 = vor.u32 1.1754944e-38, %v3755_v57 }
 0x551   : > { %v3747_v10 = vmul.f32 %v6948_v55, %v3746_v3  ;;  %v3867_v24 = vsel %vm1167_vm4, %v9499_v11, 0.0  ;;  %v3895_v13 = vmul.f32 %v9499_v11, %v9499_v11  ;;  %v6950_v14 = vpop.eup %6949  ;;  %v6433_v43 = vmul.f32 -1.442695, %v9510_v52 }
 0x552   : > { %3868 = vadd.xlane.f32.xlu0 %v3867_v24  ;;  %v6952_v16 = vpop.eup %6951  ;;  %v9517_v18 = vadd.f32 1.0, %v6950_v14 }
 0x553   : > { %v3748_v53 = vadd.f32 %v6948_v55, %v3747_v10  ;;  %v3931_v39 = vsel %vm1167_vm4, %v3895_v13, 0.0  ;;  %v3760_v33 = vmul.f32 %v6952_v16, %v9494_v31  ;;  %6953 = vpow2.f32 %v6433_v43 }
 0x554   : > { %3932 = vadd.xlane.f32.xlu1 %v3931_v39  ;;  %6955 = vrcp.f32 %v9517_v18  ;;  %v3496_v58 = vpop.f32.mrf.mxu3  ;;  %vm3765_vm10 = vweird.f32 %v6952_v16  ;;  %v3783_v43 = vand.u32 2147483647, %v9517_v18  ;;  %vm3779_vm15 = vweird.f32 %v9517_v18 }
 0x555   : > { %v3752_v6 = vsel %vm3751_vm8, %v6948_v55, %v3748_v53  ;;  %v3761_v23 = vsub.f32 1.0, %v3760_v33  ;;  %v3497_v62 = vadd.f32 %v9283_v45, %v3496_v58  ;;  %v4277_v55 = vld [vmem:[%s10669_s3 + $0xf0] sm:$0xff]  ;;  %vm3766_vm12 = vmor %vm3764_vm11, %vm3765_vm10  ;;  %v4274_v53 = vld [vmem:[%s10669_s3 + $0xd8] sm:$0xff] }
 0x556   : > { %v3757_v17 = vsel %vm3754_vm9, %v3756_v47, %v3752_v6  ;;  %4338 = vmatpush.msrb.mxu1 %v4277_v55  ;;  %vm3784_vm1 = vcmp.eq.f32.partialorder %v3783_v43, 8.507059e+37 }
 0x557   : > { %v9523_v22 = vmul.f32 %v3757_v17, %v9466_v36  ;;  %v3770_v36 = vand.u32 2147483648, %v9494_v31  ;;  %v3762_v59 = vmul.f32 %v6952_v16, %v3761_v23  ;;  %v9539_v0 = vadd.f32 %v3497_v62, %v9527_v9 }
 0x558   : > { %4339 = vmatpush.msrb.mxu1 %v4276_v15 }
 0x559   : > { %v3870_v45 = vsel %vm1167_vm4, %v9523_v22, 0.0  ;;  %v3896_v42 = vmul.f32 %v9523_v22, %v9523_v22  ;;  %v6954_v30 = vpop.eup %6953  ;;  %v3763_v8 = vadd.f32 %v6952_v16, %v3762_v59  ;;  %v6434_v3 = vmul.f32 -1.442695, %v9539_v0 }
 0x55a   : > { %3871 = vadd.xlane.f32.xlu2 %v3870_v45  ;;  %v6956_v12 = vpop.eup %6955  ;;  %v3771_v44 = vor.u32 1.1754944e-38, %v3770_v36  ;;  %v9550_v26 = vadd.f32 1.0, %v6954_v30  ;;  %4340 = vmatpush.msrb.mxu1 %v4275_v28 }
 0x55b   : > { %v3934_v57 = vsel %vm1167_vm4, %v3896_v42, 0.0  ;;  %v3767_v10 = vsel %vm3766_vm12, %v6952_v16, %v3763_v8  ;;  %v3775_v24 = vmul.f32 %v6956_v12, %v9517_v18  ;;  %6957 = vpow2.f32 %v6434_v3 }
 0x55c   : > { %3935 = vadd.xlane.f32.xlu0 %v3934_v57  ;;  %v3772_v13 = vsel %vm3769_vm13, %v3771_v44, %v3767_v10  ;;  %6959 = vrcp.f32 %v9550_v26  ;;  %v3785_v16 = vand.u32 2147483648, %v9517_v18  ;;  %4341 = vmatpush.msrb.mxu1 %v4274_v53  ;;  %vm3780_vm14 = vweird.f32 %v6956_v12 }
 0x55d   : > { %v9556_v31 = vmul.f32 %v3772_v13, %v9475_v35  ;;  %v3776_v14 = vsub.f32 1.0, %v3775_v24  ;;  %vm3781_vm0 = vmor %vm3779_vm15, %vm3780_vm14  ;;  %v3798_v8 = vand.u32 2147483647, %v9550_v26  ;;  %v3800_v3 = vand.u32 2147483648, %v9550_v26 }
 0x55e   : > { %v3786_v62 = vor.u32 1.1754944e-38, %v3785_v16  ;;  %4342 = vmatpush.msrb.mxu1 %v4273_v19  ;;  %vm3794_vm3 = vweird.f32 %v9550_v26 }
 0x55f   : > { %v3777_v47 = vmul.f32 %v6956_v12, %v3776_v14  ;;  %v3873_v39 = vsel %vm1167_vm4, %v9556_v31, 0.0  ;;  %v3897_v6 = vmul.f32 %v9556_v31, %v9556_v31  ;;  %v3801_v43 = vor.u32 1.1754944e-38, %v3800_v3 }
 0x560   : > { %3874 = vadd.xlane.f32.xlu1 %v3873_v39  ;;  %vm3799_vm6 = vcmp.eq.f32.partialorder %v3798_v8, 8.507059e+37 }
 0x561   : > { %v6958_v35 = vpop.eup %6957  ;;  %v3778_v33 = vadd.f32 %v6956_v12, %v3777_v47  ;;  %v3937_v17 = vsel %vm1167_vm4, %v3897_v6, 0.0 }
 0x562   : > { %v6960_v23 = vpop.eup %6959  ;;  %v3578_v55 = vadd.f32 1.0, %v6958_v35  ;;  %3938 = vadd.xlane.f32.xlu2 %v3937_v17 }
 0x563   : > { %v3782_v36 = vsel %vm3781_vm0, %v6956_v12, %v3778_v33  ;;  %v3790_v59 = vmul.f32 %v6960_v23, %v9550_v26  ;;  %vm3795_vm2 = vweird.f32 %v6960_v23 }
 0x564   : > { %v3787_v18 = vsel %vm3784_vm1, %v3786_v62, %v3782_v36  ;;  %6961 = vrcp.f32 %v3578_v55  ;;  %vm3796_vm5 = vmor %vm3794_vm3, %vm3795_vm2  ;;  %v3813_v19 = vand.u32 2147483647, %v3578_v55  ;;  %v3815_v36 = vand.u32 2147483648, %v3578_v55 }
 0x565   : > { %v9576_v28 = vmul.f32 %v3787_v18, %v9487_v29  ;;  %v3791_v42 = vsub.f32 1.0, %v3790_v59  ;;  %vm3809_vm8 = vweird.f32 %v3578_v55 }
 0x566   : > { %v3816_v3 = vor.u32 1.1754944e-38, %v3815_v36  ;;  %vm3814_vm10 = vcmp.eq.f32.partialorder %v3813_v19, 8.507059e+37 }
 0x567   : > { %v3839_v58 = vpop.xlane.xlu1 %3838  ;;  %v3792_v12 = vmul.f32 %v6960_v23, %v3791_v42  ;;  %v3876_v57 = vsel %vm1167_vm4, %v9576_v28, 0.0  ;;  %v3898_v10 = vmul.f32 %v9576_v28, %v9576_v28 }
 0x568   : > { %v9569_v15 = vmul.f32 0.015625, %v3839_v58  ;;  %3877 = vadd.xlane.f32.xlu0 %v3876_v57 }
 0x569   : > { %v3903_v45 = vpop.xlane.xlu2 %3902  ;;  %v3793_v24 = vadd.f32 %v6960_v23, %v3792_v12  ;;  %v3940_v13 = vsel %vm1167_vm4, %v3898_v10, 0.0  ;;  %v4272_v10 = vld [vmem:[%s10669_s3 + $0xc8] sm:$0xff] }
 0x56a   : > { %v3981_v30 = vmul.f32 %v9569_v15, %v9569_v15  ;;  %v3965_v44 = vmul.f32 0.015625, %v3903_v45  ;;  %v6962_v53 = vpop.eup %6961  ;;  %3941 = vadd.xlane.f32.xlu1 %v3940_v13  ;;  %4343 = vmatpush.msrb.mxu1 %v4272_v10 }
 0x56b   : > { %v3797_v39 = vsel %vm3796_vm5, %v6960_v23, %v3793_v24  ;;  %v3805_v6 = vmul.f32 %v6962_v53, %v3578_v55  ;;  %vm3810_vm7 = vweird.f32 %v6962_v53  ;;  %v4271_v55 = vld [vmem:[%s10669_s3 + $0xc0] sm:$0xff] }
 0x56c   : > { %v3997_v29 = vsub.f32 %v3965_v44, %v3981_v30  ;;  %v3802_v33 = vsel %vm3799_vm6, %v3801_v43, %v3797_v39  ;;  %vm3811_vm9 = vmor %vm3809_vm8, %vm3810_vm7  ;;  %4344 = vmatpush.msrb.mxu1 %v4271_v55  ;;  %v9632_v55 = vld [vmem:[%s10670_s4 + $0xd] ss:$0 sm:$0xff] }
 0x56d   : > { %v9593_v26 = vmul.f32 %v3802_v33, %v9510_v52  ;;  %v3806_v58 = vsub.f32 1.0, %v3805_v6 }
 0x56e   : > { %v4029_v16 = vadd.f32 0.1, %v3997_v29 }
 0x56f   : > { %v3842_v14 = vpop.xlane.xlu0 %3841  ;;  %v3807_v59 = vmul.f32 %v6962_v53, %v3806_v58  ;;  %v3879_v23 = vsel %vm1167_vm4, %v9593_v26, 0.0  ;;  %v3899_v18 = vmul.f32 %v9593_v26, %v9593_v26 }
 0x570   : > { %v9588_v47 = vmul.f32 0.015625, %v3842_v14  ;;  %6963 = vrsqrt.f32 %v4029_v16  ;;  %3880 = vadd.xlane.f32.xlu2 %v3879_v23  ;;  %vm4051_vm12 = vweird.f32 %v4029_v16 }
 0x571   : > { %v3906_v35 = vpop.xlane.xlu1 %3905  ;;  %v3808_v42 = vadd.f32 %v6962_v53, %v3807_v59  ;;  %v3943_v52 = vsel %vm1167_vm4, %v3899_v18, 0.0 }
 0x572   : > { %v3982_v17 = vmul.f32 %v9588_v47, %v9588_v47  ;;  %v3966_v62 = vmul.f32 0.015625, %v3906_v35  ;;  %3944 = vadd.xlane.f32.xlu0 %v3943_v52 }
 0x573   : > { %v3812_v44 = vsel %vm3811_vm9, %v6962_v53, %v3808_v42  ;;  %v4013_v42 = vsub.f32 %v9326_v51, %v9569_v15 }
 0x574   : > { %v3998_v45 = vsub.f32 %v3966_v62, %v3982_v17  ;;  %v3817_v29 = vsel %vm3814_vm10, %v3816_v3, %v3812_v44  ;;  %v9625_v44 = vld [vmem:[%s10670_s4 + $0x8] ss:$0 sm:$0xff] }
 0x575   : > { %v9609_v13 = vmul.f32 %v3817_v29, %v9539_v0 }
 0x576   : > { %v4030_v30 = vadd.f32 0.1, %v3998_v45  ;;  %v6964_v8 = vpop.eup %6963 }
 0x577   : > { %v4046_v12 = vmul.f32 %v6964_v8, %v4029_v16  ;;  %v3882_v6 = vsel %vm1167_vm4, %v9609_v13, 0.0  ;;  %v3900_v33 = vmul.f32 %v9609_v13, %v9609_v13  ;;  %vm4052_vm11 = vweird.f32 %v6964_v8 }
 0x578   : > { %6965 = vrsqrt.f32 %v4030_v30  ;;  %3883 = vadd.xlane.f32.xlu1 %v3882_v6  ;;  %vm4053_vm13 = vmor %vm4051_vm12, %vm4052_vm11  ;;  %vm4061_vm15 = vweird.f32 %v4030_v30  ;;  %v4014_v6 = vsub.f32 %v9343_v63, %v9588_v47 }
 0x579   : > { %v3845_v57 = vpop.xlane.xlu2 %3844  ;;  %v4047_v14 = vmul.f32 %v6964_v8, %v4046_v12  ;;  %v3946_v62 = vsel %vm1167_vm4, %v3900_v33, 0.0 }
 0x57a   : > { %v9606_v24 = vmul.f32 0.015625, %v3845_v57  ;;  %3947 = vadd.xlane.f32.xlu2 %v3946_v62 }
 0x57b   : > { %v3909_v43 = vpop.xlane.xlu0 %3908  ;;  %v4048_v39 = vmul.f32 0.5, %v4047_v14 }
 0x57c   : > { %v3983_v53 = vmul.f32 %v9606_v24, %v9606_v24  ;;  %v3967_v35 = vmul.f32 0.015625, %v3909_v43 }
 0x57d   : > { %v4049_v58 = vsub.f32 1.5, %v4048_v39 }
 0x57e   : > { %v6966_v17 = vpop.eup %6965  ;;  %v3999_v0 = vsub.f32 %v3967_v35, %v3983_v53 }
 0x57f   : > { %v4056_v19 = vmul.f32 %v6966_v17, %v4030_v30  ;;  %v4050_v36 = vmul.f32 %v6964_v8, %v4049_v58  ;;  %vm4062_vm14 = vweird.f32 %v6966_v17 }
 0x580   : > { %v4031_v59 = vadd.f32 0.1, %v3999_v0  ;;  %vm4063_vm0 = vmor %vm4061_vm15, %vm4062_vm14 }
 0x581   : > { %v3848_v23 = vpop.xlane.xlu1 %3847  ;;  %v4057_v45 = vmul.f32 %v6966_v17, %v4056_v19  ;;  %v4054_v52 = vsel %vm4053_vm13, %v6964_v8, %v4050_v36 }
 0x582   : > { %v9618_v18 = vmul.f32 0.015625, %v3848_v23  ;;  %6967 = vrsqrt.f32 %v4031_v59  ;;  %v4205_v10 = vmul.f32 %v4054_v52, %v4013_v42  ;;  %vm4071_vm2 = vweird.f32 %v4031_v59 }
 0x583   : > { %v3912_v3 = vpop.xlane.xlu2 %3911  ;;  %v4058_v12 = vmul.f32 0.5, %v4057_v45 }
 0x584   : > { %v3984_v16 = vmul.f32 %v9618_v18, %v9618_v18  ;;  %v3968_v57 = vmul.f32 0.015625, %v3912_v3  ;;  %v4222_v8 = vmul.f32 %v9625_v44, %v4205_v10  ;;  %v4015_v10 = vsub.f32 %v9360_v5, %v9606_v24 }
 0x585   : > { %v4059_v51 = vsub.f32 1.5, %v4058_v12 }
 0x586   : > { %v4000_v15 = vsub.f32 %v3968_v57, %v3984_v16  ;;  %v9636_v39 = vadd.f32 %v9632_v55, %v4222_v8 }
 0x587   : > { %v4060_v29 = vmul.f32 %v6966_v17, %v4059_v51 }
 0x588   : > { %v4032_v14 = vadd.f32 0.1, %v4000_v15  ;;  %v6968_v53 = vpop.eup %6967  ;;  %6435 = vmatmul.msk.f32.vlgmr.msrb.gmra.mxu1 %vm1167_vm4, %v9636_v39 }
 0x589   : > { %v3851_v43 = vpop.xlane.xlu0 %3850  ;;  %v4066_v35 = vmul.f32 %v6968_v53, %v4031_v59  ;;  %v4064_v58 = vsel %vm4063_vm0, %v6966_v17, %v4060_v29  ;;  %vm4072_vm1 = vweird.f32 %v6968_v53 }
 0x58a   : > { %6969 = vrsqrt.f32 %v4032_v14  ;;  %v9640_v33 = vmul.f32 0.015625, %v3851_v43  ;;  %v4206_v19 = vmul.f32 %v4064_v58, %v4014_v6  ;;  %vm4073_vm3 = vmor %vm4071_vm2, %vm4072_vm1  ;;  %vm4081_vm6 = vweird.f32 %v4032_v14 }
 0x58b   : > { %v4067_v0 = vmul.f32 %v6968_v53, %v4066_v35  ;;  %v3915_v62 = vpop.xlane.xlu1 %3914 }
 0x58c   : > { %v3985_v30 = vmul.f32 %v9640_v33, %v9640_v33  ;;  %v3969_v36 = vmul.f32 0.015625, %v3915_v62  ;;  %v4223_v45 = vmul.f32 %v9625_v44, %v4206_v19 }
 0x58d   : > { %v4068_v23 = vmul.f32 0.5, %v4067_v0 }
 0x58e   : > { %v4001_v63 = vsub.f32 %v3969_v36, %v3985_v30  ;;  %v9648_v52 = vadd.f32 %v9632_v55, %v4223_v45  ;;  %v4016_v30 = vsub.f32 %v9377_v61, %v9618_v18 }
 0x58f   : > { %v4069_v42 = vsub.f32 1.5, %v4068_v23 }
 0x590   : > { %v6970_v47 = vpop.eup %6969  ;;  %v4033_v12 = vadd.f32 0.1, %v4001_v63  ;;  %6436 = vmatmul.msk.f32.gmra.mxu1 %vm1167_vm4, %v9648_v52 }
 0x591   : > { %v4076_v3 = vmul.f32 %v6970_v47, %v4032_v14  ;;  %v3854_v17 = vpop.xlane.xlu2 %3853  ;;  %v4070_v16 = vmul.f32 %v6968_v53, %v4069_v42  ;;  %vm4082_vm5 = vweird.f32 %v6970_v47 }
 0x592   : > { %v9650_v57 = vmul.f32 0.015625, %v3854_v17  ;;  %6971 = vrsqrt.f32 %v4033_v12  ;;  %vm4083_vm7 = vmor %vm4081_vm6, %vm4082_vm5  ;;  %vm4091_vm9 = vweird.f32 %v4033_v12 }
 0x593   : > { %v4077_v51 = vmul.f32 %v6970_v47, %v4076_v3  ;;  %v3918_v15 = vpop.xlane.xlu0 %3917  ;;  %v4074_v43 = vsel %vm4073_vm3, %v6968_v53, %v4070_v16 }
 0x594   : > { %v3986_v8 = vmul.f32 %v9650_v57, %v9650_v57  ;;  %v3970_v29 = vmul.f32 0.015625, %v3918_v15  ;;  %v4207_v35 = vmul.f32 %v4074_v43, %v4015_v10  ;;  %v4017_v43 = vsub.f32 %v9393_v48, %v9640_v33 }
 0x595   : > { %v4078_v6 = vmul.f32 0.5, %v4077_v51 }
 0x596   : > { %v4002_v59 = vsub.f32 %v3970_v29, %v3986_v8  ;;  %v4224_v0 = vmul.f32 %v9625_v44, %v4207_v35 }
 0x597   : > { %v4079_v58 = vsub.f32 1.5, %v4078_v6 }
 0x598   : > { %v4034_v5 = vadd.f32 0.1, %v4002_v59  ;;  %v6972_v24 = vpop.eup %6971  ;;  %v9660_v19 = vadd.f32 %v9632_v55, %v4224_v0 }
 0x599   : > { %v4080_v62 = vmul.f32 %v6970_v47, %v4079_v58  ;;  %v4086_v36 = vmul.f32 %v6972_v24, %v4033_v12  ;;  %v3857_v53 = vpop.xlane.xlu1 %3856  ;;  %vm4092_vm8 = vweird.f32 %v6972_v24 }
 0x59a   : > { %6973 = vrsqrt.f32 %v4034_v5  ;;  %v9664_v23 = vmul.f32 0.015625, %v3857_v53  ;;  %6437 = vmatmul.msk.f32.gmra.mxu1 %vm1167_vm4, %v9660_v19  ;;  %vm4093_vm10 = vmor %vm4091_vm9, %vm4092_vm8  ;;  %vm4101_vm12 = vweird.f32 %v4034_v5 }
 0x59b   : > { %v4084_v45 = vsel %vm4083_vm7, %v6970_v47, %v4080_v62  ;;  %v4087_v63 = vmul.f32 %v6972_v24, %v4086_v36  ;;  %v3921_v42 = vpop.xlane.xlu2 %3920 }
 0x59c   : > { %v4208_v3 = vmul.f32 %v4084_v45, %v4016_v30  ;;  %v3987_v14 = vmul.f32 %v9664_v23, %v9664_v23  ;;  %v3971_v17 = vmul.f32 0.015625, %v3921_v42 }
 0x59d   : > { %v4088_v16 = vmul.f32 0.5, %v4087_v63 }
 0x59e   : > { %v4225_v61 = vmul.f32 %v9625_v44, %v4208_v3  ;;  %v4003_v18 = vsub.f32 %v3971_v17, %v3987_v14 }
 0x59f   : > { %v4089_v51 = vsub.f32 1.5, %v4088_v16 }
 0x5a0   : > { %v6974_v10 = vpop.eup %6973  ;;  %v9672_v15 = vadd.f32 %v9632_v55, %v4225_v61  ;;  %v4035_v29 = vadd.f32 0.1, %v4003_v18 }
 0x5a1   : > { %v4096_v8 = vmul.f32 %v6974_v10, %v4034_v5  ;;  %v4090_v47 = vmul.f32 %v6972_v24, %v4089_v51  ;;  %vm4102_vm11 = vweird.f32 %v6974_v10 }
 0x5a2   : > { %6975 = vrsqrt.f32 %v4035_v29  ;;  %6438 = vmatmul.msk.f32.gmra.mxu1 %vm1167_vm4, %v9672_v15  ;;  %vm4103_vm13 = vmor %vm4101_vm12, %vm4102_vm11  ;;  %vm4111_vm15 = vweird.f32 %v4035_v29 }
 0x5a3   : > { %v4097_v6 = vmul.f32 %v6974_v10, %v4096_v8  ;;  %v4094_v35 = vsel %vm4093_vm10, %v6972_v24, %v4090_v47  ;;  %v4018_v24 = vsub.f32 %v9411_v25, %v9650_v57 }
 0x5a4   : > { %v4209_v0 = vmul.f32 %v4094_v35, %v4017_v43 }
 0x5a5   : > { %v4098_v59 = vmul.f32 0.5, %v4097_v6  ;;  %v3860_v58 = vpop.xlane.xlu0 %3859 }
 0x5a6   : > { %v3956_v62 = vmul.f32 0.015625, %v3860_v58  ;;  %v4226_v53 = vmul.f32 %v9625_v44, %v4209_v0 }
 0x5a7   : > { %v4099_v30 = vsub.f32 1.5, %v4098_v59  ;;  %v3924_v36 = vpop.xlane.xlu1 %3923  ;;  %v4019_v59 = vsub.f32 %v9419_v56, %v9664_v23 }
 0x5a8   : > { %v3988_v12 = vmul.f32 %v3956_v62, %v3956_v62  ;;  %v3972_v45 = vmul.f32 0.015625, %v3924_v36  ;;  %v6976_v63 = vpop.eup %6975  ;;  %v9680_v33 = vadd.f32 %v9632_v55, %v4226_v53 }
 0x5a9   : > { %v4100_v48 = vmul.f32 %v6974_v10, %v4099_v30  ;;  %v4106_v42 = vmul.f32 %v6976_v63, %v4035_v29  ;;  %vm4112_vm14 = vweird.f32 %v6976_v63 }
 0x5aa   : > { %v4004_v3 = vsub.f32 %v3972_v45, %v3988_v12  ;;  %6439 = vmatmul.msk.f32.gmra.mxu1 %vm1167_vm4, %v9680_v33  ;;  %vm4113_vm0 = vmor %vm4111_vm15, %vm4112_vm14 }
 0x5ab   : > { %v4104_v14 = vsel %vm4103_vm13, %v6974_v10, %v4100_v48  ;;  %v4107_v17 = vmul.f32 %v6976_v63, %v4106_v42 }
 0x5ac   : > { %v4036_v16 = vadd.f32 0.1, %v4004_v3  ;;  %v4210_v18 = vmul.f32 %v4104_v14, %v4018_v24 }
 0x5ad   : > { %v3863_v61 = vpop.xlane.xlu2 %3862  ;;  %v4108_v8 = vmul.f32 0.5, %v4107_v17 }
 0x5ae   : > { %v3957_v51 = vmul.f32 0.015625, %v3863_v61  ;;  %6977 = vrsqrt.f32 %v4036_v16  ;;  %v4227_v5 = vmul.f32 %v9625_v44, %v4210_v18  ;;  %vm4121_vm2 = vweird.f32 %v4036_v16 }
 0x5af   : > { %v3927_v43 = vpop.xlane.xlu0 %3926  ;;  %v4109_v6 = vsub.f32 1.5, %v4108_v8 }
 0x5b0   : > { %v3989_v47 = vmul.f32 %v3957_v51, %v3957_v51  ;;  %v3973_v25 = vmul.f32 0.015625, %v3927_v43  ;;  %v9688_v57 = vadd.f32 %v9632_v55, %v4227_v5 }
 0x5b1   : > { %v4110_v35 = vmul.f32 %v6976_v63, %v4109_v6 }
 0x5b2   : > { %v4005_v10 = vsub.f32 %v3973_v25, %v3989_v47  ;;  %6440 = vmatmul.msk.f32.gmra.mxu1 %vm1167_vm4, %v9688_v57 }
 0x5b3   : > { %v4114_v30 = vsel %vm4113_vm0, %v6976_v63, %v4110_v35  ;;  %v4020_v63 = vsub.f32 %v9435_v2, %v3956_v62  ;;  %v4021_v2 = vsub.f32 %v9452_v49, %v3957_v51 }
 0x5b4   : > { %v6978_v58 = vpop.eup %6977  ;;  %v4037_v0 = vadd.f32 0.1, %v4005_v10  ;;  %v4211_v53 = vmul.f32 %v4114_v30, %v4019_v59 }
 0x5b5   : > { %v4116_v36 = vmul.f32 %v6978_v58, %v4036_v16  ;;  %vm4122_vm1 = vweird.f32 %v6978_v58 }
 0x5b6   : > { %6979 = vrsqrt.f32 %v4037_v0  ;;  %v4228_v45 = vmul.f32 %v9625_v44, %v4211_v53  ;;  %vm4123_vm3 = vmor %vm4121_vm2, %vm4122_vm1  ;;  %vm4131_vm6 = vweird.f32 %v4037_v0 }
 0x5b7   : > { %v4117_v12 = vmul.f32 %v6978_v58, %v4116_v36 }
 0x5b8   : > { %v9696_v29 = vadd.f32 %v9632_v55, %v4228_v45 }
 0x5b9   : > { %v4118_v48 = vmul.f32 0.5, %v4117_v12 }
 0x5ba   : > { %6441 = vmatmul.msk.f32.gmra.mxu1 %vm1167_vm4, %v9696_v29 }
 0x5bb   : > { %v4119_v24 = vsub.f32 1.5, %v4118_v48 }
 0x5bc   : > { %v6980_v56 = vpop.eup %6979  ;;  %v3866_v18 = vpop.xlane.xlu1 %3865 }
 0x5bd   : > { %v4120_v23 = vmul.f32 %v6978_v58, %v4119_v24  ;;  %v4126_v42 = vmul.f32 %v6980_v56, %v4037_v0  ;;  %v3958_v8 = vmul.f32 0.015625, %v3866_v18  ;;  %vm4132_vm5 = vweird.f32 %v6980_v56 }
 0x5be   : > { %v3930_v6 = vpop.xlane.xlu2 %3929  ;;  %vm4133_vm7 = vmor %vm4131_vm6, %vm4132_vm5 }
 0x5bf   : > { %v4127_v3 = vmul.f32 %v6980_v56, %v4126_v42  ;;  %v4124_v14 = vsel %vm4123_vm3, %v6978_v58, %v4120_v23  ;;  %v3990_v43 = vmul.f32 %v3958_v8, %v3958_v8  ;;  %v3974_v35 = vmul.f32 0.015625, %v3930_v6 }
 0x5c0   : > { %v4212_v17 = vmul.f32 %v4124_v14, %v4020_v63 }
 0x5c1   : > { %v4128_v61 = vmul.f32 0.5, %v4127_v3  ;;  %v4006_v62 = vsub.f32 %v3974_v35, %v3990_v43 }
 0x5c2   : > { %v4229_v5 = vmul.f32 %v9625_v44, %v4212_v17 }
 0x5c3   : > { %v4129_v47 = vsub.f32 1.5, %v4128_v61  ;;  %v4038_v58 = vadd.f32 0.1, %v4006_v62 }
 0x5c4   : > { %v9703_v25 = vadd.f32 %v9632_v55, %v4229_v5 }
 0x5c5   : > { %v4130_v16 = vmul.f32 %v6980_v56, %v4129_v47  ;;  %v3869_v30 = vpop.xlane.xlu0 %3868  ;;  %6981 = vrsqrt.f32 %v4038_v58  ;;  %vm4141_vm9 = vweird.f32 %v4038_v58 }
 0x5c6   : > { %6442 = vmatmul.msk.f32.gmra.mxu1 %vm1167_vm4, %v9703_v25  ;;  %v3959_v36 = vmul.f32 0.015625, %v3869_v30 }
 0x5c7   : > { %v4134_v10 = vsel %vm4133_vm7, %v6980_v56, %v4130_v16  ;;  %v3933_v45 = vpop.xlane.xlu1 %3932 }
 0x5c8   : > { %v4213_v59 = vmul.f32 %v4134_v10, %v4021_v2  ;;  %v3991_v12 = vmul.f32 %v3959_v36, %v3959_v36  ;;  %v3975_v48 = vmul.f32 0.015625, %v3933_v45  ;;  %v4022_v10 = vsub.f32 %v9479_v34, %v3958_v8 }
 0x5c9   : > { %v4023_v8 = vsub.f32 %v9499_v11, %v3959_v36 }
 0x5ca   : > { %v4230_v53 = vmul.f32 %v9625_v44, %v4213_v59  ;;  %v4007_v49 = vsub.f32 %v3975_v48, %v3991_v12 }
 0x5cb   : > { %v6982_v51 = vpop.eup %6981 }
 0x5cc   : > { %v9710_v0 = vadd.f32 %v9632_v55, %v4230_v53  ;;  %v4039_v24 = vadd.f32 0.1, %v4007_v49  ;;  %v4136_v23 = vmul.f32 %v6982_v51, %v4038_v58  ;;  %vm4142_vm8 = vweird.f32 %v6982_v51 }
 0x5cd   : > { %v3872_v56 = vpop.xlane.xlu2 %3871  ;;  %vm4143_vm10 = vmor %vm4141_vm9, %vm4142_vm8 }
 0x5ce   : > { %6443 = vmatmul.msk.f32.gmra.mxu1 %vm1167_vm4, %v9710_v0  ;;  %v9714_v42 = vmul.f32 0.015625, %v3872_v56  ;;  %6983 = vrsqrt.f32 %v4039_v24  ;;  %v4137_v63 = vmul.f32 %v6982_v51, %v4136_v23  ;;  %vm4151_vm12 = vweird.f32 %v4039_v24 }
 0x5cf   : > { %v3936_v14 = vpop.xlane.xlu0 %3935 }
 0x5d0   : > { %v3992_v3 = vmul.f32 %v9714_v42, %v9714_v42  ;;  %v3976_v17 = vmul.f32 0.015625, %v3936_v14  ;;  %v4138_v61 = vmul.f32 0.5, %v4137_v63 }
 0x5d2   : > { %v4008_v18 = vsub.f32 %v3976_v17, %v3992_v3  ;;  %v4139_v5 = vsub.f32 1.5, %v4138_v61 }
 0x5d3   : > { %v3875_v6 = vpop.xlane.xlu1 %3874 }
 0x5d4   : > { %v6984_v47 = vpop.eup %6983  ;;  %v4040_v43 = vadd.f32 0.1, %v4008_v18  ;;  %v4140_v16 = vmul.f32 %v6982_v51, %v4139_v5  ;;  %v9718_v2 = vmul.f32 0.015625, %v3875_v6 }
 0x5d5   : > { %v4146_v35 = vmul.f32 %v6984_v47, %v4039_v24  ;;  %v3939_v62 = vpop.xlane.xlu2 %3938  ;;  %vm4152_vm11 = vweird.f32 %v6984_v47 }
 0x5d6   : > { %6985 = vrsqrt.f32 %v4040_v43  ;;  %v3993_v30 = vmul.f32 %v9718_v2, %v9718_v2  ;;  %v3977_v53 = vmul.f32 0.015625, %v3939_v62  ;;  %v4144_v12 = vsel %vm4143_vm10, %v6982_v51, %v4140_v16  ;;  %vm4153_vm13 = vmor %vm4151_vm12, %vm4152_vm11 }
 0x5d7   : > { %v4147_v59 = vmul.f32 %v6984_v47, %v4146_v35  ;;  %v4214_v49 = vmul.f32 %v4144_v12, %v4022_v10  ;;  %vm4161_vm15 = vweird.f32 %v4040_v43 }
 0x5d8   : > { %v4009_v48 = vsub.f32 %v3977_v53, %v3993_v30 }
 0x5d9   : > { %v4148_v45 = vmul.f32 0.5, %v4147_v59  ;;  %v4231_v63 = vmul.f32 %v9625_v44, %v4214_v49 }
 0x5da   : > { %v4041_v23 = vadd.f32 0.1, %v4009_v48  ;;  %v4024_v48 = vsub.f32 %v9523_v22, %v9714_v42 }
 0x5db   : > { %v4149_v56 = vsub.f32 1.5, %v4148_v45  ;;  %v3878_v3 = vpop.xlane.xlu0 %3877  ;;  %v9728_v51 = vadd.f32 %v9632_v55, %v4231_v63 }
 0x5dc   : > { %v6986_v58 = vpop.eup %6985  ;;  %6987 = vrsqrt.f32 %v4041_v23  ;;  %v9725_v17 = vmul.f32 0.015625, %v3878_v3  ;;  %vm4171_vm2 = vweird.f32 %v4041_v23 }
 0x5dd   : > { %v4150_v14 = vmul.f32 %v6984_v47, %v4149_v56  ;;  %v4156_v34 = vmul.f32 %v6986_v58, %v4040_v43  ;;  %v3942_v61 = vpop.xlane.xlu1 %3941  ;;  %6444 = vmatmul.msk.f32.gmra.mxu1 %vm1167_vm4, %v9728_v51  ;;  %vm4162_vm14 = vweird.f32 %v6986_v58 }
 0x5de   : > { %v3978_v5 = vmul.f32 0.015625, %v3942_v61  ;;  %v3994_v16 = vmul.f32 %v9725_v17, %v9725_v17  ;;  %vm4163_vm0 = vmor %vm4161_vm15, %vm4162_vm14 }
 0x5df   : > { %v4157_v18 = vmul.f32 %v6986_v58, %v4156_v34  ;;  %v4154_v6 = vsel %vm4153_vm13, %v6984_v47, %v4150_v14 }
 0x5e0   : > { %v4215_v24 = vmul.f32 %v4154_v6, %v4023_v8  ;;  %v4010_v62 = vsub.f32 %v3978_v5, %v3994_v16 }
 0x5e1   : > { %v4158_v35 = vmul.f32 0.5, %v4157_v18 }
 0x5e2   : > { %v4232_v11 = vmul.f32 %v9625_v44, %v4215_v24  ;;  %v6988_v36 = vpop.eup %6987  ;;  %v4042_v30 = vadd.f32 0.1, %v4010_v62 }
 0x5e3   : > { %v4159_v10 = vsub.f32 1.5, %v4158_v35  ;;  %v4166_v59 = vmul.f32 %v6988_v36, %v4041_v23  ;;  %v3881_v53 = vpop.xlane.xlu2 %3880  ;;  %vm4172_vm1 = vweird.f32 %v6988_v36 }
 0x5e4   : > { %v9736_v12 = vadd.f32 %v9632_v55, %v4232_v11  ;;  %v9738_v45 = vmul.f32 0.015625, %v3881_v53  ;;  %6989 = vrsqrt.f32 %v4042_v30  ;;  %vm4173_vm3 = vmor %vm4171_vm2, %vm4172_vm1  ;;  %vm4181_vm6 = vweird.f32 %v4042_v30 }
 0x5e5   : > { %v4160_v47 = vmul.f32 %v6986_v58, %v4159_v10  ;;  %v4167_v49 = vmul.f32 %v6988_v36, %v4166_v59  ;;  %v3945_v56 = vpop.xlane.xlu0 %3944 }
 0x5e6   : > { %v3995_v63 = vmul.f32 %v9738_v45, %v9738_v45  ;;  %v3979_v3 = vmul.f32 0.015625, %v3945_v56  ;;  %6445 = vmatmul.msk.f32.gmra.mxu1 %vm1167_vm4, %v9736_v12 }
 0x5e7   : > { %v4164_v14 = vsel %vm4163_vm0, %v6986_v58, %v4160_v47  ;;  %v4168_v34 = vmul.f32 0.5, %v4167_v49  ;;  %v4025_v58 = vsub.f32 %v9556_v31, %v9718_v2 }
 0x5e8   : > { %v4216_v8 = vmul.f32 %v4164_v14, %v4024_v48  ;;  %v4011_v43 = vsub.f32 %v3979_v3, %v3995_v63  ;;  %v4026_v14 = vsub.f32 %v9576_v28, %v9725_v17  ;;  %v4027_v28 = vsub.f32 %v9593_v26, %v9738_v45 }
 0x5e9   : > { %v4169_v61 = vsub.f32 1.5, %v4168_v34  ;;  %v4255_v45 = vadd.f32 %v9636_v39, %v9289_v60  ;;  %v4256_v39 = vadd.f32 %v9648_v52, %v9301_v7 }
 0x5ea   : > { %v4233_v18 = vmul.f32 %v9625_v44, %v4216_v8  ;;  %v4043_v22 = vadd.f32 0.1, %v4011_v43  ;;  %v6990_v42 = vpop.eup %6989 }
 0x5eb   : > { %v4170_v5 = vmul.f32 %v6988_v36, %v4169_v61  ;;  %v3884_v6 = vpop.xlane.xlu1 %3883  ;;  %v4176_v24 = vmul.f32 %v6990_v42, %v4042_v30  ;;  %vm4182_vm5 = vweird.f32 %v6990_v42 }
 0x5ec   : > { %v9748_v16 = vadd.f32 %v9632_v55, %v4233_v18  ;;  %6991 = vrsqrt.f32 %v4043_v22  ;;  %v3964_v35 = vmul.f32 0.015625, %v3884_v6  ;;  %vm4183_vm7 = vmor %vm4181_vm6, %vm4182_vm5  ;;  %vm4191_vm9 = vweird.f32 %v4043_v22 }
 0x5ed   : > { %v3948_v62 = vpop.xlane.xlu2 %3947  ;;  %v4174_v11 = vsel %vm4173_vm3, %v6988_v36, %v4170_v5  ;;  %v4177_v10 = vmul.f32 %v6990_v42, %v4176_v24 }
 0x5ee   : > { %v3980_v59 = vmul.f32 0.015625, %v3948_v62  ;;  %v4217_v53 = vmul.f32 %v4174_v11, %v4025_v58  ;;  %v3996_v47 = vmul.f32 %v3964_v35, %v3964_v35  ;;  %6446 = vmatmul.msk.f32.gmra.mxu1 %vm1167_vm4, %v9748_v16  ;;  %v9773_v11 = vld [vmem:[%s10670_s4 + $0x4] ss:$0 sm:$0xff] }
 0x5ef   : > { %v4178_v23 = vmul.f32 0.5, %v4177_v10 }
 0x5f0   : > { %v4234_v48 = vmul.f32 %v9625_v44, %v4217_v53  ;;  %v4012_v49 = vsub.f32 %v3980_v59, %v3996_v47 }
 0x5f1   : > { %v4179_v63 = vsub.f32 1.5, %v4178_v23 }
 0x5f2   : > { %v6992_v56 = vpop.eup %6991  ;;  %v4044_v2 = vadd.f32 0.1, %v4012_v49  ;;  %v9756_v3 = vadd.f32 %v9632_v55, %v4234_v48  ;;  %v4028_v48 = vsub.f32 %v9609_v13, %v3964_v35 }
 0x5f3   : > { %v4186_v31 = vmul.f32 %v6992_v56, %v4043_v22  ;;  %v4180_v36 = vmul.f32 %v6990_v42, %v4179_v63  ;;  %vm4192_vm8 = vweird.f32 %v6992_v56 }
 0x5f4   : > { %6993 = vrsqrt.f32 %v4044_v2  ;;  %vm4193_vm10 = vmor %vm4191_vm9, %vm4192_vm8  ;;  %vm4201_vm12 = vweird.f32 %v4044_v2 }
 0x5f5   : > { %v4187_v34 = vmul.f32 %v6992_v56, %v4186_v31  ;;  %v4184_v8 = vsel %vm4183_vm7, %v6990_v42, %v4180_v36 }
 0x5f6   : > { %6447 = vmatmul.msk.f32.gmra.mxu1 %vm1167_vm4, %v9756_v3  ;;  %v4218_v61 = vmul.f32 %v4184_v8, %v4026_v14 }
 0x5f7   : > { %v4188_v43 = vmul.f32 0.5, %v4187_v34 }
 0x5f8   : > { %v4235_v5 = vmul.f32 %v9625_v44, %v4218_v61 }
 0x5f9   : > { %v4189_v18 = vsub.f32 1.5, %v4188_v43 }
 0x5fa   : > { %v6994_v6 = vpop.eup %6993  ;;  %v9764_v30 = vadd.f32 %v9632_v55, %v4235_v5 }
 0x5fb   : > { %v4190_v58 = vmul.f32 %v6992_v56, %v4189_v18  ;;  %v4196_v17 = vmul.f32 %v6994_v6, %v4044_v2  ;;  %vm4202_vm11 = vweird.f32 %v6994_v6 }
 0x5fc   : > { %vm4203_vm13 = vmor %vm4201_vm12, %vm4202_vm11 }
 0x5fd   : > { %v4194_v42 = vsel %vm4193_vm10, %v6992_v56, %v4190_v58  ;;  %v4197_v24 = vmul.f32 %v6994_v6, %v4196_v17  ;;  %v4258_v17 = vadd.f32 %v9672_v15, %v9319_v21 }
 0x5fe   : > { %v4219_v62 = vmul.f32 %v4194_v42, %v4027_v28  ;;  %6448 = vmatmul.msk.f32.gmra.mxu1 %vm1167_vm4, %v9764_v30 }
 0x5ff   : > { %v4198_v22 = vmul.f32 0.5, %v4197_v24 }
 0x600   : > { %v4236_v10 = vmul.f32 %v9625_v44, %v4219_v62 }
 0x601   : > { %v4199_v59 = vsub.f32 1.5, %v4198_v22 }
 0x602   : > { %v9777_v26 = vadd.f32 %v9632_v55, %v4236_v10 }
 0x603   : > { %v4200_v23 = vmul.f32 %v6994_v6, %v4199_v59 }
 0x605   : > { %v4346_v53 = vpop.f32.mrf.mxu1  ;;  %v4204_v56 = vsel %vm4203_vm13, %v6994_v6, %v4200_v23 }
 0x606   : > { %v4347_v47 = vadd.f32 %v9773_v11, %v4346_v53  ;;  %6449 = vmatmul.msk.f32.gmra.mxu1 %vm1167_vm4, %v9777_v26  ;;  %v4220_v31 = vmul.f32 %v4204_v56, %v4028_v48 }
 0x608   : > { %v4394_v49 = vadd.f32 %v4347_v47, %v4255_v45  ;;  %v4237_v36 = vmul.f32 %v9625_v44, %v4220_v31  ;;  %v4259_v31 = vadd.f32 %v9680_v33, %v9330_v1 }
 0x60a   : > { %v6451_v63 = vmul.f32 -1.442695, %v4394_v49  ;;  %v9787_v60 = vadd.f32 %v9632_v55, %v4237_v36  ;;  %v4257_v55 = vadd.f32 %v9660_v19, %v9310_v54 }
 0x60c   : > { %6995 = vpow2.f32 %v6451_v63 }
 0x60d   : > { %v4349_v14 = vpop.f32.mrf.mxu1 }
 0x60e   : > { %v4350_v13 = vadd.f32 %v9773_v11, %v4349_v14  ;;  %6450 = vmatmul.msk.f32.gmra.mxu1 %vm1167_vm4, %v9787_v60 }
 0x610   : > { %v9792_v35 = vadd.f32 %v4350_v13, %v4256_v39 }
 0x612   : > { %v6996_v2 = vpop.eup %6995  ;;  %v6452_v34 = vmul.f32 -1.442695, %v9792_v35 }
 0x613   : > { %v4458_v8 = vadd.f32 1.0, %v6996_v2 }
 0x614   : > { %6997 = vpow2.f32 %v6452_v34 }
 0x615   : > { %6999 = vrcp.f32 %v4458_v8  ;;  %v4485_v54 = vand.u32 2147483648, %v4458_v8  ;;  %v4483_v24 = vand.u32 2147483647, %v4458_v8  ;;  %vm4479_vm15 = vweird.f32 %v4458_v8 }
 0x617   : > { %v4352_v44 = vpop.f32.mrf.mxu1  ;;  %v4486_v45 = vor.u32 1.1754944e-38, %v4485_v54  ;;  %vm4484_vm1 = vcmp.eq.f32.partialorder %v4483_v24, 8.507059e+37 }
 0x618   : > { %v4353_v43 = vadd.f32 %v9773_v11, %v4352_v44 }
 0x61a   : > { %v9800_v7 = vadd.f32 %v4353_v43, %v4257_v55  ;;  %v6998_v52 = vpop.eup %6997 }
 0x61b   : > { %v7000_v18 = vpop.eup %6999  ;;  %v4459_v5 = vadd.f32 1.0, %v6998_v52 }
 0x61c   : > { %v6453_v61 = vmul.f32 -1.442695, %v9800_v7  ;;  %v4475_v6 = vmul.f32 %v7000_v18, %v4458_v8  ;;  %vm4480_vm14 = vweird.f32 %v7000_v18 }
 0x61d   : > { %vm4481_vm0 = vmor %vm4479_vm15, %vm4480_vm14  ;;  %v4498_v14 = vand.u32 2147483647, %v4459_v5  ;;  %v4500_v39 = vand.u32 2147483648, %v4459_v5  ;;  %vm4494_vm3 = vweird.f32 %v4459_v5 }
 0x61e   : > { %7001 = vpow2.f32 %v6453_v61  ;;  %v4476_v28 = vsub.f32 1.0, %v4475_v6 }
 0x61f   : > { %7003 = vrcp.f32 %v4459_v5  ;;  %v4355_v58 = vpop.f32.mrf.mxu1  ;;  %v4501_v55 = vor.u32 1.1754944e-38, %v4500_v39  ;;  %vm4499_vm6 = vcmp.eq.f32.partialorder %v4498_v14, 8.507059e+37  ;;  %v4261_v14 = vadd.f32 %v9696_v29, %v9364_v50 }
 0x620   : > { %v4356_v42 = vadd.f32 %v9773_v11, %v4355_v58  ;;  %v4477_v19 = vmul.f32 %v7000_v18, %v4476_v28 }
 0x622   : > { %v9806_v62 = vadd.f32 %v4356_v42, %v4258_v17  ;;  %v4478_v10 = vadd.f32 %v7000_v18, %v4477_v19  ;;  %v4260_v17 = vadd.f32 %v9688_v57, %v9347_v27 }
 0x624   : > { %v7002_v22 = vpop.eup %7001  ;;  %v6454_v59 = vmul.f32 -1.442695, %v9806_v62  ;;  %v4482_v23 = vsel %vm4481_vm0, %v7000_v18, %v4478_v10 }
 0x625   : > { %v7004_v53 = vpop.eup %7003  ;;  %v4460_v47 = vadd.f32 1.0, %v7002_v22  ;;  %v4487_v15 = vsel %vm4484_vm1, %v4486_v45, %v4482_v23 }
 0x626   : > { %v4490_v21 = vmul.f32 %v7004_v53, %v4459_v5  ;;  %7005 = vpow2.f32 %v6454_v59  ;;  %v9809_v56 = vmul.f32 %v4487_v15, %v4394_v49  ;;  %vm4495_vm2 = vweird.f32 %v7004_v53 }
 0x627   : > { %7007 = vrcp.f32 %v4460_v47  ;;  %v4358_v48 = vpop.f32.mrf.mxu1  ;;  %vm4496_vm5 = vmor %vm4494_vm3, %vm4495_vm2  ;;  %v4513_v54 = vand.u32 2147483647, %v4460_v47  ;;  %v4515_v19 = vand.u32 2147483648, %v4460_v47  ;;  %vm4509_vm8 = vweird.f32 %v4460_v47 }
 0x628   : > { %v4491_v63 = vsub.f32 1.0, %v4490_v21  ;;  %v4359_v36 = vadd.f32 %v9773_v11, %v4358_v48  ;;  %v4732_v34 = vsel %vm1167_vm4, %v9809_v56, 0.0  ;;  %v4780_v49 = vmul.f32 %v9809_v56, %v9809_v56 }
 0x629   : > { %4733 = vadd.xlane.f32.xlu0 %v4732_v34  ;;  %v4516_v45 = vor.u32 1.1754944e-38, %v4515_v19  ;;  %vm4514_vm10 = vcmp.eq.f32.partialorder %v4513_v54, 8.507059e+37 }
 0x62a   : > { %v4492_v13 = vmul.f32 %v7004_v53, %v4491_v63  ;;  %v9814_v2 = vadd.f32 %v4359_v36, %v4259_v31  ;;  %v4796_v52 = vsel %vm1167_vm4, %v4780_v49, 0.0 }
 0x62b   : > { %4797 = vadd.xlane.f32.xlu1 %v4796_v52 }
 0x62c   : > { %v7006_v8 = vpop.eup %7005  ;;  %v4493_v44 = vadd.f32 %v7004_v53, %v4492_v13  ;;  %v6455_v1 = vmul.f32 -1.442695, %v9814_v2 }
 0x62d   : > { %v7008_v33 = vpop.eup %7007  ;;  %v4461_v43 = vadd.f32 1.0, %v7006_v8 }
 0x62e   : > { %v4497_v61 = vsel %vm4496_vm5, %v7004_v53, %v4493_v44  ;;  %v4505_v18 = vmul.f32 %v7008_v33, %v4460_v47  ;;  %7009 = vpow2.f32 %v6455_v1  ;;  %vm4510_vm7 = vweird.f32 %v7008_v33 }
 0x62f   : > { %v4502_v6 = vsel %vm4499_vm6, %v4501_v55, %v4497_v61  ;;  %7011 = vrcp.f32 %v4461_v43  ;;  %v4361_v58 = vpop.f32.mrf.mxu1  ;;  %vm4511_vm9 = vmor %vm4509_vm8, %vm4510_vm7  ;;  %v4528_v13 = vand.u32 2147483647, %v4461_v43  ;;  %v4530_v34 = vand.u32 2147483648, %v4461_v43 }
 0x630   : > { %v9823_v28 = vmul.f32 %v4502_v6, %v9792_v35  ;;  %v4506_v5 = vsub.f32 1.0, %v4505_v18  ;;  %v4362_v42 = vadd.f32 %v9773_v11, %v4361_v58  ;;  %vm4524_vm12 = vweird.f32 %v4461_v43 }
 0x631   : > { %v4531_v55 = vor.u32 1.1754944e-38, %v4530_v34  ;;  %vm4529_vm14 = vcmp.eq.f32.partialorder %v4528_v13, 8.507059e+37 }
 0x632   : > { %v4507_v24 = vmul.f32 %v7008_v33, %v4506_v5  ;;  %v9828_v22 = vadd.f32 %v4362_v42, %v4260_v17  ;;  %v4735_v10 = vsel %vm1167_vm4, %v9823_v28, 0.0  ;;  %v4781_v35 = vmul.f32 %v9823_v28, %v9823_v28 }
 0x633   : > { %4736 = vadd.xlane.f32.xlu2 %v4735_v10 }
 0x634   : > { %v7010_v59 = vpop.eup %7009  ;;  %v4508_v53 = vadd.f32 %v7008_v33, %v4507_v24  ;;  %v6456_v27 = vmul.f32 -1.442695, %v9828_v22  ;;  %v4799_v21 = vsel %vm1167_vm4, %v4781_v35, 0.0  ;;  %v4262_v35 = vadd.f32 %v9703_v25, %v9385_v4 }
 0x635   : > { %v7012_v57 = vpop.eup %7011  ;;  %v4462_v23 = vadd.f32 1.0, %v7010_v59  ;;  %4800 = vadd.xlane.f32.xlu0 %v4799_v21 }
 0x636   : > { %v4512_v15 = vsel %vm4511_vm9, %v7008_v33, %v4508_v53  ;;  %v4520_v48 = vmul.f32 %v7012_v57, %v4461_v43  ;;  %7013 = vpow2.f32 %v6456_v27  ;;  %vm4525_vm11 = vweird.f32 %v7012_v57 }
 0x637   : > { %v4517_v63 = vsel %vm4514_vm10, %v4516_v45, %v4512_v15  ;;  %7015 = vrcp.f32 %v4462_v23  ;;  %v4364_v31 = vpop.f32.mrf.mxu1  ;;  %vm4526_vm13 = vmor %vm4524_vm12, %vm4525_vm11  ;;  %v4543_v43 = vand.u32 2147483647, %v4462_v23  ;;  %v4545_v42 = vand.u32 2147483648, %v4462_v23 }
 0x638   : > { %v9837_v36 = vmul.f32 %v4517_v63, %v9800_v7  ;;  %v4521_v47 = vsub.f32 1.0, %v4520_v48  ;;  %v4365_v39 = vadd.f32 %v9773_v11, %v4364_v31  ;;  %vm4539_vm0 = vweird.f32 %v4462_v23 }
 0x639   : > { %v4546_v45 = vor.u32 1.1754944e-38, %v4545_v42  ;;  %vm4544_vm2 = vcmp.eq.f32.partialorder %v4543_v43, 8.507059e+37 }
 0x63a   : > { %v4522_v49 = vmul.f32 %v7012_v57, %v4521_v47  ;;  %v9842_v8 = vadd.f32 %v4365_v39, %v4261_v14  ;;  %v4738_v44 = vsel %vm1167_vm4, %v9837_v36, 0.0  ;;  %v4782_v7 = vmul.f32 %v9837_v36, %v9837_v36 }
 0x63b   : > { %4739 = vadd.xlane.f32.xlu1 %v4738_v44 }
 0x63c   : > { %v7014_v1 = vpop.eup %7013  ;;  %v4523_v33 = vadd.f32 %v7012_v57, %v4522_v49  ;;  %v6457_v50 = vmul.f32 -1.442695, %v9842_v8  ;;  %v4802_v61 = vsel %vm1167_vm4, %v4782_v7, 0.0 }
 0x63d   : > { %v7016_v29 = vpop.eup %7015  ;;  %v4463_v52 = vadd.f32 1.0, %v7014_v1  ;;  %4803 = vadd.xlane.f32.xlu2 %v4802_v61 }
 0x63e   : > { %v4527_v18 = vsel %vm4526_vm13, %v7012_v57, %v4523_v33  ;;  %v4535_v6 = vmul.f32 %v7016_v29, %v4462_v23  ;;  %7017 = vpow2.f32 %v6457_v50  ;;  %vm4540_vm15 = vweird.f32 %v7016_v29 }
 0x63f   : > { %v4532_v58 = vsel %vm4529_vm14, %v4531_v55, %v4527_v18  ;;  %7019 = vrcp.f32 %v4463_v52  ;;  %vm4541_vm1 = vmor %vm4539_vm0, %vm4540_vm15  ;;  %v4558_v47 = vand.u32 2147483647, %v4463_v52  ;;  %v4560_v14 = vand.u32 2147483648, %v4463_v52 }
 0x640   : > { %v9851_v5 = vmul.f32 %v4532_v58, %v9806_v62  ;;  %v4536_v17 = vsub.f32 1.0, %v4535_v6  ;;  %vm4554_vm5 = vweird.f32 %v4463_v52 }
 0x641   : > { %v4561_v33 = vor.u32 1.1754944e-38, %v4560_v14  ;;  %vm4559_vm7 = vcmp.eq.f32.partialorder %v4558_v47, 8.507059e+37 }
 0x642   : > { %v4537_v54 = vmul.f32 %v7016_v29, %v4536_v17  ;;  %v4741_v19 = vsel %vm1167_vm4, %v9851_v5, 0.0  ;;  %v4783_v24 = vmul.f32 %v9851_v5, %v9851_v5 }
 0x643   : > { %v4367_v10 = vpop.f32.mrf.mxu1  ;;  %4742 = vadd.xlane.f32.xlu0 %v4741_v19 }
 0x644   : > { %v4368_v59 = vadd.f32 %v9773_v11, %v4367_v10  ;;  %v7018_v62 = vpop.eup %7017  ;;  %v4538_v53 = vadd.f32 %v7016_v29, %v4537_v54  ;;  %v4805_v27 = vsel %vm1167_vm4, %v4783_v24, 0.0 }
 0x645   : > { %v7020_v57 = vpop.eup %7019  ;;  %v4464_v21 = vadd.f32 1.0, %v7018_v62  ;;  %4806 = vadd.xlane.f32.xlu1 %v4805_v27 }
 0x646   : > { %v9861_v15 = vadd.f32 %v4368_v59, %v4262_v35  ;;  %v4542_v48 = vsel %vm4541_vm1, %v7016_v29, %v4538_v53  ;;  %v4550_v63 = vmul.f32 %v7020_v57, %v4463_v52  ;;  %vm4555_vm3 = vweird.f32 %v7020_v57 }
 0x647   : > { %v4547_v31 = vsel %vm4544_vm2, %v4546_v45, %v4542_v48  ;;  %7021 = vrcp.f32 %v4464_v21  ;;  %vm4556_vm6 = vmor %vm4554_vm5, %vm4555_vm3  ;;  %v4573_v52 = vand.u32 2147483647, %v4464_v21  ;;  %v4575_v17 = vand.u32 2147483648, %v4464_v21 }
 0x648   : > { %v9864_v4 = vmul.f32 %v4547_v31, %v9814_v2  ;;  %v4551_v25 = vsub.f32 1.0, %v4550_v63  ;;  %v6458_v23 = vmul.f32 -1.442695, %v9861_v15  ;;  %v4263_v2 = vadd.f32 %v9710_v0, %v9402_v38 }
 0x649   : > { %vm4569_vm9 = vweird.f32 %v4464_v21  ;;  %v4576_v10 = vor.u32 1.1754944e-38, %v4575_v17  ;;  %vm4574_vm11 = vcmp.eq.f32.partialorder %v4573_v52, 8.507059e+37 }
 0x64a   : > { %v4552_v39 = vmul.f32 %v7020_v57, %v4551_v25  ;;  %7023 = vpow2.f32 %v6458_v23  ;;  %v4744_v13 = vsel %vm1167_vm4, %v9864_v4, 0.0  ;;  %v4784_v49 = vmul.f32 %v9864_v4, %v9864_v4 }
 0x64b   : > { %v4370_v34 = vpop.f32.mrf.mxu1  ;;  %4745 = vadd.xlane.f32.xlu2 %v4744_v13 }
 0x64c   : > { %v4371_v44 = vadd.f32 %v9773_v11, %v4370_v34  ;;  %v4553_v7 = vadd.f32 %v7020_v57, %v4552_v39  ;;  %v4808_v50 = vsel %vm1167_vm4, %v4784_v49, 0.0 }
 0x64d   : > { %v7022_v1 = vpop.eup %7021  ;;  %4809 = vadd.xlane.f32.xlu0 %v4808_v50 }
 0x64e   : > { %v9875_v29 = vadd.f32 %v4371_v44, %v4263_v2  ;;  %v4557_v55 = vsel %vm4556_vm6, %v7020_v57, %v4553_v7  ;;  %v4565_v61 = vmul.f32 %v7022_v1, %v4464_v21  ;;  %vm4570_vm8 = vweird.f32 %v7022_v1 }
 0x64f   : > { %v4562_v18 = vsel %vm4559_vm7, %v4561_v33, %v4557_v55  ;;  %vm4571_vm10 = vmor %vm4569_vm9, %vm4570_vm8  ;;  %v4264_v2 = vadd.f32 %v9728_v51, %v9428_v20 }
 0x650   : > { %v6459_v6 = vmul.f32 -1.442695, %v9875_v29  ;;  %v7024_v58 = vpop.eup %7023  ;;  %v9879_v38 = vmul.f32 %v4562_v18, %v9828_v22  ;;  %v4566_v0 = vsub.f32 1.0, %v4565_v61 }
 0x651   : > { %v4465_v43 = vadd.f32 1.0, %v7024_v58 }
 0x652   : > { %7025 = vpow2.f32 %v6459_v6  ;;  %v4567_v42 = vmul.f32 %v7022_v1, %v4566_v0  ;;  %v4747_v54 = vsel %vm1167_vm4, %v9879_v38, 0.0  ;;  %v4785_v19 = vmul.f32 %v9879_v38, %v9879_v38 }
 0x653   : > { %7027 = vrcp.f32 %v4465_v43  ;;  %4748 = vadd.xlane.f32.xlu1 %v4747_v54  ;;  %v4590_v31 = vand.u32 2147483648, %v4465_v43  ;;  %v4588_v47 = vand.u32 2147483647, %v4465_v43  ;;  %vm4584_vm13 = vweird.f32 %v4465_v43 }
 0x654   : > { %v4568_v24 = vadd.f32 %v7022_v1, %v4567_v42  ;;  %v4811_v22 = vsel %vm1167_vm4, %v4785_v19, 0.0  ;;  %v4265_v42 = vadd.f32 %v9736_v12, %v9444_v46 }
 0x655   : > { %4812 = vadd.xlane.f32.xlu2 %v4811_v22  ;;  %v4591_v39 = vor.u32 1.1754944e-38, %v4590_v31  ;;  %vm4589_vm15 = vcmp.eq.f32.partialorder %v4588_v47, 8.507059e+37  ;;  %v4267_v47 = vadd.f32 %v9756_v3, %v9471_v32 }
 0x656   : > { %v4572_v35 = vsel %vm4571_vm10, %v7022_v1, %v4568_v24 }
 0x657   : > { %v4577_v62 = vsel %vm4574_vm11, %v4576_v10, %v4572_v35 }
 0x658   : > { %v7026_v59 = vpop.eup %7025  ;;  %v9887_v53 = vmul.f32 %v4577_v62, %v9842_v8 }
 0x659   : > { %v4466_v27 = vadd.f32 1.0, %v7026_v59  ;;  %v7028_v57 = vpop.eup %7027 }
 0x65a   : > { %v4580_v45 = vmul.f32 %v7028_v57, %v4465_v43  ;;  %v4750_v48 = vsel %vm1167_vm4, %v9887_v53, 0.0  ;;  %v4786_v21 = vmul.f32 %v9887_v53, %v9887_v53  ;;  %vm4585_vm12 = vweird.f32 %v7028_v57  ;;  %v4373_v34 = vpop.f32.mrf.mxu1 }
 0x65b   : > { %7029 = vrcp.f32 %v4466_v27  ;;  %4751 = vadd.xlane.f32.xlu0 %v4750_v48  ;;  %vm4586_vm14 = vmor %vm4584_vm13, %vm4585_vm12  ;;  %v4374_v44 = vadd.f32 %v9773_v11, %v4373_v34  ;;  %v4605_v50 = vand.u32 2147483648, %v4466_v27  ;;  %v4603_v18 = vand.u32 2147483647, %v4466_v27 }
 0x65c   : > { %v4581_v63 = vsub.f32 1.0, %v4580_v45  ;;  %v4814_v25 = vsel %vm1167_vm4, %v4786_v21, 0.0  ;;  %vm4599_vm1 = vweird.f32 %v4466_v27 }
 0x65d   : > { %4815 = vadd.xlane.f32.xlu1 %v4814_v25  ;;  %v9900_v55 = vadd.f32 %v4374_v44, %v4264_v2  ;;  %vm4604_vm3 = vcmp.eq.f32.partialorder %v4603_v18, 8.507059e+37 }
 0x65e   : > { %v4582_v23 = vmul.f32 %v7028_v57, %v4581_v63 }
 0x65f   : > { %v6460_v6 = vmul.f32 -1.442695, %v9900_v55 }
 0x660   : > { %v4583_v14 = vadd.f32 %v7028_v57, %v4582_v23 }
 0x661   : > { %v7030_v8 = vpop.eup %7029  ;;  %7031 = vpow2.f32 %v6460_v6  ;;  %v4268_v6 = vadd.f32 %v9764_v30, %v9483_v40 }
 0x662   : > { %v4595_v13 = vmul.f32 %v7030_v8, %v4466_v27  ;;  %v4587_v49 = vsel %vm4586_vm14, %v7028_v57, %v4583_v14  ;;  %vm4600_vm0 = vweird.f32 %v7030_v8 }
 0x663   : > { %v4592_v7 = vsel %vm4589_vm15, %v4591_v39, %v4587_v49  ;;  %vm4601_vm2 = vmor %vm4599_vm1, %vm4600_vm0  ;;  %v4376_v17 = vpop.f32.mrf.mxu1 }
 0x664   : > { %v4596_v1 = vsub.f32 1.0, %v4595_v13  ;;  %v9898_v33 = vmul.f32 %v4592_v7, %v9861_v15  ;;  %v4606_v15 = vor.u32 1.1754944e-38, %v4605_v50  ;;  %v4377_v54 = vadd.f32 %v9773_v11, %v4376_v17 }
 0x666   : > { %v4597_v61 = vmul.f32 %v7030_v8, %v4596_v1  ;;  %v4753_v58 = vsel %vm1167_vm4, %v9898_v33, 0.0  ;;  %v4787_v20 = vmul.f32 %v9898_v33, %v9898_v33  ;;  %v9914_v24 = vadd.f32 %v4377_v54, %v4265_v42 }
 0x667   : > { %4754 = vadd.xlane.f32.xlu2 %v4753_v58  ;;  %v7032_v35 = vpop.eup %7031 }
 0x668   : > { %v4598_v51 = vadd.f32 %v7030_v8, %v4597_v61  ;;  %v4817_v0 = vsel %vm1167_vm4, %v4787_v20, 0.0  ;;  %v6461_v59 = vmul.f32 -1.442695, %v9914_v24  ;;  %v4467_v62 = vadd.f32 1.0, %v7032_v35 }
 0x669   : > { %4818 = vadd.xlane.f32.xlu0 %v4817_v0 }
 0x66a   : > { %v4602_v52 = vsel %vm4601_vm2, %v7030_v8, %v4598_v51  ;;  %7033 = vpow2.f32 %v6461_v59  ;;  %v4618_v14 = vand.u32 2147483647, %v4467_v62  ;;  %vm4614_vm6 = vweird.f32 %v4467_v62 }
 0x66b   : > { %v4607_v43 = vsel %vm4604_vm3, %v4606_v15, %v4602_v52  ;;  %7035 = vrcp.f32 %v4467_v62  ;;  %v4379_v12 = vpop.f32.mrf.mxu1 }
 0x66c   : > { %v9912_v19 = vmul.f32 %v4607_v43, %v9875_v29  ;;  %v4266_v29 = vadd.f32 %v9748_v16, %v9461_v41  ;;  %v4380_v27 = vadd.f32 %v9773_v11, %v4379_v12  ;;  %v4620_v41 = vand.u32 2147483648, %v4467_v62 }
 0x66d   : > { %vm4619_vm8 = vcmp.eq.f32.partialorder %v4618_v14, 8.507059e+37 }
 0x66e   : > { %v4756_v22 = vsel %vm1167_vm4, %v9912_v19, 0.0  ;;  %v4788_v10 = vmul.f32 %v9912_v19, %v9912_v19  ;;  %v9925_v57 = vadd.f32 %v4380_v27, %v4266_v29  ;;  %v4621_v44 = vor.u32 1.1754944e-38, %v4620_v41 }
 0x66f   : > { %4757 = vadd.xlane.f32.xlu1 %v4756_v22  ;;  %v4269_v29 = vadd.f32 %v9777_v26, %v9503_v37 }
 0x670   : > { %v4820_v46 = vsel %vm1167_vm4, %v4788_v10, 0.0  ;;  %v7034_v45 = vpop.eup %7033  ;;  %v6462_v48 = vmul.f32 -1.442695, %v9925_v57 }
 0x671   : > { %4821 = vadd.xlane.f32.xlu2 %v4820_v46  ;;  %v7036_v21 = vpop.eup %7035  ;;  %v4468_v63 = vadd.f32 1.0, %v7034_v45  ;;  %v5157_v45 = vld [vmem:[%s10669_s3 + $0x138] sm:$0xff] }
 0x672   : > { %v4610_v31 = vmul.f32 %v7036_v21, %v4467_v62  ;;  %7037 = vpow2.f32 %v6462_v48  ;;  %vm4615_vm5 = vweird.f32 %v7036_v21  ;;  %5216 = vmatpush.msrb.mxu2 %v5157_v45 }
 0x673   : > { %7039 = vrcp.f32 %v4468_v63  ;;  %v4382_v25 = vpop.f32.mrf.mxu1  ;;  %vm4616_vm7 = vmor %vm4614_vm6, %vm4615_vm5  ;;  %v4633_v20 = vand.u32 2147483647, %v4468_v63  ;;  %v4635_v51 = vand.u32 2147483648, %v4468_v63  ;;  %vm4629_vm10 = vweird.f32 %v4468_v63 }
 0x674   : > { %v4611_v23 = vsub.f32 1.0, %v4610_v31  ;;  %v4383_v8 = vadd.f32 %v9773_v11, %v4382_v25 }
 0x675   : > { %v4636_v42 = vor.u32 1.1754944e-38, %v4635_v51  ;;  %vm4634_vm12 = vcmp.eq.f32.partialorder %v4633_v20, 8.507059e+37 }
 0x676   : > { %v4612_v16 = vmul.f32 %v7036_v21, %v4611_v23  ;;  %v9931_v39 = vadd.f32 %v4383_v8, %v4267_v47 }
 0x678   : > { %v7038_v13 = vpop.eup %7037  ;;  %v4613_v34 = vadd.f32 %v7036_v21, %v4612_v16  ;;  %v6463_v49 = vmul.f32 -1.442695, %v9931_v39 }
 0x679   : > { %v7040_v2 = vpop.eup %7039  ;;  %v4469_v7 = vadd.f32 1.0, %v7038_v13 }
 0x67a   : > { %v4617_v1 = vsel %vm4616_vm7, %v7036_v21, %v4613_v34  ;;  %v4625_v32 = vmul.f32 %v7040_v2, %v4468_v63  ;;  %7041 = vpow2.f32 %v6463_v49  ;;  %vm4630_vm9 = vweird.f32 %v7040_v2 }
 0x67b   : > { %v4622_v3 = vsel %vm4619_vm8, %v4621_v44, %v4617_v1  ;;  %7043 = vrcp.f32 %v4469_v7  ;;  %v4385_v50 = vpop.f32.mrf.mxu1  ;;  %vm4631_vm11 = vmor %vm4629_vm10, %vm4630_vm9  ;;  %v4648_v48 = vand.u32 2147483647, %v4469_v7  ;;  %v4650_v21 = vand.u32 2147483648, %v4469_v7 }
 0x67c   : > { %v9935_v61 = vmul.f32 %v4622_v3, %v9900_v55  ;;  %v4626_v18 = vsub.f32 1.0, %v4625_v32  ;;  %v4386_v58 = vadd.f32 %v9773_v11, %v4385_v50  ;;  %vm4644_vm14 = vweird.f32 %v4469_v7  ;;  %v5156_v32 = vld [vmem:[%s10669_s3 + $0x130] sm:$0xff]  ;;  %v5155_v3 = vld [vmem:[%s10669_s3 + $0x128] sm:$0xff] }
 0x67d   : > { %v4651_v8 = vor.u32 1.1754944e-38, %v4650_v21  ;;  %vm4649_vm0 = vcmp.eq.f32.partialorder %v4648_v48, 8.507059e+37  ;;  %5217 = vmatpush.msrb.mxu2 %v5156_v32 }
 0x67e   : > { %v4627_v15 = vmul.f32 %v7040_v2, %v4626_v18  ;;  %v9940_v0 = vadd.f32 %v4386_v58, %v4268_v6  ;;  %v4759_v52 = vsel %vm1167_vm4, %v9935_v61, 0.0  ;;  %v4789_v55 = vmul.f32 %v9935_v61, %v9935_v61 }
 0x67f   : > { %4760 = vadd.xlane.f32.xlu0 %v4759_v52  ;;  %5218 = vmatpush.msrb.mxu2 %v5155_v3 }
 0x680   : > { %v7042_v17 = vpop.eup %7041  ;;  %v4628_v43 = vadd.f32 %v7040_v2, %v4627_v15  ;;  %v6464_v40 = vmul.f32 -1.442695, %v9940_v0  ;;  %v4823_v22 = vsel %vm1167_vm4, %v4789_v55, 0.0 }
 0x681   : > { %v7044_v30 = vpop.eup %7043  ;;  %v9947_v54 = vadd.f32 1.0, %v7042_v17  ;;  %4824 = vadd.xlane.f32.xlu1 %v4823_v22  ;;  %v5153_v22 = vld [vmem:[%s10669_s3 + $0x118] sm:$0xff] }
 0x682   : > { %v4632_v10 = vsel %vm4631_vm11, %v7040_v2, %v4628_v43  ;;  %v4640_v35 = vmul.f32 %v7044_v30, %v4469_v7  ;;  %7045 = vpow2.f32 %v6464_v40  ;;  %vm4645_vm13 = vweird.f32 %v7044_v30 }
 0x683   : > { %v4637_v59 = vsel %vm4634_vm12, %v4636_v42, %v4632_v10  ;;  %7047 = vrcp.f32 %v9947_v54  ;;  %v4388_v62 = vpop.f32.mrf.mxu1  ;;  %vm4646_vm15 = vmor %vm4644_vm14, %vm4645_vm13  ;;  %v4270_v7 = vadd.f32 %v9787_v60, %v9527_v9  ;;  %v4663_v50 = vand.u32 2147483647, %v9947_v54 }
 0x684   : > { %v9952_v46 = vmul.f32 %v4637_v59, %v9914_v24  ;;  %v4641_v12 = vsub.f32 1.0, %v4640_v35  ;;  %v4389_v27 = vadd.f32 %v9773_v11, %v4388_v62  ;;  %v4665_v18 = vand.u32 2147483648, %v9947_v54 }
 0x685   : > { %vm4659_vm2 = vweird.f32 %v9947_v54  ;;  %vm4664_vm5 = vcmp.eq.f32.partialorder %v4663_v50, 8.507059e+37 }
 0x686   : > { %v4642_v63 = vmul.f32 %v7044_v30, %v4641_v12  ;;  %v9960_v31 = vadd.f32 %v4389_v27, %v4269_v29  ;;  %v4762_v24 = vsel %vm1167_vm4, %v9952_v46, 0.0  ;;  %v4790_v37 = vmul.f32 %v9952_v46, %v9952_v46 }
 0x687   : > { %4763 = vadd.xlane.f32.xlu2 %v4762_v24  ;;  %v4666_v52 = vor.u32 1.1754944e-38, %v4665_v18 }
 0x688   : > { %v7046_v26 = vpop.eup %7045  ;;  %v4643_v25 = vadd.f32 %v7044_v30, %v4642_v63  ;;  %v6465_v23 = vmul.f32 -1.442695, %v9960_v31  ;;  %v4826_v16 = vsel %vm1167_vm4, %v4790_v37, 0.0  ;;  %v5152_v37 = vld [vmem:[%s10669_s3 + $0x110] sm:$0xff] }
 0x689   : > { %v7048_v47 = vpop.eup %7047  ;;  %v9967_v41 = vadd.f32 1.0, %v7046_v26  ;;  %4827 = vadd.xlane.f32.xlu0 %v4826_v16 }
 0x68a   : > { %v4647_v14 = vsel %vm4646_vm15, %v7044_v30, %v4643_v25  ;;  %v4655_v13 = vmul.f32 %v7048_v47, %v9947_v54  ;;  %7049 = vpow2.f32 %v6465_v23  ;;  %vm4660_vm1 = vweird.f32 %v7048_v47 }
 0x68b   : > { %v4652_v34 = vsel %vm4649_vm0, %v4651_v8, %v4647_v14  ;;  %7051 = vrcp.f32 %v9967_v41  ;;  %v4391_v49 = vpop.f32.mrf.mxu1  ;;  %vm4661_vm3 = vmor %vm4659_vm2, %vm4660_vm1  ;;  %v4678_v10 = vand.u32 2147483647, %v9967_v41  ;;  %v4680_v35 = vand.u32 2147483648, %v9967_v41 }
 0x68c   : > { %v9973_v2 = vmul.f32 %v4652_v34, %v9925_v57  ;;  %v4656_v44 = vsub.f32 1.0, %v4655_v13  ;;  %v4392_v1 = vadd.f32 %v9773_v11, %v4391_v49  ;;  %v5154_v11 = vld [vmem:[%s10669_s3 + $0x120] sm:$0xff]  ;;  %vm4674_vm7 = vweird.f32 %v9967_v41 }
 0x68d   : > { %5219 = vmatpush.msrb.mxu2 %v5154_v11  ;;  %v4681_v21 = vor.u32 1.1754944e-38, %v4680_v35  ;;  %vm4679_vm9 = vcmp.eq.f32.partialorder %v4678_v10, 8.507059e+37 }
 0x68e   : > { %v4657_v57 = vmul.f32 %v7048_v47, %v4656_v44  ;;  %v9986_v6 = vadd.f32 %v4392_v1, %v4270_v7  ;;  %v4765_v9 = vsel %vm1167_vm4, %v9973_v2, 0.0  ;;  %v4791_v60 = vmul.f32 %v9973_v2, %v9973_v2 }
 0x68f   : > { %4766 = vadd.xlane.f32.xlu1 %v4765_v9  ;;  %5220 = vmatpush.msrb.mxu2 %v5153_v22 }
 0x690   : > { %v7050_v58 = vpop.eup %7049  ;;  %v4658_v20 = vadd.f32 %v7048_v47, %v4657_v57  ;;  %v6466_v51 = vmul.f32 -1.442695, %v9986_v6  ;;  %v4829_v17 = vsel %vm1167_vm4, %v4791_v60, 0.0 }
 0x691   : > { %v7052_v15 = vpop.eup %7051  ;;  %v9997_v55 = vadd.f32 1.0, %v7050_v58  ;;  %4830 = vadd.xlane.f32.xlu2 %v4829_v17  ;;  %5221 = vmatpush.msrb.mxu2 %v5152_v37 }
 0x692   : > { %v4662_v43 = vsel %vm4661_vm3, %v7048_v47, %v4658_v20  ;;  %v4670_v40 = vmul.f32 %v7052_v15, %v9967_v41  ;;  %7053 = vpow2.f32 %v6466_v51  ;;  %vm4675_vm6 = vweird.f32 %v7052_v15 }
 0x693   : > { %v4667_v30 = vsel %vm4664_vm5, %v4666_v52, %v4662_v43  ;;  %7055 = vrcp.f32 %v9997_v55  ;;  %vm4676_vm8 = vmor %vm4674_vm7, %vm4675_vm6  ;;  %v4693_v14 = vand.u32 2147483647, %v9997_v55  ;;  %v4695_v13 = vand.u32 2147483648, %v9997_v55 }
 0x694   : > { %v10003_v42 = vmul.f32 %v4667_v30, %v9931_v39  ;;  %v4671_v54 = vsub.f32 1.0, %v4670_v40  ;;  %vm4689_vm11 = vweird.f32 %v9997_v55 }
 0x695   : > { %v4696_v18 = vor.u32 1.1754944e-38, %v4695_v13  ;;  %vm4694_vm13 = vcmp.eq.f32.partialorder %v4693_v14, 8.507059e+37 }
 0x696   : > { %v4672_v59 = vmul.f32 %v7052_v15, %v4671_v54  ;;  %v4768_v62 = vsel %vm1167_vm4, %v10003_v42, 0.0  ;;  %v4792_v12 = vmul.f32 %v10003_v42, %v10003_v42 }
 0x697   : > { %4769 = vadd.xlane.f32.xlu0 %v4768_v62  ;;  %v5151_v62 = vld [vmem:[%s10669_s3 + $0x108] sm:$0xff] }
 0x698   : > { %v7054_v39 = vpop.eup %7053  ;;  %v4673_v29 = vadd.f32 %v7052_v15, %v4672_v59  ;;  %v4832_v27 = vsel %vm1167_vm4, %v4792_v12, 0.0  ;;  %v5150_v12 = vld [vmem:[%s10669_s3 + $0x100] sm:$0xff]  ;;  %5222 = vmatpush.msrb.mxu2 %v5151_v62 }
 0x699   : > { %v7056_v48 = vpop.eup %7055  ;;  %v10016_v63 = vadd.f32 1.0, %v7054_v39  ;;  %4833 = vadd.xlane.f32.xlu1 %v4832_v27 }
 0x69a   : > { %v4677_v26 = vsel %vm4676_vm8, %v7052_v15, %v4673_v29  ;;  %v4685_v25 = vmul.f32 %v7056_v48, %v9997_v55  ;;  %vm4690_vm10 = vweird.f32 %v7056_v48  ;;  %5223 = vmatpush.msrb.mxu2 %v5150_v12 }
 0x69b   : > { %v4682_v23 = vsel %vm4679_vm9, %v4681_v21, %v4677_v26  ;;  %7057 = vrcp.f32 %v10016_v63  ;;  %vm4691_vm12 = vmor %vm4689_vm11, %vm4690_vm10  ;;  %v4708_v17 = vand.u32 2147483647, %v10016_v63  ;;  %v4710_v43 = vand.u32 2147483648, %v10016_v63 }
 0x69c   : > { %v4734_v45 = vpop.xlane.xlu0 %4733  ;;  %v10026_v8 = vmul.f32 %v4682_v23, %v9940_v0  ;;  %v4686_v41 = vsub.f32 1.0, %v4685_v25  ;;  %vm4704_vm15 = vweird.f32 %v10016_v63 }
 0x69d   : > { %v10018_v24 = vmul.f32 0.015625, %v4734_v45  ;;  %v4711_v29 = vor.u32 1.1754944e-38, %v4710_v43  ;;  %vm4709_vm1 = vcmp.eq.f32.partialorder %v4708_v17, 8.507059e+37 }
 0x69e   : > { %v4798_v47 = vpop.xlane.xlu1 %4797  ;;  %v4687_v49 = vmul.f32 %v7056_v48, %v4686_v41  ;;  %v4771_v44 = vsel %vm1167_vm4, %v10026_v8, 0.0  ;;  %v4793_v7 = vmul.f32 %v10026_v8, %v10026_v8 }
 0x69f   : > { %v4876_v16 = vmul.f32 %v10018_v24, %v10018_v24  ;;  %v4860_v34 = vmul.f32 0.015625, %v4798_v47  ;;  %4772 = vadd.xlane.f32.xlu2 %v4771_v44 }
 0x6a0   : > { %v4688_v1 = vadd.f32 %v7056_v48, %v4687_v49  ;;  %v4835_v32 = vsel %vm1167_vm4, %v4793_v7, 0.0 }
 0x6a1   : > { %v4892_v0 = vsub.f32 %v4860_v34, %v4876_v16  ;;  %v7058_v50 = vpop.eup %7057  ;;  %4836 = vadd.xlane.f32.xlu0 %v4835_v32 }
 0x6a2   : > { %v4692_v11 = vsel %vm4691_vm12, %v7056_v48, %v4688_v1  ;;  %v4700_v60 = vmul.f32 %v7058_v50, %v10016_v63  ;;  %vm4705_vm14 = vweird.f32 %v7058_v50 }
 0x6a3   : > { %v10038_v57 = vadd.f32 0.1, %v4892_v0  ;;  %v4697_v58 = vsel %vm4694_vm13, %v4696_v18, %v4692_v11  ;;  %vm4706_vm0 = vmor %vm4704_vm15, %vm4705_vm14 }
 0x6a4   : > { %v10047_v15 = vmul.f32 %v4697_v58, %v9960_v31  ;;  %v4701_v52 = vsub.f32 1.0, %v4700_v60  ;;  %v10087_v60 = vld [vmem:[%s10670_s4 + $0x9] ss:$0 sm:$0xff] }
 0x6a5   : > { %7059 = vrsqrt.f32 %v10038_v57  ;;  %vm4946_vm3 = vweird.f32 %v10038_v57 }
 0x6a6   : > { %v4737_v3 = vpop.xlane.xlu2 %4736  ;;  %v4702_v40 = vmul.f32 %v7058_v50, %v4701_v52  ;;  %v4774_v30 = vsel %vm1167_vm4, %v10047_v15, 0.0  ;;  %v4794_v22 = vmul.f32 %v10047_v15, %v10047_v15  ;;  %v10092_v52 = vld [vmem:[%s10670_s4 + $0xe] ss:$0 sm:$0xff] }
 0x6a7   : > { %v10040_v9 = vmul.f32 0.015625, %v4737_v3  ;;  %4775 = vadd.xlane.f32.xlu1 %v4774_v30  ;;  %v4908_v3 = vsub.f32 %v9809_v56, %v10018_v24 }
 0x6a8   : > { %v4801_v51 = vpop.xlane.xlu0 %4800  ;;  %v4703_v10 = vadd.f32 %v7058_v50, %v4702_v40  ;;  %v4838_v35 = vsel %vm1167_vm4, %v4794_v22, 0.0 }
 0x6a9   : > { %v4877_v20 = vmul.f32 %v10040_v9, %v10040_v9  ;;  %v4861_v55 = vmul.f32 0.015625, %v4801_v51  ;;  %4839 = vadd.xlane.f32.xlu2 %v4838_v35 }
 0x6aa   : > { %v4707_v45 = vsel %vm4706_vm0, %v7058_v50, %v4703_v10 }
 0x6ab   : > { %v4893_v54 = vsub.f32 %v4861_v55, %v4877_v20  ;;  %v7060_v39 = vpop.eup %7059  ;;  %v4712_v21 = vsel %vm4709_vm1, %v4711_v29, %v4707_v45 }
 0x6ac   : > { %v4941_v48 = vmul.f32 %v7060_v39, %v10038_v57  ;;  %v10070_v26 = vmul.f32 %v4712_v21, %v9986_v6  ;;  %vm4947_vm2 = vweird.f32 %v7060_v39 }
 0x6ad   : > { %v4925_v31 = vadd.f32 0.1, %v4893_v54  ;;  %vm4948_vm5 = vmor %vm4946_vm3, %vm4947_vm2  ;;  %v4909_v54 = vsub.f32 %v9823_v28, %v10040_v9 }
 0x6ae   : > { %v4740_v59 = vpop.xlane.xlu1 %4739  ;;  %v4942_v25 = vmul.f32 %v7060_v39, %v4941_v48  ;;  %v4777_v41 = vsel %vm1167_vm4, %v10070_v26, 0.0  ;;  %v4795_v14 = vmul.f32 %v10070_v26, %v10070_v26 }
 0x6af   : > { %v10064_v27 = vmul.f32 0.015625, %v4740_v59  ;;  %7061 = vrsqrt.f32 %v4925_v31  ;;  %4778 = vadd.xlane.f32.xlu0 %v4777_v41  ;;  %vm4956_vm7 = vweird.f32 %v4925_v31 }
 0x6b0   : > { %v4804_v37 = vpop.xlane.xlu2 %4803  ;;  %v4943_v47 = vmul.f32 0.5, %v4942_v25  ;;  %v4841_v44 = vsel %vm1167_vm4, %v4795_v14, 0.0 }
 0x6b1   : > { %v4878_v63 = vmul.f32 %v10064_v27, %v10064_v27  ;;  %v4862_v23 = vmul.f32 0.015625, %v4804_v37  ;;  %4842 = vadd.xlane.f32.xlu1 %v4841_v44  ;;  %v4910_v41 = vsub.f32 %v9837_v36, %v10064_v27 }
 0x6b2   : > { %v4944_v34 = vsub.f32 1.5, %v4943_v47 }
 0x6b3   : > { %v4894_v16 = vsub.f32 %v4862_v23, %v4878_v63 }
 0x6b4   : > { %v4945_v1 = vmul.f32 %v7060_v39, %v4944_v34 }
 0x6b5   : > { %v7062_v13 = vpop.eup %7061  ;;  %v4926_v49 = vadd.f32 0.1, %v4894_v16 }
 0x6b6   : > { %v4743_v7 = vpop.xlane.xlu0 %4742  ;;  %v4951_v6 = vmul.f32 %v7062_v13, %v4925_v31  ;;  %v4949_v58 = vsel %vm4948_vm5, %v7060_v39, %v4945_v1  ;;  %vm4957_vm6 = vweird.f32 %v7062_v13 }
 0x6b7   : > { %v10077_v0 = vmul.f32 0.015625, %v4743_v7  ;;  %7063 = vrsqrt.f32 %v4926_v49  ;;  %v5100_v57 = vmul.f32 %v4949_v58, %v4908_v3  ;;  %vm4958_vm8 = vmor %vm4956_vm7, %vm4957_vm6  ;;  %vm4966_vm10 = vweird.f32 %v4926_v49 }
 0x6b8   : > { %v4807_v32 = vpop.xlane.xlu1 %4806  ;;  %v4952_v50 = vmul.f32 %v7062_v13, %v4951_v6 }
 0x6b9   : > { %v4879_v18 = vmul.f32 %v10077_v0, %v10077_v0  ;;  %v4863_v11 = vmul.f32 0.015625, %v4807_v32  ;;  %v5117_v55 = vmul.f32 %v10087_v60, %v5100_v57 }
 0x6ba   : > { %v4953_v20 = vmul.f32 0.5, %v4952_v50 }
 0x6bb   : > { %v4895_v51 = vsub.f32 %v4863_v11, %v4879_v18  ;;  %v5134_v10 = vadd.f32 %v10092_v52, %v5117_v55  ;;  %v4911_v18 = vsub.f32 %v9851_v5, %v10077_v0 }
 0x6bc   : > { %v4954_v56 = vsub.f32 1.5, %v4953_v20 }
 0x6bd   : > { %v4927_v24 = vadd.f32 0.1, %v4895_v51  ;;  %v7064_v17 = vpop.eup %7063  ;;  %6467 = vmatmul.msk.f32.vlgmr.msrb.gmra.mxu2 %vm1167_vm4, %v5134_v10 }
 0x6be   : > { %v4746_v43 = vpop.xlane.xlu2 %4745  ;;  %v4955_v40 = vmul.f32 %v7062_v13, %v4954_v56  ;;  %v4961_v30 = vmul.f32 %v7064_v17, %v4926_v49  ;;  %vm4967_vm9 = vweird.f32 %v7064_v17 }
 0x6bf   : > { %7065 = vrsqrt.f32 %v4927_v24  ;;  %v10097_v22 = vmul.f32 0.015625, %v4746_v43  ;;  %vm4968_vm11 = vmor %vm4966_vm10, %vm4967_vm9  ;;  %vm4976_vm13 = vweird.f32 %v4927_v24 }
 0x6c0   : > { %v4962_v35 = vmul.f32 %v7064_v17, %v4961_v30  ;;  %v4810_v59 = vpop.xlane.xlu0 %4809  ;;  %v4959_v62 = vsel %vm4958_vm8, %v7062_v13, %v4955_v40 }
 0x6c1   : > { %v4880_v12 = vmul.f32 %v10097_v22, %v10097_v22  ;;  %v4864_v39 = vmul.f32 0.015625, %v4810_v59  ;;  %v5101_v31 = vmul.f32 %v4959_v62, %v4909_v54  ;;  %v4912_v62 = vsub.f32 %v9864_v4, %v10097_v22 }
 0x6c2   : > { %v4963_v29 = vmul.f32 0.5, %v4962_v35 }
 0x6c3   : > { %v4896_v45 = vsub.f32 %v4864_v39, %v4880_v12  ;;  %v5118_v48 = vmul.f32 %v10087_v60, %v5101_v31 }
 0x6c4   : > { %v4964_v9 = vsub.f32 1.5, %v4963_v29 }
 0x6c5   : > { %v7066_v28 = vpop.eup %7065  ;;  %v4928_v63 = vadd.f32 0.1, %v4896_v45  ;;  %v5135_v25 = vadd.f32 %v10092_v52, %v5118_v48 }
 0x6c6   : > { %v4971_v21 = vmul.f32 %v7066_v28, %v4927_v24  ;;  %v4749_v37 = vpop.xlane.xlu1 %4748  ;;  %v4965_v23 = vmul.f32 %v7064_v17, %v4964_v9  ;;  %vm4977_vm12 = vweird.f32 %v7066_v28 }
 0x6c7   : > { %v10105_v47 = vmul.f32 0.015625, %v4749_v37  ;;  %7067 = vrsqrt.f32 %v4928_v63  ;;  %6468 = vmatmul.msk.f32.gmra.mxu2 %vm1167_vm4, %v5135_v25  ;;  %vm4978_vm14 = vmor %vm4976_vm13, %vm4977_vm12  ;;  %vm4986_vm0 = vweird.f32 %v4928_v63 }
 0x6c8   : > { %v4972_v16 = vmul.f32 %v7066_v28, %v4971_v21  ;;  %v4813_v14 = vpop.xlane.xlu2 %4812  ;;  %v4969_v44 = vsel %vm4968_vm11, %v7064_v17, %v4965_v23 }
 0x6c9   : > { %v4881_v13 = vmul.f32 %v10105_v47, %v10105_v47  ;;  %v4865_v34 = vmul.f32 0.015625, %v4813_v14  ;;  %v5102_v6 = vmul.f32 %v4969_v44, %v4910_v41  ;;  %v4913_v22 = vsub.f32 %v9879_v38, %v10105_v47 }
 0x6ca   : > { %v4973_v7 = vmul.f32 0.5, %v4972_v16 }
 0x6cb   : > { %v4897_v1 = vsub.f32 %v4865_v34, %v4881_v13  ;;  %v5119_v32 = vmul.f32 %v10087_v60, %v5102_v6 }
 0x6cc   : > { %v4974_v49 = vsub.f32 1.5, %v4973_v7 }
 0x6cd   : > { %v4929_v3 = vadd.f32 0.1, %v4897_v1  ;;  %v7068_v36 = vpop.eup %7067  ;;  %v5136_v50 = vadd.f32 %v10092_v52, %v5119_v32 }
 0x6ce   : > { %v4975_v27 = vmul.f32 %v7066_v28, %v4974_v49  ;;  %v4981_v11 = vmul.f32 %v7068_v36, %v4928_v63  ;;  %v4752_v58 = vpop.xlane.xlu0 %4751  ;;  %vm4987_vm15 = vweird.f32 %v7068_v36 }
 0x6cf   : > { %7069 = vrsqrt.f32 %v4929_v3  ;;  %v10116_v20 = vmul.f32 0.015625, %v4752_v58  ;;  %6469 = vmatmul.msk.f32.gmra.mxu2 %vm1167_vm4, %v5136_v50  ;;  %vm4988_vm1 = vmor %vm4986_vm0, %vm4987_vm15  ;;  %vm4996_vm3 = vweird.f32 %v4929_v3 }
 0x6d0   : > { %v4979_v51 = vsel %vm4978_vm14, %v7066_v28, %v4975_v27  ;;  %v4982_v57 = vmul.f32 %v7068_v36, %v4981_v11  ;;  %v4816_v56 = vpop.xlane.xlu1 %4815 }
 0x6d1   : > { %v5103_v55 = vmul.f32 %v4979_v51, %v4911_v18  ;;  %v4882_v17 = vmul.f32 %v10116_v20, %v10116_v20  ;;  %v4866_v24 = vmul.f32 0.015625, %v4816_v56  ;;  %v4914_v58 = vsub.f32 %v9887_v53, %v10116_v20 }
 0x6d2   : > { %v4983_v43 = vmul.f32 0.5, %v4982_v57 }
 0x6d3   : > { %v5120_v40 = vmul.f32 %v10087_v60, %v5103_v55  ;;  %v4898_v5 = vsub.f32 %v4866_v24, %v4882_v17 }
 0x6d4   : > { %v4984_v30 = vsub.f32 1.5, %v4983_v43 }
 0x6d5   : > { %v7070_v0 = vpop.eup %7069  ;;  %v4930_v10 = vadd.f32 0.1, %v4898_v5  ;;  %v5137_v35 = vadd.f32 %v10092_v52, %v5120_v40 }
 0x6d6   : > { %v4991_v54 = vmul.f32 %v7070_v0, %v4929_v3  ;;  %v4985_v59 = vmul.f32 %v7068_v36, %v4984_v30  ;;  %vm4997_vm2 = vweird.f32 %v7070_v0 }
 0x6d7   : > { %7071 = vrsqrt.f32 %v4930_v10  ;;  %6470 = vmatmul.msk.f32.gmra.mxu2 %vm1167_vm4, %v5137_v35  ;;  %vm4998_vm5 = vmor %vm4996_vm3, %vm4997_vm2  ;;  %vm5006_vm7 = vweird.f32 %v4930_v10 }
 0x6d8   : > { %v4992_v12 = vmul.f32 %v7070_v0, %v4991_v54  ;;  %v4989_v39 = vsel %vm4988_vm1, %v7068_v36, %v4985_v59 }
 0x6d9   : > { %v5104_v45 = vmul.f32 %v4989_v39, %v4912_v62 }
 0x6da   : > { %v4993_v31 = vmul.f32 0.5, %v4992_v12  ;;  %v4755_v29 = vpop.xlane.xlu2 %4754 }
 0x6db   : > { %v4851_v48 = vmul.f32 0.015625, %v4755_v29  ;;  %v5121_v21 = vmul.f32 %v10087_v60, %v5104_v45 }
 0x6dc   : > { %v4994_v28 = vsub.f32 1.5, %v4993_v31  ;;  %v4819_v9 = vpop.xlane.xlu0 %4818 }
 0x6dd   : > { %v4883_v37 = vmul.f32 %v4851_v48, %v4851_v48  ;;  %v4867_v63 = vmul.f32 0.015625, %v4819_v9  ;;  %v7072_v25 = vpop.eup %7071  ;;  %v5138_v4 = vadd.f32 %v10092_v52, %v5121_v21  ;;  %v4915_v53 = vsub.f32 %v9898_v33, %v4851_v48 }
 0x6de   : > { %v4995_v23 = vmul.f32 %v7070_v0, %v4994_v28  ;;  %v5001_v41 = vmul.f32 %v7072_v25, %v4930_v10  ;;  %vm5007_vm6 = vweird.f32 %v7072_v25 }
 0x6df   : > { %v4899_v16 = vsub.f32 %v4867_v63, %v4883_v37  ;;  %6471 = vmatmul.msk.f32.gmra.mxu2 %vm1167_vm4, %v5138_v4  ;;  %vm5008_vm8 = vmor %vm5006_vm7, %vm5007_vm6 }
 0x6e0   : > { %v4999_v14 = vsel %vm4998_vm5, %v7070_v0, %v4995_v23  ;;  %v5002_v13 = vmul.f32 %v7072_v25, %v5001_v41 }
 0x6e1   : > { %v4931_v34 = vadd.f32 0.1, %v4899_v16  ;;  %v5105_v7 = vmul.f32 %v4999_v14, %v4913_v22 }
 0x6e2   : > { %v4758_v44 = vpop.xlane.xlu1 %4757  ;;  %v5003_v1 = vmul.f32 0.5, %v5002_v13 }
 0x6e3   : > { %v4852_v6 = vmul.f32 0.015625, %v4758_v44  ;;  %7073 = vrsqrt.f32 %v4931_v34  ;;  %v5122_v32 = vmul.f32 %v10087_v60, %v5105_v7  ;;  %vm5016_vm10 = vweird.f32 %v4931_v34 }
 0x6e4   : > { %v4822_v49 = vpop.xlane.xlu2 %4821  ;;  %v5004_v27 = vsub.f32 1.5, %v5003_v1 }
 0x6e5   : > { %v4884_v3 = vmul.f32 %v4852_v6, %v4852_v6  ;;  %v4868_v36 = vmul.f32 0.015625, %v4822_v49  ;;  %v5139_v47 = vadd.f32 %v10092_v52, %v5122_v32  ;;  %v4916_v45 = vsub.f32 %v9912_v19, %v4852_v6 }
 0x6e6   : > { %v5005_v50 = vmul.f32 %v7072_v25, %v5004_v27 }
 0x6e7   : > { %v4900_v38 = vsub.f32 %v4868_v36, %v4884_v3  ;;  %6472 = vmatmul.msk.f32.gmra.mxu2 %vm1167_vm4, %v5139_v47 }
 0x6e8   : > { %v5009_v51 = vsel %vm5008_vm8, %v7072_v25, %v5005_v50 }
 0x6e9   : > { %v4932_v18 = vadd.f32 0.1, %v4900_v38  ;;  %v7074_v11 = vpop.eup %7073  ;;  %v5106_v56 = vmul.f32 %v5009_v51, %v4914_v58 }
 0x6ea   : > { %v5011_v57 = vmul.f32 %v7074_v11, %v4931_v34  ;;  %vm5017_vm9 = vweird.f32 %v7074_v11 }
 0x6eb   : > { %7075 = vrsqrt.f32 %v4932_v18  ;;  %v5123_v17 = vmul.f32 %v10087_v60, %v5106_v56  ;;  %vm5018_vm11 = vmor %vm5016_vm10, %vm5017_vm9  ;;  %vm5026_vm13 = vweird.f32 %v4932_v18 }
 0x6ec   : > { %v5012_v55 = vmul.f32 %v7074_v11, %v5011_v57 }
 0x6ed   : > { %v5140_v43 = vadd.f32 %v10092_v52, %v5123_v17 }
 0x6ee   : > { %v5013_v24 = vmul.f32 0.5, %v5012_v55 }
 0x6ef   : > { %6473 = vmatmul.msk.f32.gmra.mxu2 %vm1167_vm4, %v5140_v43 }
 0x6f0   : > { %v5014_v5 = vsub.f32 1.5, %v5013_v24 }
 0x6f1   : > { %v7076_v40 = vpop.eup %7075 }
 0x6f2   : > { %v5021_v0 = vmul.f32 %v7076_v40, %v4932_v18  ;;  %v5015_v30 = vmul.f32 %v7074_v11, %v5014_v5  ;;  %vm5027_vm12 = vweird.f32 %v7076_v40  ;;  %v4761_v12 = vpop.xlane.xlu0 %4760 }
 0x6f3   : > { %v4853_v31 = vmul.f32 0.015625, %v4761_v12  ;;  %vm5028_vm14 = vmor %vm5026_vm13, %vm5027_vm12 }
 0x6f4   : > { %v5022_v20 = vmul.f32 %v7076_v40, %v5021_v0  ;;  %v5019_v54 = vsel %vm5018_vm11, %v7074_v11, %v5015_v30  ;;  %v4825_v33 = vpop.xlane.xlu1 %4824 }
 0x6f5   : > { %v5107_v35 = vmul.f32 %v5019_v54, %v4915_v53  ;;  %v4885_v28 = vmul.f32 %v4853_v31, %v4853_v31  ;;  %v4869_v9 = vmul.f32 0.015625, %v4825_v33  ;;  %v4917_v56 = vsub.f32 %v9935_v61, %v4853_v31 }
 0x6f6   : > { %v5023_v10 = vmul.f32 0.5, %v5022_v20 }
 0x6f7   : > { %v5124_v62 = vmul.f32 %v10087_v60, %v5107_v35  ;;  %v4901_v37 = vsub.f32 %v4869_v9, %v4885_v28 }
 0x6f8   : > { %v5024_v59 = vsub.f32 1.5, %v5023_v10 }
 0x6f9   : > { %v5141_v29 = vadd.f32 %v10092_v52, %v5124_v62  ;;  %v4933_v25 = vadd.f32 0.1, %v4901_v37 }
 0x6fa   : > { %v5025_v39 = vmul.f32 %v7076_v40, %v5024_v59  ;;  %v4764_v23 = vpop.xlane.xlu2 %4763 }
 0x6fb   : > { %6474 = vmatmul.msk.f32.gmra.mxu2 %vm1167_vm4, %v5141_v29  ;;  %v4854_v22 = vmul.f32 0.015625, %v4764_v23  ;;  %7077 = vrsqrt.f32 %v4933_v25  ;;  %vm5036_vm0 = vweird.f32 %v4933_v25 }
 0x6fc   : > { %v5029_v48 = vsel %vm5028_vm14, %v7076_v40, %v5025_v39  ;;  %v4828_v16 = vpop.xlane.xlu0 %4827 }
 0x6fd   : > { %v5108_v21 = vmul.f32 %v5029_v48, %v4916_v45  ;;  %v4886_v41 = vmul.f32 %v4854_v22, %v4854_v22  ;;  %v4870_v19 = vmul.f32 0.015625, %v4828_v16  ;;  %v4918_v59 = vsub.f32 %v9952_v46, %v4854_v22 }
 0x6ff   : > { %v5125_v63 = vmul.f32 %v10087_v60, %v5108_v21  ;;  %v4902_v14 = vsub.f32 %v4870_v19, %v4886_v41 }
 0x701   : > { %v5142_v4 = vadd.f32 %v10092_v52, %v5125_v63  ;;  %v7078_v13 = vpop.eup %7077  ;;  %v4934_v34 = vadd.f32 0.1, %v4902_v14 }
 0x702   : > { %v4767_v44 = vpop.xlane.xlu1 %4766  ;;  %v5031_v7 = vmul.f32 %v7078_v13, %v4933_v25  ;;  %vm5037_vm15 = vweird.f32 %v7078_v13 }
 0x703   : > { %6475 = vmatmul.msk.f32.gmra.mxu2 %vm1167_vm4, %v5142_v4  ;;  %v10147_v6 = vmul.f32 0.015625, %v4767_v44  ;;  %7079 = vrsqrt.f32 %v4934_v34  ;;  %vm5038_vm1 = vmor %vm5036_vm0, %vm5037_vm15  ;;  %vm5046_vm3 = vweird.f32 %v4934_v34 }
 0x704   : > { %v5032_v1 = vmul.f32 %v7078_v13, %v5031_v7  ;;  %v4831_v32 = vpop.xlane.xlu2 %4830 }
 0x705   : > { %v4887_v49 = vmul.f32 %v10147_v6, %v10147_v6  ;;  %v4871_v3 = vmul.f32 0.015625, %v4831_v32  ;;  %v4919_v16 = vsub.f32 %v9973_v2, %v10147_v6 }
 0x706   : > { %v5033_v36 = vmul.f32 0.5, %v5032_v1 }
 0x707   : > { %v4903_v27 = vsub.f32 %v4871_v3, %v4887_v49 }
 0x708   : > { %v5034_v38 = vsub.f32 1.5, %v5033_v36 }
 0x709   : > { %v7080_v47 = vpop.eup %7079  ;;  %v4935_v50 = vadd.f32 0.1, %v4903_v27 }
 0x70a   : > { %v4770_v18 = vpop.xlane.xlu0 %4769  ;;  %v5035_v11 = vmul.f32 %v7078_v13, %v5034_v38  ;;  %v5041_v58 = vmul.f32 %v7080_v47, %v4934_v34  ;;  %vm5047_vm2 = vweird.f32 %v7080_v47 }
 0x70b   : > { %v10151_v51 = vmul.f32 0.015625, %v4770_v18  ;;  %7081 = vrsqrt.f32 %v4935_v50  ;;  %vm5048_vm5 = vmor %vm5046_vm3, %vm5047_vm2  ;;  %vm5056_vm7 = vweird.f32 %v4935_v50 }
 0x70c   : > { %v4834_v57 = vpop.xlane.xlu1 %4833  ;;  %v5042_v55 = vmul.f32 %v7080_v47, %v5041_v58  ;;  %v5039_v43 = vsel %vm5038_vm1, %v7078_v13, %v5035_v11 }
 0x70d   : > { %v4888_v17 = vmul.f32 %v10151_v51, %v10151_v51  ;;  %v4872_v24 = vmul.f32 0.015625, %v4834_v57  ;;  %v5109_v0 = vmul.f32 %v5039_v43, %v4917_v56 }
 0x70e   : > { %v5043_v40 = vmul.f32 0.5, %v5042_v55 }
 0x70f   : > { %v4904_v5 = vsub.f32 %v4872_v24, %v4888_v17  ;;  %v5126_v20 = vmul.f32 %v10087_v60, %v5109_v0 }
 0x710   : > { %v5044_v30 = vsub.f32 1.5, %v5043_v40 }
 0x711   : > { %v4936_v53 = vadd.f32 0.1, %v4904_v5  ;;  %v7082_v54 = vpop.eup %7081  ;;  %v5143_v12 = vadd.f32 %v10092_v52, %v5126_v20 }
 0x712   : > { %v4773_v10 = vpop.xlane.xlu2 %4772  ;;  %v5045_v35 = vmul.f32 %v7080_v47, %v5044_v30  ;;  %v5051_v61 = vmul.f32 %v7082_v54, %v4935_v50  ;;  %vm5057_vm6 = vweird.f32 %v7082_v54 }
 0x713   : > { %7083 = vrsqrt.f32 %v4936_v53  ;;  %v10158_v62 = vmul.f32 0.015625, %v4773_v10  ;;  %6476 = vmatmul.msk.f32.gmra.mxu2 %vm1167_vm4, %v5143_v12  ;;  %vm5058_vm8 = vmor %vm5056_vm7, %vm5057_vm6  ;;  %vm5066_vm10 = vweird.f32 %v4936_v53 }
 0x714   : > { %v4837_v39 = vpop.xlane.xlu0 %4836  ;;  %v5052_v31 = vmul.f32 %v7082_v54, %v5051_v61  ;;  %v5049_v45 = vsel %vm5048_vm5, %v7080_v47, %v5045_v35  ;;  %v4920_v47 = vsub.f32 %v10003_v42, %v10151_v51 }
 0x715   : > { %v4873_v29 = vmul.f32 0.015625, %v4837_v39  ;;  %v4889_v28 = vmul.f32 %v10158_v62, %v10158_v62  ;;  %v5110_v33 = vmul.f32 %v5049_v45, %v4918_v59  ;;  %v4921_v20 = vsub.f32 %v10026_v8, %v10158_v62 }
 0x716   : > { %v5053_v48 = vmul.f32 0.5, %v5052_v31 }
 0x717   : > { %v4905_v9 = vsub.f32 %v4873_v29, %v4889_v28  ;;  %v5127_v21 = vmul.f32 %v10087_v60, %v5110_v33 }
 0x718   : > { %v5054_v37 = vsub.f32 1.5, %v5053_v48 }
 0x719   : > { %v7084_v46 = vpop.eup %7083  ;;  %v4937_v25 = vadd.f32 0.1, %v4905_v9  ;;  %v5144_v4 = vadd.f32 %v10092_v52, %v5127_v21 }
 0x71a   : > { %v5061_v63 = vmul.f32 %v7084_v46, %v4936_v53  ;;  %v4776_v23 = vpop.xlane.xlu1 %4775  ;;  %v5055_v22 = vmul.f32 %v7082_v54, %v5054_v37  ;;  %vm5067_vm9 = vweird.f32 %v7084_v46 }
 0x71b   : > { %v10166_v41 = vmul.f32 0.015625, %v4776_v23  ;;  %7085 = vrsqrt.f32 %v4937_v25  ;;  %6477 = vmatmul.msk.f32.gmra.mxu2 %vm1167_vm4, %v5144_v4  ;;  %vm5068_vm11 = vmor %vm5066_vm10, %vm5067_vm9  ;;  %vm5076_vm13 = vweird.f32 %v4937_v25 }
 0x71c   : > { %v5062_v19 = vmul.f32 %v7084_v46, %v5061_v63  ;;  %v4840_v14 = vpop.xlane.xlu2 %4839  ;;  %v5059_v44 = vsel %vm5058_vm8, %v7082_v54, %v5055_v22 }
 0x71d   : > { %v4890_v13 = vmul.f32 %v10166_v41, %v10166_v41  ;;  %v4874_v34 = vmul.f32 0.015625, %v4840_v14  ;;  %v5111_v1 = vmul.f32 %v5059_v44, %v4919_v16  ;;  %v4922_v8 = vsub.f32 %v10047_v15, %v10166_v41  ;;  %v10194_v15 = vld [vmem:[%s10670_s4 + $0xf] ss:$0 sm:$0xff] }
 0x71e   : > { %v5063_v7 = vmul.f32 0.5, %v5062_v19 }
 0x71f   : > { %v4906_v49 = vsub.f32 %v4874_v34, %v4890_v13  ;;  %v5128_v3 = vmul.f32 %v10087_v60, %v5111_v1 }
 0x720   : > { %v5064_v32 = vsub.f32 1.5, %v5063_v7 }
 0x721   : > { %v4938_v36 = vadd.f32 0.1, %v4906_v49  ;;  %v7086_v2 = vpop.eup %7085  ;;  %v5145_v38 = vadd.f32 %v10092_v52, %v5128_v3 }
 0x722   : > { %v5065_v6 = vmul.f32 %v7084_v46, %v5064_v32  ;;  %v4779_v27 = vpop.xlane.xlu0 %4778  ;;  %v5071_v50 = vmul.f32 %v7086_v2, %v4937_v25  ;;  %vm5077_vm12 = vweird.f32 %v7086_v2 }
 0x723   : > { %7087 = vrsqrt.f32 %v4938_v36  ;;  %v4859_v18 = vmul.f32 0.015625, %v4779_v27  ;;  %6478 = vmatmul.msk.f32.gmra.mxu2 %vm1167_vm4, %v5145_v38  ;;  %vm5078_vm14 = vmor %vm5076_vm13, %vm5077_vm12  ;;  %vm5086_vm0 = vweird.f32 %v4938_v36 }
 0x724   : > { %v4843_v11 = vpop.xlane.xlu1 %4842  ;;  %v5069_v58 = vsel %vm5068_vm11, %v7084_v46, %v5065_v6  ;;  %v5072_v57 = vmul.f32 %v7086_v2, %v5071_v50 }
 0x725   : > { %v4875_v56 = vmul.f32 0.015625, %v4843_v11  ;;  %v5112_v55 = vmul.f32 %v5069_v58, %v4920_v47  ;;  %v4891_v17 = vmul.f32 %v4859_v18, %v4859_v18  ;;  %v4923_v63 = vsub.f32 %v10070_v26, %v4859_v18 }
 0x726   : > { %v5073_v24 = vmul.f32 0.5, %v5072_v57 }
 0x727   : > { %v5129_v43 = vmul.f32 %v10087_v60, %v5112_v55  ;;  %v4907_v40 = vsub.f32 %v4875_v56, %v4891_v17 }
 0x728   : > { %v5074_v0 = vsub.f32 1.5, %v5073_v24 }
 0x729   : > { %v7088_v5 = vpop.eup %7087  ;;  %v4939_v51 = vadd.f32 0.1, %v4907_v40  ;;  %v5146_v30 = vadd.f32 %v10092_v52, %v5129_v43 }
 0x72a   : > { %v5081_v42 = vmul.f32 %v7088_v5, %v4938_v36  ;;  %v5075_v53 = vmul.f32 %v7086_v2, %v5074_v0  ;;  %vm5087_vm15 = vweird.f32 %v7088_v5 }
 0x72b   : > { %7089 = vrsqrt.f32 %v4939_v51  ;;  %6479 = vmatmul.msk.f32.gmra.mxu2 %vm1167_vm4, %v5146_v30  ;;  %vm5088_vm1 = vmor %vm5086_vm0, %vm5087_vm15  ;;  %vm5096_vm3 = vweird.f32 %v4939_v51 }
 0x72c   : > { %v5082_v54 = vmul.f32 %v7088_v5, %v5081_v42  ;;  %v5079_v10 = vsel %vm5078_vm14, %v7086_v2, %v5075_v53 }
 0x72d   : > { %v5113_v61 = vmul.f32 %v5079_v10, %v4921_v20 }
 0x72e   : > { %v5083_v35 = vmul.f32 0.5, %v5082_v54 }
 0x72f   : > { %v5130_v12 = vmul.f32 %v10087_v60, %v5113_v61 }
 0x730   : > { %v5084_v59 = vsub.f32 1.5, %v5083_v35 }
 0x731   : > { %v7090_v39 = vpop.eup %7089  ;;  %v5147_v29 = vadd.f32 %v10092_v52, %v5130_v12 }
 0x732   : > { %v5085_v31 = vmul.f32 %v7088_v5, %v5084_v59  ;;  %v5091_v62 = vmul.f32 %v7090_v39, %v4939_v51  ;;  %vm5097_vm2 = vweird.f32 %v7090_v39 }
 0x733   : > { %6480 = vmatmul.msk.f32.gmra.mxu2 %vm1167_vm4, %v5147_v29  ;;  %vm5098_vm5 = vmor %vm5096_vm3, %vm5097_vm2 }
 0x734   : > { %v5089_v45 = vsel %vm5088_vm1, %v7088_v5, %v5085_v31  ;;  %v5092_v28 = vmul.f32 %v7090_v39, %v5091_v62 }
 0x735   : > { %v5114_v33 = vmul.f32 %v5089_v45, %v4922_v8 }
 0x736   : > { %v5093_v48 = vmul.f32 0.5, %v5092_v28 }
 0x737   : > { %v5131_v9 = vmul.f32 %v10087_v60, %v5114_v33 }
 0x738   : > { %v5094_v21 = vsub.f32 1.5, %v5093_v48 }
 0x739   : > { %v5148_v46 = vadd.f32 %v10092_v52, %v5131_v9 }
 0x73a   : > { %v5095_v37 = vmul.f32 %v7090_v39, %v5094_v21 }
 0x73b   : > { %6481 = vmatmul.msk.f32.gmra.mxu2 %vm1167_vm4, %v5148_v46 }
 0x73c   : > { %v5099_v25 = vsel %vm5098_vm5, %v7090_v39, %v5095_v37 }
 0x73d   : > { %v5115_v23 = vmul.f32 %v5099_v25, %v4923_v63 }
 0x73f   : > { %v5132_v41 = vmul.f32 %v10087_v60, %v5115_v23 }
 0x740   : > { %v5225_v4 = vpop.f32.mrf.mxu2 }
 0x741   : > { %v10198_v22 = vadd.f32 %v10194_v15, %v5225_v4  ;;  %v5149_v26 = vadd.f32 %v10092_v52, %v5132_v41 }
 0x743   : > { %v6483_v16 = vclamps-f32 %v10198_v22, 6.0  ;;  %6482 = vmatmul.msk.f32.gmra.mxu2 %vm1167_vm4, %v5149_v26 }
 0x745   : > { %v5427_v19 = vmul.f32 1.442695, %v6483_v16 }
 0x747   : > { %7091 = vpow2.f32 %v5427_v19 }
 0x74a   : > { %v5228_v14 = vpop.f32.mrf.mxu2 }
 0x74b   : > { %v10205_v13 = vadd.f32 %v10194_v15, %v5228_v14 }
 0x74d   : > { %v6484_v34 = vclamps-f32 %v10205_v13, 6.0  ;;  %v7092_v44 = vpop.eup %7091 }
 0x74e   : > { %v5459_v1 = vadd.f32 1e-08, %v7092_v44 }
 0x74f   : > { %v5429_v7 = vmul.f32 1.442695, %v6484_v34 }
 0x750   : > { %v5486_v11 = vand.u32 2147483648, %v5459_v1  ;;  %v5484_v56 = vand.u32 2147483647, %v5459_v1  ;;  %vm5480_vm6 = vweird.f32 %v5459_v1 }
 0x751   : > { %7093 = vpow2.f32 %v5429_v7 }
 0x752   : > { %7095 = vrcp.f32 %v5459_v1  ;;  %v5231_v60 = vpop.f32.mrf.mxu2  ;;  %v5487_v5 = vor.u32 1.1754944e-38, %v5486_v11  ;;  %vm5485_vm8 = vcmp.eq.f32.partialorder %v5484_v56, 8.507059e+37 }
 0x753   : > { %v10209_v49 = vadd.f32 %v10194_v15, %v5231_v60  ;;  %7097 = vlog2.f32 %v5459_v1 }
 0x755   : > { %v6485_v52 = vclamps-f32 %v10209_v49, 6.0 }
 0x757   : > { %v7094_v32 = vpop.eup %7093  ;;  %v5431_v3 = vmul.f32 1.442695, %v6485_v52 }
 0x758   : > { %v7096_v36 = vpop.eup %7095  ;;  %v5460_v2 = vadd.f32 1e-08, %v7094_v32 }
 0x759   : > { %v7098_v6 = vpop.eup %7097  ;;  %7099 = vpow2.f32 %v5431_v3  ;;  %v5476_v27 = vmul.f32 %v7096_v36, %v5459_v1  ;;  %vm5481_vm4 = vweird.f32 %v7096_v36 }
 0x75a   : > { %7101 = vrcp.f32 %v5460_v2  ;;  %v5234_v38 = vpop.f32.mrf.mxu2  ;;  %v5828_v47 = vmul.f32 0.6931472, %v7098_v6  ;;  %vm5482_vm7 = vmor %vm5480_vm6, %vm5481_vm4  ;;  %v5498_v54 = vand.u32 2147483647, %v5460_v2  ;;  %v5500_v10 = vand.u32 2147483648, %v5460_v2 }
 0x75b   : > { %v10213_v50 = vadd.f32 %v10194_v15, %v5234_v38  ;;  %v5477_v18 = vsub.f32 1.0, %v5476_v27  ;;  %7103 = vlog2.f32 %v5460_v2  ;;  %vm5494_vm10 = vweird.f32 %v5460_v2 }
 0x75c   : > { %5875 = vrot.lane.b32.xlu0 %v5828_v47, %s7332_s7  ;;  %vm5499_vm12 = vcmp.eq.f32.partialorder %v5498_v54, 8.507059e+37  ;;  %v5501_v62 = vor.u32 1.1754944e-38, %v5500_v10 }
 0x75d   : > { %v6486_v58 = vclamps-f32 %v10213_v50, 6.0  ;;  %v5478_v57 = vmul.f32 %v7096_v36, %v5477_v18 }
 0x75f   : > { %v7100_v55 = vpop.eup %7099  ;;  %v5433_v17 = vmul.f32 1.442695, %v6486_v58  ;;  %v5479_v24 = vadd.f32 %v7096_v36, %v5478_v57 }
 0x760   : > { %v7102_v43 = vpop.eup %7101  ;;  %v5461_v40 = vadd.f32 1e-08, %v7100_v55 }
 0x761   : > { %7105 = vpow2.f32 %v5433_v17  ;;  %v5483_v0 = vsel %vm5482_vm7, %v7096_v36, %v5479_v24  ;;  %v5490_v42 = vmul.f32 %v7102_v43, %v5460_v2  ;;  %vm5495_vm9 = vweird.f32 %v7102_v43  ;;  %v7104_v59 = vpop.eup %7103 }
 0x762   : > { %7107 = vrcp.f32 %v5461_v40  ;;  %v5237_v51 = vpop.f32.mrf.mxu2  ;;  %v5488_v30 = vsel %vm5485_vm8, %v5487_v5, %v5483_v0  ;;  %vm5496_vm11 = vmor %vm5494_vm10, %vm5495_vm9  ;;  %v5830_v28 = vmul.f32 0.6931472, %v7104_v59  ;;  %v5514_v25 = vand.u32 2147483648, %v5461_v40 }
 0x763   : > { %v10218_v53 = vadd.f32 %v10194_v15, %v5237_v51  ;;  %5747 = vrot.lane.b32.xlu2 %v5488_v30, %s7332_s7  ;;  %7109 = vlog2.f32 %v5461_v40  ;;  %v5491_v20 = vsub.f32 1.0, %v5490_v42  ;;  %v5512_v41 = vand.u32 2147483647, %v5461_v40 }
 0x764   : > { %vm5508_vm14 = vweird.f32 %v5461_v40  ;;  %v5515_v44 = vor.u32 1.1754944e-38, %v5514_v25 }
 0x765   : > { %v6487_v35 = vclamps-f32 %v10218_v53, 6.0  ;;  %v5492_v61 = vmul.f32 %v7102_v43, %v5491_v20  ;;  %vm5513_vm0 = vcmp.eq.f32.partialorder %v5512_v41, 8.507059e+37 }
 0x767   : > { %v7106_v12 = vpop.eup %7105  ;;  %v5435_v39 = vmul.f32 1.442695, %v6487_v35  ;;  %v5493_v31 = vadd.f32 %v7102_v43, %v5492_v61 }
 0x768   : > { %v7108_v29 = vpop.eup %7107  ;;  %v5462_v8 = vadd.f32 1e-08, %v7106_v12 }
 0x769   : > { %v7110_v45 = vpop.eup %7109  ;;  %7111 = vpow2.f32 %v5435_v39  ;;  %v5497_v33 = vsel %vm5496_vm11, %v7102_v43, %v5493_v31  ;;  %v5504_v48 = vmul.f32 %v7108_v29, %v5461_v40  ;;  %vm5509_vm13 = vweird.f32 %v7108_v29 }
 0x76a   : > { %7113 = vrcp.f32 %v5462_v8  ;;  %v5240_v9 = vpop.f32.mrf.mxu2  ;;  %v5832_v21 = vmul.f32 0.6931472, %v7110_v45  ;;  %v5502_v46 = vsel %vm5499_vm12, %v5501_v62, %v5497_v33  ;;  %vm5510_vm15 = vmor %vm5508_vm14, %vm5509_vm13  ;;  %v5528_v6 = vand.u32 2147483648, %v5462_v8 }
 0x76b   : > { %v10223_v37 = vadd.f32 %v10194_v15, %v5240_v9  ;;  %5877 = vrot.lane.b32.xlu2 %v5830_v28, %s7332_s7  ;;  %5749 = vrot.lane.b32.xlu0 %v5502_v46, %s7332_s7  ;;  %v5505_v63 = vsub.f32 1.0, %v5504_v48  ;;  %7115 = vlog2.f32 %v5462_v8  ;;  %v5526_v47 = vand.u32 2147483647, %v5462_v8 }
 0x76c   : > { %5879 = vrot.lane.b32.xlu1 %v5832_v21, %s7332_s7  ;;  %vm5522_vm2 = vweird.f32 %v5462_v8  ;;  %v5529_v55 = vor.u32 1.1754944e-38, %v5528_v6 }
 0x76d   : > { %v6488_v23 = vclamps-f32 %v10223_v37, 6.0  ;;  %v5506_v4 = vmul.f32 %v7108_v29, %v5505_v63  ;;  %vm5527_vm5 = vcmp.eq.f32.partialorder %v5526_v47, 8.507059e+37 }
 0x76f   : > { %v7112_v16 = vpop.eup %7111  ;;  %v5437_v26 = vmul.f32 1.442695, %v6488_v23  ;;  %v5507_v19 = vadd.f32 %v7108_v29, %v5506_v4 }
 0x770   : > { %v7114_v14 = vpop.eup %7113  ;;  %v5463_v34 = vadd.f32 1e-08, %v7112_v16 }
 0x771   : > { %v7116_v7 = vpop.eup %7115  ;;  %7117 = vpow2.f32 %v5437_v26  ;;  %v5511_v1 = vsel %vm5510_vm15, %v7108_v29, %v5507_v19  ;;  %v5518_v60 = vmul.f32 %v7114_v14, %v5462_v8  ;;  %vm5523_vm1 = vweird.f32 %v7114_v14 }
 0x772   : > { %7119 = vrcp.f32 %v5463_v34  ;;  %v5243_v52 = vpop.f32.mrf.mxu2  ;;  %v5516_v32 = vsel %vm5513_vm0, %v5515_v44, %v5511_v1  ;;  %v5834_v3 = vmul.f32 0.6931472, %v7116_v7  ;;  %vm5524_vm3 = vmor %vm5522_vm2, %vm5523_vm1  ;;  %v5542_v42 = vand.u32 2147483648, %v5463_v34 }
 0x773   : > { %v10230_v36 = vadd.f32 %v10194_v15, %v5243_v52  ;;  %v5519_v2 = vsub.f32 1.0, %v5518_v60  ;;  %7121 = vlog2.f32 %v5463_v34  ;;  %v5540_v30 = vand.u32 2147483647, %v5463_v34 }
 0x774   : > { %5751 = vrot.lane.b32.xlu1 %v5516_v32, %s7332_s7  ;;  %5881 = vrot.lane.b32.xlu0 %v5834_v3, %s7332_s7  ;;  %vm5536_vm6 = vweird.f32 %v5463_v34  ;;  %v5543_v39 = vor.u32 1.1754944e-38, %v5542_v42 }
 0x775   : > { %v6489_v27 = vclamps-f32 %v10230_v36, 6.0  ;;  %v5520_v38 = vmul.f32 %v7114_v14, %v5519_v2  ;;  %vm5541_vm8 = vcmp.eq.f32.partialorder %v5540_v30, 8.507059e+37 }
 0x777   : > { %v7118_v18 = vpop.eup %7117  ;;  %v5439_v11 = vmul.f32 1.442695, %v6489_v27  ;;  %v5521_v58 = vadd.f32 %v7114_v14, %v5520_v38 }
 0x778   : > { %v7120_v57 = vpop.eup %7119  ;;  %v5464_v56 = vadd.f32 1e-08, %v7118_v18 }
 0x779   : > { %7123 = vpow2.f32 %v5439_v11  ;;  %v5525_v17 = vsel %vm5524_vm3, %v7114_v14, %v5521_v58  ;;  %v5532_v24 = vmul.f32 %v7120_v57, %v5463_v34  ;;  %vm5537_vm4 = vweird.f32 %v7120_v57  ;;  %v7122_v20 = vpop.eup %7121 }
 0x77a   : > { %7125 = vrcp.f32 %v5464_v56  ;;  %v5530_v43 = vsel %vm5527_vm5, %v5529_v55, %v5525_v17  ;;  %vm5538_vm7 = vmor %vm5536_vm6, %vm5537_vm4  ;;  %v5836_v29 = vmul.f32 0.6931472, %v7122_v20  ;;  %v5556_v21 = vand.u32 2147483648, %v5464_v56 }
 0x77b   : > { %5753 = vrot.lane.b32.xlu2 %v5530_v43, %s7332_s7  ;;  %7127 = vlog2.f32 %v5464_v56  ;;  %v5533_v5 = vsub.f32 1.0, %v5532_v24  ;;  %v5554_v63 = vand.u32 2147483647, %v5464_v56  ;;  %vm5550_vm10 = vweird.f32 %v5464_v56 }
 0x77c   : > { %v5557_v16 = vor.u32 1.1754944e-38, %v5556_v21 }
 0x77d   : > { %v5534_v51 = vmul.f32 %v7120_v57, %v5533_v5  ;;  %vm5555_vm12 = vcmp.eq.f32.partialorder %v5554_v63, 8.507059e+37 }
 0x77e   : > { %v5246_v40 = vpop.f32.mrf.mxu2 }
 0x77f   : > { %v10237_v0 = vadd.f32 %v10194_v15, %v5246_v40  ;;  %v7124_v10 = vpop.eup %7123  ;;  %v5535_v35 = vadd.f32 %v7120_v57, %v5534_v51 }
 0x780   : > { %v7126_v61 = vpop.eup %7125  ;;  %v5465_v59 = vadd.f32 1e-08, %v7124_v10 }
 0x781   : > { %v6490_v54 = vclamps-f32 %v10237_v0, 6.0  ;;  %v7128_v31 = vpop.eup %7127  ;;  %v5539_v8 = vsel %vm5538_vm7, %v7120_v57, %v5535_v35  ;;  %v5546_v62 = vmul.f32 %v7126_v61, %v5464_v56  ;;  %vm5551_vm9 = vweird.f32 %v7126_v61 }
 0x782   : > { %7129 = vrcp.f32 %v5465_v59  ;;  %v5838_v45 = vmul.f32 0.6931472, %v7128_v31  ;;  %v5544_v28 = vsel %vm5541_vm8, %v5543_v39, %v5539_v8  ;;  %vm5552_vm11 = vmor %vm5550_vm10, %vm5551_vm9  ;;  %v5570_v52 = vand.u32 2147483648, %v5465_v59 }
 0x783   : > { %v5441_v12 = vmul.f32 1.442695, %v6490_v54  ;;  %5883 = vrot.lane.b32.xlu2 %v5836_v29, %s7332_s7  ;;  %5755 = vrot.lane.b32.xlu0 %v5544_v28, %s7332_s7  ;;  %v5547_v48 = vsub.f32 1.0, %v5546_v62  ;;  %v5568_v3 = vand.u32 2147483647, %v5465_v59  ;;  %vm5564_vm14 = vweird.f32 %v5465_v59 }
 0x784   : > { %5885 = vrot.lane.b32.xlu1 %v5838_v45, %s7332_s7  ;;  %v5571_v27 = vor.u32 1.1754944e-38, %v5570_v52 }
 0x785   : > { %7131 = vpow2.f32 %v5441_v12  ;;  %v5548_v46 = vmul.f32 %v7126_v61, %v5547_v48  ;;  %vm5569_vm0 = vcmp.eq.f32.partialorder %v5568_v3, 8.507059e+37 }
 0x786   : > { %v5249_v33 = vpop.f32.mrf.mxu2  ;;  %7133 = vlog2.f32 %v5465_v59 }
 0x787   : > { %v10244_v9 = vadd.f32 %v10194_v15, %v5249_v33  ;;  %v5549_v23 = vadd.f32 %v7126_v61, %v5548_v46 }
 0x788   : > { %v7130_v4 = vpop.eup %7129 }
 0x789   : > { %v6491_v25 = vclamps-f32 %v10244_v9, 6.0  ;;  %v5553_v19 = vsel %vm5552_vm11, %v7126_v61, %v5549_v23  ;;  %v5560_v14 = vmul.f32 %v7130_v4, %v5465_v59  ;;  %vm5565_vm13 = vweird.f32 %v7130_v4 }
 0x78a   : > { %v5558_v7 = vsel %vm5555_vm12, %v5557_v16, %v5553_v19  ;;  %vm5566_vm15 = vmor %vm5564_vm14, %vm5565_vm13 }
 0x78b   : > { %v5443_v41 = vmul.f32 1.442695, %v6491_v25  ;;  %v7132_v26 = vpop.eup %7131  ;;  %5757 = vrot.lane.b32.xlu2 %v5558_v7, %s7332_s7  ;;  %v5561_v60 = vsub.f32 1.0, %v5560_v14 }
 0x78c   : > { %v7134_v34 = vpop.eup %7133  ;;  %v5466_v44 = vadd.f32 1e-08, %v7132_v26 }
 0x78d   : > { %7135 = vpow2.f32 %v5443_v41  ;;  %v5840_v1 = vmul.f32 0.6931472, %v7134_v34  ;;  %v5562_v32 = vmul.f32 %v7130_v4, %v5561_v60 }
 0x78e   : > { %7137 = vrcp.f32 %v5466_v44  ;;  %v5584_v17 = vand.u32 2147483648, %v5466_v44  ;;  %v5582_v43 = vand.u32 2147483647, %v5466_v44  ;;  %vm5578_vm2 = vweird.f32 %v5466_v44 }
 0x78f   : > { %5887 = vrot.lane.b32.xlu0 %v5840_v1, %s7332_s7  ;;  %7139 = vlog2.f32 %v5466_v44  ;;  %v5563_v2 = vadd.f32 %v7130_v4, %v5562_v32 }
 0x790   : > { %v5585_v51 = vor.u32 1.1754944e-38, %v5584_v17  ;;  %vm5583_vm5 = vcmp.eq.f32.partialorder %v5582_v43, 8.507059e+37 }
 0x791   : > { %v5567_v47 = vsel %vm5566_vm15, %v7130_v4, %v5563_v2 }
 0x792   : > { %v5572_v11 = vsel %vm5569_vm0, %v5571_v27, %v5567_v47 }
 0x793   : > { %v7136_v6 = vpop.eup %7135  ;;  %5759 = vrot.lane.b32.xlu1 %v5572_v11, %s7332_s7 }
 0x794   : > { %v5467_v38 = vadd.f32 1e-08, %v7136_v6  ;;  %v7138_v18 = vpop.eup %7137 }
 0x795   : > { %v7140_v58 = vpop.eup %7139  ;;  %v5574_v57 = vmul.f32 %v7138_v18, %v5466_v44  ;;  %vm5579_vm1 = vweird.f32 %v7138_v18 }
 0x796   : > { %7141 = vrcp.f32 %v5467_v38  ;;  %v5842_v56 = vmul.f32 0.6931472, %v7140_v58  ;;  %vm5580_vm3 = vmor %vm5578_vm2, %vm5579_vm1  ;;  %v5252_v10 = vpop.f32.mrf.mxu2  ;;  %v5598_v12 = vand.u32 2147483648, %v5467_v38  ;;  %v5596_v31 = vand.u32 2147483647, %v5467_v38 }
 0x797   : > { %7143 = vlog2.f32 %v5467_v38  ;;  %v5575_v55 = vsub.f32 1.0, %v5574_v57  ;;  %v10252_v59 = vadd.f32 %v10194_v15, %v5252_v10  ;;  %vm5592_vm6 = vweird.f32 %v5467_v38 }
 0x798   : > { %5889 = vrot.lane.b32.xlu2 %v5842_v56, %s7332_s7  ;;  %v5599_v45 = vor.u32 1.1754944e-38, %v5598_v12  ;;  %vm5597_vm8 = vcmp.eq.f32.partialorder %v5596_v31, 8.507059e+37 }
 0x799   : > { %v5576_v24 = vmul.f32 %v7138_v18, %v5575_v55  ;;  %v6492_v29 = vclamps-f32 %v10252_v59, 6.0 }
 0x79b   : > { %v5577_v5 = vadd.f32 %v7138_v18, %v5576_v24  ;;  %v5445_v62 = vmul.f32 1.442695, %v6492_v29 }
 0x79c   : > { %v7142_v40 = vpop.eup %7141 }
 0x79d   : > { %v7144_v42 = vpop.eup %7143  ;;  %v5588_v30 = vmul.f32 %v7142_v40, %v5467_v38  ;;  %v5581_v54 = vsel %vm5580_vm3, %v7138_v18, %v5577_v5  ;;  %vm5593_vm4 = vweird.f32 %v7142_v40  ;;  %7145 = vpow2.f32 %v5445_v62 }
 0x79e   : > { %v5844_v20 = vmul.f32 0.6931472, %v7144_v42  ;;  %v5586_v35 = vsel %vm5583_vm5, %v5585_v51, %v5581_v54  ;;  %vm5594_vm7 = vmor %vm5592_vm6, %vm5593_vm4  ;;  %v5255_v48 = vpop.f32.mrf.mxu2 }
 0x79f   : > { %v5589_v61 = vsub.f32 1.0, %v5588_v30  ;;  %5761 = vrot.lane.b32.xlu0 %v5586_v35, %s7332_s7  ;;  %v10259_v21 = vadd.f32 %v10194_v15, %v5255_v48  ;;  %v5305_v30 = vld [vmem:[%s10277_s10] sm:$0xff]  ;;  %v10291_v35 = vld [vmem:[%s10670_s4 + $0x10] ss:$0 sm:$0xff] }
 0x7a0   : > { %5891 = vrot.lane.b32.xlu1 %v5844_v20, %s7332_s7  ;;  %v5699_v29 = vsub.f32 %v5305_v30, %v10198_v22  ;;  %v5323_v48 = vsub.f32 %v5305_v30, %v10291_v35 }
 0x7a1   : > { %v5590_v39 = vmul.f32 %v7142_v40, %v5589_v61  ;;  %v6493_v46 = vclamps-f32 %v10259_v21, 6.0 }
 0x7a3   : > { %v5591_v8 = vadd.f32 %v7142_v40, %v5590_v39  ;;  %v7146_v63 = vpop.eup %7145  ;;  %v5447_v25 = vmul.f32 1.442695, %v6493_v46 }
 0x7a4   : > { %v5468_v23 = vadd.f32 1e-08, %v7146_v63 }
 0x7a5   : > { %v5595_v28 = vsel %vm5594_vm7, %v7142_v40, %v5591_v8  ;;  %7147 = vpow2.f32 %v5447_v25 }
 0x7a6   : > { %v5600_v33 = vsel %vm5597_vm8, %v5599_v45, %v5595_v28  ;;  %7149 = vrcp.f32 %v5468_v23  ;;  %v5258_v4 = vpop.f32.mrf.mxu2  ;;  %v5612_v3 = vand.u32 2147483648, %v5468_v23  ;;  %v5610_v27 = vand.u32 2147483647, %v5468_v23 }
 0x7a7   : > { %5763 = vrot.lane.b32.xlu2 %v5600_v33, %s7332_s7  ;;  %v10263_v41 = vadd.f32 %v10194_v15, %v5258_v4  ;;  %7151 = vlog2.f32 %v5468_v23  ;;  %vm5606_vm10 = vweird.f32 %v5468_v23  ;;  %v5715_v4 = vmul.f32 %v5699_v29, %v5699_v29 }
 0x7a8   : > { %v5613_v57 = vor.u32 1.1754944e-38, %v5612_v3  ;;  %vm5611_vm12 = vcmp.eq.f32.partialorder %v5610_v27, 8.507059e+37  ;;  %v10320_v27 = vld [vmem:[%s10670_s4 + $0x13] ss:$0 sm:$0xff] }
 0x7a9   : > { %v6494_v16 = vclamps-f32 %v10263_v41, 6.0 }
 0x7ab   : > { %v7148_v26 = vpop.eup %7147  ;;  %v5449_v19 = vmul.f32 1.442695, %v6494_v16 }
 0x7ac   : > { %v7150_v14 = vpop.eup %7149  ;;  %v5469_v34 = vadd.f32 1e-08, %v7148_v26 }
 0x7ad   : > { %v7152_v44 = vpop.eup %7151  ;;  %7153 = vpow2.f32 %v5449_v19  ;;  %v5602_v7 = vmul.f32 %v7150_v14, %v5468_v23  ;;  %vm5607_vm9 = vweird.f32 %v7150_v14 }
 0x7ae   : > { %7155 = vrcp.f32 %v5469_v34  ;;  %v5261_v1 = vpop.f32.mrf.mxu2  ;;  %v5846_v60 = vmul.f32 0.6931472, %v7152_v44  ;;  %vm5608_vm11 = vmor %vm5606_vm10, %vm5607_vm9  ;;  %v5626_v51 = vand.u32 2147483648, %v5469_v34  ;;  %v5624_v10 = vand.u32 2147483647, %v5469_v34 }
 0x7af   : > { %v10267_v52 = vadd.f32 %v10194_v15, %v5261_v1  ;;  %v5603_v32 = vsub.f32 1.0, %v5602_v7  ;;  %7157 = vlog2.f32 %v5469_v34  ;;  %vm5620_vm14 = vweird.f32 %v5469_v34  ;;  %v10311_v7 = vld [vmem:[%s10670_s4 + $0x11] ss:$0 sm:$0xff] }
 0x7b0   : > { %5893 = vrot.lane.b32.xlu0 %v5846_v60, %s7332_s7  ;;  %v5627_v62 = vor.u32 1.1754944e-38, %v5626_v51  ;;  %vm5625_vm0 = vcmp.eq.f32.partialorder %v5624_v10, 8.507059e+37  ;;  %v5339_v44 = vmul.f32 %v5323_v48, %v5323_v48  ;;  %v10314_v60 = vld [vmem:[%s10277_s10 + $0x8] sm:$0xff] }
 0x7b1   : > { %v6495_v2 = vclamps-f32 %v10267_v52, 6.0  ;;  %v5604_v6 = vmul.f32 %v7150_v14, %v5603_v32 }
 0x7b2   : > { %v5393_v30 = vmul.f32 %v10320_v27, %v5339_v44 }
 0x7b3   : > { %v7154_v38 = vpop.eup %7153  ;;  %v5451_v47 = vmul.f32 1.442695, %v6495_v2  ;;  %v5605_v18 = vadd.f32 %v7150_v14, %v5604_v6 }
 0x7b4   : > { %v7156_v11 = vpop.eup %7155  ;;  %v10271_v58 = vadd.f32 1e-08, %v7154_v38  ;;  %v5324_v38 = vsub.f32 %v10314_v60, %v10291_v35 }
 0x7b5   : > { %v7158_v56 = vpop.eup %7157  ;;  %7159 = vpow2.f32 %v5451_v47  ;;  %v5609_v55 = vsel %vm5608_vm11, %v7150_v14, %v5605_v18  ;;  %v5616_v17 = vmul.f32 %v7156_v11, %v5469_v34  ;;  %vm5621_vm13 = vweird.f32 %v7156_v11 }
 0x7b6   : > { %7161 = vrcp.f32 %v10271_v58  ;;  %v5264_v24 = vpop.f32.mrf.mxu2  ;;  %v5614_v43 = vsel %vm5611_vm12, %v5613_v57, %v5609_v55  ;;  %v5848_v40 = vmul.f32 0.6931472, %v7158_v56  ;;  %vm5622_vm15 = vmor %vm5620_vm14, %vm5621_vm13  ;;  %v5640_v26 = vand.u32 2147483648, %v10271_v58 }
 0x7b7   : > { %v10281_v5 = vadd.f32 %v10194_v15, %v5264_v24  ;;  %5765 = vrot.lane.b32.xlu1 %v5614_v43, %s7332_s7  ;;  %7163 = vlog2.f32 %v10271_v58  ;;  %v5617_v42 = vsub.f32 1.0, %v5616_v17  ;;  %v5638_v34 = vand.u32 2147483647, %v10271_v58  ;;  %v10332_v43 = vld [vmem:[%s10670_s4 + $0x12] ss:$0 sm:$0xff] }
 0x7b8   : > { %5895 = vrot.lane.b32.xlu2 %v5848_v40, %s7332_s7  ;;  %vm5634_vm2 = vweird.f32 %v10271_v58  ;;  %v5641_v18 = vor.u32 1.1754944e-38, %v5640_v26 }
 0x7b9   : > { %v6496_v20 = vclamps-f32 %v10281_v5, 6.0  ;;  %v5618_v54 = vmul.f32 %v7156_v11, %v5617_v42  ;;  %vm5639_vm5 = vcmp.eq.f32.partialorder %v5638_v34, 8.507059e+37 }
 0x7bb   : > { %v7160_v61 = vpop.eup %7159  ;;  %v5453_v12 = vmul.f32 1.442695, %v6496_v20  ;;  %v5619_v39 = vadd.f32 %v7156_v11, %v5618_v54  ;;  %v5340_v20 = vmul.f32 %v5324_v38, %v5324_v38  ;;  %v10342_v54 = vld [vmem:[%s10670_s4 + $0x14] ss:$0 sm:$0xff] }
 0x7bc   : > { %v7162_v31 = vpop.eup %7161  ;;  %v10294_v8 = vadd.f32 1e-08, %v7160_v61 }
 0x7bd   : > { %v7164_v45 = vpop.eup %7163  ;;  %7165 = vpow2.f32 %v5453_v12  ;;  %v5623_v28 = vsel %vm5622_vm15, %v7156_v11, %v5619_v39  ;;  %v5630_v33 = vmul.f32 %v7162_v31, %v10271_v58  ;;  %v5748_v16 = vpop.permute.xlu2 %5747  ;;  %vm5635_vm1 = vweird.f32 %v7162_v31 }
 0x7be   : > { %7167 = vrcp.f32 %v10294_v8  ;;  %v5267_v46 = vpop.f32.mrf.mxu2  ;;  %v5850_v63 = vmul.f32 0.6931472, %v7164_v45  ;;  %v5628_v25 = vsel %vm5625_vm0, %v5627_v62, %v5623_v28  ;;  %v5795_v32 = vmul.f32 %v5748_v16, %v5715_v4  ;;  %vm5636_vm3 = vmor %vm5634_vm2, %vm5635_vm1 }
 0x7bf   : > { %v10300_v22 = vadd.f32 %v10194_v15, %v5267_v46  ;;  %5767 = vrot.lane.b32.xlu0 %v5628_v25, %s7332_s7  ;;  %v5631_v23 = vsub.f32 1.0, %v5630_v33  ;;  %7169 = vlog2.f32 %v10294_v8  ;;  %v5357_v58 = vmul.f32 %v10311_v7, %v5339_v44 }
 0x7c0   : > { %5897 = vrot.lane.b32.xlu1 %v5850_v63, %s7332_s7  ;;  %v5811_v40 = vadd.f32 1.837877, %v5795_v32  ;;  %v5652_v61 = vand.u32 2147483647, %v10294_v8  ;;  %v5654_v12 = vand.u32 2147483648, %v10294_v8  ;;  %v5394_v62 = vmul.f32 %v10320_v27, %v5340_v20 }
 0x7c1   : > { %v6497_v19 = vclamps-f32 %v10300_v22, 6.0  ;;  %v5632_v14 = vmul.f32 %v7162_v31, %v5631_v23  ;;  %v5375_v28 = vadd.f32 %v10332_v43, %v5357_v58  ;;  %vm5648_vm6 = vweird.f32 %v10294_v8 }
 0x7c2   : > { %v5411_v4 = vadd.f32 %v10342_v54, %v5393_v30  ;;  %vm5653_vm8 = vcmp.eq.f32.partialorder %v5652_v61, 8.507059e+37  ;;  %v5655_v16 = vor.u32 1.1754944e-38, %v5654_v12 }
 0x7c3   : > { %v7166_v1 = vpop.eup %7165  ;;  %v5455_v3 = vmul.f32 1.442695, %v6497_v19  ;;  %v5633_v2 = vadd.f32 %v7162_v31, %v5632_v14 }
 0x7c4   : > { %v7168_v6 = vpop.eup %7167  ;;  %v10324_v47 = vadd.f32 1e-08, %v7166_v1  ;;  %v5308_v1 = vld [vmem:[%s10277_s10 + $0x18] sm:$0xff] }
 0x7c5   : > { %v7170_v11 = vpop.eup %7169  ;;  %7171 = vpow2.f32 %v5455_v3  ;;  %v5637_v57 = vsel %vm5636_vm3, %v7162_v31, %v5633_v2  ;;  %v5644_v56 = vmul.f32 %v7168_v6, %v10294_v8  ;;  %vm5649_vm4 = vweird.f32 %v7168_v6  ;;  %v10359_v26 = vpop.permute.xlu2 %5877 }
 0x7c6   : > { %7173 = vrcp.f32 %v10324_v47  ;;  %v5270_v55 = vpop.f32.mrf.mxu2  ;;  %v5642_v17 = vsel %vm5639_vm5, %v5641_v18, %v5637_v57  ;;  %v5852_v24 = vmul.f32 0.6931472, %v7170_v11  ;;  %vm5650_vm7 = vmor %vm5648_vm6, %vm5649_vm4  ;;  %v10366_v3 = vmul.f32 %v10311_v7, %v5340_v20 }
 0x7c7   : > { %v10335_v42 = vadd.f32 %v10194_v15, %v5270_v55  ;;  %5769 = vrot.lane.b32.xlu2 %v5642_v17, %s7332_s7  ;;  %v5645_v51 = vsub.f32 1.0, %v5644_v56  ;;  %v10348_v15 = vld [vmem:[%s10277_s10 + $0x10] sm:$0xff]  ;;  %v10369_v2 = vadd.f32 %v10342_v54, %v5394_v62  ;;  %v5666_v38 = vand.u32 2147483647, %v10324_v47 }
 0x7c8   : > { %5899 = vrot.lane.b32.xlu0 %v5852_v24, %s7332_s7  ;;  %v5325_v45 = vsub.f32 %v10348_v15, %v10291_v35  ;;  %v5700_v56 = vsub.f32 %v10314_v60, %v10205_v13  ;;  %v5326_v58 = vsub.f32 %v5308_v1, %v10291_v35  ;;  %v5702_v55 = vsub.f32 %v5308_v1, %v10213_v50 }
 0x7c9   : > { %v6498_v39 = vclamps-f32 %v10335_v42, 6.0  ;;  %v5646_v29 = vmul.f32 %v7168_v6, %v5645_v51  ;;  %vm5662_vm10 = vweird.f32 %v10324_v47  ;;  %vm5667_vm12 = vcmp.eq.f32.partialorder %v5666_v38, 8.507059e+37 }
 0x7ca   : > { %v5341_v18 = vmul.f32 %v5325_v45, %v5325_v45  ;;  %vm6227_vm4 = vcmask 261120  }
 0x7cb   : > { %v7172_v33 = vpop.eup %7171  ;;  %v5457_v48 = vmul.f32 1.442695, %v6498_v39  ;;  %v5647_v63 = vadd.f32 %v7168_v6, %v5646_v29  ;;  %v5716_v29 = vmul.f32 %v5700_v56, %v5700_v56 }
 0x7cc   : > { %v7174_v25 = vpop.eup %7173  ;;  %v10356_v23 = vadd.f32 1e-08, %v7172_v33  ;;  %v10389_v45 = vmul.f32 %v10311_v7, %v5341_v18  ;;  %v5342_v33 = vmul.f32 %v5326_v58, %v5326_v58  ;;  %v5376_v58 = vadd.f32 %v10332_v43, %v10366_v3 }
 0x7cd   : > { %7175 = vpow2.f32 %v5457_v48  ;;  %v5651_v14 = vsel %vm5650_vm7, %v7168_v6, %v5647_v63  ;;  %v5658_v34 = vmul.f32 %v7174_v25, %v10324_v47  ;;  %v5668_v6 = vand.u32 2147483648, %v10324_v47 }
 0x7ce   : > { %v5876_v10 = vpop.permute.xlu0 %5875  ;;  %7177 = vrcp.f32 %v10356_v23  ;;  %v5656_v44 = vsel %vm5653_vm8, %v5655_v16, %v5651_v14  ;;  %vm5663_vm9 = vweird.f32 %v7174_v25  ;;  %v5701_v48 = vsub.f32 %v10348_v15, %v10209_v49 }
 0x7cf   : > { %v5923_v31 = vadd.f32 %v5876_v10, %v5811_v40  ;;  %5771 = vrot.lane.b32.xlu1 %v5656_v44, %s7332_s7  ;;  %v5659_v32 = vsub.f32 1.0, %v5658_v34  ;;  %vm5664_vm11 = vmor %vm5662_vm10, %vm5663_vm9  ;;  %v5669_v13 = vor.u32 1.1754944e-38, %v5668_v6  ;;  %7179 = vlog2.f32 %v10324_v47 }
 0x7d0   : > { %v5680_v16 = vand.u32 2147483647, %v10356_v23  ;;  %v5360_v15 = vmul.f32 %v10311_v7, %v5342_v33  ;;  %v5396_v1 = vmul.f32 %v10320_v27, %v5342_v33  ;;  %vm5676_vm14 = vweird.f32 %v10356_v23 }
 0x7d1   : > { %v5939_v46 = vmul.f32 -0.5, %v5923_v31  ;;  %v5660_v57 = vmul.f32 %v7174_v25, %v5659_v32 }
 0x7d2   : > { %vm5681_vm0 = vcmp.eq.f32.partialorder %v5680_v16, 8.507059e+37 }
 0x7d3   : > { %v5955_v19 = vadd.f32 -0.2876821, %v5939_v46  ;;  %v7176_v17 = vpop.eup %7175  ;;  %v5661_v30 = vadd.f32 %v7174_v25, %v5660_v57 }
 0x7d4   : > { %v7178_v20 = vpop.eup %7177  ;;  %v10383_v10 = vadd.f32 1e-08, %v7176_v17  ;;  %v5717_v17 = vmul.f32 %v5701_v48, %v5701_v48 }
 0x7d5   : > { %v5971_v8 = vmax.f32 %v5375_v28, %v5955_v19  ;;  %v5754_v12 = vpop.permute.xlu2 %5753  ;;  %v5665_v39 = vsel %vm5664_vm11, %v7174_v25, %v5661_v30  ;;  %v5672_v62 = vmul.f32 %v7178_v20, %v10356_v23  ;;  %v7180_v14 = vpop.eup %7179  ;;  %vm5677_vm13 = vweird.f32 %v7178_v20 }
 0x7d6   : > { %7181 = vrcp.f32 %v10383_v10  ;;  %v5670_v31 = vsel %vm5667_vm12, %v5669_v13, %v5665_v39  ;;  %vm5678_vm15 = vmor %vm5676_vm14, %vm5677_vm13  ;;  %v5854_v13 = vmul.f32 0.6931472, %v7180_v14  ;;  %v5694_v33 = vand.u32 2147483647, %v10383_v10 }
 0x7d7   : > { %v10373_v11 = vmax.f32 %v5971_v8, %v5411_v4  ;;  %5773 = vrot.lane.b32.xlu0 %v5670_v31, %s7332_s7  ;;  %v5673_v25 = vsub.f32 1.0, %v5672_v62  ;;  %v5310_v8 = vld [vmem:[%s10277_s10 + $0x28] sm:$0xff]  ;;  %vm5690_vm2 = vweird.f32 %v10383_v10 }
 0x7d8   : > { %v5328_v6 = vsub.f32 %v5310_v8, %v10291_v35  ;;  %v5704_v3 = vsub.f32 %v5310_v8, %v10223_v37  ;;  %vm5695_vm5 = vcmp.eq.f32.partialorder %v5694_v33, 8.507059e+37 }
 0x7d9   : > { %v6003_v24 = vsub.f32 %v5375_v28, %v10373_v11  ;;  %v6051_v40 = vsub.f32 %v5955_v19, %v10373_v11  ;;  %v6115_v51 = vsub.f32 %v5411_v4, %v10373_v11  ;;  %v5395_v28 = vmul.f32 %v10320_v27, %v5341_v18 }
 0x7da   : > { %v5718_v4 = vmul.f32 %v5702_v55, %v5702_v55  ;;  %v5682_v19 = vand.u32 2147483648, %v10356_v23  ;;  %v5674_v44 = vmul.f32 %v7178_v20, %v5673_v25 }
 0x7db   : > { %v6019_v60 = vmul.f32 1.442695, %v6003_v24  ;;  %v6067_v50 = vmul.f32 1.442695, %v6051_v40  ;;  %v6131_v61 = vmul.f32 1.442695, %v6115_v51  ;;  %v10401_v49 = vadd.f32 %v10342_v54, %v5395_v28 }
 0x7dc   : > { %v5798_v32 = vmul.f32 %v5754_v12, %v5718_v4  ;;  %v7182_v38 = vpop.eup %7181  ;;  %v5675_v57 = vadd.f32 %v7178_v20, %v5674_v44  ;;  %v5683_v55 = vor.u32 1.1754944e-38, %v5682_v19  ;;  %v5378_v19 = vadd.f32 %v10332_v43, %v5360_v15 }
 0x7dd   : > { %7183 = vpow2.f32 %v6019_v60  ;;  %v5750_v47 = vpop.permute.xlu0 %5749  ;;  %v5686_v24 = vmul.f32 %v7182_v38, %v10383_v10  ;;  %vm5691_vm1 = vweird.f32 %v7182_v38  ;;  %v5414_v44 = vadd.f32 %v10342_v54, %v5396_v1 }
 0x7de   : > { %7185 = vpow2.f32 %v6067_v50  ;;  %v10395_v46 = vpop.permute.xlu1 %5879  ;;  %v5796_v63 = vmul.f32 %v5750_v47, %v5716_v29  ;;  %v5679_v30 = vsel %vm5678_vm15, %v7178_v20, %v5675_v57  ;;  %v5696_v20 = vand.u32 2147483648, %v10383_v10  ;;  %vm5692_vm3 = vmor %vm5690_vm2, %vm5691_vm1  ;;  %v5309_v57 = vld [vmem:[%s10277_s10 + $0x20] sm:$0xff] }
 0x7df   : > { %7187 = vpow2.f32 %v6131_v61  ;;  %v10412_v61 = vpop.permute.xlu2 %5883  ;;  %v5684_v12 = vsel %vm5681_vm0, %v5683_v55, %v5679_v30  ;;  %v5687_v39 = vsub.f32 1.0, %v5686_v24  ;;  %v5377_v1 = vadd.f32 %v10332_v43, %v10389_v45 }
 0x7e0   : > { %v5812_v34 = vadd.f32 1.837877, %v5796_v63  ;;  %7189 = vlog2.f32 %v10383_v10  ;;  %5775 = vrot.lane.b32.xlu2 %v5684_v12, %s7332_s7  ;;  %v5344_v30 = vmul.f32 %v5328_v6, %v5328_v6 }
 0x7e1   : > { %v5688_v16 = vmul.f32 %v7182_v38, %v5687_v39  ;;  %7191 = vlog2.f32 %v10356_v23  ;;  %v5697_v23 = vor.u32 1.1754944e-38, %v5696_v20 }
 0x7e2   : > { %v5924_v18 = vadd.f32 %v10359_v26, %v5812_v34  ;;  %v5814_v26 = vadd.f32 1.837877, %v5798_v32 }
 0x7e3   : > { %v7184_v56 = vpop.eup %7183  ;;  %v5689_v8 = vadd.f32 %v7182_v38, %v5688_v16 }
 0x7e4   : > { %v7186_v40 = vpop.eup %7185  ;;  %v5940_v51 = vmul.f32 -0.5, %v5924_v18 }
 0x7e5   : > { %v7188_v60 = vpop.eup %7187  ;;  %v6099_v50 = vadd.f32 %v7186_v40, %v7184_v56 }
 0x7e6   : > { %v7190_v31 = vpop.eup %7189  ;;  %v5956_v29 = vadd.f32 -0.2876821, %v5940_v51  ;;  %v5752_v62 = vpop.permute.xlu1 %5751  ;;  %v5327_v51 = vsub.f32 %v5309_v57, %v10291_v35 }
 0x7e7   : > { %v5882_v28 = vpop.permute.xlu0 %5881  ;;  %v6163_v47 = vadd.f32 %v7188_v60, %v6099_v50  ;;  %v5858_v48 = vmul.f32 0.6931472, %v7190_v31  ;;  %v5797_v63 = vmul.f32 %v5752_v62, %v5717_v17  ;;  %v5693_v17 = vsel %vm5692_vm3, %v7182_v38, %v5689_v8  ;;  %v5758_v45 = vpop.permute.xlu2 %5757 }
 0x7e8   : > { %v5926_v25 = vadd.f32 %v5882_v28, %v5814_v26  ;;  %v5972_v4 = vmax.f32 %v5376_v58, %v5956_v29  ;;  %v5698_v40 = vsel %vm5695_vm5, %v5697_v23, %v5693_v17  ;;  %5901 = vrot.lane.b32.xlu2 %v5854_v13, %s7332_s7  ;;  %v5720_v31 = vmul.f32 %v5704_v3, %v5704_v3 }
 0x7e9   : > { %7193 = vlog2.f32 %v6163_v47  ;;  %5905 = vrot.lane.b32.xlu0 %v5858_v48, %s7332_s7  ;;  %v5813_v37 = vadd.f32 1.837877, %v5797_v63  ;;  %5777 = vrot.lane.b32.xlu1 %v5698_v40, %s7332_s7  ;;  %v5362_v48 = vmul.f32 %v10311_v7, %v5344_v30 }
 0x7ea   : > { %v5942_v14 = vmul.f32 -0.5, %v5926_v25  ;;  %v10422_v34 = vmax.f32 %v5972_v4, %v10369_v2  ;;  %v5800_v28 = vmul.f32 %v5758_v45, %v5720_v31 }
 0x7eb   : > { %v5925_v32 = vadd.f32 %v10395_v46, %v5813_v37  ;;  %v7192_v46 = vpop.eup %7191  ;;  %v5380_v40 = vadd.f32 %v10332_v43, %v5362_v48 }
 0x7ec   : > { %v5958_v18 = vadd.f32 -0.2876821, %v5942_v14  ;;  %v6004_v56 = vsub.f32 %v5376_v58, %v10422_v34  ;;  %v6052_v15 = vsub.f32 %v5956_v29, %v10422_v34  ;;  %v6116_v55 = vsub.f32 %v10369_v2, %v10422_v34 }
 0x7ed   : > { %v5941_v24 = vmul.f32 -0.5, %v5925_v32  ;;  %v5703_v2 = vsub.f32 %v5309_v57, %v10218_v53  ;;  %v5343_v29 = vmul.f32 %v5327_v51, %v5327_v51  ;;  %v5856_v25 = vmul.f32 0.6931472, %v7192_v46 }
 0x7ee   : > { %v5974_v10 = vmax.f32 %v5378_v19, %v5958_v18  ;;  %v6021_v60 = vmul.f32 1.442695, %v6004_v56  ;;  %v6069_v50 = vmul.f32 1.442695, %v6052_v15  ;;  %v6133_v38 = vmul.f32 1.442695, %v6116_v55 }
 0x7ef   : > { %v7194_v58 = vpop.eup %7193  ;;  %v5957_v26 = vadd.f32 -0.2876821, %v5941_v24  ;;  %v5719_v4 = vmul.f32 %v5703_v2, %v5703_v2  ;;  %v5816_v8 = vadd.f32 1.837877, %v5800_v28  ;;  %v5398_v57 = vmul.f32 %v10320_v27, %v5344_v30  ;;  %v5311_v2 = vld [vmem:[%s10277_s10 + $0x30] sm:$0xff] }
 0x7f0   : > { %v10438_v12 = vmax.f32 %v5974_v10, %v5414_v44  ;;  %v6180_v39 = vmul.f32 0.6931472, %v7194_v58  ;;  %7195 = vpow2.f32 %v6021_v60  ;;  %v5397_v10 = vmul.f32 %v10320_v27, %v5343_v29 }
 0x7f1   : > { %7197 = vpow2.f32 %v6069_v50  ;;  %v5973_v6 = vmax.f32 %v5377_v1, %v5957_v26  ;;  %5903 = vrot.lane.b32.xlu1 %v5856_v25, %s7332_s7  ;;  %v5416_v50 = vadd.f32 %v10342_v54, %v5398_v57 }
 0x7f2   : > { %v6006_v13 = vsub.f32 %v5378_v19, %v10438_v12  ;;  %v6054_v53 = vsub.f32 %v5958_v18, %v10438_v12  ;;  %v6211_v62 = vadd.f32 %v6180_v39, %v10373_v11  ;;  %v6118_v33 = vsub.f32 %v5414_v44, %v10438_v12 }
 0x7f3   : > { %7199 = vpow2.f32 %v6133_v38  ;;  %v10451_v3 = vmax.f32 %v5973_v6, %v10401_v49  ;;  %v5361_v44 = vmul.f32 %v10311_v7, %v5343_v29  ;;  %v5329_v39 = vsub.f32 %v5311_v2, %v10291_v35 }
 0x7f4   : > { %v6025_v20 = vmul.f32 1.442695, %v6006_v13  ;;  %v6073_v47 = vmul.f32 1.442695, %v6054_v53  ;;  %6228 = vst.msk [vmem:[%s10444_s25] sm:$0xff] %vm6227_vm4, %v6211_v62  ;;  %v5415_v13 = vadd.f32 %v10342_v54, %v5397_v10  ;;  %v5705_v62 = vsub.f32 %v5311_v2, %v10230_v36  ;;  %v5312_v10 = vld [vmem:[%s10277_s10 + $0x38] sm:$0xff] }
 0x7f5   : > { %v6137_v63 = vmul.f32 1.442695, %v6118_v33  ;;  %v6005_v16 = vsub.f32 %v5377_v1, %v10451_v3  ;;  %v6053_v11 = vsub.f32 %v5957_v26, %v10451_v3  ;;  %v6117_v37 = vsub.f32 %v10401_v49, %v10451_v3  ;;  %v5756_v19 = vpop.permute.xlu0 %5755  ;;  %v10472_v33 = vpop.permute.xlu2 %5889 }
 0x7f6   : > { %7201 = vpow2.f32 %v6025_v20  ;;  %v7196_v14 = vpop.eup %7195  ;;  %v5886_v32 = vpop.permute.xlu1 %5885  ;;  %v5799_v18 = vmul.f32 %v5756_v19, %v5719_v4  ;;  %v5379_v26 = vadd.f32 %v10332_v43, %v5361_v44  ;;  %v5345_v4 = vmul.f32 %v5329_v39, %v5329_v39 }
 0x7f7   : > { %7203 = vpow2.f32 %v6073_v47  ;;  %v7198_v23 = vpop.eup %7197  ;;  %v6023_v56 = vmul.f32 1.442695, %v6005_v16  ;;  %v6071_v15 = vmul.f32 1.442695, %v6053_v11  ;;  %v6135_v55 = vmul.f32 1.442695, %v6117_v37 }
 0x7f8   : > { %v6100_v17 = vadd.f32 %v7198_v23, %v7196_v14  ;;  %7205 = vpow2.f32 %v6137_v63  ;;  %v5928_v49 = vadd.f32 %v5886_v32, %v5816_v8  ;;  %v5815_v1 = vadd.f32 1.837877, %v5799_v18  ;;  %v5313_v47 = vld [vmem:[%s10277_s10 + $0x40] sm:$0xff] }
 0x7f9   : > { %v7200_v24 = vpop.eup %7199  ;;  %7207 = vpow2.f32 %v6023_v56  ;;  %v5331_v16 = vsub.f32 %v5313_v47, %v10291_v35  ;;  %v5707_v8 = vsub.f32 %v5313_v47, %v10244_v9  ;;  %v5721_v23 = vmul.f32 %v5705_v62, %v5705_v62 }
 0x7fa   : > { %v6164_v46 = vadd.f32 %v7200_v24, %v6100_v17  ;;  %7209 = vpow2.f32 %v6071_v15  ;;  %v5944_v51 = vmul.f32 -0.5, %v5928_v49  ;;  %v5927_v60 = vadd.f32 %v10412_v61, %v5815_v1 }
 0x7fb   : > { %7211 = vpow2.f32 %v6135_v55  ;;  %v5347_v39 = vmul.f32 %v5331_v16, %v5331_v16 }
 0x7fc   : > { %v7202_v30 = vpop.eup %7201  ;;  %7213 = vlog2.f32 %v6164_v46  ;;  %v5960_v38 = vadd.f32 -0.2876821, %v5944_v51  ;;  %v5943_v45 = vmul.f32 -0.5, %v5927_v60  ;;  %v5363_v51 = vmul.f32 %v10311_v7, %v5345_v4 }
 0x7fd   : > { %v7204_v58 = vpop.eup %7203 }
 0x7fe   : > { %v6102_v31 = vadd.f32 %v7204_v58, %v7202_v30  ;;  %v7206_v6 = vpop.eup %7205  ;;  %v5976_v53 = vmax.f32 %v5380_v40, %v5960_v38  ;;  %v5959_v61 = vadd.f32 -0.2876821, %v5943_v45  ;;  %v5706_v45 = vsub.f32 %v5312_v10, %v10237_v0 }
 0x7ff   : > { %v7208_v29 = vpop.eup %7207 }
 0x800   : > { %v6166_v28 = vadd.f32 %v7206_v6, %v6102_v31  ;;  %v7210_v20 = vpop.eup %7209  ;;  %v10475_v48 = vmax.f32 %v5976_v53, %v5416_v50  ;;  %v5975_v63 = vmax.f32 %v5379_v26, %v5959_v61 }
 0x801   : > { %v7212_v25 = vpop.eup %7211  ;;  %v6101_v11 = vadd.f32 %v7210_v20, %v7208_v29  ;;  %v5888_v30 = vpop.permute.xlu0 %5887 }
 0x802   : > { %7215 = vlog2.f32 %v6166_v28  ;;  %v7214_v37 = vpop.eup %7213  ;;  %v6008_v19 = vsub.f32 %v5380_v40, %v10475_v48  ;;  %v6056_v14 = vsub.f32 %v5960_v38, %v10475_v48  ;;  %v6120_v36 = vsub.f32 %v5416_v50, %v10475_v48 }
 0x803   : > { %v10481_v44 = vmax.f32 %v5975_v63, %v5415_v13  ;;  %v6182_v32 = vmul.f32 0.6931472, %v7214_v37  ;;  %v6165_v18 = vadd.f32 %v7212_v25, %v6101_v11  ;;  %v5723_v50 = vmul.f32 %v5707_v8, %v5707_v8 }
 0x804   : > { %v6029_v57 = vmul.f32 1.442695, %v6008_v19  ;;  %v6077_v56 = vmul.f32 1.442695, %v6056_v14  ;;  %v6141_v15 = vmul.f32 1.442695, %v6120_v36  ;;  %v5381_v28 = vadd.f32 %v10332_v43, %v5363_v51 }
 0x805   : > { %v6007_v55 = vsub.f32 %v5379_v26, %v10481_v44  ;;  %v6212_v17 = vadd.f32 %v6182_v32, %v10422_v34  ;;  %7217 = vlog2.f32 %v6165_v18  ;;  %v6055_v49 = vsub.f32 %v5959_v61, %v10481_v44  ;;  %v5760_v24 = vpop.permute.xlu1 %5759  ;;  %v5764_v34 = vpop.permute.xlu2 %5763 }
 0x806   : > { %v6119_v1 = vsub.f32 %v5415_v13, %v10481_v44  ;;  %7219 = vpow2.f32 %v6029_v57  ;;  %v5801_v40 = vmul.f32 %v5760_v24, %v5721_v23  ;;  %v5399_v26 = vmul.f32 %v10320_v27, %v5345_v4 }
 0x807   : > { %v6027_v9 = vmul.f32 1.442695, %v6007_v55  ;;  %6229 = vst.msk [vmem:[%s10444_s25 + $0x8] sm:$0xff] %vm6227_vm4, %v6212_v17  ;;  %7221 = vpow2.f32 %v6077_v56  ;;  %v6075_v60 = vmul.f32 1.442695, %v6055_v49  ;;  %v5803_v6 = vmul.f32 %v5764_v34, %v5723_v50 }
 0x808   : > { %v7216_v46 = vpop.eup %7215  ;;  %7223 = vpow2.f32 %v6141_v15  ;;  %v6139_v2 = vmul.f32 1.442695, %v6119_v1  ;;  %v5817_v38 = vadd.f32 1.837877, %v5801_v40  ;;  %v5330_v61 = vsub.f32 %v5312_v10, %v10291_v35 }
 0x809   : > { %v6186_v58 = vmul.f32 0.6931472, %v7216_v46  ;;  %7225 = vpow2.f32 %v6027_v9  ;;  %v5417_v47 = vadd.f32 %v10342_v54, %v5399_v26  ;;  %v5722_v63 = vmul.f32 %v5706_v45, %v5706_v45 }
 0x80a   : > { %7227 = vpow2.f32 %v6075_v60  ;;  %v5929_v13 = vadd.f32 %v5888_v30, %v5817_v38  ;;  %v5819_v11 = vadd.f32 1.837877, %v5803_v6  ;;  %v5346_v14 = vmul.f32 %v5330_v61, %v5330_v61 }
 0x80b   : > { %v6214_v31 = vadd.f32 %v6186_v58, %v10438_v12  ;;  %v7218_v53 = vpop.eup %7217  ;;  %7229 = vpow2.f32 %v6139_v2  ;;  %v5365_v12 = vmul.f32 %v10311_v7, %v5347_v39  ;;  %v5401_v36 = vmul.f32 %v10320_v27, %v5347_v39 }
 0x80c   : > { %v7220_v29 = vpop.eup %7219  ;;  %v6184_v62 = vmul.f32 0.6931472, %v7218_v53  ;;  %v5945_v20 = vmul.f32 -0.5, %v5929_v13  ;;  %v5364_v10 = vmul.f32 %v10311_v7, %v5346_v14  ;;  %v5400_v50 = vmul.f32 %v10320_v27, %v5346_v14 }
 0x80d   : > { %6231 = vst.msk [vmem:[%s10444_s25 + $0x18] sm:$0xff] %vm6227_vm4, %v6214_v31  ;;  %v7222_v0 = vpop.eup %7221  ;;  %v5383_v17 = vadd.f32 %v10332_v43, %v5365_v12  ;;  %v5419_v40 = vadd.f32 %v10342_v54, %v5401_v36 }
 0x80e   : > { %v7224_v25 = vpop.eup %7223  ;;  %v6213_v4 = vadd.f32 %v6184_v62, %v10451_v3  ;;  %v6104_v16 = vadd.f32 %v7222_v0, %v7220_v29  ;;  %v5961_v37 = vadd.f32 -0.2876821, %v5945_v20  ;;  %v5382_v45 = vadd.f32 %v10332_v43, %v5364_v10 }
 0x80f   : > { %v7226_v19 = vpop.eup %7225  ;;  %v5418_v13 = vadd.f32 %v10342_v54, %v5400_v50 }
 0x810   : > { %v7228_v18 = vpop.eup %7227  ;;  %6230 = vst.msk [vmem:[%s10444_s25 + $0x10] sm:$0xff] %vm6227_vm4, %v6213_v4  ;;  %v6168_v23 = vadd.f32 %v7224_v25, %v6104_v16  ;;  %v5977_v57 = vmax.f32 %v5381_v28, %v5961_v37 }
 0x811   : > { %v5762_v32 = vpop.permute.xlu0 %5761  ;;  %v6103_v55 = vadd.f32 %v7228_v18, %v7226_v19  ;;  %v7230_v3 = vpop.eup %7229 }
 0x812   : > { %v5892_v8 = vpop.permute.xlu1 %5891  ;;  %v5802_v15 = vmul.f32 %v5762_v32, %v5722_v63  ;;  %7231 = vlog2.f32 %v6168_v23  ;;  %v10506_v49 = vmax.f32 %v5977_v57, %v5417_v47 }
 0x813   : > { %v5931_v56 = vadd.f32 %v5892_v8, %v5819_v11  ;;  %v6167_v9 = vadd.f32 %v7230_v3, %v6103_v55  ;;  %v5896_v3 = vpop.permute.xlu2 %5895 }
 0x814   : > { %v5818_v24 = vadd.f32 1.837877, %v5802_v15  ;;  %v6009_v46 = vsub.f32 %v5381_v28, %v10506_v49  ;;  %v6057_v51 = vsub.f32 %v5961_v37, %v10506_v49  ;;  %v6121_v60 = vsub.f32 %v5417_v47, %v10506_v49 }
 0x815   : > { %v5947_v1 = vmul.f32 -0.5, %v5931_v56  ;;  %7233 = vlog2.f32 %v6167_v9 }
 0x816   : > { %v5930_v34 = vadd.f32 %v10472_v33, %v5818_v24  ;;  %v6031_v58 = vmul.f32 1.442695, %v6009_v46  ;;  %v6079_v2 = vmul.f32 1.442695, %v6057_v51  ;;  %v6143_v26 = vmul.f32 1.442695, %v6121_v60 }
 0x817   : > { %v5963_v30 = vadd.f32 -0.2876821, %v5947_v1  ;;  %v5316_v46 = vld [vmem:[%s10277_s10 + $0x58] sm:$0xff] }
 0x818   : > { %v5946_v39 = vmul.f32 -0.5, %v5930_v34  ;;  %v7232_v31 = vpop.eup %7231  ;;  %7235 = vpow2.f32 %v6031_v58  ;;  %v5710_v34 = vsub.f32 %v5316_v46, %v10263_v41 }
 0x819   : > { %v5979_v38 = vmax.f32 %v5383_v17, %v5963_v30  ;;  %v6190_v53 = vmul.f32 0.6931472, %v7232_v31  ;;  %7237 = vpow2.f32 %v6079_v2 }
 0x81a   : > { %v5962_v61 = vadd.f32 -0.2876821, %v5946_v39  ;;  %7239 = vpow2.f32 %v6143_v26  ;;  %v5334_v39 = vsub.f32 %v5316_v46, %v10291_v35 }
 0x81b   : > { %v10516_v6 = vmax.f32 %v5979_v38, %v5419_v40  ;;  %v7234_v28 = vpop.eup %7233  ;;  %v6216_v20 = vadd.f32 %v6190_v53, %v10475_v48 }
 0x81c   : > { %v5978_v0 = vmax.f32 %v5382_v45, %v5962_v61  ;;  %v6188_v47 = vmul.f32 0.6931472, %v7234_v28  ;;  %v5350_v28 = vmul.f32 %v5334_v39, %v5334_v39 }
 0x81d   : > { %v6011_v29 = vsub.f32 %v5383_v17, %v10516_v6  ;;  %v6059_v33 = vsub.f32 %v5963_v30, %v10516_v6  ;;  %v6123_v62 = vsub.f32 %v5419_v40, %v10516_v6  ;;  %6233 = vst.msk [vmem:[%s10444_s25 + $0x28] sm:$0xff] %vm6227_vm4, %v6216_v20  ;;  %v5314_v17 = vld [vmem:[%s10277_s10 + $0x48] sm:$0xff] }
 0x81e   : > { %v10525_v4 = vmax.f32 %v5978_v0, %v5418_v13  ;;  %v7236_v16 = vpop.eup %7235  ;;  %v6215_v11 = vadd.f32 %v6188_v47, %v10481_v44  ;;  %v5332_v9 = vsub.f32 %v5314_v17, %v10291_v35  ;;  %v5708_v40 = vsub.f32 %v5314_v17, %v10252_v59 }
 0x81f   : > { %v6035_v12 = vmul.f32 1.442695, %v6011_v29  ;;  %v6083_v63 = vmul.f32 1.442695, %v6059_v33  ;;  %v6147_v25 = vmul.f32 1.442695, %v6123_v62  ;;  %v7238_v37 = vpop.eup %7237  ;;  %v5726_v33 = vmul.f32 %v5710_v34, %v5710_v34 }
 0x820   : > { %v6010_v19 = vsub.f32 %v5382_v45, %v10525_v4  ;;  %v6058_v48 = vsub.f32 %v5962_v61, %v10525_v4  ;;  %v6122_v14 = vsub.f32 %v5418_v13, %v10525_v4  ;;  %6232 = vst.msk [vmem:[%s10444_s25 + $0x20] sm:$0xff] %vm6227_vm4, %v6215_v11  ;;  %v6105_v36 = vadd.f32 %v7238_v37, %v7236_v16  ;;  %v7240_v8 = vpop.eup %7239  ;;  %v5315_v45 = vld [vmem:[%s10277_s10 + $0x50] sm:$0xff] }
 0x821   : > { %7241 = vpow2.f32 %v6035_v12  ;;  %v5348_v2 = vmul.f32 %v5332_v9, %v5332_v9  ;;  %v5724_v26 = vmul.f32 %v5708_v40, %v5708_v40  ;;  %v5770_v53 = vpop.permute.xlu2 %5769  ;;  %v5333_v12 = vsub.f32 %v5315_v45, %v10291_v35 }
 0x822   : > { %7243 = vpow2.f32 %v6083_v63  ;;  %v6033_v32 = vmul.f32 1.442695, %v6010_v19  ;;  %v6081_v18 = vmul.f32 1.442695, %v6058_v48  ;;  %v6169_v23 = vadd.f32 %v7240_v8, %v6105_v36  ;;  %v5894_v31 = vpop.permute.xlu0 %5893 }
 0x823   : > { %7245 = vpow2.f32 %v6147_v25  ;;  %v6145_v44 = vmul.f32 1.442695, %v6122_v14  ;;  %v5366_v41 = vmul.f32 %v10311_v7, %v5348_v2  ;;  %v5806_v0 = vmul.f32 %v5770_v53, %v5726_v33 }
 0x824   : > { %7247 = vpow2.f32 %v6033_v32  ;;  %v5402_v47 = vmul.f32 %v10320_v27, %v5348_v2  ;;  %v5349_v36 = vmul.f32 %v5333_v12, %v5333_v12 }
 0x825   : > { %7249 = vlog2.f32 %v6169_v23  ;;  %v5384_v16 = vadd.f32 %v10332_v43, %v5366_v41  ;;  %v5822_v48 = vadd.f32 1.837877, %v5806_v0 }
 0x826   : > { %7251 = vpow2.f32 %v6081_v18  ;;  %v5404_v18 = vmul.f32 %v10320_v27, %v5350_v28  ;;  %v5367_v17 = vmul.f32 %v10311_v7, %v5349_v36 }
 0x827   : > { %v7242_v57 = vpop.eup %7241  ;;  %7253 = vpow2.f32 %v6145_v44 }
 0x828   : > { %v7244_v56 = vpop.eup %7243  ;;  %v5422_v9 = vadd.f32 %v10342_v54, %v5404_v18 }
 0x829   : > { %v6107_v15 = vadd.f32 %v7244_v56, %v7242_v57  ;;  %v7246_v55 = vpop.eup %7245  ;;  %v5766_v59 = vpop.permute.xlu1 %5765 }
 0x82a   : > { %v7248_v24 = vpop.eup %7247  ;;  %v5804_v61 = vmul.f32 %v5766_v59, %v5724_v26  ;;  %v10574_v26 = vld [vmem:[%s10670_s4 + $0x10] ss:$0 sm:$0xff] }
 0x82b   : > { %v6171_v1 = vadd.f32 %v7246_v55, %v6107_v15  ;;  %v7250_v10 = vpop.eup %7249 }
 0x82c   : > { %v7252_v51 = vpop.eup %7251  ;;  %v6192_v60 = vmul.f32 0.6931472, %v7250_v10  ;;  %v5820_v62 = vadd.f32 1.837877, %v5804_v61  ;;  %v5403_v10 = vmul.f32 %v10320_v27, %v5349_v36  ;;  %v5318_v61 = vld [vmem:[%s10277_s10 + $0x68] sm:$0xff] }
 0x82d   : > { %7255 = vlog2.f32 %v6171_v1  ;;  %v6106_v30 = vadd.f32 %v7252_v51, %v7248_v24  ;;  %v7254_v50 = vpop.eup %7253 }
 0x82e   : > { %v6217_v58 = vadd.f32 %v6192_v60, %v10506_v49  ;;  %v5709_v49 = vsub.f32 %v5315_v45, %v10259_v21  ;;  %v5932_v63 = vadd.f32 %v5894_v31, %v5820_v62  ;;  %v5368_v21 = vmul.f32 %v10311_v7, %v5350_v28 }
 0x82f   : > { %v6170_v38 = vadd.f32 %v7254_v50, %v6106_v30  ;;  %v5317_v30 = vld [vmem:[%s10277_s10 + $0x60] sm:$0xff]  ;;  %v5385_v7 = vadd.f32 %v10332_v43, %v5367_v17 }
 0x830   : > { %6234 = vst.msk [vmem:[%s10444_s25 + $0x30] sm:$0xff] %vm6227_vm4, %v6217_v58  ;;  %v5948_v11 = vmul.f32 -0.5, %v5932_v63  ;;  %v5725_v37 = vmul.f32 %v5709_v49, %v5709_v49  ;;  %v5386_v15 = vadd.f32 %v10332_v43, %v5368_v21  ;;  %v5335_v45 = vsub.f32 %v5317_v30, %v10574_v26 }
 0x831   : > { %7257 = vlog2.f32 %v6170_v38  ;;  %v5768_v14 = vpop.permute.xlu0 %5767  ;;  %v5421_v38 = vadd.f32 %v10342_v54, %v5403_v10  ;;  %v5711_v39 = vsub.f32 %v5317_v30, %v10267_v52  ;;  %v5336_v63 = vsub.f32 %v5318_v61, %v10574_v26 }
 0x832   : > { %v5964_v8 = vadd.f32 -0.2876821, %v5948_v11  ;;  %v5898_v32 = vpop.permute.xlu1 %5897  ;;  %v5805_v35 = vmul.f32 %v5768_v14, %v5725_v37  ;;  %v5351_v41 = vmul.f32 %v5335_v45, %v5335_v45  ;;  %v10594_v14 = vld [vmem:[%s10670_s4 + $0x11] ss:$0 sm:$0xff] }
 0x833   : > { %v7256_v13 = vpop.eup %7255  ;;  %v5934_v44 = vadd.f32 %v5898_v32, %v5822_v48  ;;  %v5727_v52 = vmul.f32 %v5711_v39, %v5711_v39 }
 0x834   : > { %v6196_v29 = vmul.f32 0.6931472, %v7256_v13  ;;  %v5980_v57 = vmax.f32 %v5384_v16, %v5964_v8  ;;  %v5821_v56 = vadd.f32 1.837877, %v5805_v35  ;;  %v10600_v35 = vld [vmem:[%s10670_s4 + $0x13] ss:$0 sm:$0xff] }
 0x835   : > { %v5950_v55 = vmul.f32 -0.5, %v5934_v44  ;;  %v5405_v18 = vmul.f32 %v10600_v35, %v5351_v41 }
 0x836   : > { %v6219_v20 = vadd.f32 %v6196_v29, %v10516_v6  ;;  %v5420_v6 = vadd.f32 %v10342_v54, %v5402_v47  ;;  %v5933_v24 = vadd.f32 %v5896_v3, %v5821_v56 }
 0x837   : > { %v7258_v25 = vpop.eup %7257  ;;  %v5966_v40 = vadd.f32 -0.2876821, %v5950_v55  ;;  %v10606_v55 = vld [vmem:[%s10670_s4 + $0x12] ss:$0 sm:$0xff] }
 0x838   : > { %6236 = vst.msk [vmem:[%s10444_s25 + $0x40] sm:$0xff] %vm6227_vm4, %v6219_v20  ;;  %v6194_v19 = vmul.f32 0.6931472, %v7258_v25  ;;  %v10559_v1 = vmax.f32 %v5980_v57, %v5420_v6  ;;  %v5949_v60 = vmul.f32 -0.5, %v5933_v24  ;;  %v5712_v25 = vsub.f32 %v5318_v61, %v10281_v5 }
 0x839   : > { %v5982_v50 = vmax.f32 %v5386_v15, %v5966_v40  ;;  %v5352_v57 = vmul.f32 %v5336_v63, %v5336_v63 }
 0x83a   : > { %v6218_v23 = vadd.f32 %v6194_v19, %v10525_v4  ;;  %v6012_v4 = vsub.f32 %v5384_v16, %v10559_v1  ;;  %v6060_v46 = vsub.f32 %v5964_v8, %v10559_v1  ;;  %v6124_v51 = vsub.f32 %v5420_v6, %v10559_v1  ;;  %v5900_v49 = vpop.permute.xlu0 %5899  ;;  %v10589_v16 = vpop.permute.xlu2 %5775 }
 0x83b   : > { %v10568_v3 = vmax.f32 %v5982_v50, %v5422_v9  ;;  %v5965_v27 = vadd.f32 -0.2876821, %v5949_v60  ;;  %v5369_v6 = vmul.f32 %v10594_v14, %v5351_v41  ;;  %v5728_v56 = vmul.f32 %v5712_v25, %v5712_v25 }
 0x83c   : > { %6235 = vst.msk [vmem:[%s10444_s25 + $0x38] sm:$0xff] %vm6227_vm4, %v6218_v23  ;;  %v6037_v34 = vmul.f32 1.442695, %v6012_v4  ;;  %v6085_v58 = vmul.f32 1.442695, %v6060_v46  ;;  %v5370_v50 = vmul.f32 %v10594_v14, %v5352_v57 }
 0x83d   : > { %v6149_v2 = vmul.f32 1.442695, %v6124_v51  ;;  %v6014_v43 = vsub.f32 %v5386_v15, %v10568_v3  ;;  %v6062_v31 = vsub.f32 %v5966_v40, %v10568_v3  ;;  %v6126_v59 = vsub.f32 %v5422_v9, %v10568_v3  ;;  %v10612_v4 = vld [vmem:[%s10670_s4 + $0x14] ss:$0 sm:$0xff] }
 0x83e   : > { %7259 = vpow2.f32 %v6037_v34  ;;  %v5981_v13 = vmax.f32 %v5385_v7, %v5965_v27  ;;  %v5387_v17 = vadd.f32 %v10606_v55, %v5369_v6  ;;  %v5423_v46 = vadd.f32 %v10612_v4, %v5405_v18 }
 0x83f   : > { %7261 = vpow2.f32 %v6085_v58  ;;  %v6041_v54 = vmul.f32 1.442695, %v6014_v43  ;;  %v6089_v53 = vmul.f32 1.442695, %v6062_v31  ;;  %v6153_v29 = vmul.f32 1.442695, %v6126_v59 }
 0x840   : > { %7263 = vpow2.f32 %v6149_v2  ;;  %v10582_v33 = vmax.f32 %v5981_v13, %v5421_v38 }
 0x841   : > { %7265 = vpow2.f32 %v6041_v54  ;;  %v5772_v62 = vpop.permute.xlu1 %5771  ;;  %v5388_v54 = vadd.f32 %v10606_v55, %v5370_v50 }
 0x842   : > { %7267 = vpow2.f32 %v6089_v53  ;;  %v6013_v20 = vsub.f32 %v5385_v7, %v10582_v33  ;;  %v6061_v0 = vsub.f32 %v5965_v27, %v10582_v33  ;;  %v6125_v47 = vsub.f32 %v5421_v38, %v10582_v33  ;;  %v5902_v2 = vpop.permute.xlu2 %5901 }
 0x843   : > { %v5807_v11 = vmul.f32 %v5772_v62, %v5727_v52  ;;  %7269 = vpow2.f32 %v6153_v29  ;;  %v5406_v38 = vmul.f32 %v10600_v35, %v5352_v57  ;;  %v5320_v62 = vld [vmem:[%s10277_s10 + $0x78] sm:$0xff] }
 0x844   : > { %v7260_v28 = vpop.eup %7259  ;;  %v6039_v21 = vmul.f32 1.442695, %v6013_v20  ;;  %v6087_v19 = vmul.f32 1.442695, %v6061_v0  ;;  %v6151_v36 = vmul.f32 1.442695, %v6125_v47  ;;  %v5338_v0 = vsub.f32 %v5320_v62, %v10574_v26 }
 0x845   : > { %v7262_v12 = vpop.eup %7261  ;;  %v5823_v8 = vadd.f32 1.837877, %v5807_v11  ;;  %v5424_v52 = vadd.f32 %v10612_v4, %v5406_v38 }
 0x846   : > { %v6108_v37 = vadd.f32 %v7262_v12, %v7260_v28  ;;  %v7264_v48 = vpop.eup %7263  ;;  %7271 = vpow2.f32 %v6039_v21 }
 0x847   : > { %v7266_v5 = vpop.eup %7265  ;;  %7273 = vpow2.f32 %v6087_v19  ;;  %v5935_v23 = vadd.f32 %v5900_v49, %v5823_v8 }
 0x848   : > { %v6172_v32 = vadd.f32 %v7264_v48, %v6108_v37  ;;  %v7268_v44 = vpop.eup %7267  ;;  %v5714_v37 = vsub.f32 %v5320_v62, %v10335_v42 }
 0x849   : > { %v6110_v15 = vadd.f32 %v7268_v44, %v7266_v5  ;;  %v5951_v24 = vmul.f32 -0.5, %v5935_v23  ;;  %v5774_v10 = vpop.permute.xlu0 %5773  ;;  %v7270_v9 = vpop.eup %7269 }
 0x84a   : > { %7275 = vlog2.f32 %v6172_v32  ;;  %v5808_v40 = vmul.f32 %v5774_v10, %v5728_v56  ;;  %v5730_v18 = vmul.f32 %v5714_v37, %v5714_v37 }
 0x84b   : > { %7277 = vpow2.f32 %v6151_v36  ;;  %v6174_v51 = vadd.f32 %v7270_v9, %v6110_v15  ;;  %v5967_v60 = vadd.f32 -0.2876821, %v5951_v24  ;;  %v5354_v36 = vmul.f32 %v5338_v0, %v5338_v0 }
 0x84c   : > { %v7272_v30 = vpop.eup %7271  ;;  %v5824_v34 = vadd.f32 1.837877, %v5808_v40 }
 0x84d   : > { %v7274_v58 = vpop.eup %7273  ;;  %7279 = vlog2.f32 %v6174_v51  ;;  %v5983_v7 = vmax.f32 %v5387_v17, %v5967_v60  ;;  %v5372_v9 = vmul.f32 %v10594_v14, %v5354_v36  ;;  %v5408_v50 = vmul.f32 %v10600_v35, %v5354_v36 }
 0x84e   : > { %v6109_v45 = vadd.f32 %v7274_v58, %v7272_v30  ;;  %v5936_v39 = vadd.f32 %v5902_v2, %v5824_v34 }
 0x84f   : > { %v10617_v59 = vmax.f32 %v5983_v7, %v5423_v46  ;;  %v5390_v2 = vadd.f32 %v10606_v55, %v5372_v9 }
 0x850   : > { %v7276_v27 = vpop.eup %7275  ;;  %v5952_v53 = vmul.f32 -0.5, %v5936_v39 }
 0x851   : > { %v7278_v43 = vpop.eup %7277  ;;  %v6198_v31 = vmul.f32 0.6931472, %v7276_v27  ;;  %v6015_v29 = vsub.f32 %v5387_v17, %v10617_v59  ;;  %v6063_v41 = vsub.f32 %v5967_v60, %v10617_v59  ;;  %v6127_v49 = vsub.f32 %v5423_v46, %v10617_v59 }
 0x852   : > { %v6173_v13 = vadd.f32 %v7278_v43, %v6109_v45  ;;  %v5968_v28 = vadd.f32 -0.2876821, %v5952_v53  ;;  %v5426_v43 = vadd.f32 %v10612_v4, %v5408_v50 }
 0x853   : > { %v6220_v61 = vadd.f32 %v6198_v31, %v10559_v1  ;;  %v7280_v20 = vpop.eup %7279  ;;  %v6043_v47 = vmul.f32 1.442695, %v6015_v29  ;;  %v6091_v12 = vmul.f32 1.442695, %v6063_v41  ;;  %v5319_v1 = vld [vmem:[%s10277_s10 + $0x70] sm:$0xff] }
 0x854   : > { %7281 = vlog2.f32 %v6173_v13  ;;  %v6202_v63 = vmul.f32 0.6931472, %v7280_v20  ;;  %v6155_v25 = vmul.f32 1.442695, %v6127_v49  ;;  %v5984_v11 = vmax.f32 %v5388_v54, %v5968_v28 }
 0x855   : > { %6237 = vst.msk [vmem:[%s10444_s25 + $0x48] sm:$0xff] %vm6227_vm4, %v6220_v61  ;;  %7283 = vpow2.f32 %v6043_v47  ;;  %v5337_v48 = vsub.f32 %v5319_v1, %v10574_v26  ;;  %v5713_v6 = vsub.f32 %v5319_v1, %v10300_v22 }
 0x856   : > { %v6222_v21 = vadd.f32 %v6202_v63, %v10568_v3  ;;  %7285 = vpow2.f32 %v6091_v12  ;;  %v10632_v19 = vmax.f32 %v5984_v11, %v5424_v52 }
 0x857   : > { %7287 = vpow2.f32 %v6155_v25  ;;  %v5729_v56 = vmul.f32 %v5713_v6, %v5713_v6  ;;  %v5353_v10 = vmul.f32 %v5337_v48, %v5337_v48 }
 0x858   : > { %6239 = vst.msk [vmem:[%s10444_s25 + $0x58] sm:$0xff] %vm6227_vm4, %v6222_v21  ;;  %v6016_v32 = vsub.f32 %v5388_v54, %v10632_v19  ;;  %v6064_v5 = vsub.f32 %v5968_v28, %v10632_v19  ;;  %v6128_v42 = vsub.f32 %v5424_v52, %v10632_v19 }
 0x859   : > { %v5809_v40 = vmul.f32 %v10589_v16, %v5729_v56  ;;  %v5371_v58 = vmul.f32 %v10594_v14, %v5353_v10  ;;  %v5407_v39 = vmul.f32 %v10600_v35, %v5353_v10 }
 0x85a   : > { %v7282_v8 = vpop.eup %7281  ;;  %v6045_v23 = vmul.f32 1.442695, %v6016_v32  ;;  %v6093_v44 = vmul.f32 1.442695, %v6064_v5  ;;  %v6157_v15 = vmul.f32 1.442695, %v6128_v42 }
 0x85b   : > { %v6200_v3 = vmul.f32 0.6931472, %v7282_v8  ;;  %v5778_v57 = vpop.permute.xlu1 %5777  ;;  %v7284_v26 = vpop.eup %7283  ;;  %v5825_v7 = vadd.f32 1.837877, %v5809_v40  ;;  %v5389_v29 = vadd.f32 %v10606_v55, %v5371_v58  ;;  %v5425_v62 = vadd.f32 %v10612_v4, %v5407_v39 }
 0x85c   : > { %v5810_v17 = vmul.f32 %v5778_v57, %v5730_v18  ;;  %v7286_v24 = vpop.eup %7285  ;;  %7289 = vpow2.f32 %v6045_v23  ;;  %v5906_v30 = vpop.permute.xlu0 %5905 }
 0x85d   : > { %v6221_v22 = vadd.f32 %v6200_v3, %v10582_v33  ;;  %v6111_v46 = vadd.f32 %v7286_v24, %v7284_v26  ;;  %7291 = vpow2.f32 %v6093_v44  ;;  %v7288_v60 = vpop.eup %7287 }
 0x85e   : > { %v5826_v51 = vadd.f32 1.837877, %v5810_v17  ;;  %7293 = vpow2.f32 %v6157_v15 }
 0x85f   : > { %6238 = vst.msk [vmem:[%s10444_s25 + $0x50] sm:$0xff] %vm6227_vm4, %v6221_v22  ;;  %v6175_v33 = vadd.f32 %v7288_v60, %v6111_v46 }
 0x860   : > { %v5938_v34 = vadd.f32 %v5906_v30, %v5826_v51 }
 0x861   : > { %7295 = vlog2.f32 %v6175_v33 }
 0x862   : > { %v5954_v27 = vmul.f32 -0.5, %v5938_v34  ;;  %v7290_v38 = vpop.eup %7289 }
 0x863   : > { %v5904_v45 = vpop.permute.xlu1 %5903  ;;  %v7292_v16 = vpop.eup %7291 }
 0x864   : > { %v5970_v31 = vadd.f32 -0.2876821, %v5954_v27  ;;  %v5937_v13 = vadd.f32 %v5904_v45, %v5825_v7  ;;  %v6112_v54 = vadd.f32 %v7292_v16, %v7290_v38  ;;  %v7294_v53 = vpop.eup %7293 }
 0x866   : > { %v5986_v61 = vmax.f32 %v5390_v2, %v5970_v31  ;;  %v5953_v14 = vmul.f32 -0.5, %v5937_v13  ;;  %v6176_v41 = vadd.f32 %v7294_v53, %v6112_v54 }
 0x867   : > { %v7296_v49 = vpop.eup %7295 }
 0x868   : > { %v6002_v52 = vmax.f32 %v5986_v61, %v5426_v43  ;;  %v5969_v28 = vadd.f32 -0.2876821, %v5953_v14  ;;  %v6204_v20 = vmul.f32 0.6931472, %v7296_v49  ;;  %7297 = vlog2.f32 %v6176_v41 }
 0x86a   : > { %v6018_v35 = vsub.f32 %v5390_v2, %v6002_v52  ;;  %v6066_v0 = vsub.f32 %v5970_v31, %v6002_v52  ;;  %v6130_v47 = vsub.f32 %v5426_v43, %v6002_v52  ;;  %v5985_v12 = vmax.f32 %v5389_v29, %v5969_v28 }
 0x86b   : > { %v6223_v1 = vadd.f32 %v6204_v20, %v10617_v59 }
 0x86c   : > { %v6049_v63 = vmul.f32 1.442695, %v6018_v35  ;;  %v6097_v25 = vmul.f32 1.442695, %v6066_v0  ;;  %v6001_v11 = vmax.f32 %v5985_v12, %v5425_v62  ;;  %v6161_v55 = vmul.f32 1.442695, %v6130_v47 }
 0x86d   : > { %6240 = vst.msk [vmem:[%s10444_s25 + $0x60] sm:$0xff] %vm6227_vm4, %v6223_v1 }
 0x86e   : > { %7299 = vpow2.f32 %v6049_v63  ;;  %v6017_v37 = vsub.f32 %v5389_v29, %v6001_v11  ;;  %v6065_v21 = vsub.f32 %v5969_v28, %v6001_v11  ;;  %v6129_v4 = vsub.f32 %v5425_v62, %v6001_v11  ;;  %v7298_v48 = vpop.eup %7297 }
 0x86f   : > { %7301 = vpow2.f32 %v6097_v25  ;;  %v6206_v6 = vmul.f32 0.6931472, %v7298_v48 }
 0x870   : > { %v6047_v36 = vmul.f32 1.442695, %v6017_v37  ;;  %v6095_v8 = vmul.f32 1.442695, %v6065_v21  ;;  %7303 = vpow2.f32 %v6161_v55  ;;  %v6159_v32 = vmul.f32 1.442695, %v6129_v4 }
 0x871   : > { %v6224_v59 = vadd.f32 %v6206_v6, %v10632_v19 }
 0x872   : > { %7305 = vpow2.f32 %v6047_v36 }
 0x873   : > { %7307 = vpow2.f32 %v6095_v8  ;;  %6241 = vst.msk [vmem:[%s10444_s25 + $0x68] sm:$0xff] %vm6227_vm4, %v6224_v59 }
 0x874   : > { %v7300_v5 = vpop.eup %7299  ;;  %7309 = vpow2.f32 %v6159_v32 }
 0x875   : > { %v7302_v42 = vpop.eup %7301 }
 0x876   : > { %v6114_v3 = vadd.f32 %v7302_v42, %v7300_v5  ;;  %v7304_v18 = vpop.eup %7303 }
 0x878   : > { %v7306_v23 = vpop.eup %7305  ;;  %v6178_v44 = vadd.f32 %v7304_v18, %v6114_v3 }
 0x879   : > { %v7308_v57 = vpop.eup %7307 }
 0x87a   : > { %7311 = vlog2.f32 %v6178_v44  ;;  %v6113_v26 = vadd.f32 %v7308_v57, %v7306_v23  ;;  %v7310_v22 = vpop.eup %7309 }
 0x87c   : > { %v6177_v56 = vadd.f32 %v7310_v22, %v6113_v26 }
 0x87e   : > { %7313 = vlog2.f32 %v6177_v56 }
 0x880   : > { %v7312_v19 = vpop.eup %7311 }
 0x881   : > { %v6210_v15 = vmul.f32 0.6931472, %v7312_v19 }
 0x883   : > { %v6226_v17 = vadd.f32 %v6210_v15, %v6002_v52 }
 0x884   : > { %v7314_v24 = vpop.eup %7313 }
 0x885   : > { %6243 = vst.msk [vmem:[%s10444_s25 + $0x78] sm:$0xff] %vm6227_vm4, %v6226_v17  ;;  %v6208_v10 = vmul.f32 0.6931472, %v7314_v24 }
 0x887   : > { %v6225_v9 = vadd.f32 %v6208_v10, %v6001_v11 }
 0x889   : > { %6242 = vst.msk [vmem:[%s10444_s25 + $0x70] sm:$0xff] %vm6227_vm4, %v6225_v9 }
 0x88a PF: > { %s15_s18 = sadd.s32 1, %s7330_s18  }
 0x88b   : > { %p12_p4 = scmp.ge.s32.totalorder %s15_s18, 4  }
 0x88d   :  { %14 = sbr.rel (!%p12_p4) target bundleno = 1 (0x1), region = 73 }

</bundles_post_ra>
